<compile_context>
chip_gen: v7x
topology: tpu7x:2x2x1
jax: 0.10.0
libtpu: 0.0.40
codegen_flags: <defaults>
</compile_context>

<pallas_src>
import jax
import jax.numpy as jnp
from jax import lax
from jax.experimental import pallas as pl
from jax.experimental.pallas import tpu as pltpu

_COUT = 128
_NEG_SLOPE = 0.01
_STRIDES = (2, 1, 2, 1, 2, 1, 2, 1)


# ----------------------------- static geometry -------------------------------
def _layer_geometry(H, W, strides):
    """Per-layer static geometry for 3x3 convs with padding=1."""
    layers = []
    h, w = H, W
    for s in strides:
        oh = (h - 1) // s + 1
        ow = (w - 1) // s + 1
        wp_in = w + 2                       # padded input width
        jlen = (oh - 1) * wp_in + ow        # flat response length (incl. junk cols)
        jspan = (jlen - 1) * s + 1          # dense span needed before stride-s pick
        layers.append(dict(s=s, H_in=h, W_in=w, OH=oh, OW=ow,
                           Wp_in=wp_in, Jlen=jlen, Jspan=jspan))
        h, w = oh, ow
    return layers


# ------------------------------- fused kernel --------------------------------
def _lrelu(v):
    return jnp.where(v >= 0.0, v, _NEG_SLOPE * v)


def _make_fused_kernel(layers):
    n_layers = len(layers)

    def kernel(x_ref, w_ref, b_ref, o_ref, *act_refs):
        # Zero the padded activation scratch: borders act as the conv zero-padding;
        # interiors are fully overwritten below for every batch element.
        for a in act_refs:
            a[...] = jnp.zeros_like(a)

        def write_rows(dst_ref, vals, n_rows, ow, src_stride, dst_stride, dst_off):
            # Copy the valid OW-wide chunk of each output row into dst_ref.
            for oh in range(n_rows):
                src = vals[oh * src_stride: oh * src_stride + ow, :]
                d0 = dst_off + oh * dst_stride
                dst_ref[d0: d0 + ow, :] = src

        # -------- layer 1: host-built im2col patches (M1, 128) bf16 ----------
        g0 = layers[0]
        z = jnp.dot(x_ref[...], w_ref[0], preferred_element_type=jnp.float32)
        z = _lrelu(z + b_ref[0])
        wp_out = g0["OW"] + 2
        write_rows(act_refs[0], z, g0["OH"], g0["OW"],
                   src_stride=g0["OW"], dst_stride=wp_out, dst_off=wp_out + 1)

        # -------- layers 2..8: 9-tap accumulation straight from VMEM ---------
        for li in range(1, n_layers):
            g = layers[li]
            s, wp_in = g["s"], g["Wp_in"]
            oh_n, ow_n = g["OH"], g["OW"]
            jlen, jspan = g["Jlen"], g["Jspan"]
            src_ref = act_refs[li - 1]

            acc = jnp.zeros((jspan, _COUT), jnp.float32)
            for kh in range(3):
                for kw in range(3):
                    off = kh * wp_in + kw
                    x_tap = src_ref[off: off + jspan, :].astype(jnp.bfloat16)
                    w_tap = w_ref[1 + (li - 1) * 9 + kh * 3 + kw]
                    acc = acc + jnp.dot(x_tap, w_tap,
                                        preferred_element_type=jnp.float32)

            if jspan != jlen:
                # Stride-2 decimation via a small 0/1 selection matmul (f32, exact),
                # so all loads above stay unit-stride.
                r = lax.broadcasted_iota(jnp.int32, (jlen, jspan), 0)
                c = lax.broadcasted_iota(jnp.int32, (jlen, jspan), 1)
                sel = (c == s * r).astype(jnp.float32)
                acc = jnp.dot(sel, acc, preferred_element_type=jnp.float32)

            acc = acc + b_ref[li]
            if li < n_layers - 1:
                acc = _lrelu(acc)
                wp_out = ow_n + 2
                write_rows(act_refs[li], acc, oh_n, ow_n,
                           src_stride=wp_in, dst_stride=wp_out, dst_off=wp_out + 1)
            else:
                # Last conv: no activation, write dense (OH*OW, 128) output.
                write_rows(o_ref, acc, oh_n, ow_n,
                           src_stride=wp_in, dst_stride=ow_n, dst_off=0)

    return kernel


# ------------------------------- host-side glue ------------------------------
def _build_layer1_patches(x_nhwc, stride, oh, ow, k_pad):
    """Tiny im2col for the Cin=2 first conv; K=9*Cin zero-padded to k_pad lanes."""
    N, H, W, cin = x_nhwc.shape
    xp = jnp.pad(x_nhwc, ((0, 0), (1, 1), (1, 1), (0, 0)))
    cols = []
    for kh in range(3):
        for kw in range(3):
            cols.append(xp[:, kh: kh + (oh - 1) * stride + 1: stride,
                            kw: kw + (ow - 1) * stride + 1: stride, :])
    patches = jnp.concatenate(cols, axis=-1).reshape(N, oh * ow, 9 * cin)
    patches = jnp.pad(patches, ((0, 0), (0, 0), (0, k_pad - 9 * cin)))
    return patches.astype(jnp.bfloat16)


def init_params(key):
    """Synthetic params matching AnalysisMvNet's conv shapes (HWIO), PyTorch-like init."""
    in_chs = [2] + [_COUT] * 7
    params = []
    for cin in in_chs:
        key, kw_, kb_ = jax.random.split(key, 3)
        bound = 1.0 / (cin * 9) ** 0.5
        w = jax.random.uniform(kw_, (3, 3, cin, _COUT), jnp.float32, -bound, bound)
        b = jax.random.uniform(kb_, (_COUT,), jnp.float32, -bound, bound)
        params.append({"w": w, "b": b})
    return params


@jax.jit
def analysis_mv_net(x_nchw, params):
    """Forward pass. x_nchw: (N, 2, H, W) -> (N, 128, ceil(H/16), ceil(W/16))."""
    N, cin, H, W = x_nchw.shape
    assert 9 * cin <= _COUT
    layers = _layer_geometry(H, W, _STRIDES)
    g0, gL = layers[0], layers[-1]

    x_nhwc = jnp.transpose(x_nchw, (0, 2, 3, 1)).astype(jnp.float32)
    patches = _build_layer1_patches(x_nhwc, g0["s"], g0["OH"], g0["OW"], _COUT)

    # Pack all weights as 64 lane-dense (128, 128) tap matrices (bf16), biases f32.
    w1 = jnp.pad(params[0]["w"].reshape(9 * cin, _COUT), ((0, _COUT - 9 * cin), (0, 0)))
    w_list = [w1] + [params[l]["w"][kh, kw]
                     for l in range(1, 8) for kh in range(3) for kw in range(3)]
    w_all = jnp.stack(w_list).astype(jnp.bfloat16)                  # (64, 128, 128)
    b_all = jnp.stack([p["b"].reshape(1, _COUT) for p in params])   # (8, 1, 128)
    b_all = b_all.astype(jnp.float32)

    m1 = g0["OH"] * g0["OW"]
    m_out = gL["OH"] * gL["OW"]
    n_w = w_all.shape[0]
    scratch = [pltpu.VMEM(((layers[i]["OH"] + 2) * (layers[i]["OW"] + 2), _COUT),
                          jnp.float32) for i in range(len(layers) - 1)]

    out = pl.pallas_call(
        _make_fused_kernel(layers),
        out_shape=jax.ShapeDtypeStruct((N, m_out, _COUT), jnp.float32),
        grid=(N,),
        in_specs=[
            pl.BlockSpec((None, m1, _COUT), lambda b: (b, 0, 0)),      # per-image patches
            pl.BlockSpec((n_w, _COUT, _COUT), lambda b: (0, 0, 0)),    # resident weights
            pl.BlockSpec((8, 1, _COUT), lambda b: (0, 0, 0)),          # resident biases
        ],
        out_specs=pl.BlockSpec((None, m_out, _COUT), lambda b: (b, 0, 0)),
        scratch_shapes=scratch,
        compiler_params=pltpu.CompilerParams(dimension_semantics=("parallel",)),
    )(patches, w_all, b_all)

    out = out.reshape(N, gL["OH"], gL["OW"], _COUT)
    return jnp.transpose(out, (0, 3, 1, 2))


# ------------------------------ reference (check) -----------------------------
def _reference_forward(x_nchw, params, emulate_bf16):
    x = jnp.transpose(x_nchw, (0, 2, 3, 1)).astype(jnp.float32)
    n = len(params)
    for li, p in enumerate(params):
        s = _STRIDES[li]
        lhs = x.astype(jnp.bfloat16) if emulate_bf16 else x
        rhs = p["w"].astype(jnp.bfloat16) if emulate_bf16 else p["w"]
        y = lax.conv_general_dilated(
            lhs, rhs, window_strides=(s, s), padding=[(1, 1), (1, 1)],
            dimension_numbers=("NHWC", "HWIO", "NHWC"),
            preferred_element_type=jnp.float32) + p["b"]
        x = jnp.where(y >= 0.0, y, _NEG_SLOPE * y) if li < n - 1 else y
    return jnp.transpose(x, (0, 3, 1, 2))


if __name__ == "__main__":
    key = jax.random.PRNGKey(0)
    key, kx = jax.random.split(key)
    # motion-vector-like input: N=2, C=2, H=W=16  ->  output (2, 128, 1, 1)
    x = jax.random.normal(kx, (2, 2, 16, 16), jnp.float32)
    params = init_params(key)

    out = jax.block_until_ready(analysis_mv_net(x, params))
    assert out.shape == (2, 128, 1, 1), out.shape

    ref16 = jax.block_until_ready(_reference_forward(x, params, emulate_bf16=True))
    ref32 = jax.block_until_ready(_reference_forward(x, params, emulate_bf16=False))
    scale = float(jnp.max(jnp.abs(ref16))) + 1e-12
    err16 = float(jnp.max(jnp.abs(out - ref16)))   # vs bf16-emulating reference
    err32 = float(jnp.max(jnp.abs(out - ref32)))   # vs pure-f32 reference
    assert err16 <= 2e-2 * scale + 1e-6, (err16, scale)
    assert err32 <= 1e-1 * scale + 1e-6, (err32, scale)

    print("KERNEL_OK")
</pallas_src>

<mosaic_0001>
module attributes {stable_mosaic.version = 11 : i64} {
  func.func @kernel(%arg0: i32, %arg1: memref<1x64x128xbf16, #tpu.memory_space<vmem>>, %arg2: memref<64x128x128xbf16, #tpu.memory_space<vmem>>, %arg3: memref<8x1x128xf32, #tpu.memory_space<vmem>>, %arg4: memref<1x1x128xf32, #tpu.memory_space<vmem>>, %arg5: memref<100x128xf32, #tpu.memory_space<vmem>>, %arg6: memref<100x128xf32, #tpu.memory_space<vmem>>, %arg7: memref<36x128xf32, #tpu.memory_space<vmem>>, %arg8: memref<36x128xf32, #tpu.memory_space<vmem>>, %arg9: memref<16x128xf32, #tpu.memory_space<vmem>>, %arg10: memref<16x128xf32, #tpu.memory_space<vmem>>, %arg11: memref<9x128xf32, #tpu.memory_space<vmem>>) attributes {dimension_semantics = [#tpu.dimension_semantics<parallel>], iteration_bounds = array<i64: 2>, scalar_prefetch = 0 : i64, scratch_operands = 7 : i64, tpu.core_type = #tpu.core_type<tc>, window_params = [{transform_indices = @transform_0, window_bounds = array<i64: 1, 64, 128>}, {pipeline_mode = #tpu.pipeline_mode<synchronous>, transform_indices = @transform_1, window_bounds = array<i64: 64, 128, 128>}, {pipeline_mode = #tpu.pipeline_mode<synchronous>, transform_indices = @transform_2, window_bounds = array<i64: 8, 1, 128>}, {transform_indices = @transform_3, window_bounds = array<i64: 1, 1, 128>}]} {
    %cst = arith.constant 0.000000e+00 : f32
    %0 = vector.broadcast %cst : f32 to vector<100x128xf32>
    %c0 = arith.constant 0 : index
    %c0_0 = arith.constant 0 : index
    %1 = vector.load %arg5[%c0, %c0_0] : memref<100x128xf32, #tpu.memory_space<vmem>>, vector<100x128xf32>
    tpu.vector_store %arg5[%c0, %c0_0], %0 {strides = array<i32>} : memref<100x128xf32, #tpu.memory_space<vmem>>, vector<100x128xf32>,
    %cst_1 = arith.constant 0.000000e+00 : f32
    %2 = vector.broadcast %cst_1 : f32 to vector<100x128xf32>
    %c0_2 = arith.constant 0 : index
    %c0_3 = arith.constant 0 : index
    %3 = vector.load %arg6[%c0_2, %c0_3] : memref<100x128xf32, #tpu.memory_space<vmem>>, vector<100x128xf32>
    tpu.vector_store %arg6[%c0_2, %c0_3], %2 {strides = array<i32>} : memref<100x128xf32, #tpu.memory_space<vmem>>, vector<100x128xf32>,
    %cst_4 = arith.constant 0.000000e+00 : f32
    %4 = vector.broadcast %cst_4 : f32 to vector<36x128xf32>
    %c0_5 = arith.constant 0 : index
    %c0_6 = arith.constant 0 : index
    %5 = vector.load %arg7[%c0_5, %c0_6] : memref<36x128xf32, #tpu.memory_space<vmem>>, vector<36x128xf32>
    tpu.vector_store %arg7[%c0_5, %c0_6], %4 {strides = array<i32>} : memref<36x128xf32, #tpu.memory_space<vmem>>, vector<36x128xf32>,
    %cst_7 = arith.constant 0.000000e+00 : f32
    %6 = vector.broadcast %cst_7 : f32 to vector<36x128xf32>
    %c0_8 = arith.constant 0 : index
    %c0_9 = arith.constant 0 : index
    %7 = vector.load %arg8[%c0_8, %c0_9] : memref<36x128xf32, #tpu.memory_space<vmem>>, vector<36x128xf32>
    tpu.vector_store %arg8[%c0_8, %c0_9], %6 {strides = array<i32>} : memref<36x128xf32, #tpu.memory_space<vmem>>, vector<36x128xf32>,
    %cst_10 = arith.constant 0.000000e+00 : f32
    %8 = vector.broadcast %cst_10 : f32 to vector<16x128xf32>
    %c0_11 = arith.constant 0 : index
    %c0_12 = arith.constant 0 : index
    %9 = vector.load %arg9[%c0_11, %c0_12] : memref<16x128xf32, #tpu.memory_space<vmem>>, vector<16x128xf32>
    tpu.vector_store %arg9[%c0_11, %c0_12], %8 {strides = array<i32>} : memref<16x128xf32, #tpu.memory_space<vmem>>, vector<16x128xf32>,
    %cst_13 = arith.constant 0.000000e+00 : f32
    %10 = vector.broadcast %cst_13 : f32 to vector<16x128xf32>
    %c0_14 = arith.constant 0 : index
    %c0_15 = arith.constant 0 : index
    %11 = vector.load %arg10[%c0_14, %c0_15] : memref<16x128xf32, #tpu.memory_space<vmem>>, vector<16x128xf32>
    tpu.vector_store %arg10[%c0_14, %c0_15], %10 {strides = array<i32>} : memref<16x128xf32, #tpu.memory_space<vmem>>, vector<16x128xf32>,
    %cst_16 = arith.constant 0.000000e+00 : f32
    %12 = vector.broadcast %cst_16 : f32 to vector<9x128xf32>
    %c0_17 = arith.constant 0 : index
    %c0_18 = arith.constant 0 : index
    %13 = vector.load %arg11[%c0_17, %c0_18] : memref<9x128xf32, #tpu.memory_space<vmem>>, vector<9x128xf32>
    tpu.vector_store %arg11[%c0_17, %c0_18], %12 {strides = array<i32>} : memref<9x128xf32, #tpu.memory_space<vmem>>, vector<9x128xf32>,
    %c0_19 = arith.constant 0 : index
    %c0_20 = arith.constant 0 : index
    %c0_21 = arith.constant 0 : index
    %14 = vector.load %arg1[%c0_19, %c0_20, %c0_21] : memref<1x64x128xbf16, #tpu.memory_space<vmem>>, vector<1x64x128xbf16>
    %15 = vector.shape_cast %14 : vector<1x64x128xbf16> to vector<64x128xbf16>
    %c0_22 = arith.constant 0 : index
    %c0_23 = arith.constant 0 : index
    %c0_24 = arith.constant 0 : index
    %16 = vector.load %arg2[%c0_22, %c0_23, %c0_24] : memref<64x128x128xbf16, #tpu.memory_space<vmem>>, vector<1x128x128xbf16>
    %17 = vector.shape_cast %16 : vector<1x128x128xbf16> to vector<128x128xbf16>
    %cst_25 = arith.constant dense<0.000000e+00> : vector<64x128xf32>
    %18 = tpu.matmul %15, %17, %cst_25 {dimension_numbers = #tpu.dot_dimension_numbers<[1], [0], [0], [1], [0, 0, 1, 1], [], []>} : vector<64x128xbf16>, vector<128x128xbf16>, vector<64x128xf32> -> vector<64x128xf32>
    %c0_26 = arith.constant 0 : index
    %c0_27 = arith.constant 0 : index
    %c0_28 = arith.constant 0 : index
    %19 = vector.load %arg3[%c0_26, %c0_27, %c0_28] : memref<8x1x128xf32, #tpu.memory_space<vmem>>, vector<1x1x128xf32>
    %20 = vector.shape_cast %19 : vector<1x1x128xf32> to vector<1x128xf32>
    %21 = vector.broadcast %20 : vector<1x128xf32> to vector<64x128xf32>
    %22 = arith.addf %18, %21 : vector<64x128xf32>
    %cst_29 = arith.constant 0.000000e+00 : f32
    %23 = vector.broadcast %cst_29 : f32 to vector<64x128xf32>
    %24 = arith.cmpf oge, %22, %23 : vector<64x128xf32>
    %cst_30 = arith.constant 0.00999999977 : f32
    %25 = vector.broadcast %cst_30 : f32 to vector<64x128xf32>
    %26 = arith.mulf %25, %22 : vector<64x128xf32>
    %27 = arith.select %24, %22, %26 : vector<64x128xi1>, vector<64x128xf32>
    %28 = vector.extract_strided_slice %27 {offsets = [0, 0], sizes = [8, 128], strides = [1, 1]} : vector<64x128xf32> to vector<8x128xf32>
    %c11 = arith.constant 11 : index
    %c0_31 = arith.constant 0 : index
    %29 = vector.load %arg5[%c11, %c0_31] : memref<100x128xf32, #tpu.memory_space<vmem>>, vector<8x128xf32>
    tpu.vector_store %arg5[%c11, %c0_31], %28 {strides = array<i32>} : memref<100x128xf32, #tpu.memory_space<vmem>>, vector<8x128xf32>,
    %30 = vector.extract_strided_slice %27 {offsets = [8, 0], sizes = [8, 128], strides = [1, 1]} : vector<64x128xf32> to vector<8x128xf32>
    %c21 = arith.constant 21 : index
    %c0_32 = arith.constant 0 : index
    %31 = vector.load %arg5[%c21, %c0_32] : memref<100x128xf32, #tpu.memory_space<vmem>>, vector<8x128xf32>
    tpu.vector_store %arg5[%c21, %c0_32], %30 {strides = array<i32>} : memref<100x128xf32, #tpu.memory_space<vmem>>, vector<8x128xf32>,
    %32 = vector.extract_strided_slice %27 {offsets = [16, 0], sizes = [8, 128], strides = [1, 1]} : vector<64x128xf32> to vector<8x128xf32>
    %c31 = arith.constant 31 : index
    %c0_33 = arith.constant 0 : index
    %33 = vector.load %arg5[%c31, %c0_33] : memref<100x128xf32, #tpu.memory_space<vmem>>, vector<8x128xf32>
    tpu.vector_store %arg5[%c31, %c0_33], %32 {strides = array<i32>} : memref<100x128xf32, #tpu.memory_space<vmem>>, vector<8x128xf32>,
    %34 = vector.extract_strided_slice %27 {offsets = [24, 0], sizes = [8, 128], strides = [1, 1]} : vector<64x128xf32> to vector<8x128xf32>
    %c41 = arith.constant 41 : index
    %c0_34 = arith.constant 0 : index
    %35 = vector.load %arg5[%c41, %c0_34] : memref<100x128xf32, #tpu.memory_space<vmem>>, vector<8x128xf32>
    tpu.vector_store %arg5[%c41, %c0_34], %34 {strides = array<i32>} : memref<100x128xf32, #tpu.memory_space<vmem>>, vector<8x128xf32>,
    %36 = vector.extract_strided_slice %27 {offsets = [32, 0], sizes = [8, 128], strides = [1, 1]} : vector<64x128xf32> to vector<8x128xf32>
    %c51 = arith.constant 51 : index
    %c0_35 = arith.constant 0 : index
    %37 = vector.load %arg5[%c51, %c0_35] : memref<100x128xf32, #tpu.memory_space<vmem>>, vector<8x128xf32>
    tpu.vector_store %arg5[%c51, %c0_35], %36 {strides = array<i32>} : memref<100x128xf32, #tpu.memory_space<vmem>>, vector<8x128xf32>,
    %38 = vector.extract_strided_slice %27 {offsets = [40, 0], sizes = [8, 128], strides = [1, 1]} : vector<64x128xf32> to vector<8x128xf32>
    %c61 = arith.constant 61 : index
    %c0_36 = arith.constant 0 : index
    %39 = vector.load %arg5[%c61, %c0_36] : memref<100x128xf32, #tpu.memory_space<vmem>>, vector<8x128xf32>
    tpu.vector_store %arg5[%c61, %c0_36], %38 {strides = array<i32>} : memref<100x128xf32, #tpu.memory_space<vmem>>, vector<8x128xf32>,
    %40 = vector.extract_strided_slice %27 {offsets = [48, 0], sizes = [8, 128], strides = [1, 1]} : vector<64x128xf32> to vector<8x128xf32>
    %c71 = arith.constant 71 : index
    %c0_37 = arith.constant 0 : index
    %41 = vector.load %arg5[%c71, %c0_37] : memref<100x128xf32, #tpu.memory_space<vmem>>, vector<8x128xf32>
    tpu.vector_store %arg5[%c71, %c0_37], %40 {strides = array<i32>} : memref<100x128xf32, #tpu.memory_space<vmem>>, vector<8x128xf32>,
    %42 = vector.extract_strided_slice %27 {offsets = [56, 0], sizes = [8, 128], strides = [1, 1]} : vector<64x128xf32> to vector<8x128xf32>
    %c81 = arith.constant 81 : index
    %c0_38 = arith.constant 0 : index
    %43 = vector.load %arg5[%c81, %c0_38] : memref<100x128xf32, #tpu.memory_space<vmem>>, vector<8x128xf32>
    tpu.vector_store %arg5[%c81, %c0_38], %42 {strides = array<i32>} : memref<100x128xf32, #tpu.memory_space<vmem>>, vector<8x128xf32>,
    %cst_39 = arith.constant 0.000000e+00 : f32
    %44 = vector.broadcast %cst_39 : f32 to vector<78x128xf32>
    %c0_40 = arith.constant 0 : index
    %c0_41 = arith.constant 0 : index
    %45 = vector.load %arg5[%c0_40, %c0_41] : memref<100x128xf32, #tpu.memory_space<vmem>>, vector<78x128xf32>
    %46 = arith.truncf %45 : vector<78x128xf32> to vector<78x128xbf16>
    %c1 = arith.constant 1 : index
    %c0_42 = arith.constant 0 : index
    %c0_43 = arith.constant 0 : index
    %47 = vector.load %arg2[%c1, %c0_42, %c0_43] : memref<64x128x128xbf16, #tpu.memory_space<vmem>>, vector<1x128x128xbf16>
    %48 = vector.shape_cast %47 : vector<1x128x128xbf16> to vector<128x128xbf16>
    %cst_44 = arith.constant dense<0.000000e+00> : vector<78x128xf32>
    %49 = tpu.matmul %46, %48, %cst_44 {dimension_numbers = #tpu.dot_dimension_numbers<[1], [0], [0], [1], [0, 0, 1, 1], [], []>} : vector<78x128xbf16>, vector<128x128xbf16>, vector<78x128xf32> -> vector<78x128xf32>
    %50 = arith.addf %44, %49 : vector<78x128xf32>
    %c1_45 = arith.constant 1 : index
    %c0_46 = arith.constant 0 : index
    %51 = vector.load %arg5[%c1_45, %c0_46] : memref<100x128xf32, #tpu.memory_space<vmem>>, vector<78x128xf32>
    %52 = arith.truncf %51 : vector<78x128xf32> to vector<78x128xbf16>
    %c2 = arith.constant 2 : index
    %c0_47 = arith.constant 0 : index
    %c0_48 = arith.constant 0 : index
    %53 = vector.load %arg2[%c2, %c0_47, %c0_48] : memref<64x128x128xbf16, #tpu.memory_space<vmem>>, vector<1x128x128xbf16>
    %54 = vector.shape_cast %53 : vector<1x128x128xbf16> to vector<128x128xbf16>
    %cst_49 = arith.constant dense<0.000000e+00> : vector<78x128xf32>
    %55 = tpu.matmul %52, %54, %cst_49 {dimension_numbers = #tpu.dot_dimension_numbers<[1], [0], [0], [1], [0, 0, 1, 1], [], []>} : vector<78x128xbf16>, vector<128x128xbf16>, vector<78x128xf32> -> vector<78x128xf32>
    %56 = arith.addf %50, %55 : vector<78x128xf32>
    %c2_50 = arith.constant 2 : index
    %c0_51 = arith.constant 0 : index
    %57 = vector.load %arg5[%c2_50, %c0_51] : memref<100x128xf32, #tpu.memory_space<vmem>>, vector<78x128xf32>
    %58 = arith.truncf %57 : vector<78x128xf32> to vector<78x128xbf16>
    %c3 = arith.constant 3 : index
    %c0_52 = arith.constant 0 : index
    %c0_53 = arith.constant 0 : index
    %59 = vector.load %arg2[%c3, %c0_52, %c0_53] : memref<64x128x128xbf16, #tpu.memory_space<vmem>>, vector<1x128x128xbf16>
    %60 = vector.shape_cast %59 : vector<1x128x128xbf16> to vector<128x128xbf16>
    %cst_54 = arith.constant dense<0.000000e+00> : vector<78x128xf32>
    %61 = tpu.matmul %58, %60, %cst_54 {dimension_numbers = #tpu.dot_dimension_numbers<[1], [0], [0], [1], [0, 0, 1, 1], [], []>} : vector<78x128xbf16>, vector<128x128xbf16>, vector<78x128xf32> -> vector<78x128xf32>
    %62 = arith.addf %56, %61 : vector<78x128xf32>
    %c10 = arith.constant 10 : index
    %c0_55 = arith.constant 0 : index
    %63 = vector.load %arg5[%c10, %c0_55] : memref<100x128xf32, #tpu.memory_space<vmem>>, vector<78x128xf32>
    %64 = arith.truncf %63 : vector<78x128xf32> to vector<78x128xbf16>
    %c4 = arith.constant 4 : index
    %c0_56 = arith.constant 0 : index
    %c0_57 = arith.constant 0 : index
    %65 = vector.load %arg2[%c4, %c0_56, %c0_57] : memref<64x128x128xbf16, #tpu.memory_space<vmem>>, vector<1x128x128xbf16>
    %66 = vector.shape_cast %65 : vector<1x128x128xbf16> to vector<128x128xbf16>
    %cst_58 = arith.constant dense<0.000000e+00> : vector<78x128xf32>
    %67 = tpu.matmul %64, %66, %cst_58 {dimension_numbers = #tpu.dot_dimension_numbers<[1], [0], [0], [1], [0, 0, 1, 1], [], []>} : vector<78x128xbf16>, vector<128x128xbf16>, vector<78x128xf32> -> vector<78x128xf32>
    %68 = arith.addf %62, %67 : vector<78x128xf32>
    %c11_59 = arith.constant 11 : index
    %c0_60 = arith.constant 0 : index
    %69 = vector.load %arg5[%c11_59, %c0_60] : memref<100x128xf32, #tpu.memory_space<vmem>>, vector<78x128xf32>
    %70 = arith.truncf %69 : vector<78x128xf32> to vector<78x128xbf16>
    %c5 = arith.constant 5 : index
    %c0_61 = arith.constant 0 : index
    %c0_62 = arith.constant 0 : index
    %71 = vector.load %arg2[%c5, %c0_61, %c0_62] : memref<64x128x128xbf16, #tpu.memory_space<vmem>>, vector<1x128x128xbf16>
    %72 = vector.shape_cast %71 : vector<1x128x128xbf16> to vector<128x128xbf16>
    %cst_63 = arith.constant dense<0.000000e+00> : vector<78x128xf32>
    %73 = tpu.matmul %70, %72, %cst_63 {dimension_numbers = #tpu.dot_dimension_numbers<[1], [0], [0], [1], [0, 0, 1, 1], [], []>} : vector<78x128xbf16>, vector<128x128xbf16>, vector<78x128xf32> -> vector<78x128xf32>
    %74 = arith.addf %68, %73 : vector<78x128xf32>
    %c12 = arith.constant 12 : index
    %c0_64 = arith.constant 0 : index
    %75 = vector.load %arg5[%c12, %c0_64] : memref<100x128xf32, #tpu.memory_space<vmem>>, vector<78x128xf32>
    %76 = arith.truncf %75 : vector<78x128xf32> to vector<78x128xbf16>
    %c6 = arith.constant 6 : index
    %c0_65 = arith.constant 0 : index
    %c0_66 = arith.constant 0 : index
    %77 = vector.load %arg2[%c6, %c0_65, %c0_66] : memref<64x128x128xbf16, #tpu.memory_space<vmem>>, vector<1x128x128xbf16>
    %78 = vector.shape_cast %77 : vector<1x128x128xbf16> to vector<128x128xbf16>
    %cst_67 = arith.constant dense<0.000000e+00> : vector<78x128xf32>
    %79 = tpu.matmul %76, %78, %cst_67 {dimension_numbers = #tpu.dot_dimension_numbers<[1], [0], [0], [1], [0, 0, 1, 1], [], []>} : vector<78x128xbf16>, vector<128x128xbf16>, vector<78x128xf32> -> vector<78x128xf32>
    %80 = arith.addf %74, %79 : vector<78x128xf32>
    %c20 = arith.constant 20 : index
    %c0_68 = arith.constant 0 : index
    %81 = vector.load %arg5[%c20, %c0_68] : memref<100x128xf32, #tpu.memory_space<vmem>>, vector<78x128xf32>
    %82 = arith.truncf %81 : vector<78x128xf32> to vector<78x128xbf16>
    %c7 = arith.constant 7 : index
    %c0_69 = arith.constant 0 : index
    %c0_70 = arith.constant 0 : index
    %83 = vector.load %arg2[%c7, %c0_69, %c0_70] : memref<64x128x128xbf16, #tpu.memory_space<vmem>>, vector<1x128x128xbf16>
    %84 = vector.shape_cast %83 : vector<1x128x128xbf16> to vector<128x128xbf16>
    %cst_71 = arith.constant dense<0.000000e+00> : vector<78x128xf32>
    %85 = tpu.matmul %82, %84, %cst_71 {dimension_numbers = #tpu.dot_dimension_numbers<[1], [0], [0], [1], [0, 0, 1, 1], [], []>} : vector<78x128xbf16>, vector<128x128xbf16>, vector<78x128xf32> -> vector<78x128xf32>
    %86 = arith.addf %80, %85 : vector<78x128xf32>
    %c21_72 = arith.constant 21 : index
    %c0_73 = arith.constant 0 : index
    %87 = vector.load %arg5[%c21_72, %c0_73] : memref<100x128xf32, #tpu.memory_space<vmem>>, vector<78x128xf32>
    %88 = arith.truncf %87 : vector<78x128xf32> to vector<78x128xbf16>
    %c8 = arith.constant 8 : index
    %c0_74 = arith.constant 0 : index
    %c0_75 = arith.constant 0 : index
    %89 = vector.load %arg2[%c8, %c0_74, %c0_75] : memref<64x128x128xbf16, #tpu.memory_space<vmem>>, vector<1x128x128xbf16>
    %90 = vector.shape_cast %89 : vector<1x128x128xbf16> to vector<128x128xbf16>
    %cst_76 = arith.constant dense<0.000000e+00> : vector<78x128xf32>
    %91 = tpu.matmul %88, %90, %cst_76 {dimension_numbers = #tpu.dot_dimension_numbers<[1], [0], [0], [1], [0, 0, 1, 1], [], []>} : vector<78x128xbf16>, vector<128x128xbf16>, vector<78x128xf32> -> vector<78x128xf32>
    %92 = arith.addf %86, %91 : vector<78x128xf32>
    %c22 = arith.constant 22 : index
    %c0_77 = arith.constant 0 : index
    %93 = vector.load %arg5[%c22, %c0_77] : memref<100x128xf32, #tpu.memory_space<vmem>>, vector<78x128xf32>
    %94 = arith.truncf %93 : vector<78x128xf32> to vector<78x128xbf16>
    %c9 = arith.constant 9 : index
    %c0_78 = arith.constant 0 : index
    %c0_79 = arith.constant 0 : index
    %95 = vector.load %arg2[%c9, %c0_78, %c0_79] : memref<64x128x128xbf16, #tpu.memory_space<vmem>>, vector<1x128x128xbf16>
    %96 = vector.shape_cast %95 : vector<1x128x128xbf16> to vector<128x128xbf16>
    %cst_80 = arith.constant dense<0.000000e+00> : vector<78x128xf32>
    %97 = tpu.matmul %94, %96, %cst_80 {dimension_numbers = #tpu.dot_dimension_numbers<[1], [0], [0], [1], [0, 0, 1, 1], [], []>} : vector<78x128xbf16>, vector<128x128xbf16>, vector<78x128xf32> -> vector<78x128xf32>
    %98 = arith.addf %92, %97 : vector<78x128xf32>
    %c1_81 = arith.constant 1 : index
    %c0_82 = arith.constant 0 : index
    %c0_83 = arith.constant 0 : index
    %99 = vector.load %arg3[%c1_81, %c0_82, %c0_83] : memref<8x1x128xf32, #tpu.memory_space<vmem>>, vector<1x1x128xf32>
    %100 = vector.shape_cast %99 : vector<1x1x128xf32> to vector<1x128xf32>
    %101 = vector.broadcast %100 : vector<1x128xf32> to vector<78x128xf32>
    %102 = arith.addf %98, %101 : vector<78x128xf32>
    %cst_84 = arith.constant 0.000000e+00 : f32
    %103 = vector.broadcast %cst_84 : f32 to vector<78x128xf32>
    %104 = arith.cmpf oge, %102, %103 : vector<78x128xf32>
    %cst_85 = arith.constant 0.00999999977 : f32
    %105 = vector.broadcast %cst_85 : f32 to vector<78x128xf32>
    %106 = arith.mulf %105, %102 : vector<78x128xf32>
    %107 = arith.select %104, %102, %106 : vector<78x128xi1>, vector<78x128xf32>
    %108 = vector.extract_strided_slice %107 {offsets = [0, 0], sizes = [8, 128], strides = [1, 1]} : vector<78x128xf32> to vector<8x128xf32>
    %c11_86 = arith.constant 11 : index
    %c0_87 = arith.constant 0 : index
    %109 = vector.load %arg6[%c11_86, %c0_87] : memref<100x128xf32, #tpu.memory_space<vmem>>, vector<8x128xf32>
    tpu.vector_store %arg6[%c11_86, %c0_87], %108 {strides = array<i32>} : memref<100x128xf32, #tpu.memory_space<vmem>>, vector<8x128xf32>,
    %110 = vector.extract_strided_slice %107 {offsets = [10, 0], sizes = [8, 128], strides = [1, 1]} : vector<78x128xf32> to vector<8x128xf32>
    %c21_88 = arith.constant 21 : index
    %c0_89 = arith.constant 0 : index
    %111 = vector.load %arg6[%c21_88, %c0_89] : memref<100x128xf32, #tpu.memory_space<vmem>>, vector<8x128xf32>
    tpu.vector_store %arg6[%c21_88, %c0_89], %110 {strides = array<i32>} : memref<100x128xf32, #tpu.memory_space<vmem>>, vector<8x128xf32>,
    %112 = vector.extract_strided_slice %107 {offsets = [20, 0], sizes = [8, 128], strides = [1, 1]} : vector<78x128xf32> to vector<8x128xf32>
    %c31_90 = arith.constant 31 : index
    %c0_91 = arith.constant 0 : index
    %113 = vector.load %arg6[%c31_90, %c0_91] : memref<100x128xf32, #tpu.memory_space<vmem>>, vector<8x128xf32>
    tpu.vector_store %arg6[%c31_90, %c0_91], %112 {strides = array<i32>} : memref<100x128xf32, #tpu.memory_space<vmem>>, vector<8x128xf32>,
    %114 = vector.extract_strided_slice %107 {offsets = [30, 0], sizes = [8, 128], strides = [1, 1]} : vector<78x128xf32> to vector<8x128xf32>
    %c41_92 = arith.constant 41 : index
    %c0_93 = arith.constant 0 : index
    %115 = vector.load %arg6[%c41_92, %c0_93] : memref<100x128xf32, #tpu.memory_space<vmem>>, vector<8x128xf32>
    tpu.vector_store %arg6[%c41_92, %c0_93], %114 {strides = array<i32>} : memref<100x128xf32, #tpu.memory_space<vmem>>, vector<8x128xf32>,
    %116 = vector.extract_strided_slice %107 {offsets = [40, 0], sizes = [8, 128], strides = [1, 1]} : vector<78x128xf32> to vector<8x128xf32>
    %c51_94 = arith.constant 51 : index
    %c0_95 = arith.constant 0 : index
    %117 = vector.load %arg6[%c51_94, %c0_95] : memref<100x128xf32, #tpu.memory_space<vmem>>, vector<8x128xf32>
    tpu.vector_store %arg6[%c51_94, %c0_95], %116 {strides = array<i32>} : memref<100x128xf32, #tpu.memory_space<vmem>>, vector<8x128xf32>,
    %118 = vector.extract_strided_slice %107 {offsets = [50, 0], sizes = [8, 128], strides = [1, 1]} : vector<78x128xf32> to vector<8x128xf32>
    %c61_96 = arith.constant 61 : index
    %c0_97 = arith.constant 0 : index
    %119 = vector.load %arg6[%c61_96, %c0_97] : memref<100x128xf32, #tpu.memory_space<vmem>>, vector<8x128xf32>
    tpu.vector_store %arg6[%c61_96, %c0_97], %118 {strides = array<i32>} : memref<100x128xf32, #tpu.memory_space<vmem>>, vector<8x128xf32>,
    %120 = vector.extract_strided_slice %107 {offsets = [60, 0], sizes = [8, 128], strides = [1, 1]} : vector<78x128xf32> to vector<8x128xf32>
    %c71_98 = arith.constant 71 : index
    %c0_99 = arith.constant 0 : index
    %121 = vector.load %arg6[%c71_98, %c0_99] : memref<100x128xf32, #tpu.memory_space<vmem>>, vector<8x128xf32>
    tpu.vector_store %arg6[%c71_98, %c0_99], %120 {strides = array<i32>} : memref<100x128xf32, #tpu.memory_space<vmem>>, vector<8x128xf32>,
    %122 = vector.extract_strided_slice %107 {offsets = [70, 0], sizes = [8, 128], strides = [1, 1]} : vector<78x128xf32> to vector<8x128xf32>
    %c81_100 = arith.constant 81 : index
    %c0_101 = arith.constant 0 : index
    %123 = vector.load %arg6[%c81_100, %c0_101] : memref<100x128xf32, #tpu.memory_space<vmem>>, vector<8x128xf32>
    tpu.vector_store %arg6[%c81_100, %c0_101], %122 {strides = array<i32>} : memref<100x128xf32, #tpu.memory_space<vmem>>, vector<8x128xf32>,
    %cst_102 = arith.constant 0.000000e+00 : f32
    %124 = vector.broadcast %cst_102 : f32 to vector<67x128xf32>
    %c0_103 = arith.constant 0 : index
    %c0_104 = arith.constant 0 : index
    %125 = vector.load %arg6[%c0_103, %c0_104] : memref<100x128xf32, #tpu.memory_space<vmem>>, vector<67x128xf32>
    %126 = arith.truncf %125 : vector<67x128xf32> to vector<67x128xbf16>
    %c10_105 = arith.constant 10 : index
    %c0_106 = arith.constant 0 : index
    %c0_107 = arith.constant 0 : index
    %127 = vector.load %arg2[%c10_105, %c0_106, %c0_107] : memref<64x128x128xbf16, #tpu.memory_space<vmem>>, vector<1x128x128xbf16>
    %128 = vector.shape_cast %127 : vector<1x128x128xbf16> to vector<128x128xbf16>
    %cst_108 = arith.constant dense<0.000000e+00> : vector<67x128xf32>
    %129 = tpu.matmul %126, %128, %cst_108 {dimension_numbers = #tpu.dot_dimension_numbers<[1], [0], [0], [1], [0, 0, 1, 1], [], []>} : vector<67x128xbf16>, vector<128x128xbf16>, vector<67x128xf32> -> vector<67x128xf32>
    %130 = arith.addf %124, %129 : vector<67x128xf32>
    %c1_109 = arith.constant 1 : index
    %c0_110 = arith.constant 0 : index
    %131 = vector.load %arg6[%c1_109, %c0_110] : memref<100x128xf32, #tpu.memory_space<vmem>>, vector<67x128xf32>
    %132 = arith.truncf %131 : vector<67x128xf32> to vector<67x128xbf16>
    %c11_111 = arith.constant 11 : index
    %c0_112 = arith.constant 0 : index
    %c0_113 = arith.constant 0 : index
    %133 = vector.load %arg2[%c11_111, %c0_112, %c0_113] : memref<64x128x128xbf16, #tpu.memory_space<vmem>>, vector<1x128x128xbf16>
    %134 = vector.shape_cast %133 : vector<1x128x128xbf16> to vector<128x128xbf16>
    %cst_114 = arith.constant dense<0.000000e+00> : vector<67x128xf32>
    %135 = tpu.matmul %132, %134, %cst_114 {dimension_numbers = #tpu.dot_dimension_numbers<[1], [0], [0], [1], [0, 0, 1, 1], [], []>} : vector<67x128xbf16>, vector<128x128xbf16>, vector<67x128xf32> -> vector<67x128xf32>
    %136 = arith.addf %130, %135 : vector<67x128xf32>
    %c2_115 = arith.constant 2 : index
    %c0_116 = arith.constant 0 : index
    %137 = vector.load %arg6[%c2_115, %c0_116] : memref<100x128xf32, #tpu.memory_space<vmem>>, vector<67x128xf32>
    %138 = arith.truncf %137 : vector<67x128xf32> to vector<67x128xbf16>
    %c12_117 = arith.constant 12 : index
    %c0_118 = arith.constant 0 : index
    %c0_119 = arith.constant 0 : index
    %139 = vector.load %arg2[%c12_117, %c0_118, %c0_119] : memref<64x128x128xbf16, #tpu.memory_space<vmem>>, vector<1x128x128xbf16>
    %140 = vector.shape_cast %139 : vector<1x128x128xbf16> to vector<128x128xbf16>
    %cst_120 = arith.constant dense<0.000000e+00> : vector<67x128xf32>
    %141 = tpu.matmul %138, %140, %cst_120 {dimension_numbers = #tpu.dot_dimension_numbers<[1], [0], [0], [1], [0, 0, 1, 1], [], []>} : vector<67x128xbf16>, vector<128x128xbf16>, vector<67x128xf32> -> vector<67x128xf32>
    %142 = arith.addf %136, %141 : vector<67x128xf32>
    %c10_121 = arith.constant 10 : index
    %c0_122 = arith.constant 0 : index
    %143 = vector.load %arg6[%c10_121, %c0_122] : memref<100x128xf32, #tpu.memory_space<vmem>>, vector<67x128xf32>
    %144 = arith.truncf %143 : vector<67x128xf32> to vector<67x128xbf16>
    %c13 = arith.constant 13 : index
    %c0_123 = arith.constant 0 : index
    %c0_124 = arith.constant 0 : index
    %145 = vector.load %arg2[%c13, %c0_123, %c0_124] : memref<64x128x128xbf16, #tpu.memory_space<vmem>>, vector<1x128x128xbf16>
    %146 = vector.shape_cast %145 : vector<1x128x128xbf16> to vector<128x128xbf16>
    %cst_125 = arith.constant dense<0.000000e+00> : vector<67x128xf32>
    %147 = tpu.matmul %144, %146, %cst_125 {dimension_numbers = #tpu.dot_dimension_numbers<[1], [0], [0], [1], [0, 0, 1, 1], [], []>} : vector<67x128xbf16>, vector<128x128xbf16>, vector<67x128xf32> -> vector<67x128xf32>
    %148 = arith.addf %142, %147 : vector<67x128xf32>
    %c11_126 = arith.constant 11 : index
    %c0_127 = arith.constant 0 : index
    %149 = vector.load %arg6[%c11_126, %c0_127] : memref<100x128xf32, #tpu.memory_space<vmem>>, vector<67x128xf32>
    %150 = arith.truncf %149 : vector<67x128xf32> to vector<67x128xbf16>
    %c14 = arith.constant 14 : index
    %c0_128 = arith.constant 0 : index
    %c0_129 = arith.constant 0 : index
    %151 = vector.load %arg2[%c14, %c0_128, %c0_129] : memref<64x128x128xbf16, #tpu.memory_space<vmem>>, vector<1x128x128xbf16>
    %152 = vector.shape_cast %151 : vector<1x128x128xbf16> to vector<128x128xbf16>
    %cst_130 = arith.constant dense<0.000000e+00> : vector<67x128xf32>
    %153 = tpu.matmul %150, %152, %cst_130 {dimension_numbers = #tpu.dot_dimension_numbers<[1], [0], [0], [1], [0, 0, 1, 1], [], []>} : vector<67x128xbf16>, vector<128x128xbf16>, vector<67x128xf32> -> vector<67x128xf32>
    %154 = arith.addf %148, %153 : vector<67x128xf32>
    %c12_131 = arith.constant 12 : index
    %c0_132 = arith.constant 0 : index
    %155 = vector.load %arg6[%c12_131, %c0_132] : memref<100x128xf32, #tpu.memory_space<vmem>>, vector<67x128xf32>
    %156 = arith.truncf %155 : vector<67x128xf32> to vector<67x128xbf16>
    %c15 = arith.constant 15 : index
    %c0_133 = arith.constant 0 : index
    %c0_134 = arith.constant 0 : index
    %157 = vector.load %arg2[%c15, %c0_133, %c0_134] : memref<64x128x128xbf16, #tpu.memory_space<vmem>>, vector<1x128x128xbf16>
    %158 = vector.shape_cast %157 : vector<1x128x128xbf16> to vector<128x128xbf16>
    %cst_135 = arith.constant dense<0.000000e+00> : vector<67x128xf32>
    %159 = tpu.matmul %156, %158, %cst_135 {dimension_numbers = #tpu.dot_dimension_numbers<[1], [0], [0], [1], [0, 0, 1, 1], [], []>} : vector<67x128xbf16>, vector<128x128xbf16>, vector<67x128xf32> -> vector<67x128xf32>
    %160 = arith.addf %154, %159 : vector<67x128xf32>
    %c20_136 = arith.constant 20 : index
    %c0_137 = arith.constant 0 : index
    %161 = vector.load %arg6[%c20_136, %c0_137] : memref<100x128xf32, #tpu.memory_space<vmem>>, vector<67x128xf32>
    %162 = arith.truncf %161 : vector<67x128xf32> to vector<67x128xbf16>
    %c16 = arith.constant 16 : index
    %c0_138 = arith.constant 0 : index
    %c0_139 = arith.constant 0 : index
    %163 = vector.load %arg2[%c16, %c0_138, %c0_139] : memref<64x128x128xbf16, #tpu.memory_space<vmem>>, vector<1x128x128xbf16>
    %164 = vector.shape_cast %163 : vector<1x128x128xbf16> to vector<128x128xbf16>
    %cst_140 = arith.constant dense<0.000000e+00> : vector<67x128xf32>
    %165 = tpu.matmul %162, %164, %cst_140 {dimension_numbers = #tpu.dot_dimension_numbers<[1], [0], [0], [1], [0, 0, 1, 1], [], []>} : vector<67x128xbf16>, vector<128x128xbf16>, vector<67x128xf32> -> vector<67x128xf32>
    %166 = arith.addf %160, %165 : vector<67x128xf32>
    %c21_141 = arith.constant 21 : index
    %c0_142 = arith.constant 0 : index
    %167 = vector.load %arg6[%c21_141, %c0_142] : memref<100x128xf32, #tpu.memory_space<vmem>>, vector<67x128xf32>
    %168 = arith.truncf %167 : vector<67x128xf32> to vector<67x128xbf16>
    %c17 = arith.constant 17 : index
    %c0_143 = arith.constant 0 : index
    %c0_144 = arith.constant 0 : index
    %169 = vector.load %arg2[%c17, %c0_143, %c0_144] : memref<64x128x128xbf16, #tpu.memory_space<vmem>>, vector<1x128x128xbf16>
    %170 = vector.shape_cast %169 : vector<1x128x128xbf16> to vector<128x128xbf16>
    %cst_145 = arith.constant dense<0.000000e+00> : vector<67x128xf32>
    %171 = tpu.matmul %168, %170, %cst_145 {dimension_numbers = #tpu.dot_dimension_numbers<[1], [0], [0], [1], [0, 0, 1, 1], [], []>} : vector<67x128xbf16>, vector<128x128xbf16>, vector<67x128xf32> -> vector<67x128xf32>
    %172 = arith.addf %166, %171 : vector<67x128xf32>
    %c22_146 = arith.constant 22 : index
    %c0_147 = arith.constant 0 : index
    %173 = vector.load %arg6[%c22_146, %c0_147] : memref<100x128xf32, #tpu.memory_space<vmem>>, vector<67x128xf32>
    %174 = arith.truncf %173 : vector<67x128xf32> to vector<67x128xbf16>
    %c18 = arith.constant 18 : index
    %c0_148 = arith.constant 0 : index
    %c0_149 = arith.constant 0 : index
    %175 = vector.load %arg2[%c18, %c0_148, %c0_149] : memref<64x128x128xbf16, #tpu.memory_space<vmem>>, vector<1x128x128xbf16>
    %176 = vector.shape_cast %175 : vector<1x128x128xbf16> to vector<128x128xbf16>
    %cst_150 = arith.constant dense<0.000000e+00> : vector<67x128xf32>
    %177 = tpu.matmul %174, %176, %cst_150 {dimension_numbers = #tpu.dot_dimension_numbers<[1], [0], [0], [1], [0, 0, 1, 1], [], []>} : vector<67x128xbf16>, vector<128x128xbf16>, vector<67x128xf32> -> vector<67x128xf32>
    %178 = arith.addf %172, %177 : vector<67x128xf32>
    %179 = tpu.iota {dimensions = array<i32: 0>} : vector<34x67xi32>
    %180 = tpu.iota {dimensions = array<i32: 1>} : vector<34x67xi32>
    %c2_i32 = arith.constant 2 : i32
    %181 = vector.broadcast %c2_i32 : i32 to vector<34x67xi32>
    %182 = arith.muli %181, %179 : vector<34x67xi32>
    %183 = arith.cmpi eq, %180, %182 : vector<34x67xi32>
    %184 = arith.extui %183 : vector<34x67xi1> to vector<34x67xi32>
    %185 = arith.sitofp %184 : vector<34x67xi32> to vector<34x67xf32>
    %cst_151 = arith.constant dense<0.000000e+00> : vector<34x128xf32>
    %186 = tpu.matmul %185, %178, %cst_151 {dimension_numbers = #tpu.dot_dimension_numbers<[1], [0], [0], [1], [0, 0, 1, 1], [], []>} : vector<34x67xf32>, vector<67x128xf32>, vector<34x128xf32> -> vector<34x128xf32>
    %c2_152 = arith.constant 2 : index
    %c0_153 = arith.constant 0 : index
    %c0_154 = arith.constant 0 : index
    %187 = vector.load %arg3[%c2_152, %c0_153, %c0_154] : memref<8x1x128xf32, #tpu.memory_space<vmem>>, vector<1x1x128xf32>
    %188 = vector.shape_cast %187 : vector<1x1x128xf32> to vector<1x128xf32>
    %189 = vector.broadcast %188 : vector<1x128xf32> to vector<34x128xf32>
    %190 = arith.addf %186, %189 : vector<34x128xf32>
    %cst_155 = arith.constant 0.000000e+00 : f32
    %191 = vector.broadcast %cst_155 : f32 to vector<34x128xf32>
    %192 = arith.cmpf oge, %190, %191 : vector<34x128xf32>
    %cst_156 = arith.constant 0.00999999977 : f32
    %193 = vector.broadcast %cst_156 : f32 to vector<34x128xf32>
    %194 = arith.mulf %193, %190 : vector<34x128xf32>
    %195 = arith.select %192, %190, %194 : vector<34x128xi1>, vector<34x128xf32>
    %196 = vector.extract_strided_slice %195 {offsets = [0, 0], sizes = [4, 128], strides = [1, 1]} : vector<34x128xf32> to vector<4x128xf32>
    %c7_157 = arith.constant 7 : index
    %c0_158 = arith.constant 0 : index
    %197 = vector.load %arg7[%c7_157, %c0_158] : memref<36x128xf32, #tpu.memory_space<vmem>>, vector<4x128xf32>
    tpu.vector_store %arg7[%c7_157, %c0_158], %196 {strides = array<i32>} : memref<36x128xf32, #tpu.memory_space<vmem>>, vector<4x128xf32>,
    %198 = vector.extract_strided_slice %195 {offsets = [10, 0], sizes = [4, 128], strides = [1, 1]} : vector<34x128xf32> to vector<4x128xf32>
    %c13_159 = arith.constant 13 : index
    %c0_160 = arith.constant 0 : index
    %199 = vector.load %arg7[%c13_159, %c0_160] : memref<36x128xf32, #tpu.memory_space<vmem>>, vector<4x128xf32>
    tpu.vector_store %arg7[%c13_159, %c0_160], %198 {strides = array<i32>} : memref<36x128xf32, #tpu.memory_space<vmem>>, vector<4x128xf32>,
    %200 = vector.extract_strided_slice %195 {offsets = [20, 0], sizes = [4, 128], strides = [1, 1]} : vector<34x128xf32> to vector<4x128xf32>
    %c19 = arith.constant 19 : index
    %c0_161 = arith.constant 0 : index
    %201 = vector.load %arg7[%c19, %c0_161] : memref<36x128xf32, #tpu.memory_space<vmem>>, vector<4x128xf32>
    tpu.vector_store %arg7[%c19, %c0_161], %200 {strides = array<i32>} : memref<36x128xf32, #tpu.memory_space<vmem>>, vector<4x128xf32>,
    %202 = vector.extract_strided_slice %195 {offsets = [30, 0], sizes = [4, 128], strides = [1, 1]} : vector<34x128xf32> to vector<4x128xf32>
    %c25 = arith.constant 25 : index
    %c0_162 = arith.constant 0 : index
    %203 = vector.load %arg7[%c25, %c0_162] : memref<36x128xf32, #tpu.memory_space<vmem>>, vector<4x128xf32>
    tpu.vector_store %arg7[%c25, %c0_162], %202 {strides = array<i32>} : memref<36x128xf32, #tpu.memory_space<vmem>>, vector<4x128xf32>,
    %cst_163 = arith.constant 0.000000e+00 : f32
    %204 = vector.broadcast %cst_163 : f32 to vector<22x128xf32>
    %c0_164 = arith.constant 0 : index
    %c0_165 = arith.constant 0 : index
    %205 = vector.load %arg7[%c0_164, %c0_165] : memref<36x128xf32, #tpu.memory_space<vmem>>, vector<22x128xf32>
    %206 = arith.truncf %205 : vector<22x128xf32> to vector<22x128xbf16>
    %c19_166 = arith.constant 19 : index
    %c0_167 = arith.constant 0 : index
    %c0_168 = arith.constant 0 : index
    %207 = vector.load %arg2[%c19_166, %c0_167, %c0_168] : memref<64x128x128xbf16, #tpu.memory_space<vmem>>, vector<1x128x128xbf16>
    %208 = vector.shape_cast %207 : vector<1x128x128xbf16> to vector<128x128xbf16>
    %cst_169 = arith.constant dense<0.000000e+00> : vector<22x128xf32>
    %209 = tpu.matmul %206, %208, %cst_169 {dimension_numbers = #tpu.dot_dimension_numbers<[1], [0], [0], [1], [0, 0, 1, 1], [], []>} : vector<22x128xbf16>, vector<128x128xbf16>, vector<22x128xf32> -> vector<22x128xf32>
    %210 = arith.addf %204, %209 : vector<22x128xf32>
    %c1_170 = arith.constant 1 : index
    %c0_171 = arith.constant 0 : index
    %211 = vector.load %arg7[%c1_170, %c0_171] : memref<36x128xf32, #tpu.memory_space<vmem>>, vector<22x128xf32>
    %212 = arith.truncf %211 : vector<22x128xf32> to vector<22x128xbf16>
    %c20_172 = arith.constant 20 : index
    %c0_173 = arith.constant 0 : index
    %c0_174 = arith.constant 0 : index
    %213 = vector.load %arg2[%c20_172, %c0_173, %c0_174] : memref<64x128x128xbf16, #tpu.memory_space<vmem>>, vector<1x128x128xbf16>
    %214 = vector.shape_cast %213 : vector<1x128x128xbf16> to vector<128x128xbf16>
    %cst_175 = arith.constant dense<0.000000e+00> : vector<22x128xf32>
    %215 = tpu.matmul %212, %214, %cst_175 {dimension_numbers = #tpu.dot_dimension_numbers<[1], [0], [0], [1], [0, 0, 1, 1], [], []>} : vector<22x128xbf16>, vector<128x128xbf16>, vector<22x128xf32> -> vector<22x128xf32>
    %216 = arith.addf %210, %215 : vector<22x128xf32>
    %c2_176 = arith.constant 2 : index
    %c0_177 = arith.constant 0 : index
    %217 = vector.load %arg7[%c2_176, %c0_177] : memref<36x128xf32, #tpu.memory_space<vmem>>, vector<22x128xf32>
    %218 = arith.truncf %217 : vector<22x128xf32> to vector<22x128xbf16>
    %c21_178 = arith.constant 21 : index
    %c0_179 = arith.constant 0 : index
    %c0_180 = arith.constant 0 : index
    %219 = vector.load %arg2[%c21_178, %c0_179, %c0_180] : memref<64x128x128xbf16, #tpu.memory_space<vmem>>, vector<1x128x128xbf16>
    %220 = vector.shape_cast %219 : vector<1x128x128xbf16> to vector<128x128xbf16>
    %cst_181 = arith.constant dense<0.000000e+00> : vector<22x128xf32>
    %221 = tpu.matmul %218, %220, %cst_181 {dimension_numbers = #tpu.dot_dimension_numbers<[1], [0], [0], [1], [0, 0, 1, 1], [], []>} : vector<22x128xbf16>, vector<128x128xbf16>, vector<22x128xf32> -> vector<22x128xf32>
    %222 = arith.addf %216, %221 : vector<22x128xf32>
    %c6_182 = arith.constant 6 : index
    %c0_183 = arith.constant 0 : index
    %223 = vector.load %arg7[%c6_182, %c0_183] : memref<36x128xf32, #tpu.memory_space<vmem>>, vector<22x128xf32>
    %224 = arith.truncf %223 : vector<22x128xf32> to vector<22x128xbf16>
    %c22_184 = arith.constant 22 : index
    %c0_185 = arith.constant 0 : index
    %c0_186 = arith.constant 0 : index
    %225 = vector.load %arg2[%c22_184, %c0_185, %c0_186] : memref<64x128x128xbf16, #tpu.memory_space<vmem>>, vector<1x128x128xbf16>
    %226 = vector.shape_cast %225 : vector<1x128x128xbf16> to vector<128x128xbf16>
    %cst_187 = arith.constant dense<0.000000e+00> : vector<22x128xf32>
    %227 = tpu.matmul %224, %226, %cst_187 {dimension_numbers = #tpu.dot_dimension_numbers<[1], [0], [0], [1], [0, 0, 1, 1], [], []>} : vector<22x128xbf16>, vector<128x128xbf16>, vector<22x128xf32> -> vector<22x128xf32>
    %228 = arith.addf %222, %227 : vector<22x128xf32>
    %c7_188 = arith.constant 7 : index
    %c0_189 = arith.constant 0 : index
    %229 = vector.load %arg7[%c7_188, %c0_189] : memref<36x128xf32, #tpu.memory_space<vmem>>, vector<22x128xf32>
    %230 = arith.truncf %229 : vector<22x128xf32> to vector<22x128xbf16>
    %c23 = arith.constant 23 : index
    %c0_190 = arith.constant 0 : index
    %c0_191 = arith.constant 0 : index
    %231 = vector.load %arg2[%c23, %c0_190, %c0_191] : memref<64x128x128xbf16, #tpu.memory_space<vmem>>, vector<1x128x128xbf16>
    %232 = vector.shape_cast %231 : vector<1x128x128xbf16> to vector<128x128xbf16>
    %cst_192 = arith.constant dense<0.000000e+00> : vector<22x128xf32>
    %233 = tpu.matmul %230, %232, %cst_192 {dimension_numbers = #tpu.dot_dimension_numbers<[1], [0], [0], [1], [0, 0, 1, 1], [], []>} : vector<22x128xbf16>, vector<128x128xbf16>, vector<22x128xf32> -> vector<22x128xf32>
    %234 = arith.addf %228, %233 : vector<22x128xf32>
    %c8_193 = arith.constant 8 : index
    %c0_194 = arith.constant 0 : index
    %235 = vector.load %arg7[%c8_193, %c0_194] : memref<36x128xf32, #tpu.memory_space<vmem>>, vector<22x128xf32>
    %236 = arith.truncf %235 : vector<22x128xf32> to vector<22x128xbf16>
    %c24 = arith.constant 24 : index
    %c0_195 = arith.constant 0 : index
    %c0_196 = arith.constant 0 : index
    %237 = vector.load %arg2[%c24, %c0_195, %c0_196] : memref<64x128x128xbf16, #tpu.memory_space<vmem>>, vector<1x128x128xbf16>
    %238 = vector.shape_cast %237 : vector<1x128x128xbf16> to vector<128x128xbf16>
    %cst_197 = arith.constant dense<0.000000e+00> : vector<22x128xf32>
    %239 = tpu.matmul %236, %238, %cst_197 {dimension_numbers = #tpu.dot_dimension_numbers<[1], [0], [0], [1], [0, 0, 1, 1], [], []>} : vector<22x128xbf16>, vector<128x128xbf16>, vector<22x128xf32> -> vector<22x128xf32>
    %240 = arith.addf %234, %239 : vector<22x128xf32>
    %c12_198 = arith.constant 12 : index
    %c0_199 = arith.constant 0 : index
    %241 = vector.load %arg7[%c12_198, %c0_199] : memref<36x128xf32, #tpu.memory_space<vmem>>, vector<22x128xf32>
    %242 = arith.truncf %241 : vector<22x128xf32> to vector<22x128xbf16>
    %c25_200 = arith.constant 25 : index
    %c0_201 = arith.constant 0 : index
    %c0_202 = arith.constant 0 : index
    %243 = vector.load %arg2[%c25_200, %c0_201, %c0_202] : memref<64x128x128xbf16, #tpu.memory_space<vmem>>, vector<1x128x128xbf16>
    %244 = vector.shape_cast %243 : vector<1x128x128xbf16> to vector<128x128xbf16>
    %cst_203 = arith.constant dense<0.000000e+00> : vector<22x128xf32>
    %245 = tpu.matmul %242, %244, %cst_203 {dimension_numbers = #tpu.dot_dimension_numbers<[1], [0], [0], [1], [0, 0, 1, 1], [], []>} : vector<22x128xbf16>, vector<128x128xbf16>, vector<22x128xf32> -> vector<22x128xf32>
    %246 = arith.addf %240, %245 : vector<22x128xf32>
    %c13_204 = arith.constant 13 : index
    %c0_205 = arith.constant 0 : index
    %247 = vector.load %arg7[%c13_204, %c0_205] : memref<36x128xf32, #tpu.memory_space<vmem>>, vector<22x128xf32>
    %248 = arith.truncf %247 : vector<22x128xf32> to vector<22x128xbf16>
    %c26 = arith.constant 26 : index
    %c0_206 = arith.constant 0 : index
    %c0_207 = arith.constant 0 : index
    %249 = vector.load %arg2[%c26, %c0_206, %c0_207] : memref<64x128x128xbf16, #tpu.memory_space<vmem>>, vector<1x128x128xbf16>
    %250 = vector.shape_cast %249 : vector<1x128x128xbf16> to vector<128x128xbf16>
    %cst_208 = arith.constant dense<0.000000e+00> : vector<22x128xf32>
    %251 = tpu.matmul %248, %250, %cst_208 {dimension_numbers = #tpu.dot_dimension_numbers<[1], [0], [0], [1], [0, 0, 1, 1], [], []>} : vector<22x128xbf16>, vector<128x128xbf16>, vector<22x128xf32> -> vector<22x128xf32>
    %252 = arith.addf %246, %251 : vector<22x128xf32>
    %c14_209 = arith.constant 14 : index
    %c0_210 = arith.constant 0 : index
    %253 = vector.load %arg7[%c14_209, %c0_210] : memref<36x128xf32, #tpu.memory_space<vmem>>, vector<22x128xf32>
    %254 = arith.truncf %253 : vector<22x128xf32> to vector<22x128xbf16>
    %c27 = arith.constant 27 : index
    %c0_211 = arith.constant 0 : index
    %c0_212 = arith.constant 0 : index
    %255 = vector.load %arg2[%c27, %c0_211, %c0_212] : memref<64x128x128xbf16, #tpu.memory_space<vmem>>, vector<1x128x128xbf16>
    %256 = vector.shape_cast %255 : vector<1x128x128xbf16> to vector<128x128xbf16>
    %cst_213 = arith.constant dense<0.000000e+00> : vector<22x128xf32>
    %257 = tpu.matmul %254, %256, %cst_213 {dimension_numbers = #tpu.dot_dimension_numbers<[1], [0], [0], [1], [0, 0, 1, 1], [], []>} : vector<22x128xbf16>, vector<128x128xbf16>, vector<22x128xf32> -> vector<22x128xf32>
    %258 = arith.addf %252, %257 : vector<22x128xf32>
    %c3_214 = arith.constant 3 : index
    %c0_215 = arith.constant 0 : index
    %c0_216 = arith.constant 0 : index
    %259 = vector.load %arg3[%c3_214, %c0_215, %c0_216] : memref<8x1x128xf32, #tpu.memory_space<vmem>>, vector<1x1x128xf32>
    %260 = vector.shape_cast %259 : vector<1x1x128xf32> to vector<1x128xf32>
    %261 = vector.broadcast %260 : vector<1x128xf32> to vector<22x128xf32>
    %262 = arith.addf %258, %261 : vector<22x128xf32>
    %cst_217 = arith.constant 0.000000e+00 : f32
    %263 = vector.broadcast %cst_217 : f32 to vector<22x128xf32>
    %264 = arith.cmpf oge, %262, %263 : vector<22x128xf32>
    %cst_218 = arith.constant 0.00999999977 : f32
    %265 = vector.broadcast %cst_218 : f32 to vector<22x128xf32>
    %266 = arith.mulf %265, %262 : vector<22x128xf32>
    %267 = arith.select %264, %262, %266 : vector<22x128xi1>, vector<22x128xf32>
    %268 = vector.extract_strided_slice %267 {offsets = [0, 0], sizes = [4, 128], strides = [1, 1]} : vector<22x128xf32> to vector<4x128xf32>
    %c7_219 = arith.constant 7 : index
    %c0_220 = arith.constant 0 : index
    %269 = vector.load %arg8[%c7_219, %c0_220] : memref<36x128xf32, #tpu.memory_space<vmem>>, vector<4x128xf32>
    tpu.vector_store %arg8[%c7_219, %c0_220], %268 {strides = array<i32>} : memref<36x128xf32, #tpu.memory_space<vmem>>, vector<4x128xf32>,
    %270 = vector.extract_strided_slice %267 {offsets = [6, 0], sizes = [4, 128], strides = [1, 1]} : vector<22x128xf32> to vector<4x128xf32>
    %c13_221 = arith.constant 13 : index
    %c0_222 = arith.constant 0 : index
    %271 = vector.load %arg8[%c13_221, %c0_222] : memref<36x128xf32, #tpu.memory_space<vmem>>, vector<4x128xf32>
    tpu.vector_store %arg8[%c13_221, %c0_222], %270 {strides = array<i32>} : memref<36x128xf32, #tpu.memory_space<vmem>>, vector<4x128xf32>,
    %272 = vector.extract_strided_slice %267 {offsets = [12, 0], sizes = [4, 128], strides = [1, 1]} : vector<22x128xf32> to vector<4x128xf32>
    %c19_223 = arith.constant 19 : index
    %c0_224 = arith.constant 0 : index
    %273 = vector.load %arg8[%c19_223, %c0_224] : memref<36x128xf32, #tpu.memory_space<vmem>>, vector<4x128xf32>
    tpu.vector_store %arg8[%c19_223, %c0_224], %272 {strides = array<i32>} : memref<36x128xf32, #tpu.memory_space<vmem>>, vector<4x128xf32>,
    %274 = vector.extract_strided_slice %267 {offsets = [18, 0], sizes = [4, 128], strides = [1, 1]} : vector<22x128xf32> to vector<4x128xf32>
    %c25_225 = arith.constant 25 : index
    %c0_226 = arith.constant 0 : index
    %275 = vector.load %arg8[%c25_225, %c0_226] : memref<36x128xf32, #tpu.memory_space<vmem>>, vector<4x128xf32>
    tpu.vector_store %arg8[%c25_225, %c0_226], %274 {strides = array<i32>} : memref<36x128xf32, #tpu.memory_space<vmem>>, vector<4x128xf32>,
    %cst_227 = arith.constant 0.000000e+00 : f32
    %276 = vector.broadcast %cst_227 : f32 to vector<15x128xf32>
    %c0_228 = arith.constant 0 : index
    %c0_229 = arith.constant 0 : index
    %277 = vector.load %arg8[%c0_228, %c0_229] : memref<36x128xf32, #tpu.memory_space<vmem>>, vector<15x128xf32>
    %278 = arith.truncf %277 : vector<15x128xf32> to vector<15x128xbf16>
    %c28 = arith.constant 28 : index
    %c0_230 = arith.constant 0 : index
    %c0_231 = arith.constant 0 : index
    %279 = vector.load %arg2[%c28, %c0_230, %c0_231] : memref<64x128x128xbf16, #tpu.memory_space<vmem>>, vector<1x128x128xbf16>
    %280 = vector.shape_cast %279 : vector<1x128x128xbf16> to vector<128x128xbf16>
    %cst_232 = arith.constant dense<0.000000e+00> : vector<15x128xf32>
    %281 = tpu.matmul %278, %280, %cst_232 {dimension_numbers = #tpu.dot_dimension_numbers<[1], [0], [0], [1], [0, 0, 1, 1], [], []>} : vector<15x128xbf16>, vector<128x128xbf16>, vector<15x128xf32> -> vector<15x128xf32>
    %282 = arith.addf %276, %281 : vector<15x128xf32>
    %c1_233 = arith.constant 1 : index
    %c0_234 = arith.constant 0 : index
    %283 = vector.load %arg8[%c1_233, %c0_234] : memref<36x128xf32, #tpu.memory_space<vmem>>, vector<15x128xf32>
    %284 = arith.truncf %283 : vector<15x128xf32> to vector<15x128xbf16>
    %c29 = arith.constant 29 : index
    %c0_235 = arith.constant 0 : index
    %c0_236 = arith.constant 0 : index
    %285 = vector.load %arg2[%c29, %c0_235, %c0_236] : memref<64x128x128xbf16, #tpu.memory_space<vmem>>, vector<1x128x128xbf16>
    %286 = vector.shape_cast %285 : vector<1x128x128xbf16> to vector<128x128xbf16>
    %cst_237 = arith.constant dense<0.000000e+00> : vector<15x128xf32>
    %287 = tpu.matmul %284, %286, %cst_237 {dimension_numbers = #tpu.dot_dimension_numbers<[1], [0], [0], [1], [0, 0, 1, 1], [], []>} : vector<15x128xbf16>, vector<128x128xbf16>, vector<15x128xf32> -> vector<15x128xf32>
    %288 = arith.addf %282, %287 : vector<15x128xf32>
    %c2_238 = arith.constant 2 : index
    %c0_239 = arith.constant 0 : index
    %289 = vector.load %arg8[%c2_238, %c0_239] : memref<36x128xf32, #tpu.memory_space<vmem>>, vector<15x128xf32>
    %290 = arith.truncf %289 : vector<15x128xf32> to vector<15x128xbf16>
    %c30 = arith.constant 30 : index
    %c0_240 = arith.constant 0 : index
    %c0_241 = arith.constant 0 : index
    %291 = vector.load %arg2[%c30, %c0_240, %c0_241] : memref<64x128x128xbf16, #tpu.memory_space<vmem>>, vector<1x128x128xbf16>
    %292 = vector.shape_cast %291 : vector<1x128x128xbf16> to vector<128x128xbf16>
    %cst_242 = arith.constant dense<0.000000e+00> : vector<15x128xf32>
    %293 = tpu.matmul %290, %292, %cst_242 {dimension_numbers = #tpu.dot_dimension_numbers<[1], [0], [0], [1], [0, 0, 1, 1], [], []>} : vector<15x128xbf16>, vector<128x128xbf16>, vector<15x128xf32> -> vector<15x128xf32>
    %294 = arith.addf %288, %293 : vector<15x128xf32>
    %c6_243 = arith.constant 6 : index
    %c0_244 = arith.constant 0 : index
    %295 = vector.load %arg8[%c6_243, %c0_244] : memref<36x128xf32, #tpu.memory_space<vmem>>, vector<15x128xf32>
    %296 = arith.truncf %295 : vector<15x128xf32> to vector<15x128xbf16>
    %c31_245 = arith.constant 31 : index
    %c0_246 = arith.constant 0 : index
    %c0_247 = arith.constant 0 : index
    %297 = vector.load %arg2[%c31_245, %c0_246, %c0_247] : memref<64x128x128xbf16, #tpu.memory_space<vmem>>, vector<1x128x128xbf16>
    %298 = vector.shape_cast %297 : vector<1x128x128xbf16> to vector<128x128xbf16>
    %cst_248 = arith.constant dense<0.000000e+00> : vector<15x128xf32>
    %299 = tpu.matmul %296, %298, %cst_248 {dimension_numbers = #tpu.dot_dimension_numbers<[1], [0], [0], [1], [0, 0, 1, 1], [], []>} : vector<15x128xbf16>, vector<128x128xbf16>, vector<15x128xf32> -> vector<15x128xf32>
    %300 = arith.addf %294, %299 : vector<15x128xf32>
    %c7_249 = arith.constant 7 : index
    %c0_250 = arith.constant 0 : index
    %301 = vector.load %arg8[%c7_249, %c0_250] : memref<36x128xf32, #tpu.memory_space<vmem>>, vector<15x128xf32>
    %302 = arith.truncf %301 : vector<15x128xf32> to vector<15x128xbf16>
    %c32 = arith.constant 32 : index
    %c0_251 = arith.constant 0 : index
    %c0_252 = arith.constant 0 : index
    %303 = vector.load %arg2[%c32, %c0_251, %c0_252] : memref<64x128x128xbf16, #tpu.memory_space<vmem>>, vector<1x128x128xbf16>
    %304 = vector.shape_cast %303 : vector<1x128x128xbf16> to vector<128x128xbf16>
    %cst_253 = arith.constant dense<0.000000e+00> : vector<15x128xf32>
    %305 = tpu.matmul %302, %304, %cst_253 {dimension_numbers = #tpu.dot_dimension_numbers<[1], [0], [0], [1], [0, 0, 1, 1], [], []>} : vector<15x128xbf16>, vector<128x128xbf16>, vector<15x128xf32> -> vector<15x128xf32>
    %306 = arith.addf %300, %305 : vector<15x128xf32>
    %c8_254 = arith.constant 8 : index
    %c0_255 = arith.constant 0 : index
    %307 = vector.load %arg8[%c8_254, %c0_255] : memref<36x128xf32, #tpu.memory_space<vmem>>, vector<15x128xf32>
    %308 = arith.truncf %307 : vector<15x128xf32> to vector<15x128xbf16>
    %c33 = arith.constant 33 : index
    %c0_256 = arith.constant 0 : index
    %c0_257 = arith.constant 0 : index
    %309 = vector.load %arg2[%c33, %c0_256, %c0_257] : memref<64x128x128xbf16, #tpu.memory_space<vmem>>, vector<1x128x128xbf16>
    %310 = vector.shape_cast %309 : vector<1x128x128xbf16> to vector<128x128xbf16>
    %cst_258 = arith.constant dense<0.000000e+00> : vector<15x128xf32>
    %311 = tpu.matmul %308, %310, %cst_258 {dimension_numbers = #tpu.dot_dimension_numbers<[1], [0], [0], [1], [0, 0, 1, 1], [], []>} : vector<15x128xbf16>, vector<128x128xbf16>, vector<15x128xf32> -> vector<15x128xf32>
    %312 = arith.addf %306, %311 : vector<15x128xf32>
    %c12_259 = arith.constant 12 : index
    %c0_260 = arith.constant 0 : index
    %313 = vector.load %arg8[%c12_259, %c0_260] : memref<36x128xf32, #tpu.memory_space<vmem>>, vector<15x128xf32>
    %314 = arith.truncf %313 : vector<15x128xf32> to vector<15x128xbf16>
    %c34 = arith.constant 34 : index
    %c0_261 = arith.constant 0 : index
    %c0_262 = arith.constant 0 : index
    %315 = vector.load %arg2[%c34, %c0_261, %c0_262] : memref<64x128x128xbf16, #tpu.memory_space<vmem>>, vector<1x128x128xbf16>
    %316 = vector.shape_cast %315 : vector<1x128x128xbf16> to vector<128x128xbf16>
    %cst_263 = arith.constant dense<0.000000e+00> : vector<15x128xf32>
    %317 = tpu.matmul %314, %316, %cst_263 {dimension_numbers = #tpu.dot_dimension_numbers<[1], [0], [0], [1], [0, 0, 1, 1], [], []>} : vector<15x128xbf16>, vector<128x128xbf16>, vector<15x128xf32> -> vector<15x128xf32>
    %318 = arith.addf %312, %317 : vector<15x128xf32>
    %c13_264 = arith.constant 13 : index
    %c0_265 = arith.constant 0 : index
    %319 = vector.load %arg8[%c13_264, %c0_265] : memref<36x128xf32, #tpu.memory_space<vmem>>, vector<15x128xf32>
    %320 = arith.truncf %319 : vector<15x128xf32> to vector<15x128xbf16>
    %c35 = arith.constant 35 : index
    %c0_266 = arith.constant 0 : index
    %c0_267 = arith.constant 0 : index
    %321 = vector.load %arg2[%c35, %c0_266, %c0_267] : memref<64x128x128xbf16, #tpu.memory_space<vmem>>, vector<1x128x128xbf16>
    %322 = vector.shape_cast %321 : vector<1x128x128xbf16> to vector<128x128xbf16>
    %cst_268 = arith.constant dense<0.000000e+00> : vector<15x128xf32>
    %323 = tpu.matmul %320, %322, %cst_268 {dimension_numbers = #tpu.dot_dimension_numbers<[1], [0], [0], [1], [0, 0, 1, 1], [], []>} : vector<15x128xbf16>, vector<128x128xbf16>, vector<15x128xf32> -> vector<15x128xf32>
    %324 = arith.addf %318, %323 : vector<15x128xf32>
    %c14_269 = arith.constant 14 : index
    %c0_270 = arith.constant 0 : index
    %325 = vector.load %arg8[%c14_269, %c0_270] : memref<36x128xf32, #tpu.memory_space<vmem>>, vector<15x128xf32>
    %326 = arith.truncf %325 : vector<15x128xf32> to vector<15x128xbf16>
    %c36 = arith.constant 36 : index
    %c0_271 = arith.constant 0 : index
    %c0_272 = arith.constant 0 : index
    %327 = vector.load %arg2[%c36, %c0_271, %c0_272] : memref<64x128x128xbf16, #tpu.memory_space<vmem>>, vector<1x128x128xbf16>
    %328 = vector.shape_cast %327 : vector<1x128x128xbf16> to vector<128x128xbf16>
    %cst_273 = arith.constant dense<0.000000e+00> : vector<15x128xf32>
    %329 = tpu.matmul %326, %328, %cst_273 {dimension_numbers = #tpu.dot_dimension_numbers<[1], [0], [0], [1], [0, 0, 1, 1], [], []>} : vector<15x128xbf16>, vector<128x128xbf16>, vector<15x128xf32> -> vector<15x128xf32>
    %330 = arith.addf %324, %329 : vector<15x128xf32>
    %331 = tpu.iota {dimensions = array<i32: 0>} : vector<8x15xi32>
    %332 = tpu.iota {dimensions = array<i32: 1>} : vector<8x15xi32>
    %c2_i32_274 = arith.constant 2 : i32
    %333 = vector.broadcast %c2_i32_274 : i32 to vector<8x15xi32>
    %334 = arith.muli %333, %331 : vector<8x15xi32>
    %335 = arith.cmpi eq, %332, %334 : vector<8x15xi32>
    %336 = arith.extui %335 : vector<8x15xi1> to vector<8x15xi32>
    %337 = arith.sitofp %336 : vector<8x15xi32> to vector<8x15xf32>
    %cst_275 = arith.constant dense<0.000000e+00> : vector<8x128xf32>
    %338 = tpu.matmul %337, %330, %cst_275 {dimension_numbers = #tpu.dot_dimension_numbers<[1], [0], [0], [1], [0, 0, 1, 1], [], []>} : vector<8x15xf32>, vector<15x128xf32>, vector<8x128xf32> -> vector<8x128xf32>
    %c4_276 = arith.constant 4 : index
    %c0_277 = arith.constant 0 : index
    %c0_278 = arith.constant 0 : index
    %339 = vector.load %arg3[%c4_276, %c0_277, %c0_278] : memref<8x1x128xf32, #tpu.memory_space<vmem>>, vector<1x1x128xf32>
    %340 = vector.shape_cast %339 : vector<1x1x128xf32> to vector<1x128xf32>
    %341 = vector.broadcast %340 : vector<1x128xf32> to vector<8x128xf32>
    %342 = arith.addf %338, %341 : vector<8x128xf32>
    %cst_279 = arith.constant 0.000000e+00 : f32
    %343 = vector.broadcast %cst_279 : f32 to vector<8x128xf32>
    %344 = arith.cmpf oge, %342, %343 : vector<8x128xf32>
    %cst_280 = arith.constant 0.00999999977 : f32
    %345 = vector.broadcast %cst_280 : f32 to vector<8x128xf32>
    %346 = arith.mulf %345, %342 : vector<8x128xf32>
    %347 = arith.select %344, %342, %346 : vector<8x128xi1>, vector<8x128xf32>
    %348 = vector.extract_strided_slice %347 {offsets = [0, 0], sizes = [2, 128], strides = [1, 1]} : vector<8x128xf32> to vector<2x128xf32>
    %c5_281 = arith.constant 5 : index
    %c0_282 = arith.constant 0 : index
    %349 = vector.load %arg9[%c5_281, %c0_282] : memref<16x128xf32, #tpu.memory_space<vmem>>, vector<2x128xf32>
    tpu.vector_store %arg9[%c5_281, %c0_282], %348 {strides = array<i32>} : memref<16x128xf32, #tpu.memory_space<vmem>>, vector<2x128xf32>,
    %350 = vector.extract_strided_slice %347 {offsets = [6, 0], sizes = [2, 128], strides = [1, 1]} : vector<8x128xf32> to vector<2x128xf32>
    %c9_283 = arith.constant 9 : index
    %c0_284 = arith.constant 0 : index
    %351 = vector.load %arg9[%c9_283, %c0_284] : memref<16x128xf32, #tpu.memory_space<vmem>>, vector<2x128xf32>
    tpu.vector_store %arg9[%c9_283, %c0_284], %350 {strides = array<i32>} : memref<16x128xf32, #tpu.memory_space<vmem>>, vector<2x128xf32>,
    %cst_285 = arith.constant 0.000000e+00 : f32
    %352 = vector.broadcast %cst_285 : f32 to vector<6x128xf32>
    %c0_286 = arith.constant 0 : index
    %c0_287 = arith.constant 0 : index
    %353 = vector.load %arg9[%c0_286, %c0_287] : memref<16x128xf32, #tpu.memory_space<vmem>>, vector<6x128xf32>
    %354 = arith.truncf %353 : vector<6x128xf32> to vector<6x128xbf16>
    %c37 = arith.constant 37 : index
    %c0_288 = arith.constant 0 : index
    %c0_289 = arith.constant 0 : index
    %355 = vector.load %arg2[%c37, %c0_288, %c0_289] : memref<64x128x128xbf16, #tpu.memory_space<vmem>>, vector<1x128x128xbf16>
    %356 = vector.shape_cast %355 : vector<1x128x128xbf16> to vector<128x128xbf16>
    %cst_290 = arith.constant dense<0.000000e+00> : vector<6x128xf32>
    %357 = tpu.matmul %354, %356, %cst_290 {dimension_numbers = #tpu.dot_dimension_numbers<[1], [0], [0], [1], [0, 0, 1, 1], [], []>} : vector<6x128xbf16>, vector<128x128xbf16>, vector<6x128xf32> -> vector<6x128xf32>
    %358 = arith.addf %352, %357 : vector<6x128xf32>
    %c1_291 = arith.constant 1 : index
    %c0_292 = arith.constant 0 : index
    %359 = vector.load %arg9[%c1_291, %c0_292] : memref<16x128xf32, #tpu.memory_space<vmem>>, vector<6x128xf32>
    %360 = arith.truncf %359 : vector<6x128xf32> to vector<6x128xbf16>
    %c38 = arith.constant 38 : index
    %c0_293 = arith.constant 0 : index
    %c0_294 = arith.constant 0 : index
    %361 = vector.load %arg2[%c38, %c0_293, %c0_294] : memref<64x128x128xbf16, #tpu.memory_space<vmem>>, vector<1x128x128xbf16>
    %362 = vector.shape_cast %361 : vector<1x128x128xbf16> to vector<128x128xbf16>
    %cst_295 = arith.constant dense<0.000000e+00> : vector<6x128xf32>
    %363 = tpu.matmul %360, %362, %cst_295 {dimension_numbers = #tpu.dot_dimension_numbers<[1], [0], [0], [1], [0, 0, 1, 1], [], []>} : vector<6x128xbf16>, vector<128x128xbf16>, vector<6x128xf32> -> vector<6x128xf32>
    %364 = arith.addf %358, %363 : vector<6x128xf32>
    %c2_296 = arith.constant 2 : index
    %c0_297 = arith.constant 0 : index
    %365 = vector.load %arg9[%c2_296, %c0_297] : memref<16x128xf32, #tpu.memory_space<vmem>>, vector<6x128xf32>
    %366 = arith.truncf %365 : vector<6x128xf32> to vector<6x128xbf16>
    %c39 = arith.constant 39 : index
    %c0_298 = arith.constant 0 : index
    %c0_299 = arith.constant 0 : index
    %367 = vector.load %arg2[%c39, %c0_298, %c0_299] : memref<64x128x128xbf16, #tpu.memory_space<vmem>>, vector<1x128x128xbf16>
    %368 = vector.shape_cast %367 : vector<1x128x128xbf16> to vector<128x128xbf16>
    %cst_300 = arith.constant dense<0.000000e+00> : vector<6x128xf32>
    %369 = tpu.matmul %366, %368, %cst_300 {dimension_numbers = #tpu.dot_dimension_numbers<[1], [0], [0], [1], [0, 0, 1, 1], [], []>} : vector<6x128xbf16>, vector<128x128xbf16>, vector<6x128xf32> -> vector<6x128xf32>
    %370 = arith.addf %364, %369 : vector<6x128xf32>
    %c4_301 = arith.constant 4 : index
    %c0_302 = arith.constant 0 : index
    %371 = vector.load %arg9[%c4_301, %c0_302] : memref<16x128xf32, #tpu.memory_space<vmem>>, vector<6x128xf32>
    %372 = arith.truncf %371 : vector<6x128xf32> to vector<6x128xbf16>
    %c40 = arith.constant 40 : index
    %c0_303 = arith.constant 0 : index
    %c0_304 = arith.constant 0 : index
    %373 = vector.load %arg2[%c40, %c0_303, %c0_304] : memref<64x128x128xbf16, #tpu.memory_space<vmem>>, vector<1x128x128xbf16>
    %374 = vector.shape_cast %373 : vector<1x128x128xbf16> to vector<128x128xbf16>
    %cst_305 = arith.constant dense<0.000000e+00> : vector<6x128xf32>
    %375 = tpu.matmul %372, %374, %cst_305 {dimension_numbers = #tpu.dot_dimension_numbers<[1], [0], [0], [1], [0, 0, 1, 1], [], []>} : vector<6x128xbf16>, vector<128x128xbf16>, vector<6x128xf32> -> vector<6x128xf32>
    %376 = arith.addf %370, %375 : vector<6x128xf32>
    %c5_306 = arith.constant 5 : index
    %c0_307 = arith.constant 0 : index
    %377 = vector.load %arg9[%c5_306, %c0_307] : memref<16x128xf32, #tpu.memory_space<vmem>>, vector<6x128xf32>
    %378 = arith.truncf %377 : vector<6x128xf32> to vector<6x128xbf16>
    %c41_308 = arith.constant 41 : index
    %c0_309 = arith.constant 0 : index
    %c0_310 = arith.constant 0 : index
    %379 = vector.load %arg2[%c41_308, %c0_309, %c0_310] : memref<64x128x128xbf16, #tpu.memory_space<vmem>>, vector<1x128x128xbf16>
    %380 = vector.shape_cast %379 : vector<1x128x128xbf16> to vector<128x128xbf16>
    %cst_311 = arith.constant dense<0.000000e+00> : vector<6x128xf32>
    %381 = tpu.matmul %378, %380, %cst_311 {dimension_numbers = #tpu.dot_dimension_numbers<[1], [0], [0], [1], [0, 0, 1, 1], [], []>} : vector<6x128xbf16>, vector<128x128xbf16>, vector<6x128xf32> -> vector<6x128xf32>
    %382 = arith.addf %376, %381 : vector<6x128xf32>
    %c6_312 = arith.constant 6 : index
    %c0_313 = arith.constant 0 : index
    %383 = vector.load %arg9[%c6_312, %c0_313] : memref<16x128xf32, #tpu.memory_space<vmem>>, vector<6x128xf32>
    %384 = arith.truncf %383 : vector<6x128xf32> to vector<6x128xbf16>
    %c42 = arith.constant 42 : index
    %c0_314 = arith.constant 0 : index
    %c0_315 = arith.constant 0 : index
    %385 = vector.load %arg2[%c42, %c0_314, %c0_315] : memref<64x128x128xbf16, #tpu.memory_space<vmem>>, vector<1x128x128xbf16>
    %386 = vector.shape_cast %385 : vector<1x128x128xbf16> to vector<128x128xbf16>
    %cst_316 = arith.constant dense<0.000000e+00> : vector<6x128xf32>
    %387 = tpu.matmul %384, %386, %cst_316 {dimension_numbers = #tpu.dot_dimension_numbers<[1], [0], [0], [1], [0, 0, 1, 1], [], []>} : vector<6x128xbf16>, vector<128x128xbf16>, vector<6x128xf32> -> vector<6x128xf32>
    %388 = arith.addf %382, %387 : vector<6x128xf32>
    %c8_317 = arith.constant 8 : index
    %c0_318 = arith.constant 0 : index
    %389 = vector.load %arg9[%c8_317, %c0_318] : memref<16x128xf32, #tpu.memory_space<vmem>>, vector<6x128xf32>
    %390 = arith.truncf %389 : vector<6x128xf32> to vector<6x128xbf16>
    %c43 = arith.constant 43 : index
    %c0_319 = arith.constant 0 : index
    %c0_320 = arith.constant 0 : index
    %391 = vector.load %arg2[%c43, %c0_319, %c0_320] : memref<64x128x128xbf16, #tpu.memory_space<vmem>>, vector<1x128x128xbf16>
    %392 = vector.shape_cast %391 : vector<1x128x128xbf16> to vector<128x128xbf16>
    %cst_321 = arith.constant dense<0.000000e+00> : vector<6x128xf32>
    %393 = tpu.matmul %390, %392, %cst_321 {dimension_numbers = #tpu.dot_dimension_numbers<[1], [0], [0], [1], [0, 0, 1, 1], [], []>} : vector<6x128xbf16>, vector<128x128xbf16>, vector<6x128xf32> -> vector<6x128xf32>
    %394 = arith.addf %388, %393 : vector<6x128xf32>
    %c9_322 = arith.constant 9 : index
    %c0_323 = arith.constant 0 : index
    %395 = vector.load %arg9[%c9_322, %c0_323] : memref<16x128xf32, #tpu.memory_space<vmem>>, vector<6x128xf32>
    %396 = arith.truncf %395 : vector<6x128xf32> to vector<6x128xbf16>
    %c44 = arith.constant 44 : index
    %c0_324 = arith.constant 0 : index
    %c0_325 = arith.constant 0 : index
    %397 = vector.load %arg2[%c44, %c0_324, %c0_325] : memref<64x128x128xbf16, #tpu.memory_space<vmem>>, vector<1x128x128xbf16>
    %398 = vector.shape_cast %397 : vector<1x128x128xbf16> to vector<128x128xbf16>
    %cst_326 = arith.constant dense<0.000000e+00> : vector<6x128xf32>
    %399 = tpu.matmul %396, %398, %cst_326 {dimension_numbers = #tpu.dot_dimension_numbers<[1], [0], [0], [1], [0, 0, 1, 1], [], []>} : vector<6x128xbf16>, vector<128x128xbf16>, vector<6x128xf32> -> vector<6x128xf32>
    %400 = arith.addf %394, %399 : vector<6x128xf32>
    %c10_327 = arith.constant 10 : index
    %c0_328 = arith.constant 0 : index
    %401 = vector.load %arg9[%c10_327, %c0_328] : memref<16x128xf32, #tpu.memory_space<vmem>>, vector<6x128xf32>
    %402 = arith.truncf %401 : vector<6x128xf32> to vector<6x128xbf16>
    %c45 = arith.constant 45 : index
    %c0_329 = arith.constant 0 : index
    %c0_330 = arith.constant 0 : index
    %403 = vector.load %arg2[%c45, %c0_329, %c0_330] : memref<64x128x128xbf16, #tpu.memory_space<vmem>>, vector<1x128x128xbf16>
    %404 = vector.shape_cast %403 : vector<1x128x128xbf16> to vector<128x128xbf16>
    %cst_331 = arith.constant dense<0.000000e+00> : vector<6x128xf32>
    %405 = tpu.matmul %402, %404, %cst_331 {dimension_numbers = #tpu.dot_dimension_numbers<[1], [0], [0], [1], [0, 0, 1, 1], [], []>} : vector<6x128xbf16>, vector<128x128xbf16>, vector<6x128xf32> -> vector<6x128xf32>
    %406 = arith.addf %400, %405 : vector<6x128xf32>
    %c5_332 = arith.constant 5 : index
    %c0_333 = arith.constant 0 : index
    %c0_334 = arith.constant 0 : index
    %407 = vector.load %arg3[%c5_332, %c0_333, %c0_334] : memref<8x1x128xf32, #tpu.memory_space<vmem>>, vector<1x1x128xf32>
    %408 = vector.shape_cast %407 : vector<1x1x128xf32> to vector<1x128xf32>
    %409 = vector.broadcast %408 : vector<1x128xf32> to vector<6x128xf32>
    %410 = arith.addf %406, %409 : vector<6x128xf32>
    %cst_335 = arith.constant 0.000000e+00 : f32
    %411 = vector.broadcast %cst_335 : f32 to vector<6x128xf32>
    %412 = arith.cmpf oge, %410, %411 : vector<6x128xf32>
    %cst_336 = arith.constant 0.00999999977 : f32
    %413 = vector.broadcast %cst_336 : f32 to vector<6x128xf32>
    %414 = arith.mulf %413, %410 : vector<6x128xf32>
    %415 = arith.select %412, %410, %414 : vector<6x128xi1>, vector<6x128xf32>
    %416 = vector.extract_strided_slice %415 {offsets = [0, 0], sizes = [2, 128], strides = [1, 1]} : vector<6x128xf32> to vector<2x128xf32>
    %c5_337 = arith.constant 5 : index
    %c0_338 = arith.constant 0 : index
    %417 = vector.load %arg10[%c5_337, %c0_338] : memref<16x128xf32, #tpu.memory_space<vmem>>, vector<2x128xf32>
    tpu.vector_store %arg10[%c5_337, %c0_338], %416 {strides = array<i32>} : memref<16x128xf32, #tpu.memory_space<vmem>>, vector<2x128xf32>,
    %418 = vector.extract_strided_slice %415 {offsets = [4, 0], sizes = [2, 128], strides = [1, 1]} : vector<6x128xf32> to vector<2x128xf32>
    %c9_339 = arith.constant 9 : index
    %c0_340 = arith.constant 0 : index
    %419 = vector.load %arg10[%c9_339, %c0_340] : memref<16x128xf32, #tpu.memory_space<vmem>>, vector<2x128xf32>
    tpu.vector_store %arg10[%c9_339, %c0_340], %418 {strides = array<i32>} : memref<16x128xf32, #tpu.memory_space<vmem>>, vector<2x128xf32>,
    %cst_341 = arith.constant 0.000000e+00 : f32
    %420 = vector.broadcast %cst_341 : f32 to vector<1x128xf32>
    %c0_342 = arith.constant 0 : index
    %c0_343 = arith.constant 0 : index
    %421 = vector.load %arg10[%c0_342, %c0_343] : memref<16x128xf32, #tpu.memory_space<vmem>>, vector<1x128xf32>
    %422 = arith.truncf %421 : vector<1x128xf32> to vector<1x128xbf16>
    %c46 = arith.constant 46 : index
    %c0_344 = arith.constant 0 : index
    %c0_345 = arith.constant 0 : index
    %423 = vector.load %arg2[%c46, %c0_344, %c0_345] : memref<64x128x128xbf16, #tpu.memory_space<vmem>>, vector<1x128x128xbf16>
    %424 = vector.shape_cast %423 : vector<1x128x128xbf16> to vector<128x128xbf16>
    %cst_346 = arith.constant dense<0.000000e+00> : vector<1x128xf32>
    %425 = tpu.matmul %422, %424, %cst_346 {dimension_numbers = #tpu.dot_dimension_numbers<[1], [0], [0], [1], [0, 0, 1, 1], [], []>} : vector<1x128xbf16>, vector<128x128xbf16>, vector<1x128xf32> -> vector<1x128xf32>
    %426 = arith.addf %420, %425 : vector<1x128xf32>
    %c1_347 = arith.constant 1 : index
    %c0_348 = arith.constant 0 : index
    %427 = vector.load %arg10[%c1_347, %c0_348] : memref<16x128xf32, #tpu.memory_space<vmem>>, vector<1x128xf32>
    %428 = arith.truncf %427 : vector<1x128xf32> to vector<1x128xbf16>
    %c47 = arith.constant 47 : index
    %c0_349 = arith.constant 0 : index
    %c0_350 = arith.constant 0 : index
    %429 = vector.load %arg2[%c47, %c0_349, %c0_350] : memref<64x128x128xbf16, #tpu.memory_space<vmem>>, vector<1x128x128xbf16>
    %430 = vector.shape_cast %429 : vector<1x128x128xbf16> to vector<128x128xbf16>
    %cst_351 = arith.constant dense<0.000000e+00> : vector<1x128xf32>
    %431 = tpu.matmul %428, %430, %cst_351 {dimension_numbers = #tpu.dot_dimension_numbers<[1], [0], [0], [1], [0, 0, 1, 1], [], []>} : vector<1x128xbf16>, vector<128x128xbf16>, vector<1x128xf32> -> vector<1x128xf32>
    %432 = arith.addf %426, %431 : vector<1x128xf32>
    %c2_352 = arith.constant 2 : index
    %c0_353 = arith.constant 0 : index
    %433 = vector.load %arg10[%c2_352, %c0_353] : memref<16x128xf32, #tpu.memory_space<vmem>>, vector<1x128xf32>
    %434 = arith.truncf %433 : vector<1x128xf32> to vector<1x128xbf16>
    %c48 = arith.constant 48 : index
    %c0_354 = arith.constant 0 : index
    %c0_355 = arith.constant 0 : index
    %435 = vector.load %arg2[%c48, %c0_354, %c0_355] : memref<64x128x128xbf16, #tpu.memory_space<vmem>>, vector<1x128x128xbf16>
    %436 = vector.shape_cast %435 : vector<1x128x128xbf16> to vector<128x128xbf16>
    %cst_356 = arith.constant dense<0.000000e+00> : vector<1x128xf32>
    %437 = tpu.matmul %434, %436, %cst_356 {dimension_numbers = #tpu.dot_dimension_numbers<[1], [0], [0], [1], [0, 0, 1, 1], [], []>} : vector<1x128xbf16>, vector<128x128xbf16>, vector<1x128xf32> -> vector<1x128xf32>
    %438 = arith.addf %432, %437 : vector<1x128xf32>
    %c4_357 = arith.constant 4 : index
    %c0_358 = arith.constant 0 : index
    %439 = vector.load %arg10[%c4_357, %c0_358] : memref<16x128xf32, #tpu.memory_space<vmem>>, vector<1x128xf32>
    %440 = arith.truncf %439 : vector<1x128xf32> to vector<1x128xbf16>
    %c49 = arith.constant 49 : index
    %c0_359 = arith.constant 0 : index
    %c0_360 = arith.constant 0 : index
    %441 = vector.load %arg2[%c49, %c0_359, %c0_360] : memref<64x128x128xbf16, #tpu.memory_space<vmem>>, vector<1x128x128xbf16>
    %442 = vector.shape_cast %441 : vector<1x128x128xbf16> to vector<128x128xbf16>
    %cst_361 = arith.constant dense<0.000000e+00> : vector<1x128xf32>
    %443 = tpu.matmul %440, %442, %cst_361 {dimension_numbers = #tpu.dot_dimension_numbers<[1], [0], [0], [1], [0, 0, 1, 1], [], []>} : vector<1x128xbf16>, vector<128x128xbf16>, vector<1x128xf32> -> vector<1x128xf32>
    %444 = arith.addf %438, %443 : vector<1x128xf32>
    %c5_362 = arith.constant 5 : index
    %c0_363 = arith.constant 0 : index
    %445 = vector.load %arg10[%c5_362, %c0_363] : memref<16x128xf32, #tpu.memory_space<vmem>>, vector<1x128xf32>
    %446 = arith.truncf %445 : vector<1x128xf32> to vector<1x128xbf16>
    %c50 = arith.constant 50 : index
    %c0_364 = arith.constant 0 : index
    %c0_365 = arith.constant 0 : index
    %447 = vector.load %arg2[%c50, %c0_364, %c0_365] : memref<64x128x128xbf16, #tpu.memory_space<vmem>>, vector<1x128x128xbf16>
    %448 = vector.shape_cast %447 : vector<1x128x128xbf16> to vector<128x128xbf16>
    %cst_366 = arith.constant dense<0.000000e+00> : vector<1x128xf32>
    %449 = tpu.matmul %446, %448, %cst_366 {dimension_numbers = #tpu.dot_dimension_numbers<[1], [0], [0], [1], [0, 0, 1, 1], [], []>} : vector<1x128xbf16>, vector<128x128xbf16>, vector<1x128xf32> -> vector<1x128xf32>
    %450 = arith.addf %444, %449 : vector<1x128xf32>
    %c6_367 = arith.constant 6 : index
    %c0_368 = arith.constant 0 : index
    %451 = vector.load %arg10[%c6_367, %c0_368] : memref<16x128xf32, #tpu.memory_space<vmem>>, vector<1x128xf32>
    %452 = arith.truncf %451 : vector<1x128xf32> to vector<1x128xbf16>
    %c51_369 = arith.constant 51 : index
    %c0_370 = arith.constant 0 : index
    %c0_371 = arith.constant 0 : index
    %453 = vector.load %arg2[%c51_369, %c0_370, %c0_371] : memref<64x128x128xbf16, #tpu.memory_space<vmem>>, vector<1x128x128xbf16>
    %454 = vector.shape_cast %453 : vector<1x128x128xbf16> to vector<128x128xbf16>
    %cst_372 = arith.constant dense<0.000000e+00> : vector<1x128xf32>
    %455 = tpu.matmul %452, %454, %cst_372 {dimension_numbers = #tpu.dot_dimension_numbers<[1], [0], [0], [1], [0, 0, 1, 1], [], []>} : vector<1x128xbf16>, vector<128x128xbf16>, vector<1x128xf32> -> vector<1x128xf32>
    %456 = arith.addf %450, %455 : vector<1x128xf32>
    %c8_373 = arith.constant 8 : index
    %c0_374 = arith.constant 0 : index
    %457 = vector.load %arg10[%c8_373, %c0_374] : memref<16x128xf32, #tpu.memory_space<vmem>>, vector<1x128xf32>
    %458 = arith.truncf %457 : vector<1x128xf32> to vector<1x128xbf16>
    %c52 = arith.constant 52 : index
    %c0_375 = arith.constant 0 : index
    %c0_376 = arith.constant 0 : index
    %459 = vector.load %arg2[%c52, %c0_375, %c0_376] : memref<64x128x128xbf16, #tpu.memory_space<vmem>>, vector<1x128x128xbf16>
    %460 = vector.shape_cast %459 : vector<1x128x128xbf16> to vector<128x128xbf16>
    %cst_377 = arith.constant dense<0.000000e+00> : vector<1x128xf32>
    %461 = tpu.matmul %458, %460, %cst_377 {dimension_numbers = #tpu.dot_dimension_numbers<[1], [0], [0], [1], [0, 0, 1, 1], [], []>} : vector<1x128xbf16>, vector<128x128xbf16>, vector<1x128xf32> -> vector<1x128xf32>
    %462 = arith.addf %456, %461 : vector<1x128xf32>
    %c9_378 = arith.constant 9 : index
    %c0_379 = arith.constant 0 : index
    %463 = vector.load %arg10[%c9_378, %c0_379] : memref<16x128xf32, #tpu.memory_space<vmem>>, vector<1x128xf32>
    %464 = arith.truncf %463 : vector<1x128xf32> to vector<1x128xbf16>
    %c53 = arith.constant 53 : index
    %c0_380 = arith.constant 0 : index
    %c0_381 = arith.constant 0 : index
    %465 = vector.load %arg2[%c53, %c0_380, %c0_381] : memref<64x128x128xbf16, #tpu.memory_space<vmem>>, vector<1x128x128xbf16>
    %466 = vector.shape_cast %465 : vector<1x128x128xbf16> to vector<128x128xbf16>
    %cst_382 = arith.constant dense<0.000000e+00> : vector<1x128xf32>
    %467 = tpu.matmul %464, %466, %cst_382 {dimension_numbers = #tpu.dot_dimension_numbers<[1], [0], [0], [1], [0, 0, 1, 1], [], []>} : vector<1x128xbf16>, vector<128x128xbf16>, vector<1x128xf32> -> vector<1x128xf32>
    %468 = arith.addf %462, %467 : vector<1x128xf32>
    %c10_383 = arith.constant 10 : index
    %c0_384 = arith.constant 0 : index
    %469 = vector.load %arg10[%c10_383, %c0_384] : memref<16x128xf32, #tpu.memory_space<vmem>>, vector<1x128xf32>
    %470 = arith.truncf %469 : vector<1x128xf32> to vector<1x128xbf16>
    %c54 = arith.constant 54 : index
    %c0_385 = arith.constant 0 : index
    %c0_386 = arith.constant 0 : index
    %471 = vector.load %arg2[%c54, %c0_385, %c0_386] : memref<64x128x128xbf16, #tpu.memory_space<vmem>>, vector<1x128x128xbf16>
    %472 = vector.shape_cast %471 : vector<1x128x128xbf16> to vector<128x128xbf16>
    %cst_387 = arith.constant dense<0.000000e+00> : vector<1x128xf32>
    %473 = tpu.matmul %470, %472, %cst_387 {dimension_numbers = #tpu.dot_dimension_numbers<[1], [0], [0], [1], [0, 0, 1, 1], [], []>} : vector<1x128xbf16>, vector<128x128xbf16>, vector<1x128xf32> -> vector<1x128xf32>
    %474 = arith.addf %468, %473 : vector<1x128xf32>
    %c6_388 = arith.constant 6 : index
    %c0_389 = arith.constant 0 : index
    %c0_390 = arith.constant 0 : index
    %475 = vector.load %arg3[%c6_388, %c0_389, %c0_390] : memref<8x1x128xf32, #tpu.memory_space<vmem>>, vector<1x1x128xf32>
    %476 = vector.shape_cast %475 : vector<1x1x128xf32> to vector<1x128xf32>
    %477 = arith.addf %474, %476 : vector<1x128xf32>
    %cst_391 = arith.constant 0.000000e+00 : f32
    %478 = vector.broadcast %cst_391 : f32 to vector<1x128xf32>
    %479 = arith.cmpf oge, %477, %478 : vector<1x128xf32>
    %cst_392 = arith.constant 0.00999999977 : f32
    %480 = vector.broadcast %cst_392 : f32 to vector<1x128xf32>
    %481 = arith.mulf %480, %477 : vector<1x128xf32>
    %482 = arith.select %479, %477, %481 : vector<1x128xi1>, vector<1x128xf32>
    %c4_393 = arith.constant 4 : index
    %c0_394 = arith.constant 0 : index
    %483 = vector.load %arg11[%c4_393, %c0_394] : memref<9x128xf32, #tpu.memory_space<vmem>>, vector<1x128xf32>
    tpu.vector_store %arg11[%c4_393, %c0_394], %482 {strides = array<i32>} : memref<9x128xf32, #tpu.memory_space<vmem>>, vector<1x128xf32>,
    %cst_395 = arith.constant 0.000000e+00 : f32
    %484 = vector.broadcast %cst_395 : f32 to vector<1x128xf32>
    %c0_396 = arith.constant 0 : index
    %c0_397 = arith.constant 0 : index
    %485 = vector.load %arg11[%c0_396, %c0_397] : memref<9x128xf32, #tpu.memory_space<vmem>>, vector<1x128xf32>
    %486 = arith.truncf %485 : vector<1x128xf32> to vector<1x128xbf16>
    %c55 = arith.constant 55 : index
    %c0_398 = arith.constant 0 : index
    %c0_399 = arith.constant 0 : index
    %487 = vector.load %arg2[%c55, %c0_398, %c0_399] : memref<64x128x128xbf16, #tpu.memory_space<vmem>>, vector<1x128x128xbf16>
    %488 = vector.shape_cast %487 : vector<1x128x128xbf16> to vector<128x128xbf16>
    %cst_400 = arith.constant dense<0.000000e+00> : vector<1x128xf32>
    %489 = tpu.matmul %486, %488, %cst_400 {dimension_numbers = #tpu.dot_dimension_numbers<[1], [0], [0], [1], [0, 0, 1, 1], [], []>} : vector<1x128xbf16>, vector<128x128xbf16>, vector<1x128xf32> -> vector<1x128xf32>
    %490 = arith.addf %484, %489 : vector<1x128xf32>
    %c1_401 = arith.constant 1 : index
    %c0_402 = arith.constant 0 : index
    %491 = vector.load %arg11[%c1_401, %c0_402] : memref<9x128xf32, #tpu.memory_space<vmem>>, vector<1x128xf32>
    %492 = arith.truncf %491 : vector<1x128xf32> to vector<1x128xbf16>
    %c56 = arith.constant 56 : index
    %c0_403 = arith.constant 0 : index
    %c0_404 = arith.constant 0 : index
    %493 = vector.load %arg2[%c56, %c0_403, %c0_404] : memref<64x128x128xbf16, #tpu.memory_space<vmem>>, vector<1x128x128xbf16>
    %494 = vector.shape_cast %493 : vector<1x128x128xbf16> to vector<128x128xbf16>
    %cst_405 = arith.constant dense<0.000000e+00> : vector<1x128xf32>
    %495 = tpu.matmul %492, %494, %cst_405 {dimension_numbers = #tpu.dot_dimension_numbers<[1], [0], [0], [1], [0, 0, 1, 1], [], []>} : vector<1x128xbf16>, vector<128x128xbf16>, vector<1x128xf32> -> vector<1x128xf32>
    %496 = arith.addf %490, %495 : vector<1x128xf32>
    %c2_406 = arith.constant 2 : index
    %c0_407 = arith.constant 0 : index
    %497 = vector.load %arg11[%c2_406, %c0_407] : memref<9x128xf32, #tpu.memory_space<vmem>>, vector<1x128xf32>
    %498 = arith.truncf %497 : vector<1x128xf32> to vector<1x128xbf16>
    %c57 = arith.constant 57 : index
    %c0_408 = arith.constant 0 : index
    %c0_409 = arith.constant 0 : index
    %499 = vector.load %arg2[%c57, %c0_408, %c0_409] : memref<64x128x128xbf16, #tpu.memory_space<vmem>>, vector<1x128x128xbf16>
    %500 = vector.shape_cast %499 : vector<1x128x128xbf16> to vector<128x128xbf16>
    %cst_410 = arith.constant dense<0.000000e+00> : vector<1x128xf32>
    %501 = tpu.matmul %498, %500, %cst_410 {dimension_numbers = #tpu.dot_dimension_numbers<[1], [0], [0], [1], [0, 0, 1, 1], [], []>} : vector<1x128xbf16>, vector<128x128xbf16>, vector<1x128xf32> -> vector<1x128xf32>
    %502 = arith.addf %496, %501 : vector<1x128xf32>
    %c3_411 = arith.constant 3 : index
    %c0_412 = arith.constant 0 : index
    %503 = vector.load %arg11[%c3_411, %c0_412] : memref<9x128xf32, #tpu.memory_space<vmem>>, vector<1x128xf32>
    %504 = arith.truncf %503 : vector<1x128xf32> to vector<1x128xbf16>
    %c58 = arith.constant 58 : index
    %c0_413 = arith.constant 0 : index
    %c0_414 = arith.constant 0 : index
    %505 = vector.load %arg2[%c58, %c0_413, %c0_414] : memref<64x128x128xbf16, #tpu.memory_space<vmem>>, vector<1x128x128xbf16>
    %506 = vector.shape_cast %505 : vector<1x128x128xbf16> to vector<128x128xbf16>
    %cst_415 = arith.constant dense<0.000000e+00> : vector<1x128xf32>
    %507 = tpu.matmul %504, %506, %cst_415 {dimension_numbers = #tpu.dot_dimension_numbers<[1], [0], [0], [1], [0, 0, 1, 1], [], []>} : vector<1x128xbf16>, vector<128x128xbf16>, vector<1x128xf32> -> vector<1x128xf32>
    %508 = arith.addf %502, %507 : vector<1x128xf32>
    %c4_416 = arith.constant 4 : index
    %c0_417 = arith.constant 0 : index
    %509 = vector.load %arg11[%c4_416, %c0_417] : memref<9x128xf32, #tpu.memory_space<vmem>>, vector<1x128xf32>
    %510 = arith.truncf %509 : vector<1x128xf32> to vector<1x128xbf16>
    %c59 = arith.constant 59 : index
    %c0_418 = arith.constant 0 : index
    %c0_419 = arith.constant 0 : index
    %511 = vector.load %arg2[%c59, %c0_418, %c0_419] : memref<64x128x128xbf16, #tpu.memory_space<vmem>>, vector<1x128x128xbf16>
    %512 = vector.shape_cast %511 : vector<1x128x128xbf16> to vector<128x128xbf16>
    %cst_420 = arith.constant dense<0.000000e+00> : vector<1x128xf32>
    %513 = tpu.matmul %510, %512, %cst_420 {dimension_numbers = #tpu.dot_dimension_numbers<[1], [0], [0], [1], [0, 0, 1, 1], [], []>} : vector<1x128xbf16>, vector<128x128xbf16>, vector<1x128xf32> -> vector<1x128xf32>
    %514 = arith.addf %508, %513 : vector<1x128xf32>
    %c5_421 = arith.constant 5 : index
    %c0_422 = arith.constant 0 : index
    %515 = vector.load %arg11[%c5_421, %c0_422] : memref<9x128xf32, #tpu.memory_space<vmem>>, vector<1x128xf32>
    %516 = arith.truncf %515 : vector<1x128xf32> to vector<1x128xbf16>
    %c60 = arith.constant 60 : index
    %c0_423 = arith.constant 0 : index
    %c0_424 = arith.constant 0 : index
    %517 = vector.load %arg2[%c60, %c0_423, %c0_424] : memref<64x128x128xbf16, #tpu.memory_space<vmem>>, vector<1x128x128xbf16>
    %518 = vector.shape_cast %517 : vector<1x128x128xbf16> to vector<128x128xbf16>
    %cst_425 = arith.constant dense<0.000000e+00> : vector<1x128xf32>
    %519 = tpu.matmul %516, %518, %cst_425 {dimension_numbers = #tpu.dot_dimension_numbers<[1], [0], [0], [1], [0, 0, 1, 1], [], []>} : vector<1x128xbf16>, vector<128x128xbf16>, vector<1x128xf32> -> vector<1x128xf32>
    %520 = arith.addf %514, %519 : vector<1x128xf32>
    %c6_426 = arith.constant 6 : index
    %c0_427 = arith.constant 0 : index
    %521 = vector.load %arg11[%c6_426, %c0_427] : memref<9x128xf32, #tpu.memory_space<vmem>>, vector<1x128xf32>
    %522 = arith.truncf %521 : vector<1x128xf32> to vector<1x128xbf16>
    %c61_428 = arith.constant 61 : index
    %c0_429 = arith.constant 0 : index
    %c0_430 = arith.constant 0 : index
    %523 = vector.load %arg2[%c61_428, %c0_429, %c0_430] : memref<64x128x128xbf16, #tpu.memory_space<vmem>>, vector<1x128x128xbf16>
    %524 = vector.shape_cast %523 : vector<1x128x128xbf16> to vector<128x128xbf16>
    %cst_431 = arith.constant dense<0.000000e+00> : vector<1x128xf32>
    %525 = tpu.matmul %522, %524, %cst_431 {dimension_numbers = #tpu.dot_dimension_numbers<[1], [0], [0], [1], [0, 0, 1, 1], [], []>} : vector<1x128xbf16>, vector<128x128xbf16>, vector<1x128xf32> -> vector<1x128xf32>
    %526 = arith.addf %520, %525 : vector<1x128xf32>
    %c7_432 = arith.constant 7 : index
    %c0_433 = arith.constant 0 : index
    %527 = vector.load %arg11[%c7_432, %c0_433] : memref<9x128xf32, #tpu.memory_space<vmem>>, vector<1x128xf32>
    %528 = arith.truncf %527 : vector<1x128xf32> to vector<1x128xbf16>
    %c62 = arith.constant 62 : index
    %c0_434 = arith.constant 0 : index
    %c0_435 = arith.constant 0 : index
    %529 = vector.load %arg2[%c62, %c0_434, %c0_435] : memref<64x128x128xbf16, #tpu.memory_space<vmem>>, vector<1x128x128xbf16>
    %530 = vector.shape_cast %529 : vector<1x128x128xbf16> to vector<128x128xbf16>
    %cst_436 = arith.constant dense<0.000000e+00> : vector<1x128xf32>
    %531 = tpu.matmul %528, %530, %cst_436 {dimension_numbers = #tpu.dot_dimension_numbers<[1], [0], [0], [1], [0, 0, 1, 1], [], []>} : vector<1x128xbf16>, vector<128x128xbf16>, vector<1x128xf32> -> vector<1x128xf32>
    %532 = arith.addf %526, %531 : vector<1x128xf32>
    %c8_437 = arith.constant 8 : index
    %c0_438 = arith.constant 0 : index
    %533 = vector.load %arg11[%c8_437, %c0_438] : memref<9x128xf32, #tpu.memory_space<vmem>>, vector<1x128xf32>
    %534 = arith.truncf %533 : vector<1x128xf32> to vector<1x128xbf16>
    %c63 = arith.constant 63 : index
    %c0_439 = arith.constant 0 : index
    %c0_440 = arith.constant 0 : index
    %535 = vector.load %arg2[%c63, %c0_439, %c0_440] : memref<64x128x128xbf16, #tpu.memory_space<vmem>>, vector<1x128x128xbf16>
    %536 = vector.shape_cast %535 : vector<1x128x128xbf16> to vector<128x128xbf16>
    %cst_441 = arith.constant dense<0.000000e+00> : vector<1x128xf32>
    %537 = tpu.matmul %534, %536, %cst_441 {dimension_numbers = #tpu.dot_dimension_numbers<[1], [0], [0], [1], [0, 0, 1, 1], [], []>} : vector<1x128xbf16>, vector<128x128xbf16>, vector<1x128xf32> -> vector<1x128xf32>
    %538 = arith.addf %532, %537 : vector<1x128xf32>
    %c7_442 = arith.constant 7 : index
    %c0_443 = arith.constant 0 : index
    %c0_444 = arith.constant 0 : index
    %539 = vector.load %arg3[%c7_442, %c0_443, %c0_444] : memref<8x1x128xf32, #tpu.memory_space<vmem>>, vector<1x1x128xf32>
    %540 = vector.shape_cast %539 : vector<1x1x128xf32> to vector<1x128xf32>
    %541 = arith.addf %538, %540 : vector<1x128xf32>
    %c0_445 = arith.constant 0 : index
    %c0_446 = arith.constant 0 : index
    %c0_447 = arith.constant 0 : index
    %542 = vector.load %arg4[%c0_445, %c0_446, %c0_447] : memref<1x1x128xf32, #tpu.memory_space<vmem>>, vector<1x1x128xf32>
    %543 = vector.shape_cast %542 : vector<1x1x128xf32> to vector<1x128xf32>
    %544 = vector.shape_cast %541 : vector<1x128xf32> to vector<1x1x128xf32>
    tpu.vector_store %arg4[%c0_445, %c0_446, %c0_447], %544 {strides = array<i32>} : memref<1x1x128xf32, #tpu.memory_space<vmem>>, vector<1x1x128xf32>,
    return
  }
  func.func @transform_0(%arg0: i32) -> (i32, i32, i32) {
    %c0_i32 = arith.constant 0 : i32
    %c0_i32_0 = arith.constant 0 : i32
    %c0_i32_1 = arith.constant 0 : i32
    return %arg0, %c0_i32, %c0_i32_0 : i32, i32, i32
  }
  func.func @transform_1(%arg0: i32) -> (i32, i32, i32) {
    %c0_i32 = arith.constant 0 : i32
    %c0_i32_0 = arith.constant 0 : i32
    %c0_i32_1 = arith.constant 0 : i32
    %c0_i32_2 = arith.constant 0 : i32
    return %c0_i32, %c0_i32_0, %c0_i32_1 : i32, i32, i32
  }
  func.func @transform_2(%arg0: i32) -> (i32, i32, i32) {
    %c0_i32 = arith.constant 0 : i32
    %c0_i32_0 = arith.constant 0 : i32
    %c0_i32_1 = arith.constant 0 : i32
    %c0_i32_2 = arith.constant 0 : i32
    return %c0_i32, %c0_i32_0, %c0_i32_1 : i32, i32, i32
  }
  func.func @transform_3(%arg0: i32) -> (i32, i32, i32) {
    %c0_i32 = arith.constant 0 : i32
    %c0_i32_0 = arith.constant 0 : i32
    %c0_i32_1 = arith.constant 0 : i32
    return %arg0, %c0_i32, %c0_i32_0 : i32, i32, i32
  }
}

</mosaic_0001>

<bundles_post_ra>
// kernel: analysis_mv_net.1
= control target key start
LH: loop header
LB: loop body
LE: loop exit
PB: predicated region body
PF: predicated region fallthrough
CT: control target
= control target key end

     0   :  { %8 = vsyncpa [#allocation10], 0  ;;  %s15986_s0 = inlined_call_operand.vmem [shape: bf16[2,64,128], index: 0, kind: input, shape index: {}]   ;;  %s15987_s1 = inlined_call_operand.vmem [shape: bf16[64,128,128], index: 1, kind: input, shape index: {}]   ;;  %s15988_s2 = inlined_call_operand.vmem [shape: f32[8,1,128], index: 2, kind: input, shape index: {}]   ;;  %s15989_s3 = inlined_call_operand.hbm [shape: f32[2,1,128], index: 3, kind: output, shape index: {}]  }
   0x1   :  { %10 = vsyncpa [#allocation10 + $0x1], 0  ;;  %s13417_s12 = smov 0   ;;  %s13419_s13 = smov 0  }
   0x2   :  { %s13421_s14 = smov 0   ;;  %s13423_s15 = smov 0  }
   0x3 LB: > { %s13438_s16 = sadd.s32 4294967295, %s13390_s15   ;;  %s8704_s17 = sadd.s32 4294967294, %s13390_s15   ;;  %s13390_s15 = sphi %s13423_s15, %s15997_s15   ;;  %s13386_s14 = sphi %s13421_s14, %s15996_s14   ;;  %s13382_s13 = sphi %s13419_s13, %s15995_s13   ;;  %s13378_s12 = sphi %s13417_s12, %s15994_s12  }
   0x4   : > { %s13442_s18 = sadd.s32 1, %s13390_s15   ;;  %s91_s19 = sadd.s32 1, %s13386_s14 }
   0x5   : > { %s88_s20 = ssub.s32 %s13390_s15, %s13442_s18  ;;  %p101_p0 = scmp.ne.s32.totalorder %s13386_s14, %s13382_s13 }
   0x6   : > { %p89_p1 = scmp.eq.s32.totalorder %s88_s20, 0  ;;  %p102_p2 = scmp.eq.s32.totalorder %s13438_s16, 1 }
   0x7   : > { %p107_p3 = scmp.ne.s32.totalorder %s13382_s13, %s13378_s12  ;;  %p108_p4 = scmp.eq.s32.totalorder %s8704_s17, 1 }
   0x8   : > { %s13453_s21 = scalar_select %p89_p1, %s13386_s14, %s91_s19  }
   0x9   : > { %p13455_p5 = por %p102_p2, %p101_p0  ;;  %p13459_p6 = por %p108_p4, %p107_p3 }
   0xa   : > { %p8707_p7 = scmp.ge.s32.totalorder %s13390_s15, 1  ;;  %p140_p8 = scmp.lt.s32.totalorder %s13390_s15, 3 }
   0xc   : > { %p141_p9 = pnand %p8707_p7, %p140_p8 }
   0xd   : > { %v12804_v0 = vld [vmem:[%s15987_s1] sm:$0xff] (!%p141_p9)   ;;  %p163_p10 = scmp.lt.s32.totalorder (!%p141_p9), %s13438_s16, 1  ;;  %v12805_v1 = vld [vmem:[%s15987_s1 + $0x8] sm:$0xff] (!%p141_p9)   ;;  %v13392_v2 = vmov (!%p141_p9), 0.0   ;;  %v12806_v3 = vld [vmem:[%s15987_s1 + $0x10] sm:$0xff] (!%p141_p9)   ;;  %vm13393_vm0 = vmmov (!%p141_p9), 0  }
   0xe   : > { %144 = sbr.rel (%p141_p9) target bundleno = 3695 (0xe6f), region = 32  ;;  %10941 = vmatprep.subr.bf16.mxu0 (!%p141_p9), %v12804_v0  ;;  %10965 = vmatprep.subr.bf16.mxu1 (!%p141_p9), %v13392_v2  ;;  %169 = vst [vmem:[#allocation2] sm:$0xff] (!%p141_p9), %v13392_v2  ;;  %170 = vst [vmem:[#allocation2 + $0x8] sm:$0xff] (!%p141_p9), %v13392_v2  ;;  %v12807_v4 = vld [vmem:[%s15987_s1 + $0x18] sm:$0xff] (!%p141_p9)   ;;  %v12808_v6 = vld [vmem:[%s15987_s1 + $0x20] sm:$0xff] (!%p141_p9)   ;;  %s161_s24 = sand.u32 (!%p141_p9), 1, %s13382_s13  }
   0xf   : > { %171 = vst [vmem:[#allocation2 + $0x10] sm:$0xff] (!%p141_p9), %v13392_v2  ;;  %172 = vst [vmem:[#allocation2 + $0x18] sm:$0xff] (!%p141_p9), %v13392_v2  ;;  %10942 = vmatpush3.bf16.msra.mxu0 (!%p141_p9), %v12804_v0  ;;  %v12816_v7 = vld [vmem:[%s15987_s1 + $0x80] sm:$0xff] (!%p141_p9)   ;;  %v12818_v8 = vld [vmem:[%s15987_s1 + $0x88] sm:$0xff] (!%p141_p9)   ;;  %10981 = vmatprep.mubr.msk.bf16.mxu1 (!%p141_p9), %vm13393_vm0, %v13392_v2  ;;  %s10260_s26 = sshll.u32 (!%p141_p9), %s13438_s16, 4  ;;  %s162_s27 = scalar_lea.vmem (!%p141_p9), [#allocation9], %s161_s24 }
  0x10   : > { %173 = vst [vmem:[#allocation2 + $0x20] sm:$0xff] (!%p141_p9), %v13392_v2  ;;  %174 = vst [vmem:[#allocation2 + $0x28] sm:$0xff] (!%p141_p9), %v13392_v2  ;;  %10943 = vmatprep.subr.bf16.mxu0 (!%p141_p9), %v12805_v1  ;;  %10966 = vmatpush3.bf16.msra.mxu1 (!%p141_p9), %v12816_v7  ;;  %v12809_v9 = vld [vmem:[%s15987_s1 + $0x28] sm:$0xff] (!%p141_p9)   ;;  %v12820_v10 = vld [vmem:[%s15987_s1 + $0x90] sm:$0xff] (!%p141_p9)   ;;  %s8637_s5 = scalar_lea.sflag (!%p141_p9), [#allocation10], %s161_s24  ;;  %s13396_s6 = smov (!%p141_p9), [#allocation9]  }
  0x11   : > { %175 = vst [vmem:[#allocation2 + $0x30] sm:$0xff] (!%p141_p9), %v13392_v2  ;;  %176 = vst [vmem:[#allocation2 + $0x38] sm:$0xff] (!%p141_p9), %v13392_v2  ;;  %10967 = vmatprep.subr.bf16.mxu1 (!%p141_p9), %v13392_v2  ;;  %v12810_v11 = vld [vmem:[%s15987_s1 + $0x30] sm:$0xff] (!%p141_p9)   ;;  %v12822_v12 = vld [vmem:[%s15987_s1 + $0x98] sm:$0xff] (!%p141_p9)   ;;  %s13332_s8 = sshll.u32 (!%p141_p9), %s13396_s6, 4  ;;  %s13333_s8 = int_to_ptr.vmem [resolvable:$false] %s13332_s8 }
  0x12   : > { %177 = vst [vmem:[#allocation2 + $0x40] sm:$0xff] (!%p141_p9), %v13392_v2  ;;  %178 = vst [vmem:[#allocation2 + $0x48] sm:$0xff] (!%p141_p9), %v13392_v2  ;;  %v12811_v13 = vld [vmem:[%s15987_s1 + $0x38] sm:$0xff] (!%p141_p9)   ;;  %v12817_v16 = vld [vmem:[%s15987_s1 + $0x40] sm:$0xff] (!%p141_p9)   ;;  %s13334_s9 = scalar_lea.vmem (!%p141_p9), %s13333_s8, 32 }
  0x13   : > { %179 = vst [vmem:[#allocation2 + $0x50] sm:$0xff] (!%p141_p9), %v13392_v2  ;;  %180 = vst [vmem:[#allocation2 + $0x58] sm:$0xff] (!%p141_p9), %v13392_v2  ;;  %10944 = vmatpush3.bf16.msra.mxu0 (!%p141_p9), %v12805_v1  ;;  %v12819_v17 = vld [vmem:[%s15987_s1 + $0x48] sm:$0xff] (!%p141_p9)   ;;  %v12821_v19 = vld [vmem:[%s15987_s1 + $0x50] sm:$0xff] (!%p141_p9)  }
  0x14   : > { %181 = vst [vmem:[#allocation2 + $0x60] sm:$0xf] (!%p141_p9), %v13392_v2  ;;  %182 = vst [vmem:[#allocation3] sm:$0xff] (!%p141_p9), %v13392_v2  ;;  %10945 = vmatprep.subr.bf16.mxu0 (!%p141_p9), %v12806_v3  ;;  %10968 = vmatpush3.bf16.msra.mxu1 (!%p141_p9), %v12818_v8  ;;  %v12823_v20 = vld [vmem:[%s15987_s1 + $0x58] sm:$0xff] (!%p141_p9)   ;;  %v12824_v21 = vld [vmem:[%s15987_s1 + $0xa0] sm:$0xff] (!%p141_p9)  }
  0x15   : > { %s13473_s28 = scalar_select %p163_p10, %s13438_s16, 1  ;;  %183 = vst [vmem:[#allocation3 + $0x8] sm:$0xff] %v13392_v2  ;;  %184 = vst [vmem:[#allocation3 + $0x10] sm:$0xff] %v13392_v2  ;;  %10969 = vmatprep.subr.bf16.mxu1 %v13392_v2  ;;  %v12825_v22 = vld [vmem:[%s15987_s1 + $0x60] sm:$0xff]   ;;  %v12826_v23 = vld [vmem:[%s15987_s1 + $0xa8] sm:$0xff]  }
  0x16   : > { %185 = vst [vmem:[#allocation3 + $0x18] sm:$0xff] %v13392_v2  ;;  %186 = vst [vmem:[#allocation3 + $0x20] sm:$0xff] %v13392_v2  ;;  %v12827_v24 = vld [vmem:[%s15987_s1 + $0x68] sm:$0xff]   ;;  %v12828_v25 = vld [vmem:[%s15987_s1 + $0xb0] sm:$0xff]  }
  0x17   : > { %187 = vst [vmem:[#allocation3 + $0x28] sm:$0xff] %v13392_v2  ;;  %188 = vst [vmem:[#allocation3 + $0x30] sm:$0xff] %v13392_v2  ;;  %s10263_s4 = sshll.u32 %s13473_s28, 5  ;;  %10946 = vmatpush3.bf16.msra.mxu0 %v12806_v3  ;;  %v12829_v26 = vld [vmem:[%s15987_s1 + $0x70] sm:$0xff]   ;;  %v12830_v27 = vld [vmem:[%s15987_s1 + $0xb8] sm:$0xff]   ;;  %s8649_s28 = sshll.u32 %s162_s27, 4  ;;  %s15946_s28 = int_to_ptr.vmem [resolvable:$true] %s8649_s28 }
  0x18   : > { %189 = vst [vmem:[#allocation3 + $0x38] sm:$0xff] %v13392_v2  ;;  %190 = vst [vmem:[#allocation3 + $0x40] sm:$0xff] %v13392_v2  ;;  %s13523_s7 = scalar_lea.vmem %s15986_s0, %s10263_s4  ;;  %10947 = vmatprep.subr.bf16.mxu0 %v12807_v4  ;;  %10970 = vmatpush3.bf16.msra.mxu1 %v12820_v10  ;;  %v12831_v28 = vld [vmem:[%s15987_s1 + $0x78] sm:$0xff]   ;;  %v8710_v29 = vld [vmem:[%s15988_s2] ss:$0 sm:$0xff]  ;;  %s15944_s4 = scalar_lea.hbm %s15989_s3, %s10260_s26 }
  0x19   : > { %191 = vst [vmem:[#allocation3 + $0x48] sm:$0xff] %v13392_v2  ;;  %192 = vst [vmem:[#allocation3 + $0x50] sm:$0xff] %v13392_v2  ;;  %v12812_v5 = vld [vmem:[%s13523_s7] sm:$0xff]   ;;  %10971 = vmatprep.subr.bf16.mxu1 %v13392_v2  ;;  %v12813_v14 = vld [vmem:[%s13523_s7 + $0x8] sm:$0xff]   ;;  %s13328_s16 = scalar_lea.vmem %s15946_s28, 16  ;;  %p13335_p0 = scmp.lt.s32.totalorder %s15946_s28, %s13333_s8 }
  0x1a   : > { %193 = vst [vmem:[#allocation3 + $0x58] sm:$0xff] %v13392_v2  ;;  %195 = vst [vmem:[#allocation4] sm:$0xff] %v13392_v2  ;;  %10957 = vmatprep.mubr.bf16.mxu0 %v12812_v5  ;;  %v12814_v15 = vld [vmem:[%s13523_s7 + $0x10] sm:$0xff]   ;;  %v12815_v18 = vld [vmem:[%s13523_s7 + $0x18] sm:$0xff]   ;;  %p13329_p11 = scmp.ne.s32.totalorder %s15946_s28, %s13328_s16  ;;  %p13336_p1 = scmp.lt.s32.totalorder %s13334_s9, %s13328_s16 }
  0x1b   : > { %196 = vst [vmem:[#allocation4 + $0x8] sm:$0xff] %v13392_v2  ;;  %197 = vst [vmem:[#allocation4 + $0x10] sm:$0xff] %v13392_v2  ;;  %10948 = vmatpush3.bf16.msra.mxu0 %v12807_v4  ;;  %v443_v56 = vld [vmem:[#allocation2 + $0x1] sm:$0xff] }
  0x1c   : > { %198 = vst [vmem:[#allocation4 + $0x18] sm:$0xff] %v13392_v2  ;;  %199 = vst [vmem:[#allocation4 + $0x20] sm:$0xf] %v13392_v2  ;;  %10949 = vmatprep.subr.bf16.mxu0 %v12808_v6  ;;  %10972 = vmatpush3.bf16.msra.mxu1 %v12822_v12  ;;  %v13625_v1 = vld [vmem:[#allocation2] sm:$0xff]  ;;  %v12834_v7 = vld [vmem:[%s15987_s1 + $0xc8] sm:$0xff]   ;;  %p13330_p12 = pnand %p13329_p11, %p13455_p5  ;;  %p13337_p2 = por %p13336_p1, %p13335_p0 }
  0x1d   : > { %200 = vst [vmem:[#allocation5] sm:$0xff] %v13392_v2  ;;  %201 = vst [vmem:[#allocation5 + $0x8] sm:$0xff] %v13392_v2  ;;  %10973 = vmatprep.subr.bf16.mxu1 %v13392_v2  ;;  %v12832_v3 = vld [vmem:[%s15987_s1 + $0xc0] sm:$0xff]   ;;  %v12835_v8 = vld [vmem:[%s15987_s1 + $0x108] sm:$0xff]  }
  0x1e   : > { %202 = vst [vmem:[#allocation5 + $0x10] sm:$0xff] %v13392_v2  ;;  %203 = vst [vmem:[#allocation5 + $0x18] sm:$0xff] %v13392_v2  ;;  %v12833_v4 = vld [vmem:[%s15987_s1 + $0x100] sm:$0xff]   ;;  %p13331_p13 = pneg %p13330_p12 }
  0x1f   : > { %205 = vst [vmem:[#allocation6] sm:$0xff] %v13392_v2  ;;  %206 = vst [vmem:[#allocation6 + $0x8] sm:$0xff] %v13392_v2  ;;  %10950 = vmatpush3.bf16.msra.mxu0 %v12808_v6 }
  0x20   : > { %207 = vst [vmem:[#allocation7] sm:$0xff] %v13392_v2  ;;  %208 = vst [vmem:[#allocation7 + $0x8] sm:$0xff] %v13392_v2  ;;  %10951 = vmatprep.subr.bf16.mxu0 %v12809_v9  ;;  %10974 = vmatpush3.bf16.msra.mxu1 %v12824_v21  ;;  %p13338_p3 = pnand %p13337_p2, %p13331_p13 }
  0x21   : > { %209 = vst [vmem:[#allocation8] sm:$0xff] %v13392_v2  ;;  %210 = vst [vmem:[#allocation8 + $0x8] sm:$0x1] %v13392_v2  ;;  %10975 = vmatprep.subr.bf16.mxu1 %v13392_v2 }
  0x23   : > { %10952 = vmatpush3.bf16.msra.mxu0 %v12809_v9 }
  0x24   : > { %10953 = vmatprep.subr.bf16.mxu0 %v12810_v11  ;;  %10976 = vmatpush3.bf16.msra.mxu1 %v12826_v23  ;;  %v12840_v23 = vld [vmem:[%s15987_s1 + $0xe0] sm:$0xff]  }
  0x25   : > { %10977 = vmatprep.subr.bf16.mxu1 %v13392_v2 }
  0x27   : > { %10954 = vmatpush3.bf16.msra.mxu0 %v12810_v11 }
  0x28   : > { %10955 = vmatprep.subr.bf16.mxu0 %v12811_v13  ;;  %10978 = vmatpush3.bf16.msra.mxu1 %v12828_v25  ;;  %v12842_v25 = vld [vmem:[%s15987_s1 + $0xe8] sm:$0xff]  }
  0x29   : > { %10979 = vmatprep.subr.bf16.mxu1 %v13392_v2 }
  0x2b   : > { %10956 = vmatpush3.bf16.msra.mxu0 %v12811_v13 }
  0x2c   : > { %11001 = vmatprep.subr.bf16.mxu0 %v13392_v2  ;;  %10980 = vmatpush3.bf16.msra.mxu1 %v12830_v27 }
  0x2d   : > { %11037 = vmatprep.subr.bf16.mxu1 %v13392_v2 }
  0x2e   : > { %10958 = vmatmul.mubr.bf16.vlgmr.msra.gmra.mrb[0].mxu0 %v12813_v14  ;;  %v12836_v14 = vld [vmem:[%s15987_s1 + $0xd0] sm:$0xff]  }
  0x2f   : > { %10961 = vmatprep.mubr.bf16.mxu0 %v12814_v15  ;;  %11002 = vmatpush3.bf16.msra.mxu0 %v12817_v16  ;;  %v12837_v15 = vld [vmem:[%s15987_s1 + $0x110] sm:$0xff]   ;;  %v12838_v16 = vld [vmem:[%s15987_s1 + $0xd8] sm:$0xff]  }
  0x30   : > { %11003 = vmatprep.subr.bf16.mxu0 %v13392_v2 }
  0x33   : > { %11004 = vmatpush3.bf16.msra.mxu0 %v12819_v17  ;;  %v12839_v17 = vld [vmem:[%s15987_s1 + $0x118] sm:$0xff]  }
  0x34   : > { %11005 = vmatprep.subr.bf16.mxu0 %v13392_v2 }
  0x36   : > { %10962 = vmatmul.mubr.bf16.gmra.mrb[4].mxu0 %v12815_v18 }
  0x37   : > { %11006 = vmatpush3.bf16.msra.mxu0 %v12821_v19  ;;  %11017 = vmatprep.mubr.msk.bf16.mxu0 %vm13393_vm0, %v13392_v2 }
  0x38   : > { %11007 = vmatprep.subr.bf16.mxu0 %v13392_v2 }
  0x3b   : > { %11008 = vmatpush3.bf16.msra.mxu0 %v12823_v20 }
  0x3c   : > { %11009 = vmatprep.subr.bf16.mxu0 %v13392_v2 }
  0x3f   : > { %11010 = vmatpush3.bf16.msra.mxu0 %v12825_v22 }
  0x40   : > { %11011 = vmatprep.subr.bf16.mxu0 %v13392_v2 }
  0x43   : > { %11012 = vmatpush3.bf16.msra.mxu0 %v12827_v24  ;;  %v12841_v24 = vld [vmem:[%s15987_s1 + $0x120] sm:$0xff]  }
  0x44   : > { %11013 = vmatprep.subr.bf16.mxu0 %v13392_v2 }
  0x47   : > { %11014 = vmatpush3.bf16.msra.mxu0 %v12829_v26  ;;  %v12843_v26 = vld [vmem:[%s15987_s1 + $0x128] sm:$0xff]  }
  0x48   : > { %11015 = vmatprep.subr.bf16.mxu0 %v13392_v2 }
  0x4b   : > { %11016 = vmatpush3.bf16.msra.mxu0 %v12831_v28 }
  0x4c   : > { %11073 = vmatprep.subr.bf16.mxu0 %v13392_v2 }
 0x101   : > { %v10959_v30 = vpop.f32.mrb[0].mxu0 }
 0x102   : > { %v357_v31 = vadd.f32 %v10959_v30, %v8710_v29  ;;  %v348_v32 = vpop.f32.mrb[1].mxu0 }
 0x103   : > { %v349_v33 = vadd.f32 %v8710_v29, %v348_v32  ;;  %v10960_v34 = vpop.f32.mrb[2].mxu0  ;;  %v12845_v32 = vld [vmem:[%s15987_s1 + $0x130] sm:$0xff]  }
 0x104   : > { %vm381_vm1 = vcmp.ge.f32.partialorder %v357_v31, 0.0  ;;  %v389_v35 = vmul.f32 0.01, %v357_v31  ;;  %v360_v36 = vadd.f32 %v10960_v34, %v8710_v29  ;;  %v351_v37 = vpop.f32.mrb[3].mxu0 }
 0x105   : > { %vm379_vm2 = vcmp.ge.f32.partialorder %v349_v33, 0.0  ;;  %v387_v38 = vmul.f32 0.01, %v349_v33  ;;  %v352_v39 = vadd.f32 %v8710_v29, %v351_v37 }
 0x106   : > { %v397_v40 = vsel %vm381_vm1, %v357_v31, %v389_v35  ;;  %vm382_vm3 = vcmp.ge.f32.partialorder %v360_v36, 0.0  ;;  %v390_v41 = vmul.f32 0.01, %v360_v36  ;;  %v12844_v31 = vld [vmem:[%s15987_s1 + $0xf0] sm:$0xff]   ;;  %v12846_v35 = vld [vmem:[%s15987_s1 + $0xf8] sm:$0xff]  }
 0x107   : > { %405 = vst [vmem:[#allocation2 + $0x1f] sm:$0xff] %v397_v40  ;;  %v13616_v42 = vsel %vm379_vm2, %v349_v33, %v387_v38  ;;  %vm380_vm4 = vcmp.ge.f32.partialorder %v352_v39, 0.0  ;;  %v388_v43 = vmul.f32 0.01, %v352_v39 }
 0x108   : > { %403 = vst [vmem:[#allocation2 + $0xb] sm:$0xff] %v13616_v42  ;;  %v13619_v44 = vsel %vm382_vm3, %v360_v36, %v390_v41  ;;  %v12847_v36 = vld [vmem:[%s15987_s1 + $0x138] sm:$0xff]  }
 0x109   : > { %406 = vst [vmem:[#allocation2 + $0x29] sm:$0xff] %v13619_v44  ;;  %v396_v45 = vsel %vm380_vm4, %v352_v39, %v388_v43  ;;  %v10963_v46 = vpop.f32.mrb[4].mxu0 }
 0x10a   : > { %404 = vst [vmem:[#allocation2 + $0x15] sm:$0xff] %v396_v45  ;;  %v373_v47 = vadd.f32 %v10963_v46, %v8710_v29  ;;  %v364_v48 = vpop.f32.mrb[5].mxu0 }
 0x10b   : > { %v365_v49 = vadd.f32 %v8710_v29, %v364_v48  ;;  %v10964_v50 = vpop.f32.mrb[6].mxu0  ;;  %v12849_v48 = vld [vmem:[%s15987_s1 + $0x180] sm:$0xff]  }
 0x10c   : > { %vm385_vm5 = vcmp.ge.f32.partialorder %v373_v47, 0.0  ;;  %v393_v51 = vmul.f32 0.01, %v373_v47  ;;  %v376_v52 = vadd.f32 %v10964_v50, %v8710_v29  ;;  %v367_v53 = vpop.f32.mrb[7].mxu0 }
 0x10d   : > { %vm383_vm6 = vcmp.ge.f32.partialorder %v365_v49, 0.0  ;;  %v391_v54 = vmul.f32 0.01, %v365_v49  ;;  %v368_v55 = vadd.f32 %v8710_v29, %v367_v53 }
 0x10e   : > { %v401_v57 = vsel %vm385_vm5, %v373_v47, %v393_v51  ;;  %vm386_vm7 = vcmp.ge.f32.partialorder %v376_v52, 0.0  ;;  %v394_v58 = vmul.f32 0.01, %v376_v52  ;;  %v447_v18 = vld [vmem:[#allocation2 + $0x21] sm:$0xff]  ;;  %vm3394_vm5 = vcmask 1042432  }
 0x10f   : > { %409 = vst [vmem:[#allocation2 + $0x47] sm:$0xff] %v401_v57  ;;  %v13622_v59 = vsel %vm383_vm6, %v365_v49, %v391_v54  ;;  %vm384_vm8 = vcmp.ge.f32.partialorder %v368_v55, 0.0  ;;  %v392_v60 = vmul.f32 0.01, %v368_v55  ;;  %v444_v61 = vld [vmem:[#allocation2 + $0x9] sm:$0xff]  ;;  %v415_v20 = vld [vmem:[#allocation2 + $0x20] sm:$0xff]  ;;  %v455_v21 = vpack.c.bf16 %v13619_v44, %v447_v18 }
 0x110   : > { %v412_v62 = vld [vmem:[#allocation2 + $0x8] sm:$0xff]  ;;  %407 = vst [vmem:[#allocation2 + $0x33] sm:$0xff] %v13622_v59  ;;  %v402_v63 = vsel %vm386_vm7, %v376_v52, %v394_v58  ;;  %v453_v0 = vpack.c.bf16 %v444_v61, %v443_v56  ;;  %v12848_v47 = vld [vmem:[%s15987_s1 + $0x140] sm:$0xff]   ;;  %v12853_v56 = vld [vmem:[%s15987_s1 + $0x190] sm:$0xff]   ;;  %vm3378_vm6 = vcmask 547840  }
 0x111   : > { %v421_v2 = vpack.c.bf16 %v412_v62, %v13625_v1  ;;  %410 = vst [vmem:[#allocation2 + $0x51] sm:$0xff] %v402_v63  ;;  %v400_v5 = vsel %vm384_vm8, %v368_v55, %v392_v60  ;;  %v445_v6 = vld [vmem:[#allocation2 + $0x11] sm:$0xff]  ;;  %v446_v9 = vld [vmem:[#allocation2 + $0x19] sm:$0xff]  ;;  %v416_v19 = vld [vmem:[#allocation2 + $0x28] sm:$0xff] }
 0x112   : > { %408 = vst [vmem:[#allocation2 + $0x3d] sm:$0xff] %v400_v5  ;;  %10982 = vmatmul.mubr.bf16.vlgmr.msra.gmra.mrb[0].mxu1 %v453_v0  ;;  %v413_v10 = vld [vmem:[#allocation2 + $0x10] sm:$0xff]  ;;  %v414_v11 = vld [vmem:[#allocation2 + $0x18] sm:$0xff]  ;;  %v454_v12 = vpack.c.bf16 %v446_v9, %v445_v6  ;;  %v423_v22 = vpack.c.bf16 %v416_v19, %v415_v20  ;;  %v717_v44 = vld [vmem:[#allocation2 + $0x2] sm:$0xff] }
 0x113   : > { %11018 = vmatmul.mubr.bf16.vlgmr.msra.gmra.mrb[8].mxu0 %v421_v2  ;;  %10985 = vmatprep.mubr.msk.bf16.mxu1 %vm13393_vm0, %v13625_v1  ;;  %v422_v13 = vpack.c.bf16 %v414_v11, %v413_v10  ;;  %v718_v45 = vld [vmem:[#allocation2 + $0xa] sm:$0xff]  ;;  %v881_v46 = vld [vmem:[#allocation2 + $0x12] sm:$0xff]  ;;  %v720_v53 = vld [vmem:[#allocation2 + $0x1a] sm:$0xff] }
 0x114   : > { %11021 = vmatprep.mubr.msk.bf16.mxu0 %vm13393_vm0, %v13625_v1  ;;  %11038 = vmatpush3.bf16.msra.mxu1 %v12832_v3  ;;  %v727_v49 = vpack.c.bf16 %v718_v45, %v717_v44  ;;  %v890_v50 = vpack.c.bf16 %v881_v46, %v718_v45  ;;  %v12850_v51 = vld [vmem:[%s15987_s1 + $0x148] sm:$0xff]   ;;  %v12852_v55 = vld [vmem:[%s15987_s1 + $0x150] sm:$0xff]   ;;  %v728_v57 = vpack.c.bf16 %v720_v53, %v881_v46  ;;  %v12854_v60 = vld [vmem:[%s15987_s1 + $0x158] sm:$0xff]  }
 0x115   : > { %11074 = vmatpush3.bf16.msra.mxu0 %v12833_v4  ;;  %11039 = vmatprep.subr.bf16.mxu1 %v13625_v1  ;;  %v12851_v52 = vld [vmem:[%s15987_s1 + $0x188] sm:$0xff]   ;;  %v12855_v61 = vld [vmem:[%s15987_s1 + $0x198] sm:$0xff]   ;;  %v12856_v0 = vld [vmem:[%s15987_s1 + $0x160] sm:$0xff]  }
 0x116   : > { %11075 = vmatprep.subr.bf16.mxu0 %v13625_v1  ;;  %v452_v38 = vld [vmem:[#allocation2 + $0x49] sm:$0x3f]  ;;  %v12857_v2 = vld [vmem:[%s15987_s1 + $0x1a0] sm:$0xff]   ;;  %v12860_v9 = vld [vmem:[%s15987_s1 + $0x170] sm:$0xff]  }
 0x117   : > { %v449_v27 = vld [vmem:[#allocation2 + $0x31] sm:$0xff]  ;;  %v420_v40 = vld [vmem:[#allocation2 + $0x48] sm:$0x3f] }
 0x118   : > { %11040 = vmatpush3.bf16.msra.mxu1 %v12834_v7  ;;  %v417_v30 = vld [vmem:[#allocation2 + $0x30] sm:$0xff]  ;;  %v883_v54 = vld [vmem:[#allocation2 + $0x22] sm:$0xff] }
 0x119   : > { %11076 = vmatpush3.bf16.msra.mxu0 %v12835_v8  ;;  %11041 = vmatprep.subr.bf16.mxu1 %v13625_v1  ;;  %v450_v28 = vld [vmem:[#allocation2 + $0x39] sm:$0xff]  ;;  %v451_v37 = vld [vmem:[#allocation2 + $0x41] sm:$0xff]  ;;  %v891_v58 = vpack.c.bf16 %v883_v54, %v720_v53  ;;  %v722_v62 = vld [vmem:[#allocation2 + $0x2a] sm:$0xff] }
 0x11a   : > { %11077 = vmatprep.subr.bf16.mxu0 %v13625_v1  ;;  %10986 = vmatmul.mubr.bf16.gmra.mrb[4].mxu1 %v454_v12  ;;  %v418_v29 = vld [vmem:[#allocation2 + $0x38] sm:$0xff]  ;;  %v456_v33 = vpack.c.bf16 %v450_v28, %v449_v27  ;;  %v419_v39 = vld [vmem:[#allocation2 + $0x40] sm:$0xff]  ;;  %v457_v41 = vpack.c.bf16 %v452_v38, %v451_v37  ;;  %v729_v3 = vpack.c.bf16 %v722_v62, %v883_v54  ;;  %v12858_v5 = vld [vmem:[%s15987_s1 + $0x168] sm:$0xff]  }
 0x11b   : > { %11022 = vmatmul.mubr.bf16.gmra.mrb[12].mxu0 %v422_v13  ;;  %10989 = vmatprep.mubr.msk.bf16.mxu1 %vm13393_vm0, %v13625_v1  ;;  %v424_v34 = vpack.c.bf16 %v418_v29, %v417_v30  ;;  %v425_v43 = vpack.c.bf16 %v420_v40, %v419_v39  ;;  %v885_v63 = vld [vmem:[#allocation2 + $0x32] sm:$0xff]  ;;  %v12859_v6 = vld [vmem:[%s15987_s1 + $0x1a8] sm:$0xff]   ;;  %v724_v7 = vld [vmem:[#allocation2 + $0x3a] sm:$0xff] }
 0x11c   : > { %11025 = vmatprep.mubr.msk.bf16.mxu0 %vm13393_vm0, %v13625_v1  ;;  %11042 = vmatpush3.bf16.msra.mxu1 %v12836_v14  ;;  %v892_v4 = vpack.c.bf16 %v885_v63, %v722_v62  ;;  %v887_v8 = vld [vmem:[#allocation2 + $0x42] sm:$0xff]  ;;  %v12861_v10 = vld [vmem:[%s15987_s1 + $0x1b0] sm:$0xff]   ;;  %v730_v11 = vpack.c.bf16 %v724_v7, %v885_v63  ;;  %v12862_v13 = vld [vmem:[%s15987_s1 + $0x178] sm:$0xff]  }
 0x11d   : > { %11078 = vmatpush3.bf16.msra.mxu0 %v12837_v15  ;;  %11043 = vmatprep.subr.bf16.mxu1 %v13625_v1  ;;  %v893_v12 = vpack.c.bf16 %v887_v8, %v724_v7  ;;  %v12863_v14 = vld [vmem:[%s15987_s1 + $0x1b8] sm:$0xff]   ;;  %v726_v15 = vld [vmem:[#allocation2 + $0x4a] sm:$0x3f] }
 0x11e   : > { %11079 = vmatprep.subr.bf16.mxu0 %v13625_v1  ;;  %v731_v18 = vpack.c.bf16 %v726_v15, %v887_v8  ;;  %v1044_v20 = vld [vmem:[#allocation2 + $0x13] sm:$0xff]  ;;  %v12866_v27 = vld [vmem:[%s15987_s1 + $0x1c8] sm:$0xff]   ;;  %v1045_v29 = vld [vmem:[#allocation2 + $0x1b] sm:$0xff] }
 0x11f   : > { %v12867_v28 = vld [vmem:[%s15987_s1 + $0x208] sm:$0xff]   ;;  %v13817_v30 = vld [vmem:[#allocation2 + $0x1c] sm:$0xff]  ;;  %v13845_v40 = vld [vmem:[#allocation2 + $0x34] sm:$0xff] }
 0x120   : > { %11044 = vmatpush3.bf16.msra.mxu1 %v12838_v16  ;;  %v888_v16 = vld [vmem:[#allocation2 + $0x4a] sm:$0xff]  ;;  %v12871_v37 = vld [vmem:[%s15987_s1 + $0x218] sm:$0xff]  }
 0x121   : > { %11080 = vmatpush3.bf16.msra.mxu0 %v12839_v17  ;;  %11045 = vmatprep.subr.bf16.mxu1 %v13625_v1  ;;  %v889_v17 = vld [vmem:[#allocation2 + $0x52] sm:$0x3f]  ;;  %v12874_v46 = vld [vmem:[%s15987_s1 + $0x1e8] sm:$0xff]  }
 0x122   : > { %11081 = vmatprep.subr.bf16.mxu0 %v13625_v1  ;;  %10990 = vmatmul.mubr.bf16.gmra.mrb[8].mxu1 %v455_v21  ;;  %v894_v19 = vpack.c.bf16 %v889_v17, %v888_v16  ;;  %v13797_v21 = vld [vmem:[#allocation2 + $0x14] sm:$0xff]  ;;  %v1047_v38 = vld [vmem:[#allocation2 + $0x2b] sm:$0xff]  ;;  %v13323_v16 = vld [vmem:[#allocation2 + $0x3d] sm:$0xff] }
 0x123   : > { %11026 = vmatmul.mubr.bf16.gmra.mrb[16].mxu0 %v423_v22  ;;  %10993 = vmatprep.mubr.msk.bf16.mxu1 %vm13393_vm0, %v13625_v1  ;;  %v1206_v22 = vld [vmem:[#allocation2 + $0xc] sm:$0xff]  ;;  %v1055_v44 = vpack.c.bf16 %v13622_v59, %v1047_v38  ;;  %v1049_v59 = vld [vmem:[#allocation2 + $0x3b] sm:$0xff] }
 0x124   : > { %11029 = vmatprep.mubr.msk.bf16.mxu0 %vm13393_vm0, %v13625_v1  ;;  %11046 = vmatpush3.bf16.msra.mxu1 %v12840_v23  ;;  %v12864_v23 = vld [vmem:[%s15987_s1 + $0x1c0] sm:$0xff]   ;;  %v13843_v39 = vld [vmem:[#allocation2 + $0x2c] sm:$0xff] }
 0x125   : > { %11082 = vmatpush3.bf16.msra.mxu0 %v12841_v24  ;;  %11047 = vmatprep.subr.bf16.mxu1 %v13625_v1  ;;  %v12865_v24 = vld [vmem:[%s15987_s1 + $0x200] sm:$0xff]   ;;  %v1218_v45 = vpack.c.bf16 %v13845_v40, %v13843_v39  ;;  %v1535_v7 = vld [vmem:[#allocation2 + $0x2d] sm:$0xff] }
 0x126   : > { %11083 = vmatprep.subr.bf16.mxu0 %v13625_v1  ;;  %v1534_v8 = vld [vmem:[#allocation2 + $0x25] sm:$0xff] }
 0x128   : > { %11048 = vmatpush3.bf16.msra.mxu1 %v12842_v25  ;;  %v1053_v25 = vpack.c.bf16 %v1044_v20, %v13616_v42  ;;  %v1046_v42 = vld [vmem:[#allocation2 + $0x23] sm:$0xff]  ;;  %v1539_v20 = vld [vmem:[#allocation2 + $0x4d] sm:$0xff] }
 0x129   : > { %11084 = vmatpush3.bf16.msra.mxu0 %v12843_v26  ;;  %11049 = vmatprep.subr.bf16.mxu1 %v13625_v1  ;;  %v1216_v26 = vpack.c.bf16 %v13797_v21, %v1206_v22 }
 0x12a   : > { %11085 = vmatprep.subr.bf16.mxu0 %v13625_v1  ;;  %10994 = vmatmul.mubr.bf16.gmra.mrb[12].mxu1 %v456_v33  ;;  %v12869_v33 = vld [vmem:[%s15987_s1 + $0x210] sm:$0xff]  }
 0x12b   : > { %11030 = vmatmul.mubr.bf16.gmra.mrb[20].mxu0 %v424_v34  ;;  %10997 = vmatprep.mubr.msk.bf16.mxu1 %vm13393_vm0, %v13625_v1  ;;  %v1054_v34 = vpack.c.bf16 %v1046_v42, %v1045_v29 }
 0x12c   : > { %11033 = vmatprep.mubr.msk.bf16.mxu0 %vm13393_vm0, %v13625_v1  ;;  %11050 = vmatpush3.bf16.msra.mxu1 %v12844_v31  ;;  %v13819_v31 = vld [vmem:[#allocation2 + $0x24] sm:$0xff] }
 0x12d   : > { %11086 = vmatpush3.bf16.msra.mxu0 %v12845_v32  ;;  %11051 = vmatprep.subr.bf16.mxu1 %v13625_v1  ;;  %v12868_v32 = vld [vmem:[%s15987_s1 + $0x1d0] sm:$0xff]  }
 0x12e   : > { %11087 = vmatprep.subr.bf16.mxu0 %v13625_v1 }
 0x130   : > { %11052 = vmatpush3.bf16.msra.mxu1 %v12846_v35  ;;  %v1217_v35 = vpack.c.bf16 %v13819_v31, %v13817_v30 }
 0x131   : > { %11088 = vmatpush3.bf16.msra.mxu0 %v12847_v36  ;;  %11109 = vmatprep.subr.bf16.mxu1 %v13625_v1  ;;  %v12870_v36 = vld [vmem:[%s15987_s1 + $0x1d8] sm:$0xff]  }
 0x132   : > { %11145 = vmatprep.subr.bf16.mxu0 %v13625_v1  ;;  %10998 = vmatmul.mubr.bf16.gmra.mrb[16].mxu1 %v457_v41  ;;  %v12872_v41 = vld [vmem:[%s15987_s1 + $0x1e0] sm:$0xff]  }
 0x133   : > { %11034 = vmatmul.mubr.bf16.gmra.mrb[24].mxu0 %v425_v43  ;;  %11053 = vmatprep.mubr.msk.bf16.mxu1 %vm13393_vm0, %v13625_v1  ;;  %v12873_v43 = vld [vmem:[%s15987_s1 + $0x220] sm:$0xff]  }
 0x134   : > { %11089 = vmatprep.mubr.msk.bf16.mxu0 %vm13393_vm0, %v13625_v1 }
 0x13a   : > { %11054 = vmatmul.mubr.bf16.vlgmr.msra.gmra.mrb[20].mxu1 %v727_v49  ;;  %v13870_v49 = vld [vmem:[#allocation2 + $0x3c] sm:$0xff] }
 0x13b   : > { %11090 = vmatmul.mubr.bf16.vlgmr.msra.gmra.mrb[28].mxu0 %v890_v50  ;;  %11057 = vmatprep.mubr.msk.bf16.mxu1 %vm13393_vm0, %v13625_v1  ;;  %v13872_v50 = vld [vmem:[#allocation2 + $0x44] sm:$0xff]  ;;  %v1381_v15 = vpack.c.bf16 %v13870_v49, %v13845_v40  ;;  %v1702_v40 = vld [vmem:[#allocation2 + $0x4e] sm:$0xff] }
 0x13c   : > { %11093 = vmatprep.mubr.msk.bf16.mxu0 %vm13393_vm0, %v13625_v1  ;;  %11110 = vmatpush3.bf16.msra.mxu1 %v12848_v47  ;;  %v12875_v47 = vld [vmem:[%s15987_s1 + $0x228] sm:$0xff]   ;;  %v1219_v54 = vpack.c.bf16 %v13872_v50, %v13870_v49 }
 0x13d   : > { %11146 = vmatpush3.bf16.msra.mxu0 %v12849_v48  ;;  %11111 = vmatprep.subr.bf16.mxu1 %v13625_v1  ;;  %v1050_v48 = vld [vmem:[#allocation2 + $0x43] sm:$0xff] }
 0x13e   : > { %11147 = vmatprep.subr.bf16.mxu0 %v13625_v1  ;;  %v1056_v53 = vpack.c.bf16 %v1050_v48, %v1049_v59 }
 0x140   : > { %11112 = vmatpush3.bf16.msra.mxu1 %v12850_v51  ;;  %v12876_v51 = vld [vmem:[%s15987_s1 + $0x1f0] sm:$0xff]  }
 0x141   : > { %11148 = vmatpush3.bf16.msra.mxu0 %v12851_v52  ;;  %11113 = vmatprep.subr.bf16.mxu1 %v13625_v1  ;;  %v12877_v52 = vld [vmem:[%s15987_s1 + $0x230] sm:$0xff]  }
 0x142   : > { %11149 = vmatprep.subr.bf16.mxu0 %v13625_v1  ;;  %11058 = vmatmul.mubr.bf16.gmra.mrb[24].mxu1 %v728_v57  ;;  %v13892_v57 = vld [vmem:[#allocation2] sm:$0xff] }
 0x143   : > { %11094 = vmatmul.mubr.bf16.gmra.mrb[32].mxu0 %v891_v58  ;;  %11061 = vmatprep.mubr.msk.bf16.mxu1 %vm13393_vm0, %v13625_v1  ;;  %v1051_v58 = vld [vmem:[#allocation2 + $0x4b] sm:$0xff] }
 0x144   : > { %11097 = vmatprep.mubr.msk.bf16.mxu0 %vm13393_vm0, %v13625_v1  ;;  %11114 = vmatpush3.bf16.msra.mxu1 %v12852_v55  ;;  %v12878_v55 = vld [vmem:[%s15987_s1 + $0x1f8] sm:$0xff]  }
 0x145   : > { %11150 = vmatpush3.bf16.msra.mxu0 %v12853_v56  ;;  %11115 = vmatprep.subr.bf16.mxu1 %v13625_v1  ;;  %v12879_v56 = vld [vmem:[%s15987_s1 + $0x238] sm:$0xff]  }
 0x146   : > { %11151 = vmatprep.subr.bf16.mxu0 %v13625_v1 }
 0x148   : > { %11116 = vmatpush3.bf16.msra.mxu1 %v12854_v60  ;;  %v13898_v60 = vld [vmem:[#allocation2 + $0x4c] sm:$0xff] }
 0x149   : > { %11152 = vmatpush3.bf16.msra.mxu0 %v12855_v61  ;;  %11117 = vmatprep.subr.bf16.mxu1 %v13625_v1  ;;  %v1215_v61 = vld [vmem:[#allocation2 + $0x54] sm:$0x3f] }
 0x14a   : > { %11153 = vmatprep.subr.bf16.mxu0 %v13625_v1  ;;  %11062 = vmatmul.mubr.bf16.gmra.mrb[28].mxu1 %v729_v3  ;;  %v1220_v63 = vpack.c.bf16 %v1215_v61, %v13898_v60  ;;  %v1379_v3 = vpack.c.bf16 %v13817_v30, %v13797_v21  ;;  %v1382_v21 = vpack.c.bf16 %v13898_v60, %v13872_v50  ;;  %v1695_v30 = vld [vmem:[#allocation2 + $0x16] sm:$0xff] }
 0x14b   : > { %11098 = vmatmul.mubr.bf16.gmra.mrb[36].mxu0 %v892_v4  ;;  %11065 = vmatprep.mubr.msk.bf16.mxu1 %vm13393_vm0, %v13625_v1  ;;  %v13322_v4 = vld [vmem:[#allocation2 + $0x15] sm:$0xff] }
 0x14c   : > { %11101 = vmatprep.mubr.msk.bf16.mxu0 %vm13393_vm0, %v13625_v1  ;;  %11118 = vmatpush3.bf16.msra.mxu1 %v12856_v0  ;;  %v1533_v0 = vld [vmem:[#allocation2 + $0x1d] sm:$0xff] }
 0x14d   : > { %11154 = vmatpush3.bf16.msra.mxu0 %v12857_v2  ;;  %11119 = vmatprep.subr.bf16.mxu1 %v13625_v1  ;;  %v12880_v2 = vld [vmem:[%s15987_s1 + $0x240] sm:$0xff]  }
 0x14e   : > { %11155 = vmatprep.subr.bf16.mxu0 %v13625_v1 }
 0x150   : > { %11120 = vmatpush3.bf16.msra.mxu1 %v12858_v5  ;;  %v1542_v5 = vpack.c.bf16 %v1533_v0, %v13322_v4 }
 0x151   : > { %11156 = vmatpush3.bf16.msra.mxu0 %v12859_v6  ;;  %11121 = vmatprep.subr.bf16.mxu1 %v13625_v1  ;;  %v12881_v6 = vld [vmem:[%s15987_s1 + $0x248] sm:$0xff]  }
 0x152   : > { %11157 = vmatprep.subr.bf16.mxu0 %v13625_v1  ;;  %11066 = vmatmul.mubr.bf16.gmra.mrb[32].mxu1 %v730_v11  ;;  %v1543_v11 = vpack.c.bf16 %v1535_v7, %v1534_v8 }
 0x153   : > { %11102 = vmatmul.mubr.bf16.gmra.mrb[40].mxu0 %v893_v12  ;;  %11069 = vmatprep.mubr.msk.bf16.mxu1 %vm13393_vm0, %v13625_v1  ;;  %v12883_v12 = vld [vmem:[%s15987_s1 + $0x258] sm:$0xff]  }
 0x154   : > { %11105 = vmatprep.mubr.msk.bf16.mxu0 %vm13393_vm0, %v13625_v1  ;;  %11122 = vmatpush3.bf16.msra.mxu1 %v12860_v9  ;;  %v12882_v9 = vld [vmem:[%s15987_s1 + $0x250] sm:$0xff]  }
 0x155   : > { %11158 = vmatpush3.bf16.msra.mxu0 %v12861_v10  ;;  %11123 = vmatprep.subr.bf16.mxu1 %v13625_v1  ;;  %v1380_v10 = vpack.c.bf16 %v13843_v39, %v13819_v31  ;;  %v1696_v31 = vld [vmem:[#allocation2 + $0x1e] sm:$0xff]  ;;  %v1701_v39 = vld [vmem:[#allocation2 + $0x46] sm:$0xff] }
 0x156   : > { %11159 = vmatprep.subr.bf16.mxu0 %v13625_v1 }
 0x158   : > { %11124 = vmatpush3.bf16.msra.mxu1 %v12862_v13  ;;  %v1536_v13 = vld [vmem:[#allocation2 + $0x35] sm:$0xff] }
 0x159   : > { %11160 = vmatpush3.bf16.msra.mxu0 %v12863_v14  ;;  %11181 = vmatprep.subr.bf16.mxu1 %v13625_v1  ;;  %v12884_v14 = vld [vmem:[%s15987_s1 + $0x260] sm:$0xff]   ;;  %v1544_v17 = vpack.c.bf16 %v13323_v16, %v1536_v13 }
 0x15a   : > { %11217 = vmatprep.subr.bf16.mxu0 %v13625_v1  ;;  %11070 = vmatmul.mubr.bf16.gmra.mrb[36].mxu1 %v731_v18  ;;  %v12885_v18 = vld [vmem:[%s15987_s1 + $0x268] sm:$0xff]   ;;  %v12888_v13 = vld [vmem:[%s15987_s1 + $0x2c0] sm:$0xff]  }
 0x15b   : > { %11106 = vmatmul.mubr.bf16.gmra.mrb[44].mxu0 %v894_v19  ;;  %11125 = vmatprep.mubr.msk.bf16.mxu1 %vm13393_vm0, %v13625_v1  ;;  %v1538_v19 = vld [vmem:[#allocation2 + $0x45] sm:$0xff] }
 0x15c   : > { %11161 = vmatprep.mubr.msk.bf16.mxu0 %vm13393_vm0, %v13625_v1  ;;  %v1545_v22 = vpack.c.bf16 %v1539_v20, %v1538_v19 }
 0x162   : > { %11126 = vmatmul.mubr.bf16.vlgmr.msra.gmra.mrb[40].mxu1 %v1053_v25  ;;  %v12887_v25 = vld [vmem:[%s15987_s1 + $0x278] sm:$0xff]  }
 0x163   : > { %11162 = vmatmul.mubr.bf16.vlgmr.msra.gmra.mrb[48].mxu0 %v1216_v26  ;;  %11129 = vmatprep.mubr.msk.bf16.mxu1 %vm13393_vm0, %v13625_v1  ;;  %v1377_v26 = vld [vmem:[#allocation2 + $0x54] sm:$0xff] }
 0x164   : > { %11165 = vmatprep.mubr.msk.bf16.mxu0 %vm13393_vm0, %v13625_v1  ;;  %11182 = vmatpush3.bf16.msra.mxu1 %v12864_v23  ;;  %v12886_v23 = vld [vmem:[%s15987_s1 + $0x270] sm:$0xff]  }
 0x165   : > { %11218 = vmatpush3.bf16.msra.mxu0 %v12865_v24  ;;  %11183 = vmatprep.subr.bf16.mxu1 %v13625_v1  ;;  %v1378_v24 = vld [vmem:[#allocation2 + $0x5c] sm:$0x3f] }
 0x166   : > { %11219 = vmatprep.subr.bf16.mxu0 %v13625_v1  ;;  %v1383_v29 = vpack.c.bf16 %v1378_v24, %v1377_v26  ;;  %v12891_v26 = vld [vmem:[%s15987_s1 + $0x2d8] sm:$0xff]  }
 0x168   : > { %11184 = vmatpush3.bf16.msra.mxu1 %v12866_v27  ;;  %v1540_v27 = vld [vmem:[#allocation2 + $0x55] sm:$0xff] }
 0x169   : > { %11220 = vmatpush3.bf16.msra.mxu0 %v12867_v28  ;;  %11185 = vmatprep.subr.bf16.mxu1 %v13625_v1  ;;  %v1541_v28 = vld [vmem:[#allocation2 + $0x5d] sm:$0x3f] }
 0x16a   : > { %11221 = vmatprep.subr.bf16.mxu0 %v13625_v1  ;;  %11130 = vmatmul.mubr.bf16.gmra.mrb[44].mxu1 %v1054_v34  ;;  %v1546_v42 = vpack.c.bf16 %v1541_v28, %v1540_v27  ;;  %v1697_v34 = vld [vmem:[#allocation2 + $0x26] sm:$0xff] }
 0x16b   : > { %11166 = vmatmul.mubr.bf16.gmra.mrb[52].mxu0 %v1217_v35  ;;  %11133 = vmatprep.mubr.msk.bf16.mxu1 %vm13393_vm0, %v13625_v1 }
 0x16c   : > { %11169 = vmatprep.mubr.msk.bf16.mxu0 %vm13393_vm0, %v13625_v1  ;;  %11186 = vmatpush3.bf16.msra.mxu1 %v12868_v32  ;;  %v1705_v32 = vpack.c.bf16 %v1696_v31, %v1695_v30 }
 0x16d   : > { %11222 = vmatpush3.bf16.msra.mxu0 %v12869_v33  ;;  %11187 = vmatprep.subr.bf16.mxu1 %v13625_v1  ;;  %v1698_v33 = vld [vmem:[#allocation2 + $0x2e] sm:$0xff] }
 0x16e   : > { %11223 = vmatprep.subr.bf16.mxu0 %v13625_v1  ;;  %v1706_v35 = vpack.c.bf16 %v1698_v33, %v1697_v34 }
 0x170   : > { %11188 = vmatpush3.bf16.msra.mxu1 %v12870_v36  ;;  %v1699_v36 = vld [vmem:[#allocation2 + $0x36] sm:$0xff] }
 0x171   : > { %11224 = vmatpush3.bf16.msra.mxu0 %v12871_v37  ;;  %11189 = vmatprep.subr.bf16.mxu1 %v13625_v1  ;;  %v1700_v37 = vld [vmem:[#allocation2 + $0x3e] sm:$0xff] }
 0x172   : > { %11225 = vmatprep.subr.bf16.mxu0 %v13625_v1  ;;  %11134 = vmatmul.mubr.bf16.gmra.mrb[48].mxu1 %v1055_v44  ;;  %v1707_v38 = vpack.c.bf16 %v1700_v37, %v1699_v36  ;;  %v1704_v44 = vld [vmem:[#allocation2 + $0x5e] sm:$0x3f] }
 0x173   : > { %11170 = vmatmul.mubr.bf16.gmra.mrb[56].mxu0 %v1218_v45  ;;  %11137 = vmatprep.mubr.msk.bf16.mxu1 %vm13393_vm0, %v13625_v1 }
 0x174   : > { %11173 = vmatprep.mubr.msk.bf16.mxu0 %vm13393_vm0, %v13625_v1  ;;  %11190 = vmatpush3.bf16.msra.mxu1 %v12872_v41  ;;  %v1708_v41 = vpack.c.bf16 %v1702_v40, %v1701_v39 }
 0x175   : > { %11226 = vmatpush3.bf16.msra.mxu0 %v12873_v43  ;;  %11191 = vmatprep.subr.bf16.mxu1 %v13625_v1  ;;  %v1703_v43 = vld [vmem:[#allocation2 + $0x56] sm:$0xff] }
 0x176   : > { %11227 = vmatprep.subr.bf16.mxu0 %v13625_v1  ;;  %v1709_v45 = vpack.c.bf16 %v1704_v44, %v1703_v43  ;;  %v12892_v44 = vld [vmem:[%s15987_s1 + $0x2e0] sm:$0xff]  }
 0x178   : > { %11192 = vmatpush3.bf16.msra.mxu1 %v12874_v46 }
 0x179   : > { %11228 = vmatpush3.bf16.msra.mxu0 %v12875_v47  ;;  %11193 = vmatprep.subr.bf16.mxu1 %v13625_v1 }
 0x17a   : > { %11229 = vmatprep.subr.bf16.mxu0 %v13625_v1  ;;  %11138 = vmatmul.mubr.bf16.gmra.mrb[52].mxu1 %v1056_v53  ;;  %v1052_v1 = vld [vmem:[#allocation2 + $0x53] sm:$0x3f] }
 0x17b   : > { %11174 = vmatmul.mubr.bf16.gmra.mrb[60].mxu0 %v1219_v54  ;;  %11141 = vmatprep.mubr.msk.bf16.mxu1 %vm13393_vm0, %v13892_v57  ;;  %v1057_v62 = vpack.c.bf16 %v1052_v1, %v1051_v58 }
 0x17c   : > { %11177 = vmatprep.mubr.msk.bf16.mxu0 %vm13393_vm0, %v13892_v57  ;;  %11194 = vmatpush3.bf16.msra.mxu1 %v12876_v51 }
 0x17d   : > { %11230 = vmatpush3.bf16.msra.mxu0 %v12877_v52  ;;  %11195 = vmatprep.subr.bf16.mxu1 %v13892_v57 }
 0x17e   : > { %11231 = vmatprep.subr.bf16.mxu0 %v13892_v57 }
 0x180   : > { %11196 = vmatpush3.bf16.msra.mxu1 %v12878_v55 }
 0x181   : > { %11232 = vmatpush3.bf16.msra.mxu0 %v12879_v56  ;;  %11253 = vmatprep.subr.bf16.mxu1 %v13892_v57 }
 0x182   : > { %11289 = vmatprep.subr.bf16.mxu0 %v13892_v57  ;;  %11142 = vmatmul.mubr.bf16.gmra.mrb[56].mxu1 %v1057_v62 }
 0x183   : > { %11178 = vmatmul.mubr.bf16.gmra.mrb[64].mxu0 %v1220_v63  ;;  %11197 = vmatprep.mubr.msk.bf16.mxu1 %vm13393_vm0, %v13892_v57 }
 0x184   : > { %11233 = vmatprep.mubr.msk.bf16.mxu0 %vm13393_vm0, %v13892_v57 }
 0x18a   : > { %11198 = vmatmul.mubr.bf16.vlgmr.msra.gmra.mrb[60].mxu1 %v1379_v3 }
 0x18b   : > { %11234 = vmatmul.mubr.bf16.vlgmr.msra.gmra.mrb[68].mxu0 %v1542_v5  ;;  %11201 = vmatprep.mubr.msk.bf16.mxu1 %vm13393_vm0, %v13892_v57 }
 0x18c   : > { %11237 = vmatprep.mubr.msk.bf16.mxu0 %vm13393_vm0, %v13892_v57  ;;  %11254 = vmatpush3.bf16.msra.mxu1 %v12880_v2 }
 0x18d   : > { %11255 = vmatprep.subr.bf16.mxu1 %v13892_v57  ;;  %11290 = vmatpush3.bf16.msra.mxu0 %v12888_v13 }
 0x18e   : > { %11291 = vmatprep.subr.bf16.mxu0 %v13892_v57 }
 0x190   : > { %11256 = vmatpush3.bf16.msra.mxu1 %v12881_v6 }
 0x191   : > { %11257 = vmatprep.subr.bf16.mxu1 %v13892_v57 }
 0x192   : > { %11202 = vmatmul.mubr.bf16.gmra.mrb[64].mxu1 %v1380_v10 }
 0x193   : > { %11238 = vmatmul.mubr.bf16.gmra.mrb[72].mxu0 %v1543_v11  ;;  %11205 = vmatprep.mubr.msk.bf16.mxu1 %vm13393_vm0, %v13892_v57 }
 0x194   : > { %11241 = vmatprep.mubr.msk.bf16.mxu0 %vm13393_vm0, %v13892_v57  ;;  %11258 = vmatpush3.bf16.msra.mxu1 %v12882_v9 }
 0x195   : > { %11259 = vmatprep.subr.bf16.mxu1 %v13892_v57 }
 0x198   : > { %11260 = vmatpush3.bf16.msra.mxu1 %v12883_v12 }
 0x199   : > { %11261 = vmatprep.subr.bf16.mxu1 %v13892_v57 }
 0x19a   : > { %11206 = vmatmul.mubr.bf16.gmra.mrb[68].mxu1 %v1381_v15 }
 0x19b   : > { %11242 = vmatmul.mubr.bf16.gmra.mrb[76].mxu0 %v1544_v17  ;;  %11209 = vmatprep.mubr.msk.bf16.mxu1 %vm13393_vm0, %v13892_v57 }
 0x19c   : > { %11245 = vmatprep.mubr.msk.bf16.mxu0 %vm13393_vm0, %v13892_v57  ;;  %11262 = vmatpush3.bf16.msra.mxu1 %v12884_v14  ;;  %v12889_v14 = vld [vmem:[%s15987_s1 + $0x2c8] sm:$0xff]  }
 0x19d   : > { %11263 = vmatprep.subr.bf16.mxu1 %v13892_v57  ;;  %11292 = vmatpush3.bf16.msra.mxu0 %v12889_v14 }
 0x19e   : > { %11293 = vmatprep.subr.bf16.mxu0 %v13892_v57 }
 0x1a0   : > { %11264 = vmatpush3.bf16.msra.mxu1 %v12885_v18 }
 0x1a1   : > { %11265 = vmatprep.subr.bf16.mxu1 %v13892_v57 }
 0x1a2   : > { %11210 = vmatmul.mubr.bf16.gmra.mrb[72].mxu1 %v1382_v21 }
 0x1a3   : > { %11246 = vmatmul.mubr.bf16.gmra.mrb[80].mxu0 %v1545_v22  ;;  %11213 = vmatprep.mubr.msk.bf16.mxu1 %vm13393_vm0, %v13892_v57 }
 0x1a4   : > { %11249 = vmatprep.mubr.msk.bf16.mxu0 %vm13393_vm0, %v13892_v57  ;;  %11266 = vmatpush3.bf16.msra.mxu1 %v12886_v23 }
 0x1a5   : > { %11267 = vmatprep.subr.bf16.mxu1 %v13892_v57 }
 0x1a8   : > { %11268 = vmatpush3.bf16.msra.mxu1 %v12887_v25  ;;  %v12890_v25 = vld [vmem:[%s15987_s1 + $0x2d0] sm:$0xff]  }
 0x1a9   : > { %11294 = vmatpush3.bf16.msra.mxu0 %v12890_v25 }
 0x1aa   : > { %11214 = vmatmul.mubr.bf16.gmra.mrb[76].mxu1 %v1383_v29  ;;  %11295 = vmatprep.subr.bf16.mxu0 %v13892_v57 }
 0x1ab   : > { %11250 = vmatmul.mubr.bf16.gmra.mrb[84].mxu0 %v1546_v42  ;;  %11269 = vmatprep.mubr.msk.bf16.mxu1 %vm13393_vm0, %v13892_v57 }
 0x1ac   : > { %11305 = vmatprep.mubr.msk.bf16.mxu0 %vm13393_vm0, %v13892_v57 }
 0x1ad   : > { %11296 = vmatpush3.bf16.msra.mxu0 %v12891_v26 }
 0x1ae   : > { %11297 = vmatprep.subr.bf16.mxu0 %v13892_v57 }
 0x1b1   : > { %11298 = vmatpush3.bf16.msra.mxu0 %v12892_v44 }
 0x1b2   : > { %11270 = vmatmul.mubr.bf16.vlgmr.msra.gmra.mrb[80].mxu1 %v1705_v32  ;;  %11299 = vmatprep.subr.bf16.mxu0 %v13892_v57 }
 0x1b3   : > { %11273 = vmatprep.mubr.msk.bf16.mxu1 %vm13393_vm0, %v13892_v57 }
 0x1ba   : > { %11274 = vmatmul.mubr.bf16.gmra.mrb[84].mxu1 %v1706_v35 }
 0x1bb   : > { %11277 = vmatprep.mubr.msk.bf16.mxu1 %vm13393_vm0, %v13892_v57 }
 0x1c2   : > { %11278 = vmatmul.mubr.bf16.gmra.mrb[88].mxu1 %v1707_v38 }
 0x1c3   : > { %11281 = vmatprep.mubr.msk.bf16.mxu1 %vm13393_vm0, %v13892_v57 }
 0x1ca   : > { %11282 = vmatmul.mubr.bf16.gmra.mrb[92].mxu1 %v1708_v41 }
 0x1cb   : > { %11285 = vmatprep.mubr.msk.bf16.mxu1 %vm13393_vm0, %v13892_v57 }
 0x1d2   : > { %11286 = vmatmul.mubr.bf16.gmra.mrb[96].mxu1 %v1709_v45 }
 0x1d3   : > { %11631 = vmatprep.mubr.msk.f32.mxu1 %vm13393_vm0, %v13892_v57 }
 0x1e5   : > { %v557_v46 = vpop.f32.mrb[0].mxu1 }
 0x1e6   : > { %v678_v47 = vpop.f32.mrb[8].mxu0  ;;  %v10983_v48 = vpop.f32.mrb[1].mxu1 }
 0x1e7   : > { %v679_v59 = vadd.f32 %v678_v47, %v557_v46  ;;  %v11019_v49 = vpop.f32.mrb[9].mxu0  ;;  %v560_v50 = vpop.f32.mrb[2].mxu1 }
 0x1e8   : > { %v681_v51 = vpop.f32.mrb[10].mxu0  ;;  %v10984_v53 = vpop.f32.mrb[3].mxu1  ;;  %v12893_v49 = vld [vmem:[%s15987_s1 + $0x2e8] sm:$0xff]  }
 0x1e9   : > { %v13978_v52 = vadd.f32 %v681_v51, %v560_v50  ;;  %v11020_v54 = vpop.f32.mrb[11].mxu0  ;;  %11300 = vmatpush3.bf16.msra.mxu0 %v12893_v49 }
 0x1ea   : > { %11301 = vmatprep.subr.bf16.mxu0 %v13892_v57 }
 0x1ed   : > { %v565_v55 = vpop.f32.mrb[4].mxu1 }
 0x1ee   : > { %v686_v56 = vpop.f32.mrb[12].mxu0  ;;  %v10987_v1 = vpop.f32.mrb[5].mxu1 }
 0x1ef   : > { %v13980_v58 = vadd.f32 %v686_v56, %v565_v55  ;;  %v11023_v60 = vpop.f32.mrb[13].mxu0  ;;  %v568_v61 = vpop.f32.mrb[6].mxu1  ;;  %v12894_v1 = vld [vmem:[%s15987_s1 + $0x2f0] sm:$0xff]  }
 0x1f0   : > { %v689_v62 = vpop.f32.mrb[14].mxu0  ;;  %v10988_v0 = vpop.f32.mrb[7].mxu1  ;;  %11302 = vmatpush3.bf16.msra.mxu0 %v12894_v1 }
 0x1f1   : > { %v13982_v63 = vadd.f32 %v689_v62, %v568_v61  ;;  %v11024_v2 = vpop.f32.mrb[15].mxu0  ;;  %11303 = vmatprep.subr.bf16.mxu0 %v13892_v57 }
 0x1f5   : > { %v573_v3 = vpop.f32.mrb[8].mxu1 }
 0x1f6   : > { %v694_v4 = vpop.f32.mrb[16].mxu0  ;;  %v10991_v6 = vpop.f32.mrb[9].mxu1 }
 0x1f7   : > { %v13984_v5 = vadd.f32 %v694_v4, %v573_v3  ;;  %v11027_v7 = vpop.f32.mrb[17].mxu0  ;;  %v576_v8 = vpop.f32.mrb[10].mxu1 }
 0x1f8   : > { %v697_v9 = vpop.f32.mrb[18].mxu0  ;;  %v10992_v11 = vpop.f32.mrb[11].mxu1 }
 0x1f9   : > { %v13986_v10 = vadd.f32 %v697_v9, %v576_v8  ;;  %v11028_v12 = vpop.f32.mrb[19].mxu0 }
 0x1fd   : > { %v581_v15 = vpop.f32.mrb[12].mxu1 }
 0x1fe   : > { %v702_v16 = vpop.f32.mrb[20].mxu0  ;;  %v10995_v18 = vpop.f32.mrb[13].mxu1 }
 0x1ff   : > { %v13995_v17 = vadd.f32 %v702_v16, %v581_v15  ;;  %v11031_v19 = vpop.f32.mrb[21].mxu0  ;;  %v584_v20 = vpop.f32.mrb[14].mxu1 }
 0x200   : > { %v705_v21 = vpop.f32.mrb[22].mxu0  ;;  %v10996_v23 = vpop.f32.mrb[15].mxu1 }
 0x201   : > { %v13997_v22 = vadd.f32 %v705_v21, %v584_v20  ;;  %v11032_v24 = vpop.f32.mrb[23].mxu0 }
 0x205   : > { %v589_v27 = vpop.f32.mrb[16].mxu1 }
 0x206   : > { %v710_v28 = vpop.f32.mrb[24].mxu0  ;;  %v10999_v42 = vpop.f32.mrb[17].mxu1 }
 0x207   : > { %v14007_v29 = vadd.f32 %v710_v28, %v589_v27  ;;  %v11035_v30 = vpop.f32.mrb[25].mxu0  ;;  %v592_v31 = vpop.f32.mrb[18].mxu1 }
 0x208   : > { %v713_v32 = vpop.f32.mrb[26].mxu0  ;;  %v11000_v34 = vpop.f32.mrb[19].mxu1 }
 0x209   : > { %v14009_v33 = vadd.f32 %v713_v32, %v592_v31  ;;  %v11036_v35 = vpop.f32.mrb[27].mxu0 }
 0x20d   : > { %v831_v36 = vpop.f32.mrb[20].mxu1 }
 0x20e   : > { %v994_v37 = vpop.f32.mrb[28].mxu0  ;;  %v870_v38 = vadd.f32 %v831_v36, %v679_v59  ;;  %v11055_v39 = vpop.f32.mrb[21].mxu1 }
 0x20f   : > { %v11091_v40 = vpop.f32.mrb[29].mxu0  ;;  %v834_v41 = vpop.f32.mrb[22].mxu1 }
 0x210   : > { %v997_v43 = vpop.f32.mrb[30].mxu0  ;;  %v14015_v45 = vadd.f32 %v994_v37, %v870_v38  ;;  %v871_v46 = vadd.f32 %v834_v41, %v13978_v52  ;;  %v11056_v47 = vpop.f32.mrb[23].mxu1 }
 0x211   : > { %v11092_v48 = vpop.f32.mrb[31].mxu0 }
 0x212   : > { %v14021_v59 = vadd.f32 %v997_v43, %v871_v46 }
 0x215   : > { %v839_v50 = vpop.f32.mrb[24].mxu1 }
 0x216   : > { %v1002_v51 = vpop.f32.mrb[32].mxu0  ;;  %v872_v53 = vadd.f32 %v839_v50, %v13980_v58  ;;  %v11059_v54 = vpop.f32.mrb[25].mxu1  ;;  %v12895_v58 = vld [vmem:[%s15987_s1 + $0x2f8] sm:$0xff]  }
 0x217   : > { %v11095_v55 = vpop.f32.mrb[33].mxu0  ;;  %v842_v52 = vpop.f32.mrb[26].mxu1  ;;  %11304 = vmatpush3.bf16.msra.mxu0 %v12895_v58 }
 0x218   : > { %v1005_v56 = vpop.f32.mrb[34].mxu0  ;;  %v1035_v60 = vadd.f32 %v1002_v51, %v872_v53  ;;  %v873_v61 = vadd.f32 %v842_v52, %v13982_v63  ;;  %v11060_v62 = vpop.f32.mrb[27].mxu1  ;;  %11325 = vmatprep.subr.bf16.mxu0 %v13892_v57 }
 0x219   : > { %v11096_v0 = vpop.f32.mrb[35].mxu0 }
 0x21a   : > { %v1036_v2 = vadd.f32 %v1005_v56, %v873_v61 }
 0x21d   : > { %v847_v3 = vpop.f32.mrb[28].mxu1 }
 0x21e   : > { %v1010_v4 = vpop.f32.mrb[36].mxu0  ;;  %v874_v6 = vadd.f32 %v847_v3, %v13984_v5  ;;  %v11063_v7 = vpop.f32.mrb[29].mxu1 }
 0x21f   : > { %v11099_v8 = vpop.f32.mrb[37].mxu0  ;;  %v850_v63 = vpop.f32.mrb[30].mxu1 }
 0x220   : > { %v1013_v9 = vpop.f32.mrb[38].mxu0  ;;  %v1037_v11 = vadd.f32 %v1010_v4, %v874_v6  ;;  %v875_v12 = vadd.f32 %v850_v63, %v13986_v10  ;;  %v11064_v13 = vpop.f32.mrb[31].mxu1 }
 0x221   : > { %v11100_v14 = vpop.f32.mrb[39].mxu0 }
 0x222   : > { %v1038_v15 = vadd.f32 %v1013_v9, %v875_v12 }
 0x225   : > { %v855_v16 = vpop.f32.mrb[32].mxu1 }
 0x226   : > { %v1018_v18 = vpop.f32.mrb[40].mxu0  ;;  %v876_v19 = vadd.f32 %v855_v16, %v13995_v17  ;;  %v11067_v20 = vpop.f32.mrb[33].mxu1 }
 0x227   : > { %v11103_v21 = vpop.f32.mrb[41].mxu0  ;;  %v858_v23 = vpop.f32.mrb[34].mxu1 }
 0x228   : > { %v1021_v5 = vpop.f32.mrb[42].mxu0  ;;  %v1039_v24 = vadd.f32 %v1018_v18, %v876_v19  ;;  %v877_v25 = vadd.f32 %v858_v23, %v13997_v22  ;;  %v11068_v26 = vpop.f32.mrb[35].mxu1 }
 0x229   : > { %v11104_v27 = vpop.f32.mrb[43].mxu0 }
 0x22a   : > { %v1040_v28 = vadd.f32 %v1021_v5, %v877_v25 }
 0x22d   : > { %v863_v42 = vpop.f32.mrb[36].mxu1 }
 0x22e   : > { %v1026_v30 = vpop.f32.mrb[44].mxu0  ;;  %v878_v10 = vadd.f32 %v863_v42, %v14007_v29  ;;  %v11071_v31 = vpop.f32.mrb[37].mxu1 }
 0x22f   : > { %v11107_v32 = vpop.f32.mrb[45].mxu0  ;;  %v866_v34 = vpop.f32.mrb[38].mxu1 }
 0x230   : > { %v1029_v35 = vpop.f32.mrb[46].mxu0  ;;  %v1041_v36 = vadd.f32 %v1026_v30, %v878_v10  ;;  %v879_v17 = vadd.f32 %v866_v34, %v14009_v33  ;;  %v11072_v37 = vpop.f32.mrb[39].mxu1 }
 0x231   : > { %v11108_v38 = vpop.f32.mrb[47].mxu0 }
 0x232   : > { %v1042_v39 = vadd.f32 %v1029_v35, %v879_v17 }
 0x235   : > { %v1157_v40 = vpop.f32.mrb[40].mxu1 }
 0x236   : > { %v1320_v41 = vpop.f32.mrb[48].mxu0  ;;  %v1196_v22 = vadd.f32 %v1157_v40, %v14015_v45  ;;  %v11127_v43 = vpop.f32.mrb[41].mxu1 }
 0x237   : > { %v11163_v44 = vpop.f32.mrb[49].mxu0  ;;  %v1160_v46 = vpop.f32.mrb[42].mxu1 }
 0x238   : > { %v1323_v47 = vpop.f32.mrb[50].mxu0  ;;  %v1359_v48 = vadd.f32 %v1320_v41, %v1196_v22  ;;  %v1197_v29 = vadd.f32 %v1160_v46, %v14021_v59  ;;  %v11128_v49 = vpop.f32.mrb[43].mxu1 }
 0x239   : > { %v11164_v50 = vpop.f32.mrb[51].mxu0 }
 0x23a   : > { %v1360_v51 = vadd.f32 %v1323_v47, %v1197_v29 }
 0x23d   : > { %v1165_v53 = vpop.f32.mrb[44].mxu1 }
 0x23e   : > { %v1328_v54 = vpop.f32.mrb[52].mxu0  ;;  %v1198_v33 = vadd.f32 %v1165_v53, %v1035_v60  ;;  %v11131_v55 = vpop.f32.mrb[45].mxu1 }
 0x23f   : > { %v11167_v52 = vpop.f32.mrb[53].mxu0  ;;  %v1168_v56 = vpop.f32.mrb[46].mxu1 }
 0x240   : > { %v1331_v1 = vpop.f32.mrb[54].mxu0  ;;  %v1361_v61 = vadd.f32 %v1328_v54, %v1198_v33  ;;  %v1199_v62 = vadd.f32 %v1168_v56, %v1036_v2  ;;  %v11132_v45 = vpop.f32.mrb[47].mxu1 }
 0x241   : > { %v11168_v0 = vpop.f32.mrb[55].mxu0 }
 0x242   : > { %v1362_v58 = vadd.f32 %v1331_v1, %v1199_v62 }
 0x245   : > { %v1173_v3 = vpop.f32.mrb[48].mxu1 }
 0x246   : > { %v1336_v4 = vpop.f32.mrb[56].mxu0  ;;  %v1200_v6 = vadd.f32 %v1173_v3, %v1037_v11  ;;  %v11135_v7 = vpop.f32.mrb[49].mxu1 }
 0x247   : > { %v11171_v59 = vpop.f32.mrb[57].mxu0  ;;  %v1176_v8 = vpop.f32.mrb[50].mxu1 }
 0x248   : > { %v1339_v63 = vpop.f32.mrb[58].mxu0  ;;  %v1363_v9 = vadd.f32 %v1336_v4, %v1200_v6  ;;  %v1201_v12 = vadd.f32 %v1176_v8, %v1038_v15  ;;  %v11136_v13 = vpop.f32.mrb[51].mxu1 }
 0x249   : > { %v11172_v60 = vpop.f32.mrb[59].mxu0 }
 0x24a   : > { %v1364_v14 = vadd.f32 %v1339_v63, %v1201_v12 }
 0x24d   : > { %v1181_v16 = vpop.f32.mrb[52].mxu1 }
 0x24e   : > { %v1344_v18 = vpop.f32.mrb[60].mxu0  ;;  %v1202_v19 = vadd.f32 %v1181_v16, %v1039_v24  ;;  %v11139_v20 = vpop.f32.mrb[53].mxu1 }
 0x24f   : > { %v11175_v2 = vpop.f32.mrb[61].mxu0  ;;  %v1184_v21 = vpop.f32.mrb[54].mxu1 }
 0x250   : > { %v1347_v23 = vpop.f32.mrb[62].mxu0  ;;  %v1365_v5 = vadd.f32 %v1344_v18, %v1202_v19  ;;  %v1203_v25 = vadd.f32 %v1184_v21, %v1040_v28  ;;  %v11140_v26 = vpop.f32.mrb[55].mxu1 }
 0x251   : > { %v11176_v11 = vpop.f32.mrb[63].mxu0 }
 0x252   : > { %v1366_v27 = vadd.f32 %v1347_v23, %v1203_v25 }
 0x255   : > { %v1189_v42 = vpop.f32.mrb[56].mxu1 }
 0x256   : > { %v1352_v30 = vpop.f32.mrb[64].mxu0  ;;  %v1204_v10 = vadd.f32 %v1189_v42, %v1041_v36  ;;  %v11143_v31 = vpop.f32.mrb[57].mxu1 }
 0x257   : > { %v11179_v15 = vpop.f32.mrb[65].mxu0  ;;  %v1192_v32 = vpop.f32.mrb[58].mxu1 }
 0x258   : > { %v1355_v34 = vpop.f32.mrb[66].mxu0  ;;  %v1367_v35 = vadd.f32 %v1352_v30, %v1204_v10  ;;  %v1205_v17 = vadd.f32 %v1192_v32, %v1042_v39  ;;  %v11144_v37 = vpop.f32.mrb[59].mxu1 }
 0x259   : > { %v11180_v24 = vpop.f32.mrb[67].mxu0 }
 0x25a   : > { %v1368_v38 = vadd.f32 %v1355_v34, %v1205_v17 }
 0x25d   : > { %v1483_v40 = vpop.f32.mrb[60].mxu1 }
 0x25e   : > { %v1646_v41 = vpop.f32.mrb[68].mxu0  ;;  %v1522_v22 = vadd.f32 %v1483_v40, %v1359_v48  ;;  %v11199_v43 = vpop.f32.mrb[61].mxu1 }
 0x25f   : > { %v11235_v28 = vpop.f32.mrb[69].mxu0  ;;  %v1486_v44 = vpop.f32.mrb[62].mxu1 }
 0x260   : > { %v1649_v46 = vpop.f32.mrb[70].mxu0  ;;  %v1685_v47 = vadd.f32 %v1646_v41, %v1522_v22  ;;  %v1523_v29 = vadd.f32 %v1486_v44, %v1360_v51  ;;  %v11200_v49 = vpop.f32.mrb[63].mxu1 }
 0x261   : > { %v11236_v36 = vpop.f32.mrb[71].mxu0 }
 0x262   : > { %v1686_v50 = vadd.f32 %v1649_v46, %v1523_v29 }
 0x265   : > { %v1491_v53 = vpop.f32.mrb[64].mxu1 }
 0x266   : > { %v1654_v54 = vpop.f32.mrb[72].mxu0  ;;  %v1524_v33 = vadd.f32 %v1491_v53, %v1361_v61  ;;  %v11203_v55 = vpop.f32.mrb[65].mxu1 }
 0x267   : > { %v11239_v39 = vpop.f32.mrb[73].mxu0  ;;  %v1494_v52 = vpop.f32.mrb[66].mxu1 }
 0x268   : > { %v1657_v56 = vpop.f32.mrb[74].mxu0  ;;  %v1687_v1 = vadd.f32 %v1654_v54, %v1524_v33  ;;  %v1525_v62 = vadd.f32 %v1494_v52, %v1362_v58  ;;  %v11204_v45 = vpop.f32.mrb[67].mxu1 }
 0x269   : > { %v11240_v48 = vpop.f32.mrb[75].mxu0 }
 0x26a   : > { %v1688_v0 = vadd.f32 %v1657_v56, %v1525_v62  ;;  %v1951_v62 = vld [vmem:[#allocation3 + $0x1] sm:$0xff] }
 0x26d   : > { %v1499_v3 = vpop.f32.mrb[68].mxu1 }
 0x26e   : > { %v1662_v4 = vpop.f32.mrb[76].mxu0  ;;  %v1526_v6 = vadd.f32 %v1499_v3, %v1363_v9  ;;  %v11207_v7 = vpop.f32.mrb[69].mxu1 }
 0x26f   : > { %v11243_v51 = vpop.f32.mrb[77].mxu0  ;;  %v1502_v59 = vpop.f32.mrb[70].mxu1 }
 0x270   : > { %v1665_v8 = vpop.f32.mrb[78].mxu0  ;;  %v14043_v63 = vadd.f32 %v1662_v4, %v1526_v6  ;;  %v1527_v12 = vadd.f32 %v1502_v59, %v1364_v14  ;;  %v11208_v61 = vpop.f32.mrb[71].mxu1 }
 0x271   : > { %v11244_v13 = vpop.f32.mrb[79].mxu0 }
 0x272   : > { %v14045_v60 = vadd.f32 %v1665_v8, %v1527_v12  ;;  %v12897_v13 = vld [vmem:[%s15987_s1 + $0x288] sm:$0xff]  }
 0x275   : > { %v1507_v16 = vpop.f32.mrb[72].mxu1 }
 0x276   : > { %v1670_v18 = vpop.f32.mrb[80].mxu0  ;;  %v1528_v58 = vadd.f32 %v1507_v16, %v1365_v5  ;;  %v11211_v19 = vpop.f32.mrb[73].mxu1 }
 0x277   : > { %v11247_v20 = vpop.f32.mrb[81].mxu0  ;;  %v1510_v2 = vpop.f32.mrb[74].mxu1 }
 0x278   : > { %v1673_v21 = vpop.f32.mrb[82].mxu0  ;;  %v14047_v23 = vadd.f32 %v1670_v18, %v1528_v58  ;;  %v1529_v9 = vadd.f32 %v1510_v2, %v1366_v27  ;;  %v11212_v25 = vpop.f32.mrb[75].mxu1  ;;  %v14058_v27 = vld [vmem:[%s15988_s2 + $0x1] ss:$0 sm:$0xff]  ;;  %v12898_v20 = vld [vmem:[%s15987_s1 + $0x290] sm:$0xff]  }
 0x279   : > { %v11248_v26 = vpop.f32.mrb[83].mxu0 }
 0x27a   : > { %v14049_v11 = vadd.f32 %v1673_v21, %v1529_v9  ;;  %v14083_v9 = vld [vmem:[#allocation2] sm:$0xff] }
 0x27d   : > { %v1515_v42 = vpop.f32.mrb[76].mxu1 }
 0x27e   : > { %v1678_v14 = vpop.f32.mrb[84].mxu0  ;;  %v1530_v30 = vadd.f32 %v1515_v42, %v1367_v35  ;;  %v11215_v10 = vpop.f32.mrb[77].mxu1 }
 0x27f   : > { %v11251_v31 = vpop.f32.mrb[85].mxu0  ;;  %v1518_v15 = vpop.f32.mrb[78].mxu1 }
 0x280   : > { %v1681_v32 = vpop.f32.mrb[86].mxu0  ;;  %v14051_v34 = vadd.f32 %v1678_v14, %v1530_v30  ;;  %v1531_v5 = vadd.f32 %v1518_v15, %v1368_v38  ;;  %v11216_v17 = vpop.f32.mrb[79].mxu1  ;;  %v12899_v31 = vld [vmem:[%s15987_s1 + $0x298] sm:$0xff]  }
 0x281   : > { %v11252_v37 = vpop.f32.mrb[87].mxu0 }
 0x282   : > { %v14053_v24 = vadd.f32 %v1681_v32, %v1531_v5  ;;  %v12900_v37 = vld [vmem:[%s15987_s1 + $0x2a0] sm:$0xff]  }
 0x285   : > { %v1809_v40 = vpop.f32.mrb[80].mxu1 }
 0x286   : > { %v1848_v41 = vadd.f32 %v1809_v40, %v1685_v47  ;;  %v11271_v22 = vpop.f32.mrb[81].mxu1 }
 0x287   : > { %v1812_v35 = vpop.f32.mrb[82].mxu1 }
 0x288   : > { %v1866_v43 = vadd.f32 %v14058_v27, %v1848_v41  ;;  %v1849_v28 = vadd.f32 %v1812_v35, %v1686_v50  ;;  %v11272_v44 = vpop.f32.mrb[83].mxu1 }
 0x28a   : > { %vm1876_vm9 = vcmp.ge.f32.partialorder %v1866_v43, 0.0  ;;  %v1886_v46 = vmul.f32 0.01, %v1866_v43  ;;  %v1867_v38 = vadd.f32 %v14058_v27, %v1849_v28 }
 0x28c   : > { %v14062_v29 = vsel %vm1876_vm9, %v1866_v43, %v1886_v46  ;;  %vm1877_vm10 = vcmp.ge.f32.partialorder %v1867_v38, 0.0  ;;  %v1887_v49 = vmul.f32 0.01, %v1867_v38 }
 0x28d   : > { %1906 = vst [vmem:[#allocation3 + $0xb] sm:$0xff] %v14062_v29  ;;  %v1817_v36 = vpop.f32.mrb[84].mxu1 }
 0x28e   : > { %v1897_v53 = vsel %vm1877_vm10, %v1867_v38, %v1887_v49  ;;  %v1850_v54 = vadd.f32 %v1817_v36, %v1687_v1  ;;  %v11275_v47 = vpop.f32.mrb[85].mxu1  ;;  %v12896_v1 = vld [vmem:[%s15987_s1 + $0x280] sm:$0xff]   ;;  %v12901_v49 = vld [vmem:[%s15987_s1 + $0x2a8] sm:$0xff]  }
 0x28f   : > { %1907 = vst [vmem:[#allocation3 + $0x13] sm:$0xfc] %v1897_v53  ;;  %v1820_v33 = vpop.f32.mrb[86].mxu1 }
 0x290   : > { %v1868_v55 = vadd.f32 %v14058_v27, %v1850_v54  ;;  %v1851_v50 = vadd.f32 %v1820_v33, %v1688_v0  ;;  %v11276_v39 = vpop.f32.mrb[87].mxu1  ;;  %v12902_v33 = vld [vmem:[%s15987_s1 + $0x2b0] sm:$0xff]  }
 0x292   : > { %vm1878_vm11 = vcmp.ge.f32.partialorder %v1868_v55, 0.0  ;;  %v1888_v52 = vmul.f32 0.01, %v1868_v55  ;;  %v1869_v56 = vadd.f32 %v14058_v27, %v1851_v50 }
 0x294   : > { %v1898_v45 = vsel %vm1878_vm11, %v1868_v55, %v1888_v52  ;;  %vm1879_vm12 = vcmp.ge.f32.partialorder %v1869_v56, 0.0  ;;  %v1889_v48 = vmul.f32 0.01, %v1869_v56  ;;  %v1952_v3 = vld [vmem:[#allocation3 + $0x9] sm:$0xff] }
 0x295   : > { %1908 = vst [vmem:[#allocation3 + $0x1b] sm:$0xf3] %v1898_v45   ;;  %v1825_v4 = vpop.f32.mrb[88].mxu1  ;;  %v1960_v6 = vpack.c.bf16 %v1952_v3, %v1951_v62  ;;  %v12904_v62 = vld [vmem:[%s15987_s1 + $0x300] sm:$0xff]  }
 0x296   : > { %v1899_v7 = vsel %vm1879_vm12, %v1869_v56, %v1889_v48  ;;  %v1852_v0 = vadd.f32 %v1825_v4, %v14043_v63  ;;  %v11279_v51 = vpop.f32.mrb[89].mxu1  ;;  %v1953_v19 = vld [vmem:[#allocation3 + $0x11] sm:$0xff]  ;;  %v1921_v56 = vld [vmem:[#allocation3 + $0x8] sm:$0xff]  ;;  %v12905_v48 = vld [vmem:[%s15987_s1 + $0x308] sm:$0xff]  }
 0x297   : > { %1910 = vst [vmem:[#allocation3 + $0x23] sm:$0xcf] %v1899_v7   ;;  %v1828_v59 = vpop.f32.mrb[90].mxu1  ;;  %11306 = vmatmul.mubr.bf16.vlgmr.msra.gmra.mrb[88].mxu0 %v1960_v6  ;;  %v1929_v45 = vpack.c.bf16 %v1921_v56, %v14083_v9  ;;  %v12906_v4 = vld [vmem:[%s15987_s1 + $0x310] sm:$0xff]   ;;  %v12907_v7 = vld [vmem:[%s15987_s1 + $0x318] sm:$0xff]   ;;  %v12929_v56 = vld [vmem:[%s15987_s1 + $0x3c8] sm:$0xff]  }
 0x298   : > { %v1870_v8 = vadd.f32 %v14058_v27, %v1852_v0  ;;  %v1853_v12 = vadd.f32 %v1828_v59, %v14045_v60  ;;  %v11280_v61 = vpop.f32.mrb[91].mxu1  ;;  %11309 = vmatprep.mubr.msk.bf16.mxu0 %vm13393_vm0, %v13892_v57  ;;  %11326 = vmatpush3.bf16.msra.mxu0 %v12896_v1  ;;  %v1922_v1 = vld [vmem:[#allocation3 + $0x10] sm:$0xff]  ;;  %v12908_v59 = vld [vmem:[%s15987_s1 + $0x320] sm:$0xff]  }
 0x299   : > { %11327 = vmatprep.subr.bf16.mxu0 %v13892_v57 }
 0x29a   : > { %vm1880_vm13 = vcmp.ge.f32.partialorder %v1870_v8, 0.0  ;;  %v1890_v63 = vmul.f32 0.01, %v1870_v8  ;;  %v1871_v16 = vadd.f32 %v14058_v27, %v1853_v12  ;;  %v12909_v12 = vld [vmem:[%s15987_s1 + $0x328] sm:$0xff]  }
 0x29c   : > { %v1900_v18 = vsel %vm1880_vm13, %v1870_v8, %v1890_v63  ;;  %vm1881_vm14 = vcmp.ge.f32.partialorder %v1871_v16, 0.0  ;;  %v1891_v58 = vmul.f32 0.01, %v1871_v16  ;;  %v1954_v60 = vld [vmem:[#allocation3 + $0x19] sm:$0xff]  ;;  %11328 = vmatpush3.bf16.msra.mxu0 %v12897_v13  ;;  %v12910_v63 = vld [vmem:[%s15987_s1 + $0x330] sm:$0xff]  }
 0x29d   : > { %1912 = vst [vmem:[#allocation3 + $0x2b] sm:$0x3f] %v1900_v18  ;;  %v1833_v2 = vpop.f32.mrb[92].mxu1  ;;  %v1961_v21 = vpack.c.bf16 %v1954_v60, %v1953_v19  ;;  %11329 = vmatprep.subr.bf16.mxu0 %v14083_v9  ;;  %v1923_v3 = vld [vmem:[#allocation3 + $0x18] sm:$0xff]  ;;  %v12911_v18 = vld [vmem:[%s15987_s1 + $0x338] sm:$0xff]   ;;  %v2222_v60 = vld [vmem:[#allocation3 + $0x2] sm:$0xff] }
 0x29e   : > { %v14086_v57 = vsel %vm1881_vm14, %v1871_v16, %v1891_v58  ;;  %v1854_v25 = vadd.f32 %v1833_v2, %v14047_v23  ;;  %v11283_v26 = vpop.f32.mrb[93].mxu1  ;;  %v1955_v17 = vld [vmem:[#allocation3 + $0x21] sm:$0xff]  ;;  %v1930_v6 = vpack.c.bf16 %v1923_v3, %v1922_v1  ;;  %v12912_v2 = vld [vmem:[%s15987_s1 + $0x340] sm:$0xff]  }
 0x29f   : > { %1913 = vst [vmem:[#allocation3 + $0x33] sm:$0xff] %v14086_v57  ;;  %v1836_v42 = vpop.f32.mrb[94].mxu1  ;;  %11310 = vmatmul.mubr.bf16.gmra.mrb[92].mxu0 %v1961_v21  ;;  %v1924_v51 = vld [vmem:[#allocation3 + $0x20] sm:$0xff] }
 0x2a0   : > { %v1872_v14 = vadd.f32 %v14058_v27, %v1854_v25  ;;  %v1855_v30 = vadd.f32 %v1836_v42, %v14049_v11  ;;  %v11284_v10 = vpop.f32.mrb[95].mxu1  ;;  %11313 = vmatprep.mubr.msk.bf16.mxu0 %vm13393_vm0, %v14083_v9  ;;  %11330 = vmatpush3.bf16.msra.mxu0 %v12898_v20  ;;  %v2223_v20 = vld [vmem:[#allocation3 + $0xa] sm:$0xff]  ;;  %v12913_v25 = vld [vmem:[%s15987_s1 + $0x348] sm:$0xff]   ;;  %v2224_v42 = vld [vmem:[#allocation3 + $0x12] sm:$0xff] }
 0x2a1   : > { %11331 = vmatprep.subr.bf16.mxu0 %v14083_v9  ;;  %v2231_v21 = vpack.c.bf16 %v2223_v20, %v2222_v60  ;;  %v2225_v26 = vld [vmem:[#allocation3 + $0x1a] sm:$0xff]  ;;  %v12915_v10 = vld [vmem:[%s15987_s1 + $0x358] sm:$0xff]  }
 0x2a2   : > { %vm1882_vm15 = vcmp.ge.f32.partialorder %v1872_v14, 0.0  ;;  %v1892_v23 = vmul.f32 0.01, %v1872_v14  ;;  %v1873_v15 = vadd.f32 %v14058_v27, %v1855_v30  ;;  %v2232_v30 = vpack.c.bf16 %v2225_v26, %v2224_v42  ;;  %v2704_v60 = vld [vmem:[#allocation3 + $0x1c] sm:$0xff] }
 0x2a4   : > { %v1902_v32 = vsel %vm1882_vm15, %v1872_v14, %v1892_v23  ;;  %vm1883_vm1 = vcmp.ge.f32.partialorder %v1873_v15, 0.0  ;;  %v1893_v5 = vmul.f32 0.01, %v1873_v15  ;;  %v1956_v11 = vld [vmem:[#allocation3 + $0x29] sm:$0xff]  ;;  %11332 = vmatpush3.bf16.msra.mxu0 %v12899_v31 }
 0x2a5   : > { %1914 = vst [vmem:[#allocation3 + $0x3b] sm:$0xfc] %v1902_v32  ;;  %v1841_v40 = vpop.f32.mrb[96].mxu1  ;;  %v1962_v41 = vpack.c.bf16 %v1956_v11, %v1955_v17  ;;  %11333 = vmatprep.subr.bf16.mxu0 %v14083_v9  ;;  %v1925_v0 = vld [vmem:[#allocation3 + $0x28] sm:$0xff] }
 0x2a6   : > { %v1903_v22 = vsel %vm1883_vm1, %v1873_v15, %v1893_v5  ;;  %v1856_v35 = vadd.f32 %v1841_v40, %v14051_v34  ;;  %v11287_v43 = vpop.f32.mrb[97].mxu1  ;;  %v1957_v47 = vld [vmem:[#allocation3 + $0x31] sm:$0xff]  ;;  %v1931_v8 = vpack.c.bf16 %v1925_v0, %v1924_v51  ;;  %v12914_v14 = vld [vmem:[%s15987_s1 + $0x350] sm:$0xff]   ;;  %v12917_v5 = vld [vmem:[%s15987_s1 + $0x368] sm:$0xff]  }
 0x2a7   : > { %1915 = vst [vmem:[#allocation3 + $0x43] sm:$0xf3] %v1903_v22   ;;  %v1844_v28 = vpop.f32.mrb[98].mxu1  ;;  %11314 = vmatmul.mubr.bf16.gmra.mrb[96].mxu0 %v1962_v41  ;;  %v1926_v13 = vld [vmem:[#allocation3 + $0x30] sm:$0xff]  ;;  %v2226_v23 = vld [vmem:[#allocation3 + $0x22] sm:$0xff]  ;;  %v12916_v15 = vld [vmem:[%s15987_s1 + $0x360] sm:$0xff]  }
 0x2a8   : > { %v1874_v44 = vadd.f32 %v14058_v27, %v1856_v35  ;;  %v1857_v46 = vadd.f32 %v1844_v28, %v14053_v24  ;;  %v11288_v38 = vpop.f32.mrb[99].mxu1  ;;  %11317 = vmatprep.mubr.msk.bf16.mxu0 %vm13393_vm0, %v14083_v9  ;;  %11334 = vmatpush3.bf16.msra.mxu0 %v12900_v37  ;;  %v2227_v31 = vld [vmem:[#allocation3 + $0x2a] sm:$0xff]  ;;  %v2228_v11 = vld [vmem:[#allocation3 + $0x32] sm:$0xff]  ;;  %v2391_v28 = vpack.c.bf16 %v2224_v42, %v2223_v20 }
 0x2a9   : > { %11335 = vmatprep.subr.bf16.mxu0 %v14083_v9  ;;  %v2233_v32 = vpack.c.bf16 %v2227_v31, %v2226_v23  ;;  %v12918_v37 = vld [vmem:[%s15987_s1 + $0x370] sm:$0xff]   ;;  %v12919_v41 = vld [vmem:[%s15987_s1 + $0x378] sm:$0xff]   ;;  %v12920_v43 = vld [vmem:[%s15987_s1 + $0x380] sm:$0xff]   ;;  %v2392_v38 = vpack.c.bf16 %v2226_v23, %v2225_v26 }
 0x2aa   : > { %vm1884_vm2 = vcmp.ge.f32.partialorder %v1874_v44, 0.0  ;;  %v1894_v34 = vmul.f32 0.01, %v1874_v44  ;;  %v1875_v36 = vadd.f32 %v14058_v27, %v1857_v46  ;;  %v12903_v27 = vld [vmem:[%s15987_s1 + $0x2b8] sm:$0xff]   ;;  %v12922_v46 = vld [vmem:[%s15987_s1 + $0x390] sm:$0xff]   ;;  %v12940_v42 = vld [vmem:[%s15987_s1 + $0x420] sm:$0xff]  }
 0x2ab   : > { %v2546_v1 = vld [vmem:[#allocation3 + $0x2b] sm:$0xff]  ;;  %v2707_v26 = vld [vmem:[#allocation3 + $0x34] sm:$0xff] }
 0x2ac   : > { %v1904_v53 = vsel %vm1884_vm2, %v1874_v44, %v1894_v34  ;;  %vm1885_vm3 = vcmp.ge.f32.partialorder %v1875_v36, 0.0  ;;  %v1895_v54 = vmul.f32 0.01, %v1875_v36  ;;  %v1958_v24 = vld [vmem:[#allocation3 + $0x39] sm:$0xff]  ;;  %11336 = vmatpush3.bf16.msra.mxu0 %v12901_v49  ;;  %v12923_v49 = vld [vmem:[%s15987_s1 + $0x398] sm:$0xff]   ;;  %v12938_v20 = vld [vmem:[%s15987_s1 + $0x410] sm:$0xff]  }
 0x2ad   : > { %1917 = vst [vmem:[#allocation3 + $0x4b] sm:$0xcf] %v1904_v53   ;;  %v1963_v55 = vpack.c.bf16 %v1958_v24, %v1957_v47  ;;  %11337 = vmatprep.subr.bf16.mxu0 %v14083_v9  ;;  %v1927_v61 = vld [vmem:[#allocation3 + $0x38] sm:$0xff]  ;;  %v1928_v58 = vld [vmem:[#allocation3 + $0x40] sm:$0x7]  ;;  %v12926_v47 = vld [vmem:[%s15987_s1 + $0x3b0] sm:$0xff]  }
 0x2ae   : > { %v1905_v50 = vsel %vm1885_vm3, %v1875_v36, %v1895_v54  ;;  %v1959_v39 = vld [vmem:[#allocation3 + $0x41] sm:$0x7]  ;;  %v1932_v16 = vpack.c.bf16 %v1927_v61, %v1926_v13  ;;  %v1933_v19 = vpack.c.bf16 %v1928_v58, %v1928_v58  ;;  %v12924_v34 = vld [vmem:[%s15987_s1 + $0x3a0] sm:$0xff]   ;;  %v2393_v36 = vpack.c.bf16 %v2228_v11, %v2227_v31  ;;  %v12942_v23 = vld [vmem:[%s15987_s1 + $0x430] sm:$0xff]  }
 0x2af   : > { %1919 = vst [vmem:[#allocation3 + $0x53] sm:$0x3f] %v1905_v50  ;;  %11318 = vmatmul.mubr.bf16.gmra.mrb[100].mxu0 %v1963_v55  ;;  %v1964_v52 = vpack.c.bf16 %v1959_v39, %v1959_v39  ;;  %v2229_v17 = vld [vmem:[#allocation3 + $0x3a] sm:$0xff]  ;;  %v2230_v22 = vld [vmem:[#allocation3 + $0x42] sm:$0x7] }
 0x2b0   : > { %11321 = vmatprep.mubr.msk.bf16.mxu0 %vm13393_vm0, %v14083_v9  ;;  %11338 = vmatpush3.bf16.msra.mxu0 %v12902_v33  ;;  %v2234_v40 = vpack.c.bf16 %v2229_v17, %v2228_v11  ;;  %v2235_v35 = vpack.c.bf16 %v2230_v22, %v2230_v22  ;;  %v12921_v44 = vld [vmem:[%s15987_s1 + $0x388] sm:$0xff]   ;;  %v12927_v33 = vld [vmem:[%s15987_s1 + $0x3b8] sm:$0xff]   ;;  %v12928_v39 = vld [vmem:[%s15987_s1 + $0x3c0] sm:$0xff]  }
 0x2b1   : > { %11339 = vmatprep.subr.bf16.mxu0 %v14083_v9  ;;  %v12925_v53 = vld [vmem:[%s15987_s1 + $0x3a8] sm:$0xff]   ;;  %v2703_v13 = vld [vmem:[#allocation3 + $0x14] sm:$0xff] }
 0x2b2   : > { %v2389_v54 = vld [vmem:[#allocation3 + $0x42] sm:$0xff]  ;;  %v12944_v11 = vld [vmem:[%s15987_s1 + $0x440] sm:$0xff]  }
 0x2b3   : > { %v2394_v24 = vpack.c.bf16 %v2389_v54, %v2229_v17  ;;  %v2549_v0 = vld [vmem:[#allocation3 + $0x43] sm:$0xff]  ;;  %v2548_v51 = vld [vmem:[#allocation3 + $0x3b] sm:$0xff] }
 0x2b4   : > { %11340 = vmatpush3.bf16.msra.mxu0 %v12903_v27  ;;  %v2390_v55 = vld [vmem:[#allocation3 + $0x4a] sm:$0x7]  ;;  %v2543_v27 = vld [vmem:[#allocation3 + $0x13] sm:$0xff]  ;;  %v12937_v58 = vld [vmem:[%s15987_s1 + $0x408] sm:$0xff]  }
 0x2b5   : > { %11361 = vmatprep.subr.bf16.mxu0 %v14083_v9  ;;  %v2395_v50 = vpack.c.bf16 %v2390_v55, %v2390_v55  ;;  %v2708_v31 = vld [vmem:[#allocation3 + $0x3c] sm:$0xff] }
 0x2b6   : > { %v3023_v54 = vld [vmem:[#allocation3 + $0x1d] sm:$0xff] }
 0x2b7   : > { %11322 = vmatmul.mubr.bf16.gmra.mrb[104].mxu0 %v1964_v52  ;;  %v2551_v52 = vpack.c.bf16 %v2543_v27, %v14062_v29  ;;  %v12931_v29 = vld [vmem:[%s15987_s1 + $0x3d8] sm:$0xff]   ;;  %v12953_v55 = vld [vmem:[%s15987_s1 + $0x488] sm:$0xff]  }
 0x2b8   : > { %11341 = vmatprep.mubr.msk.bf16.mxu0 %vm13393_vm0, %v14083_v9  ;;  %v3024_v27 = vld [vmem:[#allocation3 + $0x25] sm:$0xff] }
 0x2bf   : > { %11342 = vmatmul.mubr.bf16.vlgmr.msra.gmra.mrb[88].mxu0 %v1929_v45  ;;  %v2544_v45 = vld [vmem:[#allocation3 + $0x1b] sm:$0xff] }
 0x2c0   : > { %11345 = vmatprep.mubr.msk.bf16.mxu0 %vm13393_vm0, %v14083_v9  ;;  %11362 = vmatpush3.bf16.msra.mxu0 %v12904_v62  ;;  %v2545_v62 = vld [vmem:[#allocation3 + $0x23] sm:$0xff] }
 0x2c1   : > { %11363 = vmatprep.subr.bf16.mxu0 %v14083_v9  ;;  %v2552_v3 = vpack.c.bf16 %v2545_v62, %v2544_v45  ;;  %v3027_v62 = vld [vmem:[#allocation3 + $0x3d] sm:$0xff]  ;;  %v3026_v45 = vld [vmem:[#allocation3 + $0x35] sm:$0xff] }
 0x2c4   : > { %11364 = vmatpush3.bf16.msra.mxu0 %v12905_v48  ;;  %v12930_v48 = vld [vmem:[%s15987_s1 + $0x3d0] sm:$0xff]  }
 0x2c5   : > { %11365 = vmatprep.subr.bf16.mxu0 %v14083_v9 }
 0x2c7   : > { %11346 = vmatmul.mubr.bf16.gmra.mrb[92].mxu0 %v1930_v6  ;;  %v2553_v6 = vpack.c.bf16 %v14086_v57, %v2546_v1  ;;  %v12934_v57 = vld [vmem:[%s15987_s1 + $0x3f0] sm:$0xff]  }
 0x2c8   : > { %11349 = vmatprep.mubr.msk.bf16.mxu0 %vm13393_vm0, %v14083_v9  ;;  %11366 = vmatpush3.bf16.msra.mxu0 %v12906_v4  ;;  %v12932_v4 = vld [vmem:[%s15987_s1 + $0x3e0] sm:$0xff]   ;;  %v3029_v1 = vld [vmem:[#allocation3 + $0x4d] sm:$0xff] }
 0x2c9   : > { %11367 = vmatprep.subr.bf16.mxu0 %v14083_v9 }
 0x2cc   : > { %11368 = vmatpush3.bf16.msra.mxu0 %v12907_v7  ;;  %v12933_v7 = vld [vmem:[%s15987_s1 + $0x3e8] sm:$0xff]  }
 0x2cd   : > { %11369 = vmatprep.subr.bf16.mxu0 %v14083_v9 }
 0x2cf   : > { %11350 = vmatmul.mubr.bf16.gmra.mrb[96].mxu0 %v1931_v8  ;;  %v12935_v8 = vld [vmem:[%s15987_s1 + $0x3f8] sm:$0xff]  }
 0x2d0   : > { %11353 = vmatprep.mubr.msk.bf16.mxu0 %vm13393_vm0, %v14083_v9  ;;  %11370 = vmatpush3.bf16.msra.mxu0 %v12908_v59  ;;  %v2554_v59 = vpack.c.bf16 %v2549_v0, %v2548_v51  ;;  %v12959_v0 = vld [vmem:[%s15987_s1 + $0x4b8] sm:$0xff]  }
 0x2d1   : > { %11371 = vmatprep.subr.bf16.mxu0 %v14083_v9  ;;  %v3030_v51 = vld [vmem:[#allocation3 + $0x55] sm:$0x7] }
 0x2d4   : > { %11372 = vmatpush3.bf16.msra.mxu0 %v12909_v12  ;;  %v2550_v12 = vld [vmem:[#allocation3 + $0x4b] sm:$0x7] }
 0x2d5   : > { %11373 = vmatprep.subr.bf16.mxu0 %v14083_v9  ;;  %v2555_v61 = vpack.c.bf16 %v2550_v12, %v2550_v12 }
 0x2d7   : > { %11354 = vmatmul.mubr.bf16.gmra.mrb[100].mxu0 %v1932_v16  ;;  %v12936_v16 = vld [vmem:[%s15987_s1 + $0x400] sm:$0xff]  }
 0x2d8   : > { %11357 = vmatprep.mubr.msk.bf16.mxu0 %vm13393_vm0, %v14083_v9  ;;  %11374 = vmatpush3.bf16.msra.mxu0 %v12910_v63  ;;  %v2702_v63 = vld [vmem:[#allocation3 + $0xc] sm:$0xff] }
 0x2d9   : > { %11375 = vmatprep.subr.bf16.mxu0 %v14083_v9 }
 0x2dc   : > { %11376 = vmatpush3.bf16.msra.mxu0 %v12911_v18  ;;  %v2711_v18 = vpack.c.bf16 %v2703_v13, %v2702_v63 }
 0x2dd   : > { %11397 = vmatprep.subr.bf16.mxu0 %v14083_v9 }
 0x2df   : > { %11358 = vmatmul.mubr.bf16.gmra.mrb[104].mxu0 %v1933_v19  ;;  %v2705_v19 = vld [vmem:[#allocation3 + $0x24] sm:$0xff] }
 0x2e0   : > { %11377 = vmatprep.mubr.msk.bf16.mxu0 %vm13393_vm0, %v14083_v9 }
 0x2e7   : > { %11378 = vmatmul.mubr.bf16.vlgmr.msra.gmra.mrb[88].mxu0 %v2231_v21  ;;  %v12939_v21 = vld [vmem:[%s15987_s1 + $0x418] sm:$0xff]  }
 0x2e8   : > { %11381 = vmatprep.mubr.msk.bf16.mxu0 %vm13393_vm0, %v14083_v9  ;;  %11398 = vmatpush3.bf16.msra.mxu0 %v12912_v2  ;;  %v2712_v2 = vpack.c.bf16 %v2705_v19, %v2704_v60 }
 0x2e9   : > { %11399 = vmatprep.subr.bf16.mxu0 %v14083_v9 }
 0x2ec   : > { %11400 = vmatpush3.bf16.msra.mxu0 %v12913_v25  ;;  %v2706_v25 = vld [vmem:[#allocation3 + $0x2c] sm:$0xff] }
 0x2ed   : > { %11401 = vmatprep.subr.bf16.mxu0 %v14083_v9  ;;  %v2872_v22 = vpack.c.bf16 %v2706_v25, %v2705_v19  ;;  %v3189_v19 = vld [vmem:[#allocation3 + $0x4e] sm:$0xff] }
 0x2ef   : > { %11382 = vmatmul.mubr.bf16.gmra.mrb[92].mxu0 %v2232_v30  ;;  %v12941_v30 = vld [vmem:[%s15987_s1 + $0x428] sm:$0xff]  }
 0x2f0   : > { %11385 = vmatprep.mubr.msk.bf16.mxu0 %vm13393_vm0, %v14083_v9  ;;  %11402 = vmatpush3.bf16.msra.mxu0 %v12914_v14  ;;  %v2713_v14 = vpack.c.bf16 %v2707_v26, %v2706_v25  ;;  %v13394_v25 = vmov 0.0|0.0  }
 0x2f1   : > { %11403 = vmatprep.subr.bf16.mxu0 %v14083_v9  ;;  %12553 = vmatprep.subr.bf16.mxu1 %v13394_v25 }
 0x2f4   : > { %11404 = vmatpush3.bf16.msra.mxu0 %v12915_v10  ;;  %v2709_v10 = vld [vmem:[#allocation3 + $0x44] sm:$0xff] }
 0x2f5   : > { %11405 = vmatprep.subr.bf16.mxu0 %v14083_v9 }
 0x2f7   : > { %11386 = vmatmul.mubr.bf16.gmra.mrb[96].mxu0 %v2233_v32  ;;  %v12943_v32 = vld [vmem:[%s15987_s1 + $0x438] sm:$0xff]  }
 0x2f8   : > { %11389 = vmatprep.mubr.msk.bf16.mxu0 %vm13393_vm0, %v14083_v9  ;;  %11406 = vmatpush3.bf16.msra.mxu0 %v12916_v15  ;;  %v2714_v15 = vpack.c.bf16 %v2709_v10, %v2708_v31 }
 0x2f9   : > { %11407 = vmatprep.subr.bf16.mxu0 %v14083_v9 }
 0x2fc   : > { %11408 = vmatpush3.bf16.msra.mxu0 %v12917_v5  ;;  %v2710_v5 = vld [vmem:[#allocation3 + $0x4c] sm:$0x7] }
 0x2fd   : > { %11409 = vmatprep.subr.bf16.mxu0 %v14083_v9  ;;  %v2715_v17 = vpack.c.bf16 %v2710_v5, %v2710_v5 }
 0x2ff   : > { %11390 = vmatmul.mubr.bf16.gmra.mrb[100].mxu0 %v2234_v40  ;;  %v12945_v40 = vld [vmem:[%s15987_s1 + $0x448] sm:$0xff]  }
 0x300   : > { %11393 = vmatprep.mubr.msk.bf16.mxu0 %vm13393_vm0, %v14083_v9  ;;  %11410 = vmatpush3.bf16.msra.mxu0 %v12918_v37  ;;  %v2871_v37 = vpack.c.bf16 %v2704_v60, %v2703_v13  ;;  %v3184_v13 = vld [vmem:[#allocation3 + $0x26] sm:$0xff] }
 0x301   : > { %11411 = vmatprep.subr.bf16.mxu0 %v14083_v9  ;;  %v3188_v60 = vld [vmem:[#allocation3 + $0x46] sm:$0xff] }
 0x304   : > { %11412 = vmatpush3.bf16.msra.mxu0 %v12919_v41  ;;  %v12946_v41 = vld [vmem:[%s15987_s1 + $0x450] sm:$0xff]  }
 0x305   : > { %11433 = vmatprep.subr.bf16.mxu0 %v14083_v9 }
 0x307   : > { %11394 = vmatmul.mubr.bf16.gmra.mrb[104].mxu0 %v2235_v35  ;;  %v12947_v35 = vld [vmem:[%s15987_s1 + $0x458] sm:$0xff]  }
 0x308   : > { %11413 = vmatprep.mubr.msk.bf16.mxu0 %vm13393_vm0, %v14083_v9 }
 0x30f   : > { %11414 = vmatmul.mubr.bf16.vlgmr.msra.gmra.mrb[88].mxu0 %v2391_v28  ;;  %v2873_v28 = vpack.c.bf16 %v2708_v31, %v2707_v26 }
 0x310   : > { %11417 = vmatprep.mubr.msk.bf16.mxu0 %vm13393_vm0, %v14083_v9  ;;  %11434 = vmatpush3.bf16.msra.mxu0 %v12920_v43  ;;  %v12948_v43 = vld [vmem:[%s15987_s1 + $0x460] sm:$0xff]  }
 0x311   : > { %11435 = vmatprep.subr.bf16.mxu0 %v14083_v9 }
 0x314   : > { %11436 = vmatpush3.bf16.msra.mxu0 %v12921_v44  ;;  %v12949_v44 = vld [vmem:[%s15987_s1 + $0x468] sm:$0xff]  }
 0x315   : > { %11437 = vmatprep.subr.bf16.mxu0 %v14083_v9 }
 0x317   : > { %11418 = vmatmul.mubr.bf16.gmra.mrb[92].mxu0 %v2392_v38  ;;  %v12950_v38 = vld [vmem:[%s15987_s1 + $0x470] sm:$0xff]  }
 0x318   : > { %11421 = vmatprep.mubr.msk.bf16.mxu0 %vm13393_vm0, %v14083_v9  ;;  %11438 = vmatpush3.bf16.msra.mxu0 %v12922_v46  ;;  %v2869_v46 = vld [vmem:[#allocation3 + $0x4c] sm:$0xff] }
 0x319   : > { %11439 = vmatprep.subr.bf16.mxu0 %v14083_v9 }
 0x31c   : > { %11440 = vmatpush3.bf16.msra.mxu0 %v12923_v49  ;;  %v2874_v49 = vpack.c.bf16 %v2869_v46, %v2709_v10 }
 0x31d   : > { %11441 = vmatprep.subr.bf16.mxu0 %v14083_v9 }
 0x31f   : > { %11422 = vmatmul.mubr.bf16.gmra.mrb[96].mxu0 %v2393_v36  ;;  %v2870_v36 = vld [vmem:[#allocation3 + $0x54] sm:$0x7] }
 0x320   : > { %11425 = vmatprep.mubr.msk.bf16.mxu0 %vm13393_vm0, %v14083_v9  ;;  %11442 = vmatpush3.bf16.msra.mxu0 %v12924_v34  ;;  %v12951_v34 = vld [vmem:[%s15987_s1 + $0x478] sm:$0xff]  }
 0x321   : > { %11443 = vmatprep.subr.bf16.mxu0 %v14083_v9 }
 0x324   : > { %11444 = vmatpush3.bf16.msra.mxu0 %v12925_v53  ;;  %v2875_v53 = vpack.c.bf16 %v2870_v36, %v2870_v36 }
 0x325   : > { %11445 = vmatprep.subr.bf16.mxu0 %v14083_v9 }
 0x327   : > { %11426 = vmatmul.mubr.bf16.gmra.mrb[100].mxu0 %v2394_v24  ;;  %v12952_v24 = vld [vmem:[%s15987_s1 + $0x480] sm:$0xff]  }
 0x328   : > { %11429 = vmatprep.mubr.msk.bf16.mxu0 %vm13393_vm0, %v14083_v9  ;;  %11446 = vmatpush3.bf16.msra.mxu0 %v12926_v47  ;;  %v3022_v47 = vld [vmem:[#allocation3 + $0x15] sm:$0xff] }
 0x329   : > { %11447 = vmatprep.subr.bf16.mxu0 %v14083_v9 }
 0x32c   : > { %11448 = vmatpush3.bf16.msra.mxu0 %v12927_v33  ;;  %v3031_v33 = vpack.c.bf16 %v3023_v54, %v3022_v47  ;;  %v12960_v47 = vld [vmem:[%s15987_s1 + $0x500] sm:$0xff]  }
 0x32d   : > { %11469 = vmatprep.subr.bf16.mxu0 %v14083_v9 }
 0x32f   : > { %11430 = vmatmul.mubr.bf16.gmra.mrb[104].mxu0 %v2395_v50  ;;  %v3025_v50 = vld [vmem:[#allocation3 + $0x2d] sm:$0xff] }
 0x330   : > { %11449 = vmatprep.mubr.msk.bf16.mxu0 %vm13393_vm0, %v14083_v9 }
 0x337   : > { %11450 = vmatmul.mubr.bf16.vlgmr.msra.gmra.mrb[88].mxu0 %v2551_v52  ;;  %v3032_v52 = vpack.c.bf16 %v3025_v50, %v3024_v27 }
 0x338   : > { %11453 = vmatprep.mubr.msk.bf16.mxu0 %vm13393_vm0, %v14083_v9  ;;  %11470 = vmatpush3.bf16.msra.mxu0 %v12928_v39  ;;  %v12954_v39 = vld [vmem:[%s15987_s1 + $0x490] sm:$0xff]  }
 0x339   : > { %11471 = vmatprep.subr.bf16.mxu0 %v14083_v9 }
 0x33c   : > { %11472 = vmatpush3.bf16.msra.mxu0 %v12929_v56  ;;  %v12955_v56 = vld [vmem:[%s15987_s1 + $0x498] sm:$0xff]  }
 0x33d   : > { %11473 = vmatprep.subr.bf16.mxu0 %v14083_v9 }
 0x33f   : > { %11454 = vmatmul.mubr.bf16.gmra.mrb[92].mxu0 %v2552_v3  ;;  %v3033_v3 = vpack.c.bf16 %v3027_v62, %v3026_v45 }
 0x340   : > { %11457 = vmatprep.mubr.msk.bf16.mxu0 %vm13393_vm0, %v14083_v9  ;;  %11474 = vmatpush3.bf16.msra.mxu0 %v12930_v48  ;;  %v12956_v48 = vld [vmem:[%s15987_s1 + $0x4a0] sm:$0xff]  }
 0x341   : > { %11475 = vmatprep.subr.bf16.mxu0 %v14083_v9 }
 0x344   : > { %11476 = vmatpush3.bf16.msra.mxu0 %v12931_v29  ;;  %v12957_v29 = vld [vmem:[%s15987_s1 + $0x4a8] sm:$0xff]  }
 0x345   : > { %11477 = vmatprep.subr.bf16.mxu0 %v14083_v9 }
 0x347   : > { %11458 = vmatmul.mubr.bf16.gmra.mrb[96].mxu0 %v2553_v6  ;;  %v12958_v6 = vld [vmem:[%s15987_s1 + $0x4b0] sm:$0xff]  }
 0x348   : > { %11461 = vmatprep.mubr.msk.bf16.mxu0 %vm13393_vm0, %v14083_v9  ;;  %11478 = vmatpush3.bf16.msra.mxu0 %v12932_v4  ;;  %v3028_v4 = vld [vmem:[#allocation3 + $0x45] sm:$0xff] }
 0x349   : > { %11479 = vmatprep.subr.bf16.mxu0 %v14083_v9 }
 0x34c   : > { %11480 = vmatpush3.bf16.msra.mxu0 %v12933_v7  ;;  %v3034_v7 = vpack.c.bf16 %v3029_v1, %v3028_v4 }
 0x34d   : > { %11481 = vmatprep.subr.bf16.mxu0 %v14083_v9 }
 0x34f   : > { %11462 = vmatmul.mubr.bf16.gmra.mrb[100].mxu0 %v2554_v59  ;;  %v3183_v59 = vld [vmem:[#allocation3 + $0x1e] sm:$0xff] }
 0x350   : > { %11465 = vmatprep.mubr.msk.bf16.mxu0 %vm13393_vm0, %v14083_v9  ;;  %11482 = vmatpush3.bf16.msra.mxu0 %v12934_v57  ;;  %v3035_v57 = vpack.c.bf16 %v3030_v51, %v3030_v51  ;;  %v12964_v51 = vld [vmem:[%s15987_s1 + $0x520] sm:$0xff]  }
 0x351   : > { %11483 = vmatprep.subr.bf16.mxu0 %v14083_v9 }
 0x354   : > { %11484 = vmatpush3.bf16.msra.mxu0 %v12935_v8  ;;  %v3182_v8 = vld [vmem:[#allocation3 + $0x16] sm:$0xff] }
 0x355   : > { %11505 = vmatprep.subr.bf16.mxu0 %v14083_v9  ;;  %v3191_v12 = vpack.c.bf16 %v3183_v59, %v3182_v8  ;;  %v12967_v59 = vld [vmem:[%s15987_s1 + $0x538] sm:$0xff]   ;;  %v12968_v8 = vld [vmem:[%s15987_s1 + $0x4c0] sm:$0xff]  }
 0x357   : > { %11466 = vmatmul.mubr.bf16.gmra.mrb[104].mxu0 %v2555_v61  ;;  %v3185_v61 = vld [vmem:[#allocation3 + $0x2e] sm:$0xff] }
 0x358   : > { %11485 = vmatprep.mubr.msk.bf16.mxu0 %vm13393_vm0, %v14083_v9  ;;  %v3192_v63 = vpack.c.bf16 %v3185_v61, %v3184_v13 }
 0x35f   : > { %11486 = vmatmul.mubr.bf16.vlgmr.msra.gmra.mrb[88].mxu0 %v2711_v18  ;;  %v3186_v18 = vld [vmem:[#allocation3 + $0x36] sm:$0xff] }
 0x360   : > { %11489 = vmatprep.mubr.msk.bf16.mxu0 %vm13393_vm0, %v14083_v9  ;;  %11506 = vmatpush3.bf16.msra.mxu0 %v12936_v16  ;;  %v3187_v16 = vld [vmem:[#allocation3 + $0x3e] sm:$0xff] }
 0x361   : > { %11507 = vmatprep.subr.bf16.mxu0 %v14083_v9 }
 0x364   : > { %11508 = vmatpush3.bf16.msra.mxu0 %v12937_v58  ;;  %v3193_v58 = vpack.c.bf16 %v3187_v16, %v3186_v18 }
 0x365   : > { %11509 = vmatprep.subr.bf16.mxu0 %v14083_v9 }
 0x367   : > { %11490 = vmatmul.mubr.bf16.gmra.mrb[92].mxu0 %v2712_v2  ;;  %v3190_v2 = vld [vmem:[#allocation3 + $0x56] sm:$0x7] }
 0x368   : > { %11493 = vmatprep.mubr.msk.bf16.mxu0 %vm13393_vm0, %v14083_v9  ;;  %11510 = vmatpush3.bf16.msra.mxu0 %v12938_v20  ;;  %v3194_v20 = vpack.c.bf16 %v3189_v19, %v3188_v60 }
 0x369   : > { %11511 = vmatprep.subr.bf16.mxu0 %v14083_v9 }
 0x36c   : > { %11512 = vmatpush3.bf16.msra.mxu0 %v12939_v21  ;;  %v3195_v21 = vpack.c.bf16 %v3190_v2, %v3190_v2 }
 0x36d   : > { %11513 = vmatprep.subr.bf16.mxu0 %v14083_v9 }
 0x36f   : > { %11494 = vmatmul.mubr.bf16.gmra.mrb[96].mxu0 %v2713_v14 }
 0x370   : > { %11497 = vmatprep.mubr.msk.bf16.mxu0 %vm13393_vm0, %v14083_v9  ;;  %11514 = vmatpush3.bf16.msra.mxu0 %v12940_v42 }
 0x371   : > { %11515 = vmatprep.subr.bf16.mxu0 %v14083_v9 }
 0x374   : > { %11516 = vmatpush3.bf16.msra.mxu0 %v12941_v30 }
 0x375   : > { %11517 = vmatprep.subr.bf16.mxu0 %v14083_v9 }
 0x377   : > { %11498 = vmatmul.mubr.bf16.gmra.mrb[100].mxu0 %v2714_v15 }
 0x378   : > { %11501 = vmatprep.mubr.msk.bf16.mxu0 %vm13393_vm0, %v14083_v9  ;;  %11518 = vmatpush3.bf16.msra.mxu0 %v12942_v23 }
 0x379   : > { %11519 = vmatprep.subr.bf16.mxu0 %v14083_v9 }
 0x37c   : > { %11520 = vmatpush3.bf16.msra.mxu0 %v12943_v32 }
 0x37d   : > { %11541 = vmatprep.subr.bf16.mxu0 %v14083_v9 }
 0x37f   : > { %11502 = vmatmul.mubr.bf16.gmra.mrb[104].mxu0 %v2715_v17 }
 0x380   : > { %11521 = vmatprep.mubr.msk.bf16.mxu0 %vm13393_vm0, %v14083_v9 }
 0x387   : > { %11522 = vmatmul.mubr.bf16.vlgmr.msra.gmra.mrb[88].mxu0 %v2871_v37 }
 0x388   : > { %11525 = vmatprep.mubr.msk.bf16.mxu0 %vm13393_vm0, %v14083_v9  ;;  %11542 = vmatpush3.bf16.msra.mxu0 %v12944_v11  ;;  %v3342_v11 = vlaneseq }
 0x389   : > { %11543 = vmatprep.subr.bf16.mxu0 %v14083_v9 }
 0x38c   : > { %11544 = vmatpush3.bf16.msra.mxu0 %v12945_v40 }
 0x38d   : > { %11545 = vmatprep.subr.bf16.mxu0 %v14083_v9 }
 0x38f   : > { %11526 = vmatmul.mubr.bf16.gmra.mrb[92].mxu0 %v2872_v22 }
 0x390   : > { %11529 = vmatprep.mubr.msk.bf16.mxu0 %vm13393_vm0, %v14083_v9  ;;  %11546 = vmatpush3.bf16.msra.mxu0 %v12946_v41 }
 0x391   : > { %11547 = vmatprep.subr.bf16.mxu0 %v14083_v9 }
 0x394   : > { %11548 = vmatpush3.bf16.msra.mxu0 %v12947_v35  ;;  %v3343_v35 = vshrl.u32 %v3342_v11, 7 }
 0x395   : > { %11549 = vmatprep.subr.bf16.mxu0 %v14083_v9 }
 0x396   : > { %v3344_v46 = vadd.s32 8, %v3343_v35  ;;  %v3345_v54 = vadd.s32 16, %v3343_v35  ;;  %v3346_v27 = vadd.s32 24, %v3343_v35 }
 0x397   : > { %11530 = vmatmul.mubr.bf16.gmra.mrb[96].mxu0 %v2873_v28  ;;  %v3349_v28 = vand.u32 127, %v3342_v11 }
 0x398   : > { %11533 = vmatprep.mubr.msk.bf16.mxu0 %vm13393_vm0, %v14083_v9  ;;  %11550 = vmatpush3.bf16.msra.mxu0 %v12948_v43  ;;  %v3352_v50 = vmul.u32 2, %v3345_v54  ;;  %v12974_v54 = vld [vmem:[%s15987_s1 + $0x4f0] sm:$0xff]  }
 0x399   : > { %11551 = vmatprep.subr.bf16.mxu0 %v14083_v9 }
 0x39a   : > { %vm3357_vm8 = vcmp.eq.s32.totalorder %v3349_v28, %v3352_v50 }
 0x39b   : > { %v9159_v1 = vsel %vm3357_vm8, 1.0, %v14083_v9 }
 0x39c   : > { %11552 = vmatpush3.bf16.msra.mxu0 %v12949_v44  ;;  %v3350_v44 = vmul.u32 2, %v3343_v35 }
 0x39d   : > { %11553 = vmatprep.subr.bf16.mxu0 %v14083_v9 }
 0x39e   : > { %vm3355_vm4 = vcmp.eq.s32.totalorder %v3349_v28, %v3350_v44 }
 0x39f   : > { %11534 = vmatmul.mubr.bf16.gmra.mrb[100].mxu0 %v2874_v49 }
 0x3a0   : > { %11537 = vmatprep.mubr.msk.bf16.mxu0 %vm13393_vm0, %v14083_v9  ;;  %11554 = vmatpush3.bf16.msra.mxu0 %v12950_v38 }
 0x3a1   : > { %11555 = vmatprep.subr.bf16.mxu0 %v14083_v9 }
 0x3a4   : > { %11556 = vmatpush3.bf16.msra.mxu0 %v12951_v34 }
 0x3a5   : > { %11577 = vmatprep.subr.bf16.mxu0 %v14083_v9 }
 0x3a7   : > { %11538 = vmatmul.mubr.bf16.gmra.mrb[104].mxu0 %v2875_v53  ;;  %v3351_v53 = vmul.u32 2, %v3344_v46  ;;  %v12969_v46 = vld [vmem:[%s15987_s1 + $0x4c8] sm:$0xff]  }
 0x3a8   : > { %11557 = vmatprep.mubr.msk.bf16.mxu0 %vm13393_vm0, %v14083_v9 }
 0x3a9   : > { %vm14439_vm7 = vcmp.eq.s32.totalorder %v3349_v28, %v3351_v53  ;;  %v12973_v53 = vld [vmem:[%s15987_s1 + $0x4e8] sm:$0xff]  }
 0x3aa   : > { %v9158_v45 = vsel %vm14439_vm7, 1.0, %v14083_v9  ;;  %vm5619_vm7 = vcmask 121856  }
 0x3af   : > { %11558 = vmatmul.mubr.bf16.vlgmr.msra.gmra.mrb[88].mxu0 %v3031_v33 }
 0x3b0   : > { %11561 = vmatprep.mubr.msk.bf16.mxu0 %vm13393_vm0, %v14083_v9  ;;  %11578 = vmatpush3.bf16.msra.mxu0 %v12952_v24  ;;  %v14437_v24 = vsel %vm3355_vm4, 1.0, %v14083_v9  ;;  %vm5622_vm4 = vcmask 1046528  }
 0x3b1   : > { %11579 = vmatprep.subr.bf16.mxu0 %v14083_v9 }
 0x3b4   : > { %11580 = vmatpush3.bf16.msra.mxu0 %v12953_v55 }
 0x3b5   : > { %11581 = vmatprep.subr.bf16.mxu0 %v14083_v9 }
 0x3b7   : > { %11562 = vmatmul.mubr.bf16.gmra.mrb[92].mxu0 %v3032_v52 }
 0x3b8   : > { %11565 = vmatprep.mubr.msk.bf16.mxu0 %vm13393_vm0, %v14083_v9  ;;  %11582 = vmatpush3.bf16.msra.mxu0 %v12954_v39  ;;  %v12961_v39 = vld [vmem:[%s15987_s1 + $0x508] sm:$0xff]  }
 0x3b9   : > { %11583 = vmatprep.subr.bf16.mxu0 %v14083_v9 }
 0x3bc   : > { %11584 = vmatpush3.bf16.msra.mxu0 %v12955_v56 }
 0x3bd   : > { %11585 = vmatprep.subr.bf16.mxu0 %v14083_v9 }
 0x3bf   : > { %11566 = vmatmul.mubr.bf16.gmra.mrb[96].mxu0 %v3033_v3  ;;  %v3347_v3 = vadd.s32 32, %v3343_v35 }
 0x3c0   : > { %11569 = vmatprep.mubr.msk.bf16.mxu0 %vm13393_vm0, %v14083_v9  ;;  %11586 = vmatpush3.bf16.msra.mxu0 %v12956_v48  ;;  %v3353_v48 = vmul.u32 2, %v3346_v27 }
 0x3c1   : > { %11587 = vmatprep.subr.bf16.mxu0 %v14083_v9  ;;  %v3354_v4 = vmul.u32 2, %v3347_v3  ;;  %v12981_v3 = vld [vmem:[%s15987_s1 + $0x568] sm:$0xff]  }
 0x3c2   : > { %vm3358_vm9 = vcmp.eq.s32.totalorder %v3349_v28, %v3353_v48  ;;  %v12980_v48 = vld [vmem:[%s15987_s1 + $0x560] sm:$0xff]  }
 0x3c3   : > { %vm3359_vm10 = vcmp.eq.s32.totalorder %v3349_v28, %v3354_v4  ;;  %v12984_v4 = vld [vmem:[%s15987_s1 + $0x580] sm:$0xff]  }
 0x3c4   : > { %11588 = vmatpush3.bf16.msra.mxu0 %v12957_v29  ;;  %v12962_v29 = vld [vmem:[%s15987_s1 + $0x510] sm:$0xff]  }
 0x3c5   : > { %11589 = vmatprep.subr.bf16.mxu0 %v14083_v9 }
 0x3c7   : > { %11570 = vmatmul.mubr.bf16.gmra.mrb[100].mxu0 %v3034_v7  ;;  %v9161_v7 = vsel %vm3359_vm10, 1.0, %v14083_v9 }
 0x3c8   : > { %11573 = vmatprep.mubr.msk.bf16.mxu0 %vm13393_vm0, %v14083_v9  ;;  %11590 = vmatpush3.bf16.msra.mxu0 %v12958_v6  ;;  %v9160_v6 = vsel %vm3358_vm9, 1.0, %v14083_v9 }
 0x3c9   : > { %11591 = vmatprep.subr.bf16.mxu0 %v14083_v9 }
 0x3cc   : > { %11592 = vmatpush3.bf16.msra.mxu0 %v12959_v0  ;;  %v12963_v0 = vld [vmem:[%s15987_s1 + $0x518] sm:$0xff]  }
 0x3cd   : > { %12565 = vmatprep.subr.bf16.mxu0 %v13394_v25 }
 0x3cf   : > { %11574 = vmatmul.mubr.bf16.gmra.mrb[104].mxu0 %v3035_v57  ;;  %v12965_v57 = vld [vmem:[%s15987_s1 + $0x528] sm:$0xff]  }
 0x3d0   : > { %11593 = vmatprep.mubr.msk.bf16.mxu0 %vm13393_vm0, %v14083_v9 }
 0x3d7   : > { %11594 = vmatmul.mubr.bf16.vlgmr.msra.gmra.mrb[88].mxu0 %v3191_v12  ;;  %v9163_v12 = vld [vmem:[%s15988_s2 + $0x2] ss:$0 sm:$0xff] }
 0x3d8   : > { %11597 = vmatprep.mubr.msk.bf16.mxu0 %vm13393_vm0, %v14083_v9 }
 0x3df   : > { %11598 = vmatmul.mubr.bf16.gmra.mrb[92].mxu0 %v3192_v63 }
 0x3e0   : > { %11601 = vmatprep.mubr.msk.bf16.mxu0 %vm13393_vm0, %v14083_v9 }
 0x3e7   : > { %11602 = vmatmul.mubr.bf16.gmra.mrb[96].mxu0 %v3193_v58 }
 0x3e8   : > { %11605 = vmatprep.mubr.msk.bf16.mxu0 %vm13393_vm0, %v14083_v9 }
 0x3ef   : > { %11606 = vmatmul.mubr.bf16.gmra.mrb[100].mxu0 %v3194_v20 }
 0x3f0   : > { %11609 = vmatprep.mubr.msk.bf16.mxu0 %vm13393_vm0, %v14083_v9 }
 0x3f7   : > { %11610 = vmatmul.mubr.bf16.gmra.mrb[104].mxu0 %v3195_v21 }
 0x3f8   : > { %12010 = vmatprep.mubr.msk.f32.mxu0 %vm13393_vm0, %v14083_v9 }
 0x4aa   : > { %v3295_v26 = vpop.f32.mrb[88].mxu0 }
 0x4ab   : > { %v11595_v42 = vpop.f32.mrb[89].mxu0 }
 0x4ac   : > { %v3298_v14 = vpop.f32.mrb[90].mxu0 }
 0x4ad   : > { %v12554_v30 = vpack.c.bf16 %v3298_v14, %v3295_v26  ;;  %v11596_v10 = vpop.f32.mrb[91].mxu0 }
 0x4af   : > { %12555 = vmatpush3.bf16.msra.mxu1 %v12554_v30 }
 0x4b0   : > { %12556 = vmatprep.subr.bf16.mxu1 %v13394_v25 }
 0x4b2   : > { %v3303_v31 = vpop.f32.mrb[92].mxu0 }
 0x4b3   : > { %v11599_v23 = vpop.f32.mrb[93].mxu0 }
 0x4b4   : > { %v3306_v15 = vpop.f32.mrb[94].mxu0 }
 0x4b5   : > { %v12557_v32 = vpack.c.bf16 %v3306_v15, %v3303_v31  ;;  %v11600_v5 = vpop.f32.mrb[95].mxu0 }
 0x4b7   : > { %12558 = vmatpush3.bf16.msra.mxu1 %v12557_v32 }
 0x4b8   : > { %12559 = vmatprep.subr.bf16.mxu1 %v13394_v25 }
 0x4ba   : > { %v3311_v17 = vpop.f32.mrb[96].mxu0 }
 0x4bb   : > { %v11603_v37 = vpop.f32.mrb[97].mxu0 }
 0x4bc   : > { %v3314_v40 = vpop.f32.mrb[98].mxu0 }
 0x4bd   : > { %v12560_v41 = vpack.c.bf16 %v3314_v40, %v3311_v17  ;;  %v11604_v22 = vpop.f32.mrb[99].mxu0 }
 0x4bf   : > { %12561 = vmatpush3.bf16.msra.mxu1 %v12560_v41 }
 0x4c0   : > { %12562 = vmatprep.subr.bf16.mxu1 %v13394_v25 }
 0x4c2   : > { %v3319_v43 = vpop.f32.mrb[100].mxu0 }
 0x4c3   : > { %v11607_v38 = vpop.f32.mrb[101].mxu0 }
 0x4c4   : > { %v3322_v49 = vpop.f32.mrb[102].mxu0 }
 0x4c5   : > { %v12563_v34 = vpack.c.bf16 %v3322_v49, %v3319_v43  ;;  %v11608_v36 = vpop.f32.mrb[103].mxu0  ;;  %v12970_v49 = vld [vmem:[%s15987_s1 + $0x4d0] sm:$0xff]  }
 0x4c6   : > { %v12972_v36 = vld [vmem:[%s15987_s1 + $0x4e0] sm:$0xff]  }
 0x4c7   : > { %12564 = vmatpush3.bf16.msra.mxu1 %v12563_v34  ;;  %v12971_v34 = vld [vmem:[%s15987_s1 + $0x4d8] sm:$0xff]  }
 0x4c8   : > { %11629 = vmatprep.subr.mxu1 %v14083_v9 }
 0x4ca   : > { %v3327_v33 = vpop.f32.mrb[104].mxu0 }
 0x4cb   : > { %v11611_v52 = vpop.f32.mrb[105].mxu0  ;;  %11630 = vmatpush3.msk.msra.mxu1 %vm3394_vm5, %v3327_v33  ;;  %v12976_v33 = vld [vmem:[%s15987_s1 + $0x540] sm:$0xff]   ;;  %vm13395_vm5 = vmmov 1  }
 0x4cc   : > { %v3330_v56 = vpop.f32.mrb[106].mxu0  ;;  %11632 = vmatmul.mubr.msk.f32.vlgmr.msra.gmra.mrb[100].mxu1 %vm3378_vm6, %v14437_v24  ;;  %11646 = vmatprep.subr.bf16.mxu1 %v12960_v47  ;;  %v12977_v52 = vld [vmem:[%s15987_s1 + $0x548] sm:$0xff]  }
 0x4cd   : > { %v11612_v62 = vpop.f32.mrb[107].mxu0  ;;  %11634 = vmatprep.mubr.msk.f32.mxu1 %vm13393_vm0, %v14083_v9  ;;  %11647 = vmatpush3.bf16.msra.mxu1 %v12960_v47  ;;  %v12975_v47 = vld [vmem:[%s15987_s1 + $0x4f8] sm:$0xff]  }
 0x4ce   : > { %11648 = vmatprep.subr.bf16.mxu1 %v12961_v39  ;;  %v12978_v62 = vld [vmem:[%s15987_s1 + $0x550] sm:$0xff]  }
 0x4d0   : > { %11635 = vmatmul.mubr.msk.f32.gmra.mrb[102].mxu1 %vm3378_vm6, %v9158_v45  ;;  %v12979_v45 = vld [vmem:[%s15987_s1 + $0x558] sm:$0xff]  }
 0x4d1   : > { %11637 = vmatprep.mubr.msk.f32.mxu1 %vm13393_vm0, %v14083_v9  ;;  %11649 = vmatpush3.bf16.msra.mxu1 %v12961_v39 }
 0x4d2   : > { %11650 = vmatprep.subr.bf16.mxu1 %v12962_v29 }
 0x4d4   : > { %11638 = vmatmul.mubr.msk.f32.gmra.mrb[104].mxu1 %vm3378_vm6, %v9159_v1  ;;  %v12983_v1 = vld [vmem:[%s15987_s1 + $0x578] sm:$0xff]  }
 0x4d5   : > { %11640 = vmatprep.mubr.msk.f32.mxu1 %vm13393_vm0, %v14083_v9  ;;  %11651 = vmatpush3.bf16.msra.mxu1 %v12962_v29  ;;  %v12982_v29 = vld [vmem:[%s15987_s1 + $0x570] sm:$0xff]  }
 0x4d6   : > { %11652 = vmatprep.subr.bf16.mxu1 %v12963_v0 }
 0x4d8   : > { %11641 = vmatmul.mubr.msk.f32.gmra.mrb[106].mxu1 %vm3378_vm6, %v9160_v6 }
 0x4d9   : > { %11643 = vmatprep.mubr.msk.f32.mxu1 %vm13393_vm0, %v14083_v9  ;;  %11653 = vmatpush3.bf16.msra.mxu1 %v12963_v0  ;;  %v12966_v9 = vld [vmem:[%s15987_s1 + $0x530] sm:$0xff]  }
 0x4da   : > { %11654 = vmatprep.subr.bf16.mxu1 %v12964_v51 }
 0x4dc   : > { %11644 = vmatmul.mubr.msk.f32.gmra.mrb[108].mxu1 %vm3378_vm6, %v9161_v7  ;;  %vm12567_vm6 = vmpackc.low %vm5622_vm4, %vm13395_vm5 }
 0x4dd   : > { %11655 = vmatpush3.bf16.msra.mxu1 %v12964_v51 }
 0x4de   : > { %11656 = vmatprep.subr.bf16.mxu1 %v12965_v57 }
 0x4e1   : > { %11657 = vmatpush3.bf16.msra.mxu1 %v12965_v57  ;;  %v12985_v57 = vld [vmem:[%s15987_s1 + $0x588] sm:$0xff]  }
 0x4e2   : > { %11658 = vmatprep.subr.bf16.mxu1 %v12966_v9 }
 0x4e5   : > { %11659 = vmatpush3.bf16.msra.mxu1 %v12966_v9 }
 0x4e6   : > { %11660 = vmatprep.subr.bf16.mxu1 %v12967_v59 }
 0x4e9   : > { %11661 = vmatpush3.bf16.msra.mxu1 %v12967_v59  ;;  %v12986_v59 = vld [vmem:[%s15987_s1 + $0x590] sm:$0xff]  }
 0x4ea   : > { %11666 = vmatprep.subr.bf16.mxu1 %v12968_v8 }
 0x59f   : > { %v3464_v61 = vpop.f32.mrb[100].mxu1 }
 0x5a0   : > { %v3465_v13 = vadd.f32 %v9163_v12, %v3464_v61  ;;  %v11633_v63 = vpop.f32.mrb[101].mxu1  ;;  %v12989_v61 = vld [vmem:[%s15987_s1 + $0x5a8] sm:$0xff]  }
 0x5a1   : > { %v12991_v63 = vld [vmem:[%s15987_s1 + $0x5b8] sm:$0xff]  }
 0x5a2   : > { %vm3488_vm11 = vcmp.ge.f32.partialorder %v3465_v13, 0.0  ;;  %v3493_v16 = vmul.f32 0.01, %v3465_v13 }
 0x5a3   : > { %v3469_v18 = vpop.f32.mrb[102].mxu1 }
 0x5a4   : > { %v3498_v58 = vsel %vm3488_vm11, %v3465_v13, %v3493_v16  ;;  %v3470_v19 = vadd.f32 %v9163_v12, %v3469_v18  ;;  %v11636_v60 = vpop.f32.mrb[103].mxu1  ;;  %v12990_v13 = vld [vmem:[%s15987_s1 + $0x5b0] sm:$0xff]   ;;  %v12992_v16 = vld [vmem:[%s15987_s1 + $0x5c0] sm:$0xff]  }
 0x5a5   : > { %3503 = vst [vmem:[#allocation4 + $0x7] sm:$0xf] %v3498_v58 }
 0x5a6   : > { %vm3489_vm12 = vcmp.ge.f32.partialorder %v3470_v19, 0.0  ;;  %v3494_v20 = vmul.f32 0.01, %v3470_v19 }
 0x5a7   : > { %v3474_v2 = vpop.f32.mrb[104].mxu1 }
 0x5a8   : > { %v3499_v21 = vsel %vm3489_vm12, %v3470_v19, %v3494_v20  ;;  %v3475_v25 = vadd.f32 %v9163_v12, %v3474_v2  ;;  %v11639_v26 = vpop.f32.mrb[105].mxu1  ;;  %v12993_v20 = vld [vmem:[%s15987_s1 + $0x5c8] sm:$0xff]  }
 0x5a9   : > { %3504 = vst [vmem:[#allocation4 + $0xb] sm:$0x3c] %v3499_v21  ;;  %v12994_v21 = vld [vmem:[%s15987_s1 + $0x5d0] sm:$0xff]   ;;  %v12996_v26 = vld [vmem:[%s15987_s1 + $0x5e0] sm:$0xff]  }
 0x5aa   : > { %vm3490_vm13 = vcmp.ge.f32.partialorder %v3475_v25, 0.0  ;;  %v3495_v42 = vmul.f32 0.01, %v3475_v25 }
 0x5ab   : > { %v3479_v14 = vpop.f32.mrb[106].mxu1 }
 0x5ac   : > { %v3500_v30 = vsel %vm3490_vm13, %v3475_v25, %v3495_v42  ;;  %v3480_v10 = vadd.f32 %v9163_v12, %v3479_v14  ;;  %v11642_v31 = vpop.f32.mrb[107].mxu1  ;;  %v3530_v17 = vld [vmem:[#allocation4 + $0x1] sm:$0xff]  ;;  %v12997_v42 = vld [vmem:[%s15987_s1 + $0x5e8] sm:$0xff]  }
 0x5ad   : > { %3505 = vst [vmem:[#allocation4 + $0xf] sm:$0xf0] %v3500_v30  ;;  %v3508_v44 = vld [vmem:[#allocation4] sm:$0xff]  ;;  %v12995_v25 = vld [vmem:[%s15987_s1 + $0x5d8] sm:$0xff]  }
 0x5ae   : > { %vm3491_vm14 = vcmp.ge.f32.partialorder %v3480_v10, 0.0  ;;  %v3496_v23 = vmul.f32 0.01, %v3480_v10  ;;  %v3744_v39 = vld [vmem:[#allocation4 + $0x2] sm:$0xff] }
 0x5af   : > { %v3484_v15 = vpop.f32.mrb[108].mxu1  ;;  %v12998_v14 = vld [vmem:[%s15987_s1 + $0x5f0] sm:$0xff]   ;;  %v12999_v30 = vld [vmem:[%s15987_s1 + $0x5f8] sm:$0xff]  }
 0x5b0   : > { %v3501_v32 = vsel %vm3491_vm14, %v3480_v10, %v3496_v23  ;;  %v3485_v5 = vadd.f32 %v9163_v12, %v3484_v15  ;;  %v3531_v11 = vld [vmem:[#allocation4 + $0x9] sm:$0xff]  ;;  %v11645_v37 = vpop.f32.mrb[109].mxu1 }
 0x5b1   : > { %3506 = vst [vmem:[#allocation4 + $0x13] sm:$0xc0] %v3501_v32  ;;  %v3533_v40 = vpack.c.bf16 %v3531_v11, %v3530_v17  ;;  %v14490_v22 = vld [vmem:[#allocation4 + $0x8] sm:$0xff]  ;;  %v12988_v12 = vld [vmem:[%s15987_s1 + $0x5a0] sm:$0xff]   ;;  %v13001_v32 = vld [vmem:[%s15987_s1 + $0x608] sm:$0xff]  }
 0x5b2   : > { %vm3492_vm15 = vcmp.ge.f32.partialorder %v3485_v5, 0.0  ;;  %v3497_v41 = vmul.f32 0.01, %v3485_v5  ;;  %v3511_v38 = vpack.c.bf16 %v14490_v22, %v3508_v44  ;;  %v3745_v50 = vld [vmem:[#allocation4 + $0xa] sm:$0xff]  ;;  %v13002_v17 = vld [vmem:[%s15987_s1 + $0x610] sm:$0xff]  }
 0x5b3   : > { %11662 = vmatprep.mubr.bf16.mxu1 %v3533_v40  ;;  %v3747_v56 = vpack.c.bf16 %v3745_v50, %v3744_v39  ;;  %v3865_v51 = vld [vmem:[#allocation4 + $0x6] sm:$0xff]  ;;  %v13000_v10 = vld [vmem:[%s15987_s1 + $0x600] sm:$0xff]   ;;  %v13005_v40 = vld [vmem:[%s15987_s1 + $0x628] sm:$0xff]  }
 0x5b4   : > { %v3502_v35 = vsel %vm3492_vm15, %v3485_v5, %v3497_v41  ;;  %v3532_v43 = vld [vmem:[#allocation4 + $0x11] sm:$0x3f]  ;;  %v3986_v60 = vld [vmem:[#allocation4 + $0x7] sm:$0xff] }
 0x5b5   : > { %3507 = vst [vmem:[#allocation4 + $0x1b] sm:$0x3] %v3502_v35  ;;  %v3534_v28 = vpack.c.bf16 %v3532_v43, %v3532_v43  ;;  %v3510_v55 = vld [vmem:[#allocation4 + $0x10] sm:$0x3f]  ;;  %v13003_v11 = vld [vmem:[%s15987_s1 + $0x618] sm:$0xff]   ;;  %v13006_v41 = vld [vmem:[%s15987_s1 + $0x630] sm:$0xff]  }
 0x5b6   : > { %v3512_v27 = vpack.c.bf16 %v3510_v55, %v3510_v55  ;;  %v3746_v6 = vld [vmem:[#allocation4 + $0x12] sm:$0x3f] }
 0x5b7   : > { %11663 = vmatmul.mubr.bf16.vlgmr.msra.gmra.mrb[112].mxu1 %v3534_v28  ;;  %v14541_v7 = vld [vmem:[#allocation4 + $0xe] sm:$0xff]  ;;  %v3748_v0 = vpack.c.bf16 %v3746_v6, %v3746_v6 }
 0x5b8   : > { %11667 = vmatpush3.bf16.msra.mxu1 %v12968_v8  ;;  %11682 = vmatprep.mubr.bf16.mxu1 %v3511_v38  ;;  %v3868_v9 = vpack.c.bf16 %v14541_v7, %v3865_v51  ;;  %v12987_v8 = vld [vmem:[%s15987_s1 + $0x598] sm:$0xff]   ;;  %v4108_v23 = vld [vmem:[#allocation4 + $0x10] sm:$0xff]  ;;  %v13009_v38 = vld [vmem:[%s15987_s1 + $0x648] sm:$0xff]  }
 0x5b9   : > { %11668 = vmatprep.subr.bf16.mxu1 %v12969_v46  ;;  %v3987_v58 = vld [vmem:[#allocation4 + $0xf] sm:$0xff]  ;;  %v4110_v5 = vpack.c.bf16 %v4108_v23, %v14490_v22 }
 0x5ba   : > { %v3989_v2 = vpack.c.bf16 %v3987_v58, %v3986_v60  ;;  %v13004_v37 = vld [vmem:[%s15987_s1 + $0x620] sm:$0xff]   ;;  %v13007_v22 = vld [vmem:[%s15987_s1 + $0x638] sm:$0xff]   ;;  %v13030_v58 = vld [vmem:[%s15987_s1 + $0x6f0] sm:$0xff]  }
 0x5bb   : > { %v13008_v35 = vld [vmem:[%s15987_s1 + $0x640] sm:$0xff]  }
 0x5bc   : > { %11669 = vmatpush3.bf16.msra.mxu1 %v12969_v46  ;;  %v3867_v18 = vld [vmem:[#allocation4 + $0x16] sm:$0x3f]  ;;  %v4228_v46 = vld [vmem:[#allocation4 + $0xc] sm:$0xff]  ;;  %v4230_v50 = vld [vmem:[#allocation4 + $0x1c] sm:$0x3f] }
 0x5bd   : > { %11670 = vmatprep.subr.bf16.mxu1 %v12970_v49  ;;  %v3869_v19 = vpack.c.bf16 %v3867_v18, %v3867_v18  ;;  %v3988_v31 = vld [vmem:[#allocation4 + $0x17] sm:$0x3f]  ;;  %v4232_v39 = vpack.c.bf16 %v4230_v50, %v4230_v50 }
 0x5be   : > { %v3990_v15 = vpack.c.bf16 %v3988_v31, %v3988_v31  ;;  %v4109_v43 = vld [vmem:[#allocation4 + $0x18] sm:$0x3f]  ;;  %v13016_v55 = vld [vmem:[%s15987_s1 + $0x680] sm:$0xff]  }
 0x5bf   : > { %v4229_v28 = vld [vmem:[#allocation4 + $0x14] sm:$0xff]  ;;  %v4111_v44 = vpack.c.bf16 %v4109_v43, %v4109_v43 }
 0x5c0   : > { %11671 = vmatpush3.bf16.msra.mxu1 %v12970_v49  ;;  %v4231_v49 = vpack.c.bf16 %v4229_v28, %v4228_v46  ;;  %v13029_v18 = vld [vmem:[%s15987_s1 + $0x6e8] sm:$0xff]   ;;  %v13036_v50 = vld [vmem:[%s15987_s1 + $0x760] sm:$0xff]  }
 0x5c1   : > { %11672 = vmatprep.subr.bf16.mxu1 %v12971_v34  ;;  %v13033_v46 = vld [vmem:[%s15987_s1 + $0x748] sm:$0xff]  }
 0x5c4   : > { %11673 = vmatpush3.bf16.msra.mxu1 %v12971_v34  ;;  %v13010_v34 = vld [vmem:[%s15987_s1 + $0x650] sm:$0xff]  }
 0x5c5   : > { %11674 = vmatprep.subr.bf16.mxu1 %v12972_v36 }
 0x5c8   : > { %11675 = vmatpush3.bf16.msra.mxu1 %v12972_v36  ;;  %v13011_v36 = vld [vmem:[%s15987_s1 + $0x658] sm:$0xff]  }
 0x5c9   : > { %11676 = vmatprep.subr.bf16.mxu1 %v12973_v53 }
 0x5cc   : > { %11677 = vmatpush3.bf16.msra.mxu1 %v12973_v53  ;;  %v13012_v53 = vld [vmem:[%s15987_s1 + $0x660] sm:$0xff]  }
 0x5cd   : > { %11678 = vmatprep.subr.bf16.mxu1 %v12974_v54 }
 0x5d0   : > { %11679 = vmatpush3.bf16.msra.mxu1 %v12974_v54  ;;  %v13013_v54 = vld [vmem:[%s15987_s1 + $0x668] sm:$0xff]  }
 0x5d1   : > { %11680 = vmatprep.subr.bf16.mxu1 %v12975_v47 }
 0x5d4   : > { %11681 = vmatpush3.bf16.msra.mxu1 %v12975_v47  ;;  %v13014_v47 = vld [vmem:[%s15987_s1 + $0x670] sm:$0xff]  }
 0x5d5   : > { %11686 = vmatprep.subr.bf16.mxu1 %v12976_v33 }
 0x5d7   : > { %11683 = vmatmul.mubr.bf16.vlgmr.msra.gmra.mrb[116].mxu1 %v3512_v27  ;;  %v4350_v27 = vld [vmem:[#allocation4 + $0x15] sm:$0xff] }
 0x5d8   : > { %11687 = vmatpush3.bf16.msra.mxu1 %v12976_v33  ;;  %11702 = vmatprep.mubr.bf16.mxu1 %v3747_v56  ;;  %v13015_v33 = vld [vmem:[%s15987_s1 + $0x678] sm:$0xff]   ;;  %v13017_v56 = vld [vmem:[%s15987_s1 + $0x688] sm:$0xff]  }
 0x5d9   : > { %11688 = vmatprep.subr.bf16.mxu1 %v12977_v52 }
 0x5dc   : > { %11689 = vmatpush3.bf16.msra.mxu1 %v12977_v52  ;;  %v4349_v52 = vld [vmem:[#allocation4 + $0xd] sm:$0xff] }
 0x5dd   : > { %11690 = vmatprep.subr.bf16.mxu1 %v12978_v62 }
 0x5e0   : > { %11691 = vmatpush3.bf16.msra.mxu1 %v12978_v62  ;;  %v4352_v62 = vpack.c.bf16 %v4350_v27, %v4349_v52  ;;  %v13037_v27 = vld [vmem:[%s15987_s1 + $0x768] sm:$0xff]   ;;  %v13039_v52 = vld [vmem:[%s15987_s1 + $0x778] sm:$0xff]  }
 0x5e1   : > { %11692 = vmatprep.subr.bf16.mxu1 %v12979_v45 }
 0x5e4   : > { %11693 = vmatpush3.bf16.msra.mxu1 %v12979_v45  ;;  %v13018_v45 = vld [vmem:[%s15987_s1 + $0x690] sm:$0xff]  }
 0x5e5   : > { %11694 = vmatprep.subr.bf16.mxu1 %v12980_v48 }
 0x5e8   : > { %11695 = vmatpush3.bf16.msra.mxu1 %v12980_v48  ;;  %v13019_v48 = vld [vmem:[%s15987_s1 + $0x698] sm:$0xff]  }
 0x5e9   : > { %11696 = vmatprep.subr.bf16.mxu1 %v12981_v3 }
 0x5ec   : > { %11697 = vmatpush3.bf16.msra.mxu1 %v12981_v3  ;;  %v13020_v3 = vld [vmem:[%s15987_s1 + $0x6a0] sm:$0xff]  }
 0x5ed   : > { %11698 = vmatprep.subr.bf16.mxu1 %v12982_v29 }
 0x5f0   : > { %11699 = vmatpush3.bf16.msra.mxu1 %v12982_v29  ;;  %v13021_v29 = vld [vmem:[%s15987_s1 + $0x6a8] sm:$0xff]  }
 0x5f1   : > { %11700 = vmatprep.subr.bf16.mxu1 %v12983_v1 }
 0x5f4   : > { %11701 = vmatpush3.bf16.msra.mxu1 %v12983_v1  ;;  %v13022_v1 = vld [vmem:[%s15987_s1 + $0x6b0] sm:$0xff]  }
 0x5f5   : > { %11706 = vmatprep.subr.bf16.mxu1 %v12984_v4 }
 0x5f7   : > { %11703 = vmatmul.mubr.bf16.vlgmr.msra.gmra.mrb[120].mxu1 %v3748_v0 }
 0x5f8   : > { %11707 = vmatpush3.bf16.msra.mxu1 %v12984_v4  ;;  %11722 = vmatprep.mubr.bf16.mxu1 %v3868_v9  ;;  %v4351_v9 = vld [vmem:[#allocation4 + $0x1d] sm:$0x3f] }
 0x5f9   : > { %11708 = vmatprep.subr.bf16.mxu1 %v12985_v57 }
 0x5fc   : > { %11709 = vmatpush3.bf16.msra.mxu1 %v12985_v57  ;;  %v13023_v57 = vld [vmem:[%s15987_s1 + $0x6b8] sm:$0xff]  }
 0x5fd   : > { %11710 = vmatprep.subr.bf16.mxu1 %v12986_v59 }
 0x600   : > { %11711 = vmatpush3.bf16.msra.mxu1 %v12986_v59  ;;  %v13024_v59 = vld [vmem:[%s15987_s1 + $0x6c0] sm:$0xff]  }
 0x601   : > { %11712 = vmatprep.subr.bf16.mxu1 %v12987_v8 }
 0x604   : > { %11713 = vmatpush3.bf16.msra.mxu1 %v12987_v8  ;;  %v4353_v8 = vpack.c.bf16 %v4351_v9, %v4351_v9 }
 0x605   : > { %11714 = vmatprep.subr.bf16.mxu1 %v12988_v12 }
 0x608   : > { %11715 = vmatpush3.bf16.msra.mxu1 %v12988_v12  ;;  %v4471_v12 = vld [vmem:[#allocation4 + $0x16] sm:$0xff] }
 0x609   : > { %11716 = vmatprep.subr.bf16.mxu1 %v12989_v61 }
 0x60c   : > { %11717 = vmatpush3.bf16.msra.mxu1 %v12989_v61  ;;  %v13025_v61 = vld [vmem:[%s15987_s1 + $0x6c8] sm:$0xff]  }
 0x60d   : > { %11718 = vmatprep.subr.bf16.mxu1 %v12990_v13 }
 0x610   : > { %11719 = vmatpush3.bf16.msra.mxu1 %v12990_v13  ;;  %v4473_v13 = vpack.c.bf16 %v4471_v12, %v14541_v7  ;;  %v13028_v7 = vld [vmem:[%s15987_s1 + $0x6e0] sm:$0xff]  }
 0x611   : > { %11720 = vmatprep.subr.bf16.mxu1 %v12991_v63 }
 0x614   : > { %11721 = vmatpush3.bf16.msra.mxu1 %v12991_v63  ;;  %v13026_v63 = vld [vmem:[%s15987_s1 + $0x6d0] sm:$0xff]  }
 0x615   : > { %11726 = vmatprep.subr.bf16.mxu1 %v12992_v16 }
 0x617   : > { %11723 = vmatmul.mubr.bf16.vlgmr.msra.gmra.mrb[124].mxu1 %v3869_v19 }
 0x618   : > { %11727 = vmatpush3.bf16.msra.mxu1 %v12992_v16  ;;  %11742 = vmatprep.mubr.bf16.mxu1 %v3989_v2  ;;  %v13027_v16 = vld [vmem:[%s15987_s1 + $0x6d8] sm:$0xff]  }
 0x619   : > { %11728 = vmatprep.subr.bf16.mxu1 %v12993_v20 }
 0x61c   : > { %11729 = vmatpush3.bf16.msra.mxu1 %v12993_v20 }
 0x61d   : > { %11730 = vmatprep.subr.bf16.mxu1 %v12994_v21 }
 0x620   : > { %11731 = vmatpush3.bf16.msra.mxu1 %v12994_v21 }
 0x621   : > { %11732 = vmatprep.subr.bf16.mxu1 %v12995_v25 }
 0x624   : > { %11733 = vmatpush3.bf16.msra.mxu1 %v12995_v25 }
 0x625   : > { %11734 = vmatprep.subr.bf16.mxu1 %v12996_v26 }
 0x628   : > { %11735 = vmatpush3.bf16.msra.mxu1 %v12996_v26  ;;  %v13031_v26 = vld [vmem:[%s15987_s1 + $0x6f8] sm:$0xff]  }
 0x629   : > { %11736 = vmatprep.subr.bf16.mxu1 %v12997_v42 }
 0x62c   : > { %11737 = vmatpush3.bf16.msra.mxu1 %v12997_v42 }
 0x62d   : > { %11738 = vmatprep.subr.bf16.mxu1 %v12998_v14 }
 0x630   : > { %11739 = vmatpush3.bf16.msra.mxu1 %v12998_v14  ;;  %v4472_v14 = vld [vmem:[#allocation4 + $0x1e] sm:$0x3f] }
 0x631   : > { %11740 = vmatprep.subr.bf16.mxu1 %v12999_v30 }
 0x634   : > { %11741 = vmatpush3.bf16.msra.mxu1 %v12999_v30  ;;  %v4474_v30 = vpack.c.bf16 %v4472_v14, %v4472_v14 }
 0x635   : > { %11746 = vmatprep.subr.bf16.mxu1 %v13000_v10 }
 0x637   : > { %11743 = vmatmul.mubr.bf16.vlgmr.msra.gmra.mrb[128].mxu1 %v3990_v15 }
 0x638   : > { %11747 = vmatpush3.bf16.msra.mxu1 %v13000_v10  ;;  %11762 = vmatprep.mubr.bf16.mxu1 %v4110_v5  ;;  %v14687_v10 = vld [vmem:[#allocation2] sm:$0xff] }
 0x639   : > { %11748 = vmatprep.subr.bf16.mxu1 %v13001_v32 }
 0x63c   : > { %11749 = vmatpush3.bf16.msra.mxu1 %v13001_v32 }
 0x63d   : > { %11750 = vmatprep.subr.bf16.mxu1 %v13002_v17 }
 0x640   : > { %11751 = vmatpush3.bf16.msra.mxu1 %v13002_v17 }
 0x641   : > { %11752 = vmatprep.subr.bf16.mxu1 %v13003_v11 }
 0x644   : > { %11753 = vmatpush3.bf16.msra.mxu1 %v13003_v11 }
 0x645   : > { %11754 = vmatprep.subr.bf16.mxu1 %v13004_v37 }
 0x648   : > { %11755 = vmatpush3.bf16.msra.mxu1 %v13004_v37 }
 0x649   : > { %11756 = vmatprep.subr.bf16.mxu1 %v13005_v40 }
 0x64c   : > { %11757 = vmatpush3.bf16.msra.mxu1 %v13005_v40 }
 0x64d   : > { %11758 = vmatprep.subr.bf16.mxu1 %v13006_v41 }
 0x650   : > { %11759 = vmatpush3.bf16.msra.mxu1 %v13006_v41 }
 0x651   : > { %11760 = vmatprep.subr.bf16.mxu1 %v13007_v22 }
 0x654   : > { %11761 = vmatpush3.bf16.msra.mxu1 %v13007_v22 }
 0x655   : > { %11766 = vmatprep.subr.bf16.mxu1 %v13008_v35 }
 0x657   : > { %11763 = vmatmul.mubr.bf16.vlgmr.msra.gmra.mrb[132].mxu1 %v4111_v44  ;;  %v13032_v44 = vld [vmem:[%s15987_s1 + $0x740] sm:$0xff]  }
 0x658   : > { %11767 = vmatpush3.bf16.msra.mxu1 %v13008_v35  ;;  %11782 = vmatprep.mubr.bf16.mxu1 %v4231_v49 }
 0x659   : > { %11768 = vmatprep.subr.bf16.mxu1 %v13009_v38 }
 0x65c   : > { %11769 = vmatpush3.bf16.msra.mxu1 %v13009_v38  ;;  %v13034_v38 = vld [vmem:[%s15987_s1 + $0x750] sm:$0xff]  }
 0x65d   : > { %11770 = vmatprep.subr.bf16.mxu1 %v13010_v34 }
 0x660   : > { %11771 = vmatpush3.bf16.msra.mxu1 %v13010_v34 }
 0x661   : > { %11772 = vmatprep.subr.bf16.mxu1 %v13011_v36 }
 0x664   : > { %11773 = vmatpush3.bf16.msra.mxu1 %v13011_v36 }
 0x665   : > { %11774 = vmatprep.subr.bf16.mxu1 %v13012_v53 }
 0x668   : > { %11775 = vmatpush3.bf16.msra.mxu1 %v13012_v53 }
 0x669   : > { %11776 = vmatprep.subr.bf16.mxu1 %v13013_v54 }
 0x66c   : > { %11777 = vmatpush3.bf16.msra.mxu1 %v13013_v54 }
 0x66d   : > { %11778 = vmatprep.subr.bf16.mxu1 %v13014_v47 }
 0x670   : > { %11779 = vmatpush3.bf16.msra.mxu1 %v13014_v47 }
 0x671   : > { %11780 = vmatprep.subr.bf16.mxu1 %v13015_v33 }
 0x674   : > { %11781 = vmatpush3.bf16.msra.mxu1 %v13015_v33 }
 0x675   : > { %11786 = vmatprep.subr.bf16.mxu1 %v13016_v55 }
 0x677   : > { %11783 = vmatmul.mubr.bf16.vlgmr.msra.gmra.mrb[136].mxu1 %v4232_v39  ;;  %v13038_v39 = vld [vmem:[%s15987_s1 + $0x770] sm:$0xff]  }
 0x678   : > { %11787 = vmatpush3.bf16.msra.mxu1 %v13016_v55  ;;  %11802 = vmatprep.mubr.bf16.mxu1 %v4352_v62  ;;  %v13035_v55 = vld [vmem:[%s15987_s1 + $0x758] sm:$0xff]  }
 0x679   : > { %11788 = vmatprep.subr.bf16.mxu1 %v13017_v56 }
 0x67c   : > { %11789 = vmatpush3.bf16.msra.mxu1 %v13017_v56 }
 0x67d   : > { %11790 = vmatprep.subr.bf16.mxu1 %v13018_v45 }
 0x680   : > { %11791 = vmatpush3.bf16.msra.mxu1 %v13018_v45 }
 0x681   : > { %11792 = vmatprep.subr.bf16.mxu1 %v13019_v48 }
 0x684   : > { %11793 = vmatpush3.bf16.msra.mxu1 %v13019_v48 }
 0x685   : > { %11794 = vmatprep.subr.bf16.mxu1 %v13020_v3 }
 0x688   : > { %11795 = vmatpush3.bf16.msra.mxu1 %v13020_v3 }
 0x689   : > { %11796 = vmatprep.subr.bf16.mxu1 %v13021_v29 }
 0x68a   : > { %v11664_v4 = vpop.f32.mrb[112].mxu1 }
 0x68b   : > { %v3634_v6 = vpop.f32.mrb[113].mxu1 }
 0x68c   : > { %11797 = vmatpush3.bf16.msra.mxu1 %v13021_v29  ;;  %v11665_v0 = vpop.f32.mrb[114].mxu1 }
 0x68d   : > { %v3637_v51 = vpop.f32.mrb[115].mxu1  ;;  %11798 = vmatprep.subr.bf16.mxu1 %v13022_v1 }
 0x690   : > { %11799 = vmatpush3.bf16.msra.mxu1 %v13022_v1 }
 0x691   : > { %11800 = vmatprep.subr.bf16.mxu1 %v13023_v57 }
 0x694   : > { %11801 = vmatpush3.bf16.msra.mxu1 %v13023_v57 }
 0x695   : > { %11806 = vmatprep.subr.bf16.mxu1 %v13024_v59 }
 0x697   : > { %11803 = vmatmul.mubr.bf16.vlgmr.msra.gmra.mrb[140].mxu1 %v4353_v8 }
 0x698   : > { %11807 = vmatpush3.bf16.msra.mxu1 %v13024_v59  ;;  %11822 = vmatprep.mubr.bf16.mxu1 %v4473_v13 }
 0x699   : > { %11808 = vmatprep.subr.bf16.mxu1 %v13025_v61 }
 0x69c   : > { %11809 = vmatpush3.bf16.msra.mxu1 %v13025_v61 }
 0x69d   : > { %11810 = vmatprep.subr.bf16.mxu1 %v13026_v63 }
 0x6a0   : > { %11811 = vmatpush3.bf16.msra.mxu1 %v13026_v63 }
 0x6a1   : > { %11812 = vmatprep.subr.bf16.mxu1 %v13027_v16 }
 0x6a4   : > { %11813 = vmatpush3.bf16.msra.mxu1 %v13027_v16 }
 0x6a5   : > { %11814 = vmatprep.subr.bf16.mxu1 %v13028_v7 }
 0x6a8   : > { %11815 = vmatpush3.bf16.msra.mxu1 %v13028_v7 }
 0x6a9   : > { %11816 = vmatprep.subr.bf16.mxu1 %v13029_v18 }
 0x6aa   : > { %v11684_v19 = vpop.f32.mrb[116].mxu1 }
 0x6ab   : > { %v3739_v60 = vadd.f32 %v11684_v19, %v11664_v4  ;;  %v3730_v20 = vpop.f32.mrb[117].mxu1 }
 0x6ac   : > { %v3731_v2 = vadd.f32 %v3730_v20, %v3634_v6  ;;  %v11685_v21 = vpop.f32.mrb[118].mxu1  ;;  %11817 = vmatpush3.bf16.msra.mxu1 %v13029_v18 }
 0x6ad   : > { %v3733_v25 = vpop.f32.mrb[119].mxu1  ;;  %11818 = vmatprep.subr.bf16.mxu1 %v13030_v58 }
 0x6ae   : > { %v3734_v42 = vadd.f32 %v3733_v25, %v3637_v51 }
 0x6b0   : > { %11819 = vmatpush3.bf16.msra.mxu1 %v13030_v58  ;;  %v9387_v58 = vld [vmem:[%s15988_s2 + $0x3] ss:$0 sm:$0xff] }
 0x6b1   : > { %11820 = vmatprep.subr.bf16.mxu1 %v13031_v26 }
 0x6b4   : > { %11821 = vmatpush3.bf16.msra.mxu1 %v13031_v26 }
 0x6b5   : > { %11826 = vmatprep.subr.bf16.mxu1 %v14687_v10 }
 0x6b7   : > { %11823 = vmatmul.mubr.bf16.vlgmr.msra.gmra.mrb[144].mxu1 %v4474_v30 }
 0x6b8   : > { %11842 = vmatprep.mubr.msk.bf16.mxu1 %vm13393_vm0, %v14687_v10  ;;  %11827 = vmatpush3.bf16.msra.mxu1 %v13032_v44  ;;  %v13046_v44 = vld [vmem:[%s15987_s1 + $0x730] sm:$0xff]  }
 0x6b9   : > { %11828 = vmatprep.subr.bf16.mxu1 %v14687_v10 }
 0x6bc   : > { %11829 = vmatpush3.bf16.msra.mxu1 %v13033_v46  ;;  %v13047_v46 = vld [vmem:[%s15987_s1 + $0x738] sm:$0xff]  }
 0x6bd   : > { %11830 = vmatprep.subr.bf16.mxu1 %v14687_v10 }
 0x6c0   : > { %11831 = vmatpush3.bf16.msra.mxu1 %v13034_v38 }
 0x6c1   : > { %11832 = vmatprep.subr.bf16.mxu1 %v14687_v10 }
 0x6c4   : > { %11833 = vmatpush3.bf16.msra.mxu1 %v13035_v55  ;;  %v13053_v55 = vld [vmem:[%s15987_s1 + $0x7a8] sm:$0xff]  }
 0x6c5   : > { %11834 = vmatprep.subr.bf16.mxu1 %v14687_v10 }
 0x6c8   : > { %11835 = vmatpush3.bf16.msra.mxu1 %v13036_v50  ;;  %v13054_v50 = vld [vmem:[%s15987_s1 + $0x7b0] sm:$0xff]  }
 0x6c9   : > { %11836 = vmatprep.subr.bf16.mxu1 %v14687_v10 }
 0x6ca   : > { %v11704_v31 = vpop.f32.mrb[120].mxu1 }
 0x6cb   : > { %v3864_v23 = vadd.f32 %v11704_v31, %v3739_v60  ;;  %v3848_v15 = vpop.f32.mrb[121].mxu1 }
 0x6cc   : > { %v3862_v32 = vadd.f32 %v3848_v15, %v3731_v2  ;;  %v11705_v5 = vpop.f32.mrb[122].mxu1  ;;  %11837 = vmatpush3.bf16.msra.mxu1 %v13037_v27  ;;  %v13055_v27 = vld [vmem:[%s15987_s1 + $0x7b8] sm:$0xff]  }
 0x6cd   : > { %v3851_v17 = vpop.f32.mrb[123].mxu1  ;;  %11838 = vmatprep.subr.bf16.mxu1 %v14687_v10 }
 0x6ce   : > { %v3863_v11 = vadd.f32 %v3851_v17, %v3734_v42 }
 0x6d0   : > { %11839 = vmatpush3.bf16.msra.mxu1 %v13038_v39 }
 0x6d1   : > { %11840 = vmatprep.subr.bf16.mxu1 %v14687_v10 }
 0x6d4   : > { %11841 = vmatpush3.bf16.msra.mxu1 %v13039_v52 }
 0x6d5   : > { %11846 = vmatprep.subr.bf16.mxu1 %v14687_v10 }
 0x6ea   : > { %v11724_v37 = vpop.f32.mrb[124].mxu1 }
 0x6eb   : > { %v3985_v40 = vadd.f32 %v11724_v37, %v3864_v23  ;;  %v3969_v41 = vpop.f32.mrb[125].mxu1  ;;  %v13040_v37 = vld [vmem:[%s15987_s1 + $0x700] sm:$0xff]  }
 0x6ec   : > { %v3983_v22 = vadd.f32 %v3969_v41, %v3862_v32  ;;  %v11725_v35 = vpop.f32.mrb[126].mxu1  ;;  %v13041_v41 = vld [vmem:[%s15987_s1 + $0x708] sm:$0xff]  }
 0x6ed   : > { %v3972_v43 = vpop.f32.mrb[127].mxu1  ;;  %v13043_v35 = vld [vmem:[%s15987_s1 + $0x718] sm:$0xff]  }
 0x6ee   : > { %v3984_v28 = vadd.f32 %v3972_v43, %v3863_v11  ;;  %v13044_v43 = vld [vmem:[%s15987_s1 + $0x720] sm:$0xff]  }
 0x70a   : > { %v11744_v49 = vpop.f32.mrb[128].mxu1 }
 0x70b   : > { %v4106_v34 = vadd.f32 %v11744_v49, %v3985_v40  ;;  %v4090_v36 = vpop.f32.mrb[129].mxu1 }
 0x70c   : > { %v4104_v53 = vadd.f32 %v4090_v36, %v3983_v22  ;;  %v11745_v54 = vpop.f32.mrb[130].mxu1  ;;  %v13042_v22 = vld [vmem:[%s15987_s1 + $0x710] sm:$0xff]  }
 0x70d   : > { %v4093_v47 = vpop.f32.mrb[131].mxu1  ;;  %v13050_v54 = vld [vmem:[%s15987_s1 + $0x790] sm:$0xff]  }
 0x70e   : > { %v4105_v33 = vadd.f32 %v4093_v47, %v3984_v28  ;;  %v13045_v28 = vld [vmem:[%s15987_s1 + $0x728] sm:$0xff]   ;;  %v13051_v47 = vld [vmem:[%s15987_s1 + $0x798] sm:$0xff]  }
 0x72a   : > { %v11764_v56 = vpop.f32.mrb[132].mxu1 }
 0x72b   : > { %v4227_v62 = vadd.f32 %v11764_v56, %v4106_v34  ;;  %v4211_v45 = vpop.f32.mrb[133].mxu1  ;;  %v13048_v34 = vld [vmem:[%s15987_s1 + $0x780] sm:$0xff]  }
 0x72c   : > { %v4225_v48 = vadd.f32 %v4211_v45, %v4104_v53  ;;  %v11765_v3 = vpop.f32.mrb[134].mxu1  ;;  %v13049_v53 = vld [vmem:[%s15987_s1 + $0x788] sm:$0xff]   ;;  %v13056_v56 = vld [vmem:[%s15987_s1 + $0x7c0] sm:$0xff]  }
 0x72d   : > { %v4214_v29 = vpop.f32.mrb[135].mxu1  ;;  %v13057_v45 = vld [vmem:[%s15987_s1 + $0x7c8] sm:$0xff]   ;;  %v13059_v3 = vld [vmem:[%s15987_s1 + $0x7d8] sm:$0xff]  }
 0x72e   : > { %v4226_v1 = vadd.f32 %v4214_v29, %v4105_v33  ;;  %v13052_v33 = vld [vmem:[%s15987_s1 + $0x7a0] sm:$0xff]  }
 0x72f   : > { %v13060_v29 = vld [vmem:[%s15987_s1 + $0x7e0] sm:$0xff]  }
 0x74a   : > { %v11784_v4 = vpop.f32.mrb[136].mxu1 }
 0x74b   : > { %v4348_v6 = vadd.f32 %v11784_v4, %v4227_v62  ;;  %v4332_v0 = vpop.f32.mrb[137].mxu1  ;;  %v13062_v4 = vld [vmem:[%s15987_s1 + $0x7f0] sm:$0xff]  }
 0x74c   : > { %v4346_v51 = vadd.f32 %v4332_v0, %v4225_v48  ;;  %v11785_v57 = vpop.f32.mrb[138].mxu1  ;;  %v13058_v48 = vld [vmem:[%s15987_s1 + $0x7d0] sm:$0xff]  }
 0x74d   : > { %v4335_v9 = vpop.f32.mrb[139].mxu1  ;;  %v13064_v57 = vld [vmem:[%s15987_s1 + $0x800] sm:$0xff]  }
 0x74e   : > { %v4347_v59 = vadd.f32 %v4335_v9, %v4226_v1  ;;  %v13061_v1 = vld [vmem:[%s15987_s1 + $0x7e8] sm:$0xff]  }
 0x76a   : > { %v11804_v8 = vpop.f32.mrb[140].mxu1 }
 0x76b   : > { %v4469_v12 = vadd.f32 %v11804_v8, %v4348_v6  ;;  %v4453_v61 = vpop.f32.mrb[141].mxu1  ;;  %v13063_v6 = vld [vmem:[%s15987_s1 + $0x7f8] sm:$0xff]   ;;  %v13066_v8 = vld [vmem:[%s15987_s1 + $0x810] sm:$0xff]  }
 0x76c   : > { %v4467_v13 = vadd.f32 %v4453_v61, %v4346_v51  ;;  %v11805_v63 = vpop.f32.mrb[142].mxu1  ;;  %v13068_v61 = vld [vmem:[%s15987_s1 + $0x820] sm:$0xff]  }
 0x76d   : > { %v4456_v16 = vpop.f32.mrb[143].mxu1  ;;  %v13070_v63 = vld [vmem:[%s15987_s1 + $0x830] sm:$0xff]  }
 0x76e   : > { %v4468_v7 = vadd.f32 %v4456_v16, %v4347_v59  ;;  %v13065_v59 = vld [vmem:[%s15987_s1 + $0x808] sm:$0xff]   ;;  %v13071_v16 = vld [vmem:[%s15987_s1 + $0x838] sm:$0xff]  }
 0x78a   : > { %v11824_v18 = vpop.f32.mrb[144].mxu1 }
 0x78b   : > { %v4590_v19 = vadd.f32 %v11824_v18, %v4469_v12  ;;  %v4574_v60 = vpop.f32.mrb[145].mxu1  ;;  %v13067_v12 = vld [vmem:[%s15987_s1 + $0x818] sm:$0xff]  }
 0x78c   : > { %v4588_v20 = vadd.f32 %v4574_v60, %v4467_v13  ;;  %v11825_v2 = vpop.f32.mrb[146].mxu1  ;;  %v13069_v13 = vld [vmem:[%s15987_s1 + $0x828] sm:$0xff]  }
 0x78d   : > { %v4601_v21 = vadd.f32 %v9387_v58, %v4590_v19  ;;  %v4577_v25 = vpop.f32.mrb[147].mxu1  ;;  %v13073_v60 = vld [vmem:[%s15987_s1 + $0x848] sm:$0xff]   ;;  %v13075_v2 = vld [vmem:[%s15987_s1 + $0x858] sm:$0xff]  }
 0x78e   : > { %v4599_v26 = vadd.f32 %v9387_v58, %v4588_v20  ;;  %v4589_v42 = vadd.f32 %v4577_v25, %v4468_v7  ;;  %v13074_v20 = vld [vmem:[%s15987_s1 + $0x850] sm:$0xff]   ;;  %v13077_v25 = vld [vmem:[%s15987_s1 + $0x868] sm:$0xff]  }
 0x78f   : > { %vm4604_vm1 = vcmp.ge.f32.partialorder %v4601_v21, 0.0  ;;  %v4607_v14 = vmul.f32 0.01, %v4601_v21 }
 0x790   : > { %vm4602_vm2 = vcmp.ge.f32.partialorder %v4599_v26, 0.0  ;;  %v4605_v30 = vmul.f32 0.01, %v4599_v26  ;;  %v4600_v31 = vadd.f32 %v9387_v58, %v4589_v42  ;;  %v13072_v58 = vld [vmem:[%s15987_s1 + $0x840] sm:$0xff]   ;;  %v13079_v42 = vld [vmem:[%s15987_s1 + $0x878] sm:$0xff]  }
 0x791   : > { %v4610_v23 = vsel %vm4604_vm1, %v4601_v21, %v4607_v14  ;;  %v13076_v21 = vld [vmem:[%s15987_s1 + $0x860] sm:$0xff]  }
 0x792   : > { %4615 = vst [vmem:[#allocation5 + $0x17] sm:$0x3c] %v4610_v23  ;;  %v4608_v15 = vsel %vm4602_vm2, %v4599_v26, %v4605_v30  ;;  %vm4603_vm3 = vcmp.ge.f32.partialorder %v4600_v31, 0.0  ;;  %v4606_v32 = vmul.f32 0.01, %v4600_v31  ;;  %v13078_v26 = vld [vmem:[%s15987_s1 + $0x870] sm:$0xff]  }
 0x793   : > { %4611 = vst [vmem:[#allocation5 + $0x7] sm:$0xcf] %v4608_v15   ;;  %v13081_v15 = vld [vmem:[%s15987_s1 + $0x888] sm:$0xff]  }
 0x794   : > { %v4609_v5 = vsel %vm4603_vm3, %v4600_v31, %v4606_v32  ;;  %v13080_v31 = vld [vmem:[%s15987_s1 + $0x880] sm:$0xff]   ;;  %v13082_v32 = vld [vmem:[%s15987_s1 + $0x890] sm:$0xff]  }
 0x795   : > { %4613 = vst [vmem:[#allocation5 + $0xf] sm:$0xf3] %v4609_v5   ;;  %v13083_v5 = vld [vmem:[%s15987_s1 + $0x898] sm:$0xff]  }
 0x79a   : > { %v4636_v17 = vld [vmem:[#allocation5 + $0x1] sm:$0xff] }
 0x79b   : > { %v4616_v38 = vld [vmem:[#allocation5] sm:$0xff]  ;;  %v4617_v49 = vld [vmem:[#allocation5 + $0x8] sm:$0x7f] }
 0x79c   : > { %v4637_v11 = vld [vmem:[#allocation5 + $0x9] sm:$0x7f]  ;;  %v4618_v36 = vpack.c.bf16 %v4617_v49, %v4616_v38  ;;  %v5168_v30 = vld [vmem:[#allocation5 + $0x10] sm:$0x7f] }
 0x79d   : > { %v4638_v40 = vpack.c.bf16 %v4637_v11, %v4636_v17  ;;  %v4835_v39 = vld [vmem:[#allocation5 + $0xa] sm:$0x7f]  ;;  %v4834_v52 = vld [vmem:[#allocation5 + $0x2] sm:$0xff] }
 0x79e   : > { %v4836_v62 = vpack.c.bf16 %v4835_v39, %v4834_v52  ;;  %v4946_v0 = vld [vmem:[#allocation5 + $0xe] sm:$0x7f]  ;;  %v4945_v51 = vld [vmem:[#allocation5 + $0x6] sm:$0xff] }
 0x79f   : > { %11843 = vmatmul.mubr.bf16.vlgmr.msra.gmra.mrb[148].mxu1 %v4638_v40  ;;  %v4947_v9 = vpack.c.bf16 %v4946_v0, %v4945_v51  ;;  %v5057_v7 = vld [vmem:[#allocation5 + $0xf] sm:$0x7f]  ;;  %v5056_v18 = vld [vmem:[#allocation5 + $0x7] sm:$0xff] }
 0x7a0   : > { %11847 = vmatpush3.bf16.msra.mxu1 %v13040_v37  ;;  %11862 = vmatprep.mubr.msk.bf16.mxu1 %vm13393_vm0, %v14687_v10  ;;  %v5058_v19 = vpack.c.bf16 %v5057_v7, %v5056_v18  ;;  %v5167_v14 = vld [vmem:[#allocation5 + $0x8] sm:$0xff]  ;;  %v13085_v11 = vld [vmem:[%s15987_s1 + $0x8a8] sm:$0xff]   ;;  %v13086_v37 = vld [vmem:[%s15987_s1 + $0x8b0] sm:$0xff]  }
 0x7a1   : > { %11848 = vmatprep.subr.bf16.mxu1 %v14687_v10  ;;  %v5169_v23 = vpack.c.bf16 %v5168_v30, %v5167_v14  ;;  %v13084_v17 = vld [vmem:[%s15987_s1 + $0x8a0] sm:$0xff]   ;;  %v13087_v40 = vld [vmem:[%s15987_s1 + $0x8b8] sm:$0xff]   ;;  %v13093_v49 = vld [vmem:[%s15987_s1 + $0x8e8] sm:$0xff]  }
 0x7a2   : > { %v13092_v38 = vld [vmem:[%s15987_s1 + $0x8e0] sm:$0xff]   ;;  %v13101_v52 = vld [vmem:[%s15987_s1 + $0x928] sm:$0xff]   ;;  %v13111_v7 = vld [vmem:[%s15987_s1 + $0x9b8] sm:$0xff]  }
 0x7a3   : > { %v13100_v39 = vld [vmem:[%s15987_s1 + $0x920] sm:$0xff]  }
 0x7a4   : > { %11849 = vmatpush3.bf16.msra.mxu1 %v13041_v41  ;;  %v5278_v41 = vld [vmem:[#allocation5 + $0xc] sm:$0xff] }
 0x7a5   : > { %11850 = vmatprep.subr.bf16.mxu1 %v14687_v10  ;;  %v13104_v51 = vld [vmem:[%s15987_s1 + $0x980] sm:$0xff]  }
 0x7a6   : > { %v13121_v18 = vld [vmem:[%s15987_s1 + $0xb60] sm:$0xff]  }
 0x7a7   : > { %v13112_v30 = vld [vmem:[%s15987_s1 + $0x940] sm:$0xff]  }
 0x7a8   : > { %11851 = vmatpush3.bf16.msra.mxu1 %v13042_v22  ;;  %v5279_v22 = vld [vmem:[#allocation5 + $0x14] sm:$0x7f] }
 0x7a9   : > { %11852 = vmatprep.subr.bf16.mxu1 %v14687_v10 }
 0x7ac   : > { %11853 = vmatpush3.bf16.msra.mxu1 %v13043_v35  ;;  %v13088_v35 = vld [vmem:[%s15987_s1 + $0x8c0] sm:$0xff]  }
 0x7ad   : > { %11854 = vmatprep.subr.bf16.mxu1 %v14687_v10 }
 0x7b0   : > { %11855 = vmatpush3.bf16.msra.mxu1 %v13044_v43  ;;  %v5280_v43 = vpack.c.bf16 %v5279_v22, %v5278_v41  ;;  %v13126_v41 = vld [vmem:[%s15987_s1 + $0x978] sm:$0xff]  }
 0x7b1   : > { %11856 = vmatprep.subr.bf16.mxu1 %v14687_v10 }
 0x7b4   : > { %11857 = vmatpush3.bf16.msra.mxu1 %v13045_v28  ;;  %v13089_v28 = vld [vmem:[%s15987_s1 + $0x8c8] sm:$0xff]  }
 0x7b5   : > { %11858 = vmatprep.subr.bf16.mxu1 %v14687_v10 }
 0x7b8   : > { %11859 = vmatpush3.bf16.msra.mxu1 %v13046_v44  ;;  %v13090_v44 = vld [vmem:[%s15987_s1 + $0x8d0] sm:$0xff]  }
 0x7b9   : > { %11860 = vmatprep.subr.bf16.mxu1 %v14687_v10 }
 0x7bc   : > { %11861 = vmatpush3.bf16.msra.mxu1 %v13047_v46  ;;  %v13091_v46 = vld [vmem:[%s15987_s1 + $0x8d8] sm:$0xff]  }
 0x7bd   : > { %11866 = vmatprep.subr.bf16.mxu1 %v14687_v10 }
 0x7bf   : > { %11863 = vmatmul.mubr.bf16.vlgmr.msra.gmra.mrb[148].mxu1 %v4618_v36  ;;  %v13095_v36 = vld [vmem:[%s15987_s1 + $0x8f8] sm:$0xff]  }
 0x7c0   : > { %11867 = vmatpush3.bf16.msra.mxu1 %v13048_v34  ;;  %11882 = vmatprep.mubr.msk.bf16.mxu1 %vm13393_vm0, %v14687_v10  ;;  %v13094_v34 = vld [vmem:[%s15987_s1 + $0x8f0] sm:$0xff]  }
 0x7c1   : > { %11868 = vmatprep.subr.bf16.mxu1 %v14687_v10 }
 0x7c4   : > { %11869 = vmatpush3.bf16.msra.mxu1 %v13049_v53  ;;  %v5389_v53 = vld [vmem:[#allocation5 + $0xd] sm:$0xff] }
 0x7c5   : > { %11870 = vmatprep.subr.bf16.mxu1 %v14687_v10 }
 0x7c8   : > { %11871 = vmatpush3.bf16.msra.mxu1 %v13050_v54  ;;  %v5390_v54 = vld [vmem:[#allocation5 + $0x15] sm:$0x7f] }
 0x7c9   : > { %11872 = vmatprep.subr.bf16.mxu1 %v14687_v10 }
 0x7cc   : > { %11873 = vmatpush3.bf16.msra.mxu1 %v13051_v47  ;;  %v13096_v47 = vld [vmem:[%s15987_s1 + $0x900] sm:$0xff]  }
 0x7cd   : > { %11874 = vmatprep.subr.bf16.mxu1 %v14687_v10 }
 0x7d0   : > { %11875 = vmatpush3.bf16.msra.mxu1 %v13052_v33  ;;  %v5391_v33 = vpack.c.bf16 %v5390_v54, %v5389_v53  ;;  %v13136_v54 = vld [vmem:[%s15987_s1 + $0xa00] sm:$0xff]  }
 0x7d1   : > { %11876 = vmatprep.subr.bf16.mxu1 %v14687_v10 }
 0x7d4   : > { %11877 = vmatpush3.bf16.msra.mxu1 %v13053_v55  ;;  %v13097_v55 = vld [vmem:[%s15987_s1 + $0x908] sm:$0xff]  }
 0x7d5   : > { %11878 = vmatprep.subr.bf16.mxu1 %v14687_v10 }
 0x7d8   : > { %11879 = vmatpush3.bf16.msra.mxu1 %v13054_v50  ;;  %v13098_v50 = vld [vmem:[%s15987_s1 + $0x910] sm:$0xff]  }
 0x7d9   : > { %11880 = vmatprep.subr.bf16.mxu1 %v14687_v10 }
 0x7dc   : > { %11881 = vmatpush3.bf16.msra.mxu1 %v13055_v27  ;;  %v13099_v27 = vld [vmem:[%s15987_s1 + $0x918] sm:$0xff]  }
 0x7dd   : > { %11886 = vmatprep.subr.bf16.mxu1 %v14687_v10 }
 0x7df   : > { %11883 = vmatmul.mubr.bf16.vlgmr.msra.gmra.mrb[148].mxu1 %v4836_v62  ;;  %v13103_v62 = vld [vmem:[%s15987_s1 + $0x938] sm:$0xff]  }
 0x7e0   : > { %11887 = vmatpush3.bf16.msra.mxu1 %v13056_v56  ;;  %11902 = vmatprep.mubr.msk.bf16.mxu1 %vm13393_vm0, %v14687_v10  ;;  %v13102_v56 = vld [vmem:[%s15987_s1 + $0x930] sm:$0xff]  }
 0x7e1   : > { %11888 = vmatprep.subr.bf16.mxu1 %v14687_v10 }
 0x7e4   : > { %11889 = vmatpush3.bf16.msra.mxu1 %v13057_v45  ;;  %v5500_v45 = vld [vmem:[#allocation5 + $0xe] sm:$0xff] }
 0x7e5   : > { %11890 = vmatprep.subr.bf16.mxu1 %v14687_v10 }
 0x7e8   : > { %11891 = vmatpush3.bf16.msra.mxu1 %v13058_v48  ;;  %v5501_v48 = vld [vmem:[#allocation5 + $0x16] sm:$0x7f] }
 0x7e9   : > { %11892 = vmatprep.subr.bf16.mxu1 %v14687_v10 }
 0x7ec   : > { %11893 = vmatpush3.bf16.msra.mxu1 %v13059_v3  ;;  %v5502_v3 = vpack.c.bf16 %v5501_v48, %v5500_v45  ;;  %v13144_v45 = vld [vmem:[%s15987_s1 + $0xa40] sm:$0xff]  }
 0x7ed   : > { %11894 = vmatprep.subr.bf16.mxu1 %v14687_v10 }
 0x7f0   : > { %11895 = vmatpush3.bf16.msra.mxu1 %v13060_v29 }
 0x7f1   : > { %11896 = vmatprep.subr.bf16.mxu1 %v14687_v10 }
 0x7f4   : > { %11897 = vmatpush3.bf16.msra.mxu1 %v13061_v1 }
 0x7f5   : > { %11898 = vmatprep.subr.bf16.mxu1 %v14687_v10 }
 0x7f8   : > { %11899 = vmatpush3.bf16.msra.mxu1 %v13062_v4 }
 0x7f9   : > { %11900 = vmatprep.subr.bf16.mxu1 %v14687_v10 }
 0x7fc   : > { %11901 = vmatpush3.bf16.msra.mxu1 %v13063_v6 }
 0x7fd   : > { %11906 = vmatprep.subr.bf16.mxu1 %v14687_v10 }
 0x7ff   : > { %11903 = vmatmul.mubr.bf16.vlgmr.msra.gmra.mrb[148].mxu1 %v4947_v9  ;;  %v13106_v9 = vld [vmem:[%s15987_s1 + $0x990] sm:$0xff]  }
 0x800   : > { %11907 = vmatpush3.bf16.msra.mxu1 %v13064_v57  ;;  %11922 = vmatprep.mubr.msk.bf16.mxu1 %vm13393_vm0, %v14687_v10  ;;  %v13105_v57 = vld [vmem:[%s15987_s1 + $0x988] sm:$0xff]  }
 0x801   : > { %11908 = vmatprep.subr.bf16.mxu1 %v14687_v10 }
 0x804   : > { %11909 = vmatpush3.bf16.msra.mxu1 %v13065_v59  ;;  %v13113_v59 = vld [vmem:[%s15987_s1 + $0xb40] sm:$0xff]  }
 0x805   : > { %11910 = vmatprep.subr.bf16.mxu1 %v14687_v10 }
 0x808   : > { %11911 = vmatpush3.bf16.msra.mxu1 %v13066_v8  ;;  %v13115_v8 = vld [vmem:[%s15987_s1 + $0xb48] sm:$0xff]  }
 0x809   : > { %11912 = vmatprep.subr.bf16.mxu1 %v14687_v10 }
 0x80c   : > { %11913 = vmatpush3.bf16.msra.mxu1 %v13067_v12  ;;  %v13108_v12 = vld [vmem:[%s15987_s1 + $0x9a0] sm:$0xff]  }
 0x80d   : > { %11914 = vmatprep.subr.bf16.mxu1 %v14687_v10 }
 0x810   : > { %11915 = vmatpush3.bf16.msra.mxu1 %v13068_v61  ;;  %v13109_v61 = vld [vmem:[%s15987_s1 + $0x9a8] sm:$0xff]  }
 0x811   : > { %11916 = vmatprep.subr.bf16.mxu1 %v14687_v10 }
 0x814   : > { %11917 = vmatpush3.bf16.msra.mxu1 %v13069_v13  ;;  %v13117_v13 = vld [vmem:[%s15987_s1 + $0xb50] sm:$0xff]  }
 0x815   : > { %11918 = vmatprep.subr.bf16.mxu1 %v14687_v10 }
 0x818   : > { %11919 = vmatpush3.bf16.msra.mxu1 %v13070_v63  ;;  %v13110_v63 = vld [vmem:[%s15987_s1 + $0x9b0] sm:$0xff]  }
 0x819   : > { %11920 = vmatprep.subr.bf16.mxu1 %v14687_v10 }
 0x81c   : > { %11921 = vmatpush3.bf16.msra.mxu1 %v13071_v16  ;;  %v13119_v16 = vld [vmem:[%s15987_s1 + $0xb58] sm:$0xff]  }
 0x81d   : > { %11926 = vmatprep.subr.bf16.mxu1 %v14687_v10 }
 0x81f   : > { %11923 = vmatmul.mubr.bf16.vlgmr.msra.gmra.mrb[148].mxu1 %v5058_v19  ;;  %v13125_v19 = vld [vmem:[%s15987_s1 + $0xb70] sm:$0xff]  }
 0x820   : > { %11927 = vmatpush3.bf16.msra.mxu1 %v13072_v58  ;;  %11942 = vmatprep.mubr.msk.bf16.mxu1 %vm13393_vm0, %v14687_v10  ;;  %v13123_v58 = vld [vmem:[%s15987_s1 + $0xb68] sm:$0xff]  }
 0x821   : > { %11928 = vmatprep.subr.bf16.mxu1 %v14687_v10 }
 0x824   : > { %11929 = vmatpush3.bf16.msra.mxu1 %v13073_v60  ;;  %v13127_v60 = vld [vmem:[%s15987_s1 + $0xb78] sm:$0xff]  }
 0x825   : > { %11930 = vmatprep.subr.bf16.mxu1 %v14687_v10 }
 0x828   : > { %11931 = vmatpush3.bf16.msra.mxu1 %v13074_v20  ;;  %v9605_v20 = vld [vmem:[%s15988_s2 + $0x4] ss:$0 sm:$0xff] }
 0x829   : > { %11932 = vmatprep.subr.bf16.mxu1 %v14687_v10 }
 0x82c   : > { %11933 = vmatpush3.bf16.msra.mxu1 %v13075_v2 }
 0x82d   : > { %11934 = vmatprep.subr.bf16.mxu1 %v14687_v10 }
 0x830   : > { %11935 = vmatpush3.bf16.msra.mxu1 %v13076_v21 }
 0x831   : > { %11936 = vmatprep.subr.bf16.mxu1 %v14687_v10 }
 0x834   : > { %11937 = vmatpush3.bf16.msra.mxu1 %v13077_v25 }
 0x835   : > { %11938 = vmatprep.subr.bf16.mxu1 %v14687_v10 }
 0x838   : > { %11939 = vmatpush3.bf16.msra.mxu1 %v13078_v26 }
 0x839   : > { %11940 = vmatprep.subr.bf16.mxu1 %v14687_v10 }
 0x83c   : > { %11941 = vmatpush3.bf16.msra.mxu1 %v13079_v42 }
 0x83d   : > { %11946 = vmatprep.subr.bf16.mxu1 %v14687_v10 }
 0x83f   : > { %11943 = vmatmul.mubr.bf16.vlgmr.msra.gmra.mrb[148].mxu1 %v5169_v23 }
 0x840   : > { %11947 = vmatpush3.bf16.msra.mxu1 %v13080_v31  ;;  %11962 = vmatprep.mubr.msk.bf16.mxu1 %vm13393_vm0, %v14687_v10 }
 0x841   : > { %11948 = vmatprep.subr.bf16.mxu1 %v14687_v10 }
 0x844   : > { %11949 = vmatpush3.bf16.msra.mxu1 %v13081_v15 }
 0x845   : > { %11950 = vmatprep.subr.bf16.mxu1 %v14687_v10 }
 0x848   : > { %11951 = vmatpush3.bf16.msra.mxu1 %v13082_v32  ;;  %v13114_v32 = vld [vmem:[%s15987_s1 + $0x948] sm:$0xff]  }
 0x849   : > { %11952 = vmatprep.subr.bf16.mxu1 %v14687_v10 }
 0x84c   : > { %11953 = vmatpush3.bf16.msra.mxu1 %v13083_v5  ;;  %v13116_v5 = vld [vmem:[%s15987_s1 + $0x950] sm:$0xff]  }
 0x84d   : > { %11954 = vmatprep.subr.bf16.mxu1 %v14687_v10 }
 0x850   : > { %11955 = vmatpush3.bf16.msra.mxu1 %v13084_v17  ;;  %v13118_v17 = vld [vmem:[%s15987_s1 + $0x958] sm:$0xff]  }
 0x851   : > { %11956 = vmatprep.subr.bf16.mxu1 %v14687_v10 }
 0x854   : > { %11957 = vmatpush3.bf16.msra.mxu1 %v13085_v11  ;;  %v13120_v11 = vld [vmem:[%s15987_s1 + $0x960] sm:$0xff]  }
 0x855   : > { %11958 = vmatprep.subr.bf16.mxu1 %v14687_v10 }
 0x858   : > { %11959 = vmatpush3.bf16.msra.mxu1 %v13086_v37  ;;  %v13122_v37 = vld [vmem:[%s15987_s1 + $0x968] sm:$0xff]  }
 0x859   : > { %11960 = vmatprep.subr.bf16.mxu1 %v14687_v10 }
 0x85c   : > { %11961 = vmatpush3.bf16.msra.mxu1 %v13087_v40  ;;  %v13124_v40 = vld [vmem:[%s15987_s1 + $0x970] sm:$0xff]  }
 0x85d   : > { %11966 = vmatprep.subr.bf16.mxu1 %v14687_v10 }
 0x85f   : > { %11963 = vmatmul.mubr.bf16.vlgmr.msra.gmra.mrb[148].mxu1 %v5280_v43 }
 0x860   : > { %11967 = vmatpush3.bf16.msra.mxu1 %v13088_v35  ;;  %11982 = vmatprep.mubr.msk.bf16.mxu1 %vm13393_vm0, %v14687_v10  ;;  %v13128_v35 = vld [vmem:[%s15987_s1 + $0x9c0] sm:$0xff]  }
 0x861   : > { %11968 = vmatprep.subr.bf16.mxu1 %v14687_v10 }
 0x864   : > { %11969 = vmatpush3.bf16.msra.mxu1 %v13089_v28  ;;  %v13129_v28 = vld [vmem:[%s15987_s1 + $0x9c8] sm:$0xff]  }
 0x865   : > { %11970 = vmatprep.subr.bf16.mxu1 %v14687_v10 }
 0x868   : > { %11971 = vmatpush3.bf16.msra.mxu1 %v13090_v44  ;;  %v13130_v44 = vld [vmem:[%s15987_s1 + $0x9d0] sm:$0xff]  }
 0x869   : > { %11972 = vmatprep.subr.bf16.mxu1 %v14687_v10 }
 0x86c   : > { %11973 = vmatpush3.bf16.msra.mxu1 %v13091_v46  ;;  %v13131_v46 = vld [vmem:[%s15987_s1 + $0x9d8] sm:$0xff]  }
 0x86d   : > { %11974 = vmatprep.subr.bf16.mxu1 %v14687_v10 }
 0x870   : > { %11975 = vmatpush3.bf16.msra.mxu1 %v13092_v38  ;;  %v13132_v38 = vld [vmem:[%s15987_s1 + $0x9e0] sm:$0xff]  }
 0x871   : > { %11976 = vmatprep.subr.bf16.mxu1 %v14687_v10 }
 0x874   : > { %11977 = vmatpush3.bf16.msra.mxu1 %v13093_v49  ;;  %v13133_v49 = vld [vmem:[%s15987_s1 + $0x9e8] sm:$0xff]  }
 0x875   : > { %11978 = vmatprep.subr.bf16.mxu1 %v14687_v10 }
 0x878   : > { %11979 = vmatpush3.bf16.msra.mxu1 %v13094_v34  ;;  %v13134_v34 = vld [vmem:[%s15987_s1 + $0x9f0] sm:$0xff]  }
 0x879   : > { %11980 = vmatprep.subr.bf16.mxu1 %v14687_v10 }
 0x87c   : > { %11981 = vmatpush3.bf16.msra.mxu1 %v13095_v36  ;;  %v13135_v36 = vld [vmem:[%s15987_s1 + $0x9f8] sm:$0xff]  }
 0x87d   : > { %11986 = vmatprep.subr.bf16.mxu1 %v14687_v10 }
 0x87f   : > { %11983 = vmatmul.mubr.bf16.vlgmr.msra.gmra.mrb[148].mxu1 %v5391_v33  ;;  %v13137_v33 = vld [vmem:[%s15987_s1 + $0xa08] sm:$0xff]  }
 0x880   : > { %11987 = vmatpush3.bf16.msra.mxu1 %v13096_v47  ;;  %12002 = vmatprep.mubr.msk.bf16.mxu1 %vm13393_vm0, %v14687_v10 }
 0x881   : > { %11988 = vmatprep.subr.bf16.mxu1 %v14687_v10 }
 0x884   : > { %11989 = vmatpush3.bf16.msra.mxu1 %v13097_v55  ;;  %v13138_v55 = vld [vmem:[%s15987_s1 + $0xa10] sm:$0xff]  }
 0x885   : > { %11990 = vmatprep.subr.bf16.mxu1 %v14687_v10 }
 0x888   : > { %11991 = vmatpush3.bf16.msra.mxu1 %v13098_v50  ;;  %v13139_v50 = vld [vmem:[%s15987_s1 + $0xa18] sm:$0xff]  }
 0x889   : > { %11992 = vmatprep.subr.bf16.mxu1 %v14687_v10 }
 0x88c   : > { %11993 = vmatpush3.bf16.msra.mxu1 %v13099_v27  ;;  %v13140_v27 = vld [vmem:[%s15987_s1 + $0xa20] sm:$0xff]  }
 0x88d   : > { %11994 = vmatprep.subr.bf16.mxu1 %v14687_v10 }
 0x890   : > { %11995 = vmatpush3.bf16.msra.mxu1 %v13100_v39  ;;  %v13141_v39 = vld [vmem:[%s15987_s1 + $0xa28] sm:$0xff]  }
 0x891   : > { %11996 = vmatprep.subr.bf16.mxu1 %v14687_v10 }
 0x894   : > { %11997 = vmatpush3.bf16.msra.mxu1 %v13101_v52  ;;  %v13142_v52 = vld [vmem:[%s15987_s1 + $0xa30] sm:$0xff]  }
 0x895   : > { %11998 = vmatprep.subr.bf16.mxu1 %v14687_v10 }
 0x898   : > { %11999 = vmatpush3.bf16.msra.mxu1 %v13102_v56  ;;  %v13143_v56 = vld [vmem:[%s15987_s1 + $0xa38] sm:$0xff]  }
 0x899   : > { %12000 = vmatprep.subr.bf16.mxu1 %v14687_v10 }
 0x89c   : > { %12001 = vmatpush3.bf16.msra.mxu1 %v13103_v62 }
 0x89d   : > { %12173 = vmatprep.subr.bf16.mxu1 %v14687_v10 }
 0x89f   : > { %12003 = vmatmul.mubr.bf16.vlgmr.msra.gmra.mrb[148].mxu1 %v5502_v3  ;;  %v13145_v3 = vld [vmem:[%s15987_s1 + $0xa48] sm:$0xff]  }
 0x8a0   : > { %12189 = vmatprep.mubr.msk.bf16.mxu1 %vm13393_vm0, %v14687_v10  ;;  %12174 = vmatpush3.bf16.msra.mxu1 %v13113_v59 }
 0x8a1   : > { %12175 = vmatprep.subr.bf16.mxu1 %v14687_v10 }
 0x8a4   : > { %12176 = vmatpush3.bf16.msra.mxu1 %v13115_v8  ;;  %v13154_v8 = vld [vmem:[%s15987_s1 + $0xa90] sm:$0xff]  }
 0x8a5   : > { %12177 = vmatprep.subr.bf16.mxu1 %v14687_v10 }
 0x8a8   : > { %12178 = vmatpush3.bf16.msra.mxu1 %v13117_v13  ;;  %v13157_v13 = vld [vmem:[%s15987_s1 + $0xaa8] sm:$0xff]  }
 0x8a9   : > { %12179 = vmatprep.subr.bf16.mxu1 %v14687_v10 }
 0x8ac   : > { %12180 = vmatpush3.bf16.msra.mxu1 %v13119_v16  ;;  %v13159_v16 = vld [vmem:[%s15987_s1 + $0xab8] sm:$0xff]  }
 0x8ad   : > { %12181 = vmatprep.subr.bf16.mxu1 %v14687_v10 }
 0x8b0   : > { %12182 = vmatpush3.bf16.msra.mxu1 %v13121_v18  ;;  %v13160_v18 = vld [vmem:[%s15987_s1 + $0xac0] sm:$0xff]  }
 0x8b1   : > { %12183 = vmatprep.subr.bf16.mxu1 %v14687_v10 }
 0x8b4   : > { %12184 = vmatpush3.bf16.msra.mxu1 %v13123_v58 }
 0x8b5   : > { %12185 = vmatprep.subr.bf16.mxu1 %v14687_v10 }
 0x8b8   : > { %12186 = vmatpush3.bf16.msra.mxu1 %v13125_v19  ;;  %v13161_v19 = vld [vmem:[%s15987_s1 + $0xac8] sm:$0xff]  }
 0x8b9   : > { %12187 = vmatprep.subr.bf16.mxu1 %v14687_v10 }
 0x8bc   : > { %12188 = vmatpush3.bf16.msra.mxu1 %v13127_v60  ;;  %v13162_v60 = vld [vmem:[%s15987_s1 + $0xad0] sm:$0xff]  }
 0x8bd   : > { %12213 = vmatprep.subr.bf16.mxu1 %v14687_v10 }
 0x972   : > { %v5602_v29 = vpop.f32.mrb[148].mxu1 }
 0x973   : > { %v12004_v1 = vpop.f32.mrb[149].mxu1 }
 0x974   : > { %v5605_v4 = vpop.f32.mrb[150].mxu1  ;;  %v13147_v1 = vld [vmem:[%s15987_s1 + $0xa58] sm:$0xff]  }
 0x975   : > { %v12566_v6 = vpack.c.bf16 %v5605_v4, %v5602_v29  ;;  %v12005_v0 = vpop.f32.mrb[151].mxu1  ;;  %v13146_v29 = vld [vmem:[%s15987_s1 + $0xa50] sm:$0xff]   ;;  %v13148_v4 = vld [vmem:[%s15987_s1 + $0xa60] sm:$0xff]  }
 0x976   : > { %v13150_v0 = vld [vmem:[%s15987_s1 + $0xa70] sm:$0xff]  }
 0x977   : > { %12568 = vmatpush3.bf16.msk.msra.mxu0 %vm12567_vm6, %v12566_v6  ;;  %v13149_v6 = vld [vmem:[%s15987_s1 + $0xa68] sm:$0xff]  }
 0x978   : > { %12013 = vmatprep.subr.bf16.mxu0 %v14687_v10 }
 0x97a   : > { %12011 = vmatmul.mubr.msk.f32.vlgmr.msra.gmra.mrb[108].mxu0 %vm5619_vm7, %v14437_v24  ;;  %v13107_v24 = vld [vmem:[%s15987_s1 + $0x998] sm:$0xff]  }
 0x97b   : > { %12014 = vmatpush3.bf16.msra.mxu0 %v13104_v51  ;;  %12029 = vmatprep.mubr.msk.bf16.mxu0 %vm13393_vm0, %v14687_v10  ;;  %v13151_v51 = vld [vmem:[%s15987_s1 + $0xa78] sm:$0xff]  }
 0x97c   : > { %12015 = vmatprep.subr.bf16.mxu0 %v14687_v10 }
 0x97f   : > { %12016 = vmatpush3.bf16.msra.mxu0 %v13105_v57  ;;  %v15208_v57 = vld [vmem:[#allocation2] sm:$0xff] }
 0x980   : > { %12017 = vmatprep.subr.bf16.mxu0 %v14687_v10 }
 0x983   : > { %12018 = vmatpush3.bf16.msra.mxu0 %v13106_v9 }
 0x984   : > { %12019 = vmatprep.subr.bf16.mxu0 %v14687_v10 }
 0x987   : > { %12020 = vmatpush3.bf16.msra.mxu0 %v13107_v24  ;;  %v13152_v24 = vld [vmem:[%s15987_s1 + $0xa80] sm:$0xff]  }
 0x988   : > { %12021 = vmatprep.subr.bf16.mxu0 %v14687_v10 }
 0x98b   : > { %12022 = vmatpush3.bf16.msra.mxu0 %v13108_v12  ;;  %v13155_v12 = vld [vmem:[%s15987_s1 + $0xa98] sm:$0xff]  }
 0x98c   : > { %12023 = vmatprep.subr.bf16.mxu0 %v14687_v10 }
 0x98f   : > { %12024 = vmatpush3.bf16.msra.mxu0 %v13109_v61  ;;  %v13156_v61 = vld [vmem:[%s15987_s1 + $0xaa0] sm:$0xff]  }
 0x990   : > { %12025 = vmatprep.subr.bf16.mxu0 %v14687_v10 }
 0x993   : > { %12026 = vmatpush3.bf16.msra.mxu0 %v13110_v63  ;;  %v13158_v63 = vld [vmem:[%s15987_s1 + $0xab0] sm:$0xff]  }
 0x994   : > { %12027 = vmatprep.subr.bf16.mxu0 %v14687_v10 }
 0x997   : > { %12028 = vmatpush3.bf16.msra.mxu0 %v13111_v7 }
 0x998   : > { %12033 = vmatprep.subr.bf16.mxu0 %v14687_v10 }
 0xa4d   : > { %v5692_v2 = vpop.f32.mrb[108].mxu0 }
 0xa4e   : > { %v5693_v21 = vadd.f32 %v9605_v20, %v5692_v2  ;;  %v12012_v25 = vpop.f32.mrb[109].mxu0  ;;  %v13163_v20 = vld [vmem:[%s15987_s1 + $0xad8] sm:$0xff]   ;;  %v13164_v2 = vld [vmem:[%s15987_s1 + $0xae0] sm:$0xff]  }
 0xa4f   : > { %v13166_v25 = vld [vmem:[%s15987_s1 + $0xaf0] sm:$0xff]  }
 0xa50   : > { %vm5696_vm8 = vcmp.ge.f32.partialorder %v5693_v21, 0.0  ;;  %v5697_v26 = vmul.f32 0.01, %v5693_v21 }
 0xa52   : > { %v5698_v42 = vsel %vm5696_vm8, %v5693_v21, %v5697_v26  ;;  %v13165_v21 = vld [vmem:[%s15987_s1 + $0xae8] sm:$0xff]   ;;  %v13167_v26 = vld [vmem:[%s15987_s1 + $0xaf8] sm:$0xff]  }
 0xa53   : > { %5699 = vst [vmem:[#allocation6 + $0x5] sm:$0x3] %v5698_v42  ;;  %5700 = vst [vmem:[#allocation6 + $0x3] sm:$0xc0] %v5698_v42 }
 0xa5a   : > { %v5720_v14 = vld [vmem:[#allocation6 + $0x1] sm:$0x3f]  ;;  %v6563_v31 = vld [vmem:[#allocation6 + $0xa] sm:$0x3f] }
 0xa5b   : > { %v5721_v23 = vpack.c.bf16 %v5720_v14, %v5720_v14  ;;  %v6564_v15 = vpack.c.bf16 %v6563_v31, %v6563_v31  ;;  %v5701_v22 = vld [vmem:[#allocation6] sm:$0x3f]  ;;  %v6239_v7 = vld [vmem:[#allocation6 + $0x6] sm:$0x3f] }
 0xa5c   : > { %v5702_v43 = vpack.c.bf16 %v5701_v22, %v5701_v22  ;;  %v5915_v53 = vld [vmem:[#allocation6 + $0x2] sm:$0x3f]  ;;  %v6240_v58 = vpack.c.bf16 %v6239_v7, %v6239_v7  ;;  %v6347_v42 = vld [vmem:[#allocation6 + $0x8] sm:$0x3f] }
 0xa5d   : > { %12030 = vmatmul.mubr.bf16.vlgmr.msra.gmra.mrb[112].mxu0 %v5721_v23  ;;  %12190 = vmatmul.mubr.bf16.vlgmr.msra.gmra.mrb[152].mxu1 %v6564_v15  ;;  %v5916_v47 = vpack.c.bf16 %v5915_v53, %v5915_v53  ;;  %v6023_v62 = vld [vmem:[#allocation6 + $0x4] sm:$0x3f]  ;;  %v13170_v23 = vld [vmem:[%s15987_s1 + $0xb10] sm:$0xff]   ;;  %v13171_v15 = vld [vmem:[%s15987_s1 + $0xb18] sm:$0xff]  }
 0xa5e   : > { %12034 = vmatpush3.bf16.msra.mxu0 %v13112_v30  ;;  %12049 = vmatprep.mubr.msk.bf16.mxu0 %vm13393_vm0, %v14687_v10  ;;  %v6024_v48 = vpack.c.bf16 %v6023_v62, %v6023_v62  ;;  %v6131_v9 = vld [vmem:[#allocation6 + $0x5] sm:$0x3f]  ;;  %v6348_v30 = vpack.c.bf16 %v6347_v42, %v6347_v42 }
 0xa5f   : > { %12035 = vmatprep.subr.bf16.mxu0 %v14687_v10  ;;  %12229 = vmatprep.mubr.msk.bf16.mxu1 %vm13393_vm0, %v14687_v10  ;;  %v6132_v59 = vpack.c.bf16 %v6131_v9, %v6131_v9  ;;  %v13168_v14 = vld [vmem:[%s15987_s1 + $0xb00] sm:$0xff]   ;;  %v13169_v31 = vld [vmem:[%s15987_s1 + $0xb08] sm:$0xff]   ;;  %v13190_v9 = vld [vmem:[%s15987_s1 + $0xbf8] sm:$0xff]  }
 0xa60   : > { %v13201_v7 = vld [vmem:[%s15987_s1 + $0xc60] sm:$0xff]  }
 0xa62   : > { %12036 = vmatpush3.bf16.msra.mxu0 %v13114_v32  ;;  %v13172_v32 = vld [vmem:[%s15987_s1 + $0xb20] sm:$0xff]  }
 0xa63   : > { %12037 = vmatprep.subr.bf16.mxu0 %v14687_v10 }
 0xa66   : > { %12038 = vmatpush3.bf16.msra.mxu0 %v13116_v5  ;;  %v13173_v5 = vld [vmem:[%s15987_s1 + $0xb28] sm:$0xff]  }
 0xa67   : > { %12039 = vmatprep.subr.bf16.mxu0 %v14687_v10 }
 0xa6a   : > { %12040 = vmatpush3.bf16.msra.mxu0 %v13118_v17 }
 0xa6b   : > { %12041 = vmatprep.subr.bf16.mxu0 %v14687_v10 }
 0xa6e   : > { %12042 = vmatpush3.bf16.msra.mxu0 %v13120_v11 }
 0xa6f   : > { %12043 = vmatprep.subr.bf16.mxu0 %v14687_v10 }
 0xa72   : > { %12044 = vmatpush3.bf16.msra.mxu0 %v13122_v37 }
 0xa73   : > { %12045 = vmatprep.subr.bf16.mxu0 %v14687_v10 }
 0xa76   : > { %12046 = vmatpush3.bf16.msra.mxu0 %v13124_v40 }
 0xa77   : > { %12047 = vmatprep.subr.bf16.mxu0 %v14687_v10 }
 0xa7a   : > { %12048 = vmatpush3.bf16.msra.mxu0 %v13126_v41  ;;  %v13174_v41 = vld [vmem:[%s15987_s1 + $0xb30] sm:$0xff]  }
 0xa7b   : > { %12053 = vmatprep.subr.bf16.mxu0 %v14687_v10 }
 0xa7d   : > { %12050 = vmatmul.mubr.bf16.vlgmr.msra.gmra.mrb[116].mxu0 %v5702_v43 }
 0xa7e   : > { %12054 = vmatpush3.bf16.msra.mxu0 %v13128_v35  ;;  %12069 = vmatprep.mubr.msk.bf16.mxu0 %vm13393_vm0, %v14687_v10 }
 0xa7f   : > { %12055 = vmatprep.subr.bf16.mxu0 %v14687_v10 }
 0xa82   : > { %12056 = vmatpush3.bf16.msra.mxu0 %v13129_v28 }
 0xa83   : > { %12057 = vmatprep.subr.bf16.mxu0 %v14687_v10 }
 0xa86   : > { %12058 = vmatpush3.bf16.msra.mxu0 %v13130_v44  ;;  %v13177_v44 = vld [vmem:[%s15987_s1 + $0xb80] sm:$0xff]  }
 0xa87   : > { %12059 = vmatprep.subr.bf16.mxu0 %v14687_v10  ;;  %12214 = vmatpush3.bf16.msra.mxu1 %v13177_v44 }
 0xa88   : > { %12215 = vmatprep.subr.bf16.mxu1 %v15208_v57 }
 0xa8a   : > { %12060 = vmatpush3.bf16.msra.mxu0 %v13131_v46  ;;  %v13179_v46 = vld [vmem:[%s15987_s1 + $0xb88] sm:$0xff]  }
 0xa8b   : > { %12061 = vmatprep.subr.bf16.mxu0 %v14687_v10  ;;  %12216 = vmatpush3.bf16.msra.mxu1 %v13179_v46 }
 0xa8c   : > { %12217 = vmatprep.subr.bf16.mxu1 %v15208_v57 }
 0xa8e   : > { %12062 = vmatpush3.bf16.msra.mxu0 %v13132_v38  ;;  %v13175_v38 = vld [vmem:[%s15987_s1 + $0xb38] sm:$0xff]  }
 0xa8f   : > { %12063 = vmatprep.subr.bf16.mxu0 %v14687_v10 }
 0xa92   : > { %12064 = vmatpush3.bf16.msra.mxu0 %v13133_v49  ;;  %v6455_v49 = vld [vmem:[#allocation6 + $0x9] sm:$0x3f] }
 0xa93   : > { %12065 = vmatprep.subr.bf16.mxu0 %v14687_v10  ;;  %v6456_v53 = vpack.c.bf16 %v6455_v49, %v6455_v49  ;;  %v13215_v49 = vld [vmem:[%s15987_s1 + $0xcd8] sm:$0xff]  }
 0xa96   : > { %12066 = vmatpush3.bf16.msra.mxu0 %v13134_v34  ;;  %v13181_v34 = vld [vmem:[%s15987_s1 + $0xb90] sm:$0xff]  }
 0xa97   : > { %12067 = vmatprep.subr.bf16.mxu0 %v14687_v10  ;;  %12218 = vmatpush3.bf16.msra.mxu1 %v13181_v34  ;;  %v13216_v34 = vld [vmem:[%s15987_s1 + $0xca0] sm:$0xff]  }
 0xa98   : > { %12219 = vmatprep.subr.bf16.mxu1 %v15208_v57 }
 0xa9a   : > { %12068 = vmatpush3.bf16.msra.mxu0 %v13135_v36  ;;  %v13176_v36 = vld [vmem:[%s15987_s1 + $0xbc0] sm:$0xff]  }
 0xa9b   : > { %12073 = vmatprep.subr.bf16.mxu0 %v14687_v10 }
 0xa9d   : > { %12070 = vmatmul.mubr.bf16.vlgmr.msra.gmra.mrb[120].mxu0 %v5916_v47  ;;  %v13180_v47 = vld [vmem:[%s15987_s1 + $0xbd0] sm:$0xff]  }
 0xa9e   : > { %12074 = vmatpush3.bf16.msra.mxu0 %v13136_v54  ;;  %12089 = vmatprep.mubr.msk.bf16.mxu0 %vm13393_vm0, %v14687_v10  ;;  %v13178_v54 = vld [vmem:[%s15987_s1 + $0xbc8] sm:$0xff]  }
 0xa9f   : > { %12075 = vmatprep.subr.bf16.mxu0 %v14687_v10 }
 0xaa2   : > { %12076 = vmatpush3.bf16.msra.mxu0 %v13137_v33  ;;  %v13183_v33 = vld [vmem:[%s15987_s1 + $0xb98] sm:$0xff]  }
 0xaa3   : > { %12077 = vmatprep.subr.bf16.mxu0 %v14687_v10  ;;  %12220 = vmatpush3.bf16.msra.mxu1 %v13183_v33  ;;  %v13221_v33 = vld [vmem:[%s15987_s1 + $0xcf0] sm:$0xff]  }
 0xaa4   : > { %12221 = vmatprep.subr.bf16.mxu1 %v15208_v57 }
 0xaa6   : > { %12078 = vmatpush3.bf16.msra.mxu0 %v13138_v55  ;;  %v13182_v55 = vld [vmem:[%s15987_s1 + $0xbd8] sm:$0xff]  }
 0xaa7   : > { %12079 = vmatprep.subr.bf16.mxu0 %v14687_v10 }
 0xaaa   : > { %12080 = vmatpush3.bf16.msra.mxu0 %v13139_v50  ;;  %v13185_v50 = vld [vmem:[%s15987_s1 + $0xba0] sm:$0xff]  }
 0xaab   : > { %12081 = vmatprep.subr.bf16.mxu0 %v14687_v10  ;;  %12222 = vmatpush3.bf16.msra.mxu1 %v13185_v50  ;;  %v13223_v50 = vld [vmem:[%s15987_s1 + $0xcf8] sm:$0xff]  }
 0xaac   : > { %12223 = vmatprep.subr.bf16.mxu1 %v15208_v57 }
 0xaae   : > { %12082 = vmatpush3.bf16.msra.mxu0 %v13140_v27  ;;  %v13184_v27 = vld [vmem:[%s15987_s1 + $0xbe0] sm:$0xff]  }
 0xaaf   : > { %12083 = vmatprep.subr.bf16.mxu0 %v14687_v10 }
 0xab2   : > { %12084 = vmatpush3.bf16.msra.mxu0 %v13141_v39  ;;  %v13187_v39 = vld [vmem:[%s15987_s1 + $0xba8] sm:$0xff]  }
 0xab3   : > { %12085 = vmatprep.subr.bf16.mxu0 %v14687_v10  ;;  %12224 = vmatpush3.bf16.msra.mxu1 %v13187_v39 }
 0xab4   : > { %12225 = vmatprep.subr.bf16.mxu1 %v15208_v57 }
 0xab6   : > { %12086 = vmatpush3.bf16.msra.mxu0 %v13142_v52  ;;  %v13186_v52 = vld [vmem:[%s15987_s1 + $0xbe8] sm:$0xff]  }
 0xab7   : > { %12087 = vmatprep.subr.bf16.mxu0 %v14687_v10 }
 0xaba   : > { %12088 = vmatpush3.bf16.msra.mxu0 %v13143_v56  ;;  %v13189_v56 = vld [vmem:[%s15987_s1 + $0xbb0] sm:$0xff]  }
 0xabb   : > { %12093 = vmatprep.subr.bf16.mxu0 %v14687_v10  ;;  %12226 = vmatpush3.bf16.msra.mxu1 %v13189_v56 }
 0xabc   : > { %12227 = vmatprep.subr.bf16.mxu1 %v15208_v57 }
 0xabd   : > { %12090 = vmatmul.mubr.bf16.vlgmr.msra.gmra.mrb[124].mxu0 %v6024_v48 }
 0xabe   : > { %12094 = vmatpush3.bf16.msra.mxu0 %v13144_v45  ;;  %12109 = vmatprep.mubr.msk.bf16.mxu0 %vm13393_vm0, %v14687_v10 }
 0xabf   : > { %12095 = vmatprep.subr.bf16.mxu0 %v14687_v10 }
 0xac2   : > { %12096 = vmatpush3.bf16.msra.mxu0 %v13145_v3 }
 0xac3   : > { %12097 = vmatprep.subr.bf16.mxu0 %v14687_v10 }
 0xac6   : > { %12098 = vmatpush3.bf16.msra.mxu0 %v13146_v29  ;;  %v13188_v29 = vld [vmem:[%s15987_s1 + $0xbf0] sm:$0xff]  }
 0xac7   : > { %12099 = vmatprep.subr.bf16.mxu0 %v14687_v10 }
 0xaca   : > { %12100 = vmatpush3.bf16.msra.mxu0 %v13147_v1 }
 0xacb   : > { %12101 = vmatprep.subr.bf16.mxu0 %v14687_v10 }
 0xace   : > { %12102 = vmatpush3.bf16.msra.mxu0 %v13148_v4  ;;  %v13191_v4 = vld [vmem:[%s15987_s1 + $0xbb8] sm:$0xff]  }
 0xacf   : > { %12103 = vmatprep.subr.bf16.mxu0 %v14687_v10  ;;  %12228 = vmatpush3.bf16.msra.mxu1 %v13191_v4 }
 0xad0   : > { %12253 = vmatprep.subr.bf16.mxu1 %v15208_v57 }
 0xad2   : > { %12104 = vmatpush3.bf16.msra.mxu0 %v13149_v6  ;;  %v6685_v6 = vld [vmem:[#allocation7] sm:$0x1] }
 0xad3   : > { %12105 = vmatprep.subr.bf16.mxu0 %v14687_v10  ;;  %v13153_v10 = vld [vmem:[%s15987_s1 + $0xa88] sm:$0xff]  }
 0xad6   : > { %12106 = vmatpush3.bf16.msra.mxu0 %v13150_v0  ;;  %v6686_v0 = vpack.c.bf16 %v6685_v6, %v6685_v6 }
 0xad7   : > { %12107 = vmatprep.subr.bf16.mxu0 %v15208_v57 }
 0xad8   : > { %12230 = vmatmul.mubr.bf16.vlgmr.msra.gmra.mrb[156].mxu1 %v6686_v0 }
 0xad9   : > { %12269 = vmatprep.mubr.msk.bf16.mxu1 %vm13393_vm0, %v15208_v57 }
 0xada   : > { %12108 = vmatpush3.bf16.msra.mxu0 %v13151_v51  ;;  %v13193_v51 = vld [vmem:[%s15987_s1 + $0xc40] sm:$0xff]  }
 0xadb   : > { %12113 = vmatprep.subr.bf16.mxu0 %v15208_v57  ;;  %12254 = vmatpush3.bf16.msra.mxu1 %v13193_v51 }
 0xadc   : > { %12255 = vmatprep.subr.bf16.mxu1 %v15208_v57 }
 0xadd   : > { %12110 = vmatmul.mubr.bf16.vlgmr.msra.gmra.mrb[128].mxu0 %v6132_v59 }
 0xade   : > { %12114 = vmatpush3.bf16.msra.mxu0 %v13152_v24  ;;  %12129 = vmatprep.mubr.msk.bf16.mxu0 %vm13393_vm0, %v15208_v57  ;;  %v6704_v24 = vld [vmem:[#allocation7 + $0x1] sm:$0x1] }
 0xadf   : > { %12115 = vmatprep.subr.bf16.mxu0 %v15208_v57  ;;  %v6705_v59 = vpack.c.bf16 %v6704_v24, %v6704_v24 }
 0xae2   : > { %12116 = vmatpush3.bf16.msra.mxu0 %v13153_v10  ;;  %v13195_v10 = vld [vmem:[%s15987_s1 + $0xc48] sm:$0xff]  }
 0xae3   : > { %12117 = vmatprep.subr.bf16.mxu0 %v15208_v57  ;;  %12256 = vmatpush3.bf16.msra.mxu1 %v13195_v10 }
 0xae4   : > { %12257 = vmatprep.subr.bf16.mxu1 %v15208_v57 }
 0xae6   : > { %12118 = vmatpush3.bf16.msra.mxu0 %v13154_v8  ;;  %v13192_v8 = vld [vmem:[%s15987_s1 + $0xc00] sm:$0xff]  }
 0xae7   : > { %12119 = vmatprep.subr.bf16.mxu0 %v15208_v57 }
 0xaea   : > { %12120 = vmatpush3.bf16.msra.mxu0 %v13155_v12  ;;  %v13197_v12 = vld [vmem:[%s15987_s1 + $0xc50] sm:$0xff]  }
 0xaeb   : > { %12121 = vmatprep.subr.bf16.mxu0 %v15208_v57  ;;  %12258 = vmatpush3.bf16.msra.mxu1 %v13197_v12 }
 0xaec   : > { %12259 = vmatprep.subr.bf16.mxu1 %v15208_v57 }
 0xaee   : > { %12122 = vmatpush3.bf16.msra.mxu0 %v13156_v61  ;;  %v13194_v61 = vld [vmem:[%s15987_s1 + $0xc08] sm:$0xff]  }
 0xaef   : > { %12123 = vmatprep.subr.bf16.mxu0 %v15208_v57 }
 0xaf2   : > { %12124 = vmatpush3.bf16.msra.mxu0 %v13157_v13  ;;  %v13196_v13 = vld [vmem:[%s15987_s1 + $0xc10] sm:$0xff]  }
 0xaf3   : > { %12125 = vmatprep.subr.bf16.mxu0 %v15208_v57 }
 0xaf6   : > { %12126 = vmatpush3.bf16.msra.mxu0 %v13158_v63  ;;  %v13199_v63 = vld [vmem:[%s15987_s1 + $0xc58] sm:$0xff]  }
 0xaf7   : > { %12127 = vmatprep.subr.bf16.mxu0 %v15208_v57  ;;  %12260 = vmatpush3.bf16.msra.mxu1 %v13199_v63 }
 0xaf8   : > { %12261 = vmatprep.subr.bf16.mxu1 %v15208_v57 }
 0xafa   : > { %12128 = vmatpush3.bf16.msra.mxu0 %v13159_v16  ;;  %v13198_v16 = vld [vmem:[%s15987_s1 + $0xc18] sm:$0xff]  }
 0xafb   : > { %12133 = vmatprep.subr.bf16.mxu0 %v15208_v57  ;;  %12262 = vmatpush3.bf16.msra.mxu1 %v13201_v7 }
 0xafc   : > { %12263 = vmatprep.subr.bf16.mxu1 %v15208_v57 }
 0xafd   : > { %12130 = vmatmul.mubr.bf16.vlgmr.msra.gmra.mrb[132].mxu0 %v6240_v58  ;;  %v13203_v58 = vld [vmem:[%s15987_s1 + $0xc68] sm:$0xff]  }
 0xafe   : > { %12134 = vmatpush3.bf16.msra.mxu0 %v13160_v18  ;;  %12149 = vmatprep.mubr.msk.bf16.mxu0 %vm13393_vm0, %v15208_v57  ;;  %v13200_v18 = vld [vmem:[%s15987_s1 + $0xc20] sm:$0xff]  }
 0xaff   : > { %12135 = vmatprep.subr.bf16.mxu0 %v15208_v57  ;;  %12264 = vmatpush3.bf16.msra.mxu1 %v13203_v58 }
 0xb00   : > { %12265 = vmatprep.subr.bf16.mxu1 %v15208_v57 }
 0xb02   : > { %12136 = vmatpush3.bf16.msra.mxu0 %v13161_v19  ;;  %v13202_v19 = vld [vmem:[%s15987_s1 + $0xc28] sm:$0xff]  }
 0xb03   : > { %12137 = vmatprep.subr.bf16.mxu0 %v15208_v57 }
 0xb06   : > { %12138 = vmatpush3.bf16.msra.mxu0 %v13162_v60  ;;  %v13205_v60 = vld [vmem:[%s15987_s1 + $0xc70] sm:$0xff]  }
 0xb07   : > { %12139 = vmatprep.subr.bf16.mxu0 %v15208_v57  ;;  %12266 = vmatpush3.bf16.msra.mxu1 %v13205_v60  ;;  %v13225_v60 = vld [vmem:[%s15987_s1 + $0xd40] sm:$0xff]  }
 0xb08   : > { %12267 = vmatprep.subr.bf16.mxu1 %v15208_v57 }
 0xb0a   : > { %12140 = vmatpush3.bf16.msra.mxu0 %v13163_v20 }
 0xb0b   : > { %12141 = vmatprep.subr.bf16.mxu0 %v15208_v57 }
 0xb0e   : > { %12142 = vmatpush3.bf16.msra.mxu0 %v13164_v2 }
 0xb0f   : > { %12143 = vmatprep.subr.bf16.mxu0 %v15208_v57 }
 0xb12   : > { %12144 = vmatpush3.bf16.msra.mxu0 %v13165_v21 }
 0xb13   : > { %12145 = vmatprep.subr.bf16.mxu0 %v15208_v57 }
 0xb16   : > { %12146 = vmatpush3.bf16.msra.mxu0 %v13166_v25 }
 0xb17   : > { %12147 = vmatprep.subr.bf16.mxu0 %v15208_v57 }
 0xb1a   : > { %12148 = vmatpush3.bf16.msra.mxu0 %v13167_v26  ;;  %v13204_v26 = vld [vmem:[%s15987_s1 + $0xc30] sm:$0xff]  }
 0xb1b   : > { %12153 = vmatprep.subr.bf16.mxu0 %v15208_v57 }
 0xb1d   : > { %12150 = vmatmul.mubr.bf16.vlgmr.msra.gmra.mrb[136].mxu0 %v6348_v30  ;;  %v7007_v30 = vld [vmem:[#allocation7 + $0x4] sm:$0x1] }
 0xb1e   : > { %12154 = vmatpush3.bf16.msra.mxu0 %v13168_v14  ;;  %12169 = vmatprep.mubr.msk.bf16.mxu0 %vm13393_vm0, %v15208_v57  ;;  %v13207_v14 = vld [vmem:[%s15987_s1 + $0xc78] sm:$0xff]  }
 0xb1f   : > { %12155 = vmatprep.subr.bf16.mxu0 %v15208_v57  ;;  %12268 = vmatpush3.bf16.msra.mxu1 %v13207_v14 }
 0xb20   : > { %12293 = vmatprep.subr.bf16.mxu1 %v15208_v57 }
 0xb22   : > { %12156 = vmatpush3.bf16.msra.mxu0 %v13169_v31  ;;  %v7008_v31 = vpack.c.bf16 %v7007_v30, %v7007_v30  ;;  %v13230_v30 = vld [vmem:[%s15987_s1 + $0xd18] sm:$0xff]  }
 0xb23   : > { %12157 = vmatprep.subr.bf16.mxu0 %v15208_v57 }
 0xb24   : > { %12270 = vmatmul.mubr.bf16.vlgmr.msra.gmra.mrb[160].mxu1 %v7008_v31  ;;  %v13231_v31 = vld [vmem:[%s15987_s1 + $0xd58] sm:$0xff]  }
 0xb25   : > { %12309 = vmatprep.mubr.msk.bf16.mxu1 %vm13393_vm0, %v15208_v57 }
 0xb26   : > { %12158 = vmatpush3.bf16.msra.mxu0 %v13170_v23  ;;  %v13209_v23 = vld [vmem:[%s15987_s1 + $0xcc0] sm:$0xff]  }
 0xb27   : > { %12159 = vmatprep.subr.bf16.mxu0 %v15208_v57  ;;  %12294 = vmatpush3.bf16.msra.mxu1 %v13209_v23 }
 0xb28   : > { %12295 = vmatprep.subr.bf16.mxu1 %v15208_v57 }
 0xb2a   : > { %12160 = vmatpush3.bf16.msra.mxu0 %v13171_v15  ;;  %v13206_v15 = vld [vmem:[%s15987_s1 + $0xc38] sm:$0xff]  }
 0xb2b   : > { %12161 = vmatprep.subr.bf16.mxu0 %v15208_v57 }
 0xb2e   : > { %12162 = vmatpush3.bf16.msra.mxu0 %v13172_v32  ;;  %v6899_v32 = vld [vmem:[#allocation7 + $0x2] sm:$0x1] }
 0xb2f   : > { %12163 = vmatprep.subr.bf16.mxu0 %v15208_v57 }
 0xb30   : > { %v5821_v17 = vpop.f32.mrb[112].mxu0  ;;  %v15305_v11 = vpop.f32.mrb[152].mxu1 }
 0xb31   : > { %v12031_v37 = vpop.f32.mrb[113].mxu0  ;;  %v12191_v40 = vpop.f32.mrb[153].mxu1 }
 0xb32   : > { %12164 = vmatpush3.bf16.msra.mxu0 %v13173_v5  ;;  %v5824_v22 = vpop.f32.mrb[114].mxu0  ;;  %v6667_v35 = vpop.f32.mrb[154].mxu1  ;;  %v6900_v5 = vpack.c.bf16 %v6899_v32, %v6899_v32  ;;  %v13208_v37 = vld [vmem:[%s15987_s1 + $0xc80] sm:$0xff]   ;;  %v13213_v40 = vld [vmem:[%s15987_s1 + $0xcd0] sm:$0xff]  }
 0xb33   : > { %12165 = vmatprep.subr.bf16.mxu0 %v15208_v57  ;;  %v12032_v43 = vpop.f32.mrb[115].mxu0  ;;  %v12192_v28 = vpop.f32.mrb[155].mxu1  ;;  %v13212_v22 = vld [vmem:[%s15987_s1 + $0xc90] sm:$0xff]  }
 0xb36   : > { %12166 = vmatpush3.bf16.msra.mxu0 %v13174_v41  ;;  %v13210_v41 = vld [vmem:[%s15987_s1 + $0xc88] sm:$0xff]  }
 0xb37   : > { %12167 = vmatprep.subr.bf16.mxu0 %v15208_v57 }
 0xb3a   : > { %12168 = vmatpush3.bf16.msra.mxu0 %v13175_v38  ;;  %v13214_v38 = vld [vmem:[%s15987_s1 + $0xc98] sm:$0xff]  }
 0xb3b   : > { %12193 = vmatprep.subr.bf16.mxu0 %v15208_v57 }
 0xb3d   : > { %12170 = vmatmul.mubr.bf16.vlgmr.msra.gmra.mrb[140].mxu0 %v6456_v53  ;;  %v13218_v53 = vld [vmem:[%s15987_s1 + $0xca8] sm:$0xff]  }
 0xb3e   : > { %12194 = vmatpush3.bf16.msra.mxu0 %v13176_v36  ;;  %12209 = vmatprep.mubr.msk.bf16.mxu0 %vm13393_vm0, %v15208_v57  ;;  %v13217_v36 = vld [vmem:[%s15987_s1 + $0xce0] sm:$0xff]  }
 0xb3f   : > { %12195 = vmatprep.subr.bf16.mxu0 %v15208_v57 }
 0xb42   : > { %12196 = vmatpush3.bf16.msra.mxu0 %v13178_v54  ;;  %v13219_v54 = vld [vmem:[%s15987_s1 + $0xce8] sm:$0xff]  }
 0xb43   : > { %12197 = vmatprep.subr.bf16.mxu0 %v15208_v57 }
 0xb46   : > { %12198 = vmatpush3.bf16.msra.mxu0 %v13180_v47  ;;  %v13220_v47 = vld [vmem:[%s15987_s1 + $0xcb0] sm:$0xff]  }
 0xb47   : > { %12199 = vmatprep.subr.bf16.mxu0 %v15208_v57 }
 0xb4a   : > { %12200 = vmatpush3.bf16.msra.mxu0 %v13182_v55  ;;  %v13222_v55 = vld [vmem:[%s15987_s1 + $0xcb8] sm:$0xff]  }
 0xb4b   : > { %12201 = vmatprep.subr.bf16.mxu0 %v15208_v57 }
 0xb4e   : > { %12202 = vmatpush3.bf16.msra.mxu0 %v13184_v27 }
 0xb4f   : > { %12203 = vmatprep.subr.bf16.mxu0 %v15208_v57 }
 0xb50   : > { %v5909_v62 = vpop.f32.mrb[116].mxu0 }
 0xb51   : > { %v5910_v45 = vadd.f32 %v5909_v62, %v5821_v17  ;;  %v12051_v48 = vpop.f32.mrb[117].mxu0  ;;  %v13211_v17 = vld [vmem:[%s15987_s1 + $0xcc8] sm:$0xff]  }
 0xb52   : > { %v5912_v3 = vpop.f32.mrb[118].mxu0  ;;  %12204 = vmatpush3.bf16.msra.mxu0 %v13186_v52  ;;  %12296 = vmatpush3.bf16.msra.mxu1 %v13211_v17  ;;  %v13233_v17 = vld [vmem:[%s15987_s1 + $0xd60] sm:$0xff]  }
 0xb53   : > { %v12052_v1 = vpop.f32.mrb[119].mxu0  ;;  %12205 = vmatprep.subr.bf16.mxu0 %v15208_v57  ;;  %12297 = vmatprep.subr.bf16.mxu1 %v15208_v57 }
 0xb56   : > { %12206 = vmatpush3.bf16.msra.mxu0 %v13188_v29  ;;  %12298 = vmatpush3.bf16.msra.mxu1 %v13213_v40 }
 0xb57   : > { %12207 = vmatprep.subr.bf16.mxu0 %v15208_v57  ;;  %12299 = vmatprep.subr.bf16.mxu1 %v15208_v57 }
 0xb5a   : > { %12208 = vmatpush3.bf16.msra.mxu0 %v13190_v9  ;;  %12300 = vmatpush3.bf16.msra.mxu1 %v13215_v49  ;;  %v7331_v49 = vld [vmem:[#allocation7 + $0x8] sm:$0x1] }
 0xb5b   : > { %12233 = vmatprep.subr.bf16.mxu0 %v15208_v57  ;;  %12301 = vmatprep.subr.bf16.mxu1 %v15208_v57 }
 0xb5d   : > { %12210 = vmatmul.mubr.bf16.vlgmr.msra.gmra.mrb[144].mxu0 %v6705_v59 }
 0xb5e   : > { %12234 = vmatpush3.bf16.msra.mxu0 %v13192_v8  ;;  %12249 = vmatprep.mubr.msk.bf16.mxu0 %vm13393_vm0, %v15208_v57  ;;  %v9825_v8 = vld [vmem:[%s15988_s2 + $0x5] ss:$0 sm:$0xff] }
 0xb5f   : > { %12235 = vmatprep.subr.bf16.mxu0 %v15208_v57  ;;  %12302 = vmatpush3.bf16.msra.mxu1 %v13217_v36  ;;  %v7332_v36 = vpack.c.bf16 %v7331_v49, %v7331_v49  ;;  %v13282_v49 = vld [vmem:[%s15987_s1 + $0xec8] sm:$0xff]  }
 0xb60   : > { %12303 = vmatprep.subr.bf16.mxu1 %v15208_v57 }
 0xb62   : > { %12236 = vmatpush3.bf16.msra.mxu0 %v13194_v61 }
 0xb63   : > { %12237 = vmatprep.subr.bf16.mxu0 %v15208_v57  ;;  %12304 = vmatpush3.bf16.msra.mxu1 %v13219_v54 }
 0xb64   : > { %12305 = vmatprep.subr.bf16.mxu1 %v15208_v57 }
 0xb66   : > { %12238 = vmatpush3.bf16.msra.mxu0 %v13196_v13 }
 0xb67   : > { %12239 = vmatprep.subr.bf16.mxu0 %v15208_v57  ;;  %12306 = vmatpush3.bf16.msra.mxu1 %v13221_v33  ;;  %v13241_v33 = vld [vmem:[%s15987_s1 + $0xd88] sm:$0xff]  }
 0xb68   : > { %12307 = vmatprep.subr.bf16.mxu1 %v15208_v57 }
 0xb6a   : > { %12240 = vmatpush3.bf16.msra.mxu0 %v13198_v16 }
 0xb6b   : > { %12241 = vmatprep.subr.bf16.mxu0 %v15208_v57  ;;  %12308 = vmatpush3.bf16.msra.mxu1 %v13223_v50  ;;  %v13242_v50 = vld [vmem:[%s15987_s1 + $0xd90] sm:$0xff]  }
 0xb6c   : > { %12333 = vmatprep.subr.bf16.mxu1 %v15208_v57 }
 0xb6e   : > { %12242 = vmatpush3.bf16.msra.mxu0 %v13200_v18  ;;  %v13224_v18 = vld [vmem:[%s15987_s1 + $0xd00] sm:$0xff]  }
 0xb6f   : > { %12243 = vmatprep.subr.bf16.mxu0 %v15208_v57 }
 0xb70   : > { %v6016_v20 = vpop.f32.mrb[120].mxu0 }
 0xb71   : > { %v6022_v2 = vadd.f32 %v6016_v20, %v5910_v45  ;;  %v12071_v21 = vpop.f32.mrb[121].mxu0 }
 0xb72   : > { %v6019_v25 = vpop.f32.mrb[122].mxu0  ;;  %12244 = vmatpush3.bf16.msra.mxu0 %v13202_v19  ;;  %v13227_v21 = vld [vmem:[%s15987_s1 + $0xd48] sm:$0xff]  }
 0xb73   : > { %v12072_v42 = vpop.f32.mrb[123].mxu0  ;;  %12245 = vmatprep.subr.bf16.mxu0 %v15208_v57  ;;  %v13228_v25 = vld [vmem:[%s15987_s1 + $0xd10] sm:$0xff]  }
 0xb76   : > { %12246 = vmatpush3.bf16.msra.mxu0 %v13204_v26  ;;  %v13229_v26 = vld [vmem:[%s15987_s1 + $0xd50] sm:$0xff]  }
 0xb77   : > { %12247 = vmatprep.subr.bf16.mxu0 %v15208_v57 }
 0xb7a   : > { %12248 = vmatpush3.bf16.msra.mxu0 %v13206_v15 }
 0xb7b   : > { %12273 = vmatprep.subr.bf16.mxu0 %v15208_v57 }
 0xb7d   : > { %12250 = vmatmul.mubr.bf16.vlgmr.msra.gmra.mrb[148].mxu0 %v6900_v5  ;;  %v13232_v5 = vld [vmem:[%s15987_s1 + $0xd20] sm:$0xff]  }
 0xb7e   : > { %12274 = vmatpush3.bf16.msra.mxu0 %v13208_v37  ;;  %12289 = vmatprep.mubr.msk.bf16.mxu0 %vm13393_vm0, %v15208_v57 }
 0xb7f   : > { %12275 = vmatprep.subr.bf16.mxu0 %v15208_v57 }
 0xb82   : > { %12276 = vmatpush3.bf16.msra.mxu0 %v13210_v41 }
 0xb83   : > { %12277 = vmatprep.subr.bf16.mxu0 %v15208_v57 }
 0xb86   : > { %12278 = vmatpush3.bf16.msra.mxu0 %v13212_v22 }
 0xb87   : > { %12279 = vmatprep.subr.bf16.mxu0 %v15208_v57 }
 0xb8a   : > { %12280 = vmatpush3.bf16.msra.mxu0 %v13214_v38  ;;  %v13239_v38 = vld [vmem:[%s15987_s1 + $0xd78] sm:$0xff]  }
 0xb8b   : > { %12281 = vmatprep.subr.bf16.mxu0 %v15208_v57 }
 0xb8e   : > { %12282 = vmatpush3.bf16.msra.mxu0 %v13216_v34 }
 0xb8f   : > { %12283 = vmatprep.subr.bf16.mxu0 %v15208_v57 }
 0xb90   : > { %v6124_v35 = vpop.f32.mrb[124].mxu0 }
 0xb91   : > { %v6130_v43 = vadd.f32 %v6124_v35, %v6022_v2  ;;  %v12091_v28 = vpop.f32.mrb[125].mxu0  ;;  %v13234_v35 = vld [vmem:[%s15987_s1 + $0xd28] sm:$0xff]  }
 0xb92   : > { %v6127_v44 = vpop.f32.mrb[126].mxu0  ;;  %12284 = vmatpush3.bf16.msra.mxu0 %v13218_v53  ;;  %v13236_v28 = vld [vmem:[%s15987_s1 + $0xd30] sm:$0xff]   ;;  %v13240_v53 = vld [vmem:[%s15987_s1 + $0xd80] sm:$0xff]  }
 0xb93   : > { %v12092_v46 = vpop.f32.mrb[127].mxu0  ;;  %12285 = vmatprep.subr.bf16.mxu0 %v15208_v57  ;;  %v13237_v44 = vld [vmem:[%s15987_s1 + $0xd70] sm:$0xff]  }
 0xb94   : > { %v13238_v46 = vld [vmem:[%s15987_s1 + $0xd38] sm:$0xff]  }
 0xb96   : > { %12286 = vmatpush3.bf16.msra.mxu0 %v13220_v47  ;;  %v13248_v47 = vld [vmem:[%s15987_s1 + $0xe00] sm:$0xff]  }
 0xb97   : > { %12287 = vmatprep.subr.bf16.mxu0 %v15208_v57 }
 0xb9a   : > { %12288 = vmatpush3.bf16.msra.mxu0 %v13222_v55  ;;  %v13250_v55 = vld [vmem:[%s15987_s1 + $0xe08] sm:$0xff]  }
 0xb9b   : > { %12313 = vmatprep.subr.bf16.mxu0 %v15208_v57 }
 0xbab   : > { %v6893_v42 = vpop.f32.mrb[156].mxu1 }
 0xbac   : > { %v12231_v14 = vpop.f32.mrb[157].mxu1 }
 0xbad   : > { %v6896_v23 = vpop.f32.mrb[158].mxu1 }
 0xbae   : > { %v12232_v15 = vpop.f32.mrb[159].mxu1  ;;  %v13270_v23 = vld [vmem:[%s15987_s1 + $0xe58] sm:$0xff]  }
 0xbaf   : > { %v13267_v15 = vld [vmem:[%s15987_s1 + $0xe88] sm:$0xff]  }
 0xbb0   : > { %v6232_v27 = vpop.f32.mrb[128].mxu0 }
 0xbb1   : > { %v6238_v39 = vadd.f32 %v6232_v27, %v6130_v43  ;;  %v12111_v52 = vpop.f32.mrb[129].mxu0  ;;  %v13235_v43 = vld [vmem:[%s15987_s1 + $0xd68] sm:$0xff]   ;;  %v13252_v27 = vld [vmem:[%s15987_s1 + $0xe10] sm:$0xff]  }
 0xbb2   : > { %v6235_v56 = vpop.f32.mrb[130].mxu0 }
 0xbb3   : > { %v12112_v62 = vpop.f32.mrb[131].mxu0  ;;  %v13243_v56 = vld [vmem:[%s15987_s1 + $0xd98] sm:$0xff]  }
 0xbd0   : > { %v6340_v45 = vpop.f32.mrb[132].mxu0 }
 0xbd1   : > { %v6346_v48 = vadd.f32 %v6340_v45, %v6238_v39  ;;  %v12131_v3 = vpop.f32.mrb[133].mxu0  ;;  %v13254_v45 = vld [vmem:[%s15987_s1 + $0xe18] sm:$0xff]  }
 0xbd2   : > { %v6343_v29 = vpop.f32.mrb[134].mxu0 }
 0xbd3   : > { %v12132_v1 = vpop.f32.mrb[135].mxu0  ;;  %v13244_v29 = vld [vmem:[%s15987_s1 + $0xda0] sm:$0xff]  }
 0xbf0   : > { %v6448_v4 = vpop.f32.mrb[136].mxu0 }
 0xbf1   : > { %v6454_v6 = vadd.f32 %v6448_v4, %v6346_v48  ;;  %v12151_v0 = vpop.f32.mrb[137].mxu0 }
 0xbf2   : > { %v6451_v51 = vpop.f32.mrb[138].mxu0 }
 0xbf3   : > { %v12152_v9 = vpop.f32.mrb[139].mxu0 }
 0xbf4   : > { %v13245_v9 = vld [vmem:[%s15987_s1 + $0xda8] sm:$0xff]  }
 0xbf7   : > { %v7108_v39 = vpop.f32.mrb[160].mxu1 }
 0xbf8   : > { %v12271_v52 = vpop.f32.mrb[161].mxu1 }
 0xbf9   : > { %v7111_v62 = vpop.f32.mrb[162].mxu1  ;;  %v13290_v52 = vld [vmem:[%s15987_s1 + $0xee8] sm:$0xff]  }
 0xbfa   : > { %v12272_v48 = vpop.f32.mrb[163].mxu1  ;;  %v13292_v62 = vld [vmem:[%s15987_s1 + $0xef0] sm:$0xff]  }
 0xbfb   : > { %v13294_v48 = vld [vmem:[%s15987_s1 + $0xef8] sm:$0xff]  }
 0xc10   : > { %v6556_v24 = vpop.f32.mrb[140].mxu0 }
 0xc11   : > { %v6562_v59 = vadd.f32 %v6556_v24, %v6454_v6  ;;  %v12171_v10 = vpop.f32.mrb[141].mxu0  ;;  %v13246_v24 = vld [vmem:[%s15987_s1 + $0xdb0] sm:$0xff]  }
 0xc12   : > { %v6559_v12 = vpop.f32.mrb[142].mxu0 }
 0xc13   : > { %v6670_v61 = vadd.f32 %v15305_v11, %v6562_v59  ;;  %v12172_v13 = vpop.f32.mrb[143].mxu0  ;;  %v13226_v11 = vld [vmem:[%s15987_s1 + $0xd08] sm:$0xff]   ;;  %v13247_v59 = vld [vmem:[%s15987_s1 + $0xdb8] sm:$0xff]  }
 0xc14   : > { %v13253_v13 = vld [vmem:[%s15987_s1 + $0xdd0] sm:$0xff]  }
 0xc15   : > { %v6679_v63 = vadd.f32 %v9825_v8, %v6670_v61  ;;  %v13249_v8 = vld [vmem:[%s15987_s1 + $0xdc0] sm:$0xff]   ;;  %v13251_v61 = vld [vmem:[%s15987_s1 + $0xdc8] sm:$0xff]  }
 0xc17   : > { %vm6680_vm9 = vcmp.ge.f32.partialorder %v6679_v63, 0.0  ;;  %v6681_v16 = vmul.f32 0.01, %v6679_v63 }
 0xc19   : > { %v6682_v7 = vsel %vm6680_vm9, %v6679_v63, %v6681_v16  ;;  %v13256_v63 = vld [vmem:[%s15987_s1 + $0xe20] sm:$0xff]   ;;  %v13255_v16 = vld [vmem:[%s15987_s1 + $0xdd8] sm:$0xff]  }
 0xc1a   : > { %6683 = vst [vmem:[#allocation7 + $0x5] sm:$0x33] %v6682_v7   ;;  %v13258_v7 = vld [vmem:[%s15987_s1 + $0xe28] sm:$0xff]  }
 0xc21   : > { %v7115_v58 = vld [vmem:[#allocation7 + $0x5] sm:$0x1]  ;;  %v7223_v19 = vld [vmem:[#allocation7 + $0x6] sm:$0x1]  ;;  %v7439_v34 = vld [vmem:[#allocation7 + $0x9] sm:$0x1] }
 0xc22   : > { %v7116_v20 = vpack.c.bf16 %v7115_v58, %v7115_v58  ;;  %v7224_v2 = vpack.c.bf16 %v7223_v19, %v7223_v19  ;;  %v7440_v54 = vpack.c.bf16 %v7439_v34, %v7439_v34  ;;  %v7547_v10 = vld [vmem:[#allocation7 + $0xa] sm:$0x1]  ;;  %v13260_v58 = vld [vmem:[%s15987_s1 + $0xe30] sm:$0xff]   ;;  %v13259_v19 = vld [vmem:[%s15987_s1 + $0xde8] sm:$0xff]  }
 0xc23   : > { %v7548_v12 = vpack.c.bf16 %v7547_v10, %v7547_v10  ;;  %v7984_v34 = vld [vmem:[#allocation8 + $0x3] sm:$0x1]  ;;  %v13309_v10 = vld [vmem:[%s15987_s1 + $0xfb0] sm:$0xff]  }
 0xc24   : > { %12290 = vmatmul.mubr.bf16.vlgmr.msra.gmra.mrb[152].mxu0 %v7116_v20  ;;  %12310 = vmatmul.mubr.bf16.vlgmr.msra.gmra.mrb[164].mxu1 %v7224_v2  ;;  %v7681_v20 = vld [vmem:[#allocation8 + $0x1] sm:$0x1]  ;;  %v13261_v2 = vld [vmem:[%s15987_s1 + $0xdf0] sm:$0xff]  }
 0xc25   : > { %12314 = vmatpush3.bf16.msra.mxu0 %v13224_v18  ;;  %12334 = vmatpush3.bf16.msra.mxu1 %v13225_v60  ;;  %v13257_v18 = vld [vmem:[%s15987_s1 + $0xde0] sm:$0xff]   ;;  %v13262_v60 = vld [vmem:[%s15987_s1 + $0xe38] sm:$0xff]  }
 0xc26   : > { %12315 = vmatprep.subr.bf16.mxu0 %v15208_v57  ;;  %12335 = vmatprep.subr.bf16.mxu1 %v15208_v57 }
 0xc27   : > { %12329 = vmatprep.mubr.msk.bf16.mxu0 %vm13393_vm0, %v15208_v57  ;;  %12349 = vmatprep.mubr.msk.bf16.mxu1 %vm13393_vm0, %v15208_v57 }
 0xc29   : > { %12316 = vmatpush3.bf16.msra.mxu0 %v13226_v11  ;;  %12336 = vmatpush3.bf16.msra.mxu1 %v13227_v21  ;;  %v7682_v11 = vpack.c.bf16 %v7681_v20, %v7681_v20  ;;  %v13264_v21 = vld [vmem:[%s15987_s1 + $0xe40] sm:$0xff]  }
 0xc2a   : > { %12317 = vmatprep.subr.bf16.mxu0 %v15208_v57  ;;  %12337 = vmatprep.subr.bf16.mxu1 %v15208_v57 }
 0xc2d   : > { %12318 = vmatpush3.bf16.msra.mxu0 %v13228_v25  ;;  %12338 = vmatpush3.bf16.msra.mxu1 %v13229_v26  ;;  %v13266_v25 = vld [vmem:[%s15987_s1 + $0xe48] sm:$0xff]   ;;  %v13263_v26 = vld [vmem:[%s15987_s1 + $0xdf8] sm:$0xff]  }
 0xc2e   : > { %12319 = vmatprep.subr.bf16.mxu0 %v15208_v57  ;;  %12339 = vmatprep.subr.bf16.mxu1 %v15208_v57 }
 0xc30   : > { %v6805_v32 = vpop.f32.mrb[144].mxu0 }
 0xc31   : > { %12320 = vmatpush3.bf16.msra.mxu0 %v13230_v30  ;;  %12340 = vmatpush3.bf16.msra.mxu1 %v13231_v31  ;;  %v12211_v37 = vpop.f32.mrb[145].mxu0  ;;  %v6894_v40 = vadd.f32 %v6893_v42, %v6805_v32  ;;  %v7662_v42 = vld [vmem:[#allocation8] sm:$0x1]  ;;  %v13268_v30 = vld [vmem:[%s15987_s1 + $0xe50] sm:$0xff]  }
 0xc32   : > { %12321 = vmatprep.subr.bf16.mxu0 %v15208_v57  ;;  %12341 = vmatprep.subr.bf16.mxu1 %v15208_v57  ;;  %v6808_v41 = vpop.f32.mrb[146].mxu0  ;;  %v7663_v14 = vpack.c.bf16 %v7662_v42, %v7662_v42  ;;  %v13265_v31 = vld [vmem:[%s15987_s1 + $0xe80] sm:$0xff]   ;;  %v13269_v32 = vld [vmem:[%s15987_s1 + $0xe90] sm:$0xff]   ;;  %v13274_v37 = vld [vmem:[%s15987_s1 + $0xe68] sm:$0xff]  }
 0xc33   : > { %v12212_v22 = vpop.f32.mrb[147].mxu0  ;;  %v13276_v41 = vld [vmem:[%s15987_s1 + $0xe70] sm:$0xff]  }
 0xc34   : > { %v13275_v22 = vld [vmem:[%s15987_s1 + $0xea8] sm:$0xff]  }
 0xc35   : > { %12322 = vmatpush3.bf16.msra.mxu0 %v13232_v5  ;;  %12342 = vmatpush3.bf16.msra.mxu1 %v13233_v17  ;;  %v13272_v5 = vld [vmem:[%s15987_s1 + $0xe60] sm:$0xff]   ;;  %v13271_v17 = vld [vmem:[%s15987_s1 + $0xe98] sm:$0xff]  }
 0xc36   : > { %12323 = vmatprep.subr.bf16.mxu0 %v15208_v57  ;;  %12343 = vmatprep.subr.bf16.mxu1 %v15208_v57 }
 0xc39   : > { %12324 = vmatpush3.bf16.msra.mxu0 %v13234_v35  ;;  %12344 = vmatpush3.bf16.msra.mxu1 %v13235_v43  ;;  %v13278_v35 = vld [vmem:[%s15987_s1 + $0xe78] sm:$0xff]   ;;  %v7876_v43 = vld [vmem:[#allocation8 + $0x2] sm:$0x1] }
 0xc3a   : > { %12325 = vmatprep.subr.bf16.mxu0 %v15208_v57  ;;  %12345 = vmatprep.subr.bf16.mxu1 %v15208_v57 }
 0xc3d   : > { %12326 = vmatpush3.bf16.msra.mxu0 %v13236_v28  ;;  %12346 = vmatpush3.bf16.msra.mxu1 %v13237_v44  ;;  %v7877_v28 = vpack.c.bf16 %v7876_v43, %v7876_v43  ;;  %v13277_v44 = vld [vmem:[%s15987_s1 + $0xeb0] sm:$0xff]  }
 0xc3e   : > { %12327 = vmatprep.subr.bf16.mxu0 %v15208_v57  ;;  %12347 = vmatprep.subr.bf16.mxu1 %v15208_v57 }
 0xc41   : > { %12328 = vmatpush3.bf16.msra.mxu0 %v13238_v46  ;;  %12348 = vmatpush3.bf16.msra.mxu1 %v13239_v38  ;;  %v15756_v46 = vld [vmem:[#allocation2] sm:$0xff] }
 0xc42   : > { %12353 = vmatprep.subr.bf16.mxu0 %v15208_v57  ;;  %12373 = vmatprep.subr.bf16.mxu1 %v15208_v57  ;;  %v13280_v38 = vld [vmem:[%s15987_s1 + $0xec0] sm:$0xff]  }
 0xc44   : > { %12330 = vmatmul.mubr.bf16.vlgmr.msra.gmra.mrb[156].mxu0 %v7332_v36  ;;  %12350 = vmatmul.mubr.bf16.vlgmr.msra.gmra.mrb[168].mxu1 %v7440_v54  ;;  %v7985_v36 = vpack.c.bf16 %v7984_v34, %v7984_v34  ;;  %v13281_v54 = vld [vmem:[%s15987_s1 + $0xf00] sm:$0xff]  }
 0xc45   : > { %12354 = vmatpush3.bf16.msra.mxu0 %v13240_v53  ;;  %12369 = vmatprep.mubr.msk.bf16.mxu0 %vm13393_vm0, %v15208_v57  ;;  %v13284_v53 = vld [vmem:[%s15987_s1 + $0xed0] sm:$0xff]  }
 0xc46   : > { %12355 = vmatprep.subr.bf16.mxu0 %v15208_v57  ;;  %12374 = vmatpush3.bf16.msra.mxu1 %v13248_v47  ;;  %v13286_v47 = vld [vmem:[%s15987_s1 + $0xed8] sm:$0xff]  }
 0xc47   : > { %12375 = vmatprep.subr.bf16.mxu1 %v15208_v57  ;;  %12389 = vmatprep.mubr.msk.bf16.mxu1 %vm13393_vm0, %v15208_v57 }
 0xc49   : > { %12356 = vmatpush3.bf16.msra.mxu0 %v13241_v33  ;;  %v13283_v33 = vld [vmem:[%s15987_s1 + $0xf08] sm:$0xff]  }
 0xc4a   : > { %12357 = vmatprep.subr.bf16.mxu0 %v15208_v57  ;;  %12376 = vmatpush3.bf16.msra.mxu1 %v13250_v55  ;;  %v13285_v55 = vld [vmem:[%s15987_s1 + $0xf10] sm:$0xff]  }
 0xc4b   : > { %12377 = vmatprep.subr.bf16.mxu1 %v15208_v57 }
 0xc4d   : > { %12358 = vmatpush3.bf16.msra.mxu0 %v13242_v50  ;;  %v13287_v50 = vld [vmem:[%s15987_s1 + $0xf18] sm:$0xff]  }
 0xc4e   : > { %12359 = vmatprep.subr.bf16.mxu0 %v15208_v57  ;;  %12378 = vmatpush3.bf16.msra.mxu1 %v13252_v27  ;;  %v13288_v27 = vld [vmem:[%s15987_s1 + $0xee0] sm:$0xff]  }
 0xc4f   : > { %12379 = vmatprep.subr.bf16.mxu1 %v15208_v57 }
 0xc50   : > { %v7000_v3 = vpop.f32.mrb[148].mxu0 }
 0xc51   : > { %12360 = vmatpush3.bf16.msra.mxu0 %v13243_v56  ;;  %v7006_v1 = vadd.f32 %v7000_v3, %v6894_v40  ;;  %v12251_v4 = vpop.f32.mrb[149].mxu0  ;;  %v13273_v40 = vld [vmem:[%s15987_s1 + $0xea0] sm:$0xff]   ;;  %v13291_v56 = vld [vmem:[%s15987_s1 + $0xf28] sm:$0xff]   ;;  %v13295_v3 = vld [vmem:[%s15987_s1 + $0xf38] sm:$0xff]  }
 0xc52   : > { %12361 = vmatprep.subr.bf16.mxu0 %v15208_v57  ;;  %12380 = vmatpush3.bf16.msra.mxu1 %v13254_v45  ;;  %v7003_v6 = vpop.f32.mrb[150].mxu0  ;;  %v13293_v45 = vld [vmem:[%s15987_s1 + $0xf30] sm:$0xff]   ;;  %v13297_v4 = vld [vmem:[%s15987_s1 + $0xf80] sm:$0xff]  }
 0xc53   : > { %v15628_v0 = vadd.f32 %v7108_v39, %v7006_v1  ;;  %v12252_v51 = vpop.f32.mrb[151].mxu0  ;;  %12381 = vmatprep.subr.bf16.mxu1 %v15208_v57  ;;  %v13289_v39 = vld [vmem:[%s15987_s1 + $0xf20] sm:$0xff]   ;;  %v13299_v6 = vld [vmem:[%s15987_s1 + $0xf88] sm:$0xff]  }
 0xc54   : > { %v13301_v51 = vld [vmem:[%s15987_s1 + $0xf90] sm:$0xff]  }
 0xc55   : > { %12362 = vmatpush3.bf16.msra.mxu0 %v13244_v29  ;;  %v8200_v29 = vld [vmem:[#allocation8 + $0x5] sm:$0x1] }
 0xc56   : > { %12363 = vmatprep.subr.bf16.mxu0 %v15208_v57  ;;  %12382 = vmatpush3.bf16.msra.mxu1 %v13256_v63  ;;  %v8201_v1 = vpack.c.bf16 %v8200_v29, %v8200_v29  ;;  %v13313_v29 = vld [vmem:[%s15987_s1 + $0xfc8] sm:$0xff]  }
 0xc57   : > { %12383 = vmatprep.subr.bf16.mxu1 %v15208_v57 }
 0xc59   : > { %12364 = vmatpush3.bf16.msra.mxu0 %v13245_v9  ;;  %v13303_v9 = vld [vmem:[%s15987_s1 + $0xf98] sm:$0xff]  }
 0xc5a   : > { %12365 = vmatprep.subr.bf16.mxu0 %v15208_v57  ;;  %12384 = vmatpush3.bf16.msra.mxu1 %v13258_v7 }
 0xc5b   : > { %12385 = vmatprep.subr.bf16.mxu1 %v15208_v57 }
 0xc5d   : > { %12366 = vmatpush3.bf16.msra.mxu0 %v13246_v24  ;;  %v13305_v24 = vld [vmem:[%s15987_s1 + $0xfa0] sm:$0xff]  }
 0xc5e   : > { %12367 = vmatprep.subr.bf16.mxu0 %v15208_v57  ;;  %12386 = vmatpush3.bf16.msra.mxu1 %v13260_v58 }
 0xc5f   : > { %12387 = vmatprep.subr.bf16.mxu1 %v15208_v57 }
 0xc61   : > { %12368 = vmatpush3.bf16.msra.mxu0 %v13247_v59  ;;  %v13307_v59 = vld [vmem:[%s15987_s1 + $0xfa8] sm:$0xff]  }
 0xc62   : > { %12393 = vmatprep.subr.bf16.mxu0 %v15208_v57  ;;  %12388 = vmatpush3.bf16.msra.mxu1 %v13262_v60 }
 0xc63   : > { %12413 = vmatprep.subr.bf16.mxu1 %v15208_v57 }
 0xc64   : > { %12370 = vmatmul.mubr.bf16.vlgmr.msra.gmra.mrb[160].mxu0 %v7548_v12  ;;  %v8416_v12 = vld [vmem:[#allocation8 + $0x7] sm:$0x1] }
 0xc65   : > { %12394 = vmatpush3.bf16.msra.mxu0 %v13249_v8  ;;  %12409 = vmatprep.mubr.msk.bf16.mxu0 %vm13393_vm0, %v15208_v57  ;;  %v13311_v8 = vld [vmem:[%s15987_s1 + $0xfb8] sm:$0xff]  }
 0xc66   : > { %12395 = vmatprep.subr.bf16.mxu0 %v15208_v57  ;;  %12390 = vmatmul.mubr.bf16.vlgmr.msra.gmra.mrb[172].mxu1 %v7682_v11 }
 0xc67   : > { %12414 = vmatpush3.bf16.msra.mxu1 %v13264_v21  ;;  %12429 = vmatprep.mubr.msk.bf16.mxu1 %vm13393_vm0, %v15208_v57 }
 0xc68   : > { %12415 = vmatprep.subr.bf16.mxu1 %v15208_v57 }
 0xc69   : > { %12396 = vmatpush3.bf16.msra.mxu0 %v13251_v61  ;;  %v8417_v61 = vpack.c.bf16 %v8416_v12, %v8416_v12 }
 0xc6a   : > { %12397 = vmatprep.subr.bf16.mxu0 %v15208_v57 }
 0xc6b   : > { %12416 = vmatpush3.bf16.msra.mxu1 %v13266_v25 }
 0xc6c   : > { %12417 = vmatprep.subr.bf16.mxu1 %v15208_v57 }
 0xc6d   : > { %12398 = vmatpush3.bf16.msra.mxu0 %v13253_v13 }
 0xc6e   : > { %12399 = vmatprep.subr.bf16.mxu0 %v15208_v57 }
 0xc6f   : > { %12418 = vmatpush3.bf16.msra.mxu1 %v13268_v30 }
 0xc70   : > { %12419 = vmatprep.subr.bf16.mxu1 %v15208_v57 }
 0xc71   : > { %12400 = vmatpush3.bf16.msra.mxu0 %v13255_v16 }
 0xc72   : > { %12401 = vmatprep.subr.bf16.mxu0 %v15208_v57 }
 0xc73   : > { %12420 = vmatpush3.bf16.msra.mxu1 %v13270_v23 }
 0xc74   : > { %12421 = vmatprep.subr.bf16.mxu1 %v15208_v57 }
 0xc75   : > { %12402 = vmatpush3.bf16.msra.mxu0 %v13257_v18 }
 0xc76   : > { %12403 = vmatprep.subr.bf16.mxu0 %v15208_v57 }
 0xc77   : > { %12422 = vmatpush3.bf16.msra.mxu1 %v13272_v5 }
 0xc78   : > { %12423 = vmatprep.subr.bf16.mxu1 %v15208_v57 }
 0xc79   : > { %12404 = vmatpush3.bf16.msra.mxu0 %v13259_v19 }
 0xc7a   : > { %12405 = vmatprep.subr.bf16.mxu0 %v15208_v57 }
 0xc7b   : > { %12424 = vmatpush3.bf16.msra.mxu1 %v13274_v37 }
 0xc7c   : > { %12425 = vmatprep.subr.bf16.mxu1 %v15208_v57 }
 0xc7d   : > { %12406 = vmatpush3.bf16.msra.mxu0 %v13261_v2 }
 0xc7e   : > { %12407 = vmatprep.subr.bf16.mxu0 %v15208_v57 }
 0xc7f   : > { %12426 = vmatpush3.bf16.msra.mxu1 %v13276_v41 }
 0xc80   : > { %12427 = vmatprep.subr.bf16.mxu1 %v15208_v57 }
 0xc81   : > { %12408 = vmatpush3.bf16.msra.mxu0 %v13263_v26 }
 0xc82   : > { %12433 = vmatprep.subr.bf16.mxu0 %v15208_v57 }
 0xc83   : > { %12428 = vmatpush3.bf16.msra.mxu1 %v13278_v35 }
 0xc84   : > { %12410 = vmatmul.mubr.bf16.vlgmr.msra.gmra.mrb[164].mxu0 %v7663_v14  ;;  %12453 = vmatprep.subr.bf16.mxu1 %v15208_v57 }
 0xc85   : > { %12434 = vmatpush3.bf16.msra.mxu0 %v13265_v31  ;;  %12449 = vmatprep.mubr.msk.bf16.mxu0 %vm13393_vm0, %v15208_v57 }
 0xc86   : > { %12435 = vmatprep.subr.bf16.mxu0 %v15208_v57  ;;  %12430 = vmatmul.mubr.bf16.vlgmr.msra.gmra.mrb[176].mxu1 %v7877_v28  ;;  %v13296_v28 = vld [vmem:[%s15987_s1 + $0xf40] sm:$0xff]  }
 0xc87   : > { %12454 = vmatpush3.bf16.msra.mxu1 %v13280_v38  ;;  %12469 = vmatprep.mubr.msk.bf16.mxu1 %vm13393_vm0, %v15756_v46  ;;  %v13298_v38 = vld [vmem:[%s15987_s1 + $0xf48] sm:$0xff]  }
 0xc88   : > { %12455 = vmatprep.subr.bf16.mxu1 %v15756_v46 }
 0xc89   : > { %12436 = vmatpush3.bf16.msra.mxu0 %v13267_v15 }
 0xc8a   : > { %12437 = vmatprep.subr.bf16.mxu0 %v15208_v57 }
 0xc8b   : > { %12456 = vmatpush3.bf16.msra.mxu1 %v13282_v49  ;;  %v13300_v49 = vld [vmem:[%s15987_s1 + $0xf50] sm:$0xff]  }
 0xc8c   : > { %12457 = vmatprep.subr.bf16.mxu1 %v15756_v46 }
 0xc8d   : > { %12438 = vmatpush3.bf16.msra.mxu0 %v13269_v32 }
 0xc8e   : > { %12439 = vmatprep.subr.bf16.mxu0 %v15208_v57 }
 0xc8f   : > { %12458 = vmatpush3.bf16.msra.mxu1 %v13284_v53 }
 0xc90   : > { %12459 = vmatprep.subr.bf16.mxu1 %v15756_v46 }
 0xc91   : > { %12440 = vmatpush3.bf16.msra.mxu0 %v13271_v17 }
 0xc92   : > { %12441 = vmatprep.subr.bf16.mxu0 %v15208_v57 }
 0xc93   : > { %12460 = vmatpush3.bf16.msra.mxu1 %v13286_v47  ;;  %v13304_v47 = vld [vmem:[%s15987_s1 + $0xf60] sm:$0xff]  }
 0xc94   : > { %12461 = vmatprep.subr.bf16.mxu1 %v15756_v46 }
 0xc95   : > { %12442 = vmatpush3.bf16.msra.mxu0 %v13273_v40 }
 0xc96   : > { %12443 = vmatprep.subr.bf16.mxu0 %v15208_v57  ;;  %v13279_v57 = vld [vmem:[%s15987_s1 + $0xeb8] sm:$0xff]  }
 0xc97   : > { %12462 = vmatpush3.bf16.msra.mxu1 %v13288_v27 }
 0xc98   : > { %12463 = vmatprep.subr.bf16.mxu1 %v15756_v46 }
 0xc99   : > { %12444 = vmatpush3.bf16.msra.mxu0 %v13275_v22 }
 0xc9a   : > { %12445 = vmatprep.subr.bf16.mxu0 %v15756_v46 }
 0xc9b   : > { %12464 = vmatpush3.bf16.msra.mxu1 %v13290_v52 }
 0xc9c   : > { %12465 = vmatprep.subr.bf16.mxu1 %v15756_v46 }
 0xc9d   : > { %12446 = vmatpush3.bf16.msra.mxu0 %v13277_v44 }
 0xc9e   : > { %12447 = vmatprep.subr.bf16.mxu0 %v15756_v46 }
 0xc9f   : > { %12466 = vmatpush3.bf16.msra.mxu1 %v13292_v62  ;;  %v13310_v62 = vld [vmem:[%s15987_s1 + $0xf78] sm:$0xff]  }
 0xca0   : > { %12467 = vmatprep.subr.bf16.mxu1 %v15756_v46 }
 0xca1   : > { %12448 = vmatpush3.bf16.msra.mxu0 %v13279_v57 }
 0xca2   : > { %12473 = vmatprep.subr.bf16.mxu0 %v15756_v46 }
 0xca3   : > { %12468 = vmatpush3.bf16.msra.mxu1 %v13294_v48 }
 0xca4   : > { %12450 = vmatmul.mubr.bf16.vlgmr.msra.gmra.mrb[168].mxu0 %v7985_v36  ;;  %12493 = vmatprep.subr.bf16.mxu1 %v15756_v46 }
 0xca5   : > { %12474 = vmatpush3.bf16.msra.mxu0 %v13281_v54  ;;  %12489 = vmatprep.mubr.msk.bf16.mxu0 %vm13393_vm0, %v15756_v46  ;;  %v13302_v54 = vld [vmem:[%s15987_s1 + $0xf58] sm:$0xff]  }
 0xca6   : > { %12475 = vmatprep.subr.bf16.mxu0 %v15756_v46 }
 0xca9   : > { %12476 = vmatpush3.bf16.msra.mxu0 %v13283_v33 }
 0xcaa   : > { %12477 = vmatprep.subr.bf16.mxu0 %v15756_v46 }
 0xcad   : > { %12478 = vmatpush3.bf16.msra.mxu0 %v13285_v55 }
 0xcae   : > { %12479 = vmatprep.subr.bf16.mxu0 %v15756_v46 }
 0xcb1   : > { %12480 = vmatpush3.bf16.msra.mxu0 %v13287_v50 }
 0xcb2   : > { %12481 = vmatprep.subr.bf16.mxu0 %v15756_v46 }
 0xcb5   : > { %12482 = vmatpush3.bf16.msra.mxu0 %v13289_v39  ;;  %v13306_v39 = vld [vmem:[%s15987_s1 + $0xf68] sm:$0xff]  }
 0xcb6   : > { %12483 = vmatprep.subr.bf16.mxu0 %v15756_v46 }
 0xcb9   : > { %12484 = vmatpush3.bf16.msra.mxu0 %v13291_v56  ;;  %v13308_v56 = vld [vmem:[%s15987_s1 + $0xf70] sm:$0xff]  }
 0xcba   : > { %12485 = vmatprep.subr.bf16.mxu0 %v15756_v46 }
 0xcbd   : > { %12486 = vmatpush3.bf16.msra.mxu0 %v13293_v45  ;;  %v8308_v45 = vld [vmem:[#allocation8 + $0x6] sm:$0x1] }
 0xcbe   : > { %12487 = vmatprep.subr.bf16.mxu0 %v15756_v46  ;;  %v8309_v48 = vpack.c.bf16 %v8308_v45, %v8308_v45 }
 0xcc1   : > { %12488 = vmatpush3.bf16.msra.mxu0 %v13295_v3  ;;  %v13312_v3 = vld [vmem:[%s15987_s1 + $0xfc0] sm:$0xff]  }
 0xcc2   : > { %12513 = vmatprep.subr.bf16.mxu0 %v15756_v46 }
 0xcc4   : > { %12490 = vmatmul.mubr.bf16.vlgmr.msra.gmra.mrb[172].mxu0 %v8201_v1  ;;  %v13314_v1 = vld [vmem:[%s15987_s1 + $0xfd0] sm:$0xff]  }
 0xcc5   : > { %12514 = vmatpush3.bf16.msra.mxu0 %v13297_v4  ;;  %12529 = vmatprep.mubr.msk.bf16.mxu0 %vm13393_vm0, %v15756_v46 }
 0xcc6   : > { %12515 = vmatprep.subr.bf16.mxu0 %v15756_v46 }
 0xcc9   : > { %12516 = vmatpush3.bf16.msra.mxu0 %v13299_v6 }
 0xcca   : > { %12517 = vmatprep.subr.bf16.mxu0 %v15756_v46 }
 0xccd   : > { %12518 = vmatpush3.bf16.msra.mxu0 %v13301_v51 }
 0xcce   : > { %12519 = vmatprep.subr.bf16.mxu0 %v15756_v46 }
 0xcd1   : > { %12520 = vmatpush3.bf16.msra.mxu0 %v13303_v9 }
 0xcd2   : > { %12521 = vmatprep.subr.bf16.mxu0 %v15756_v46 }
 0xcd5   : > { %12522 = vmatpush3.bf16.msra.mxu0 %v13305_v24 }
 0xcd6   : > { %12523 = vmatprep.subr.bf16.mxu0 %v15756_v46 }
 0xcd9   : > { %12524 = vmatpush3.bf16.msra.mxu0 %v13307_v59  ;;  %v13315_v59 = vld [vmem:[%s15987_s1 + $0xfd8] sm:$0xff]  }
 0xcda   : > { %12525 = vmatprep.subr.bf16.mxu0 %v15756_v46 }
 0xcdd   : > { %12526 = vmatpush3.bf16.msra.mxu0 %v13309_v10  ;;  %v13316_v10 = vld [vmem:[%s15987_s1 + $0xfe0] sm:$0xff]  }
 0xcde   : > { %12527 = vmatprep.subr.bf16.mxu0 %v15756_v46 }
 0xce1   : > { %12528 = vmatpush3.bf16.msra.mxu0 %v13311_v8 }
 0xce4   : > { %12530 = vmatmul.mubr.bf16.vlgmr.msra.gmra.mrb[176].mxu0 %v8417_v61 }
 0xcf7   : > { %v7216_v13 = vpop.f32.mrb[152].mxu0  ;;  %v7324_v63 = vpop.f32.mrb[164].mxu1 }
 0xcf8   : > { %v7222_v16 = vadd.f32 %v7216_v13, %v15628_v0  ;;  %v12291_v7 = vpop.f32.mrb[153].mxu0  ;;  %v12311_v18 = vpop.f32.mrb[165].mxu1  ;;  %v10042_v0 = vld [vmem:[%s15988_s2 + $0x6] sm:$0x1] }
 0xcf9   : > { %v7219_v58 = vpop.f32.mrb[154].mxu0  ;;  %v7327_v19 = vpop.f32.mrb[166].mxu1  ;;  %v13318_v7 = vld [vmem:[%s15987_s1 + $0xff0] sm:$0xff]   ;;  %v13319_v18 = vld [vmem:[%s15987_s1 + $0xff8] sm:$0xff]  }
 0xcfa   : > { %v7330_v60 = vadd.f32 %v7324_v63, %v7222_v16  ;;  %v12292_v20 = vpop.f32.mrb[155].mxu0  ;;  %v12312_v2 = vpop.f32.mrb[167].mxu1  ;;  %v13317_v63 = vld [vmem:[%s15987_s1 + $0xfe8] sm:$0xff]  }
 0xcfb   : > { %v8524_v58 = vld [vmem:[#allocation8 + $0x8] sm:$0x1] }
 0xcfc   : > { %v8525_v19 = vpack.c.bf16 %v8524_v58, %v8524_v58 }
 0xd17   : > { %v7432_v11 = vpop.f32.mrb[156].mxu0  ;;  %v7540_v21 = vpop.f32.mrb[168].mxu1 }
 0xd18   : > { %v7438_v25 = vadd.f32 %v7432_v11, %v7330_v60  ;;  %v12351_v26 = vpop.f32.mrb[169].mxu1  ;;  %v12331_v42 = vpop.f32.mrb[157].mxu0 }
 0xd19   : > { %v7543_v14 = vpop.f32.mrb[170].mxu1  ;;  %v7435_v30 = vpop.f32.mrb[158].mxu0 }
 0xd1a   : > { %v7546_v31 = vadd.f32 %v7540_v21, %v7438_v25  ;;  %v12352_v23 = vpop.f32.mrb[171].mxu1  ;;  %v12332_v15 = vpop.f32.mrb[159].mxu0 }
 0xd37   : > { %v7648_v32 = vpop.f32.mrb[160].mxu0 }
 0xd38   : > { %v7654_v5 = vadd.f32 %v7648_v32, %v7546_v31  ;;  %v12371_v17 = vpop.f32.mrb[161].mxu0 }
 0xd39   : > { %v7651_v37 = vpop.f32.mrb[162].mxu0  ;;  %v7782_v57 = vpop.f32.mrb[172].mxu1 }
 0xd3a   : > { %v7657_v40 = vadd.f32 %v10042_v0, %v7654_v5  ;;  %v12372_v41 = vpop.f32.mrb[163].mxu0  ;;  %v12391_v34 = vpop.f32.mrb[173].mxu1 }
 0xd3b   : > { %v7785_v36 = vpop.f32.mrb[174].mxu1 }
 0xd3c   : > { %vm7658_vm10 = vcmp.ge.f32.partialorder %v7657_v40, 0.0  ;;  %v7659_v22 = vmul.f32 0.01, %v7657_v40  ;;  %v12392_v53 = vpop.f32.mrb[175].mxu1 }
 0xd3e   : > { %v7660_v35 = vsel %vm7658_vm10, %v7657_v40, %v7659_v22  ;;  %v10259_v22 = vld [vmem:[%s15988_s2 + $0x7] sm:$0x1] }
 0xd3f   : > { %7661 = vst [vmem:[#allocation8 + $0x4] sm:$0x1] %v7660_v35 }
 0xd46   : > { %v8092_v43 = vld [vmem:[#allocation8 + $0x4] sm:$0x1] }
 0xd47   : > { %v8093_v44 = vpack.c.bf16 %v8092_v43, %v8092_v43 }
 0xd49   : > { %12470 = vmatmul.mubr.bf16.vlgmr.msra.gmra.mrb[180].mxu1 %v8093_v44 }
 0xd4a   : > { %12494 = vmatpush3.bf16.msra.mxu1 %v13296_v28  ;;  %12509 = vmatprep.mubr.msk.bf16.mxu1 %vm13393_vm0, %v15756_v46 }
 0xd4b   : > { %12495 = vmatprep.subr.bf16.mxu1 %v15756_v46 }
 0xd4e   : > { %12496 = vmatpush3.bf16.msra.mxu1 %v13298_v38 }
 0xd4f   : > { %12497 = vmatprep.subr.bf16.mxu1 %v15756_v46 }
 0xd52   : > { %12498 = vmatpush3.bf16.msra.mxu1 %v13300_v49 }
 0xd53   : > { %12499 = vmatprep.subr.bf16.mxu1 %v15756_v46 }
 0xd56   : > { %12500 = vmatpush3.bf16.msra.mxu1 %v13302_v54 }
 0xd57   : > { %12501 = vmatprep.subr.bf16.mxu1 %v15756_v46  ;;  %v7870_v33 = vpop.f32.mrb[164].mxu0 }
 0xd58   : > { %v7871_v55 = vadd.f32 %v7870_v33, %v7782_v57  ;;  %v12411_v50 = vpop.f32.mrb[165].mxu0 }
 0xd59   : > { %v7873_v27 = vpop.f32.mrb[166].mxu0  ;;  %v7977_v4 = vpop.f32.mrb[176].mxu1 }
 0xd5a   : > { %12502 = vmatpush3.bf16.msra.mxu1 %v13304_v47  ;;  %v12412_v52 = vpop.f32.mrb[167].mxu0  ;;  %v7983_v6 = vadd.f32 %v7977_v4, %v7871_v55  ;;  %v12431_v51 = vpop.f32.mrb[177].mxu1 }
 0xd5b   : > { %12503 = vmatprep.subr.bf16.mxu1 %v15756_v46  ;;  %v7980_v9 = vpop.f32.mrb[178].mxu1 }
 0xd5c   : > { %v12432_v24 = vpop.f32.mrb[179].mxu1 }
 0xd5e   : > { %12504 = vmatpush3.bf16.msra.mxu1 %v13306_v39 }
 0xd5f   : > { %12505 = vmatprep.subr.bf16.mxu1 %v15756_v46 }
 0xd62   : > { %12506 = vmatpush3.bf16.msra.mxu1 %v13308_v56 }
 0xd63   : > { %12507 = vmatprep.subr.bf16.mxu1 %v15756_v46 }
 0xd66   : > { %12508 = vmatpush3.bf16.msra.mxu1 %v13310_v62 }
 0xd67   : > { %12533 = vmatprep.subr.bf16.mxu1 %v15756_v46 }
 0xd69   : > { %12510 = vmatmul.mubr.bf16.vlgmr.msra.gmra.mrb[184].mxu1 %v8309_v48 }
 0xd6a   : > { %12534 = vmatpush3.bf16.msra.mxu1 %v13312_v3  ;;  %12549 = vmatprep.mubr.msk.bf16.mxu1 %vm13393_vm0, %v15756_v46 }
 0xd6b   : > { %12535 = vmatprep.subr.bf16.mxu1 %v15756_v46 }
 0xd6e   : > { %12536 = vmatpush3.bf16.msra.mxu1 %v13313_v29 }
 0xd6f   : > { %12537 = vmatprep.subr.bf16.mxu1 %v15756_v46 }
 0xd72   : > { %12538 = vmatpush3.bf16.msra.mxu1 %v13314_v1 }
 0xd73   : > { %12539 = vmatprep.subr.bf16.mxu1 %v15756_v46 }
 0xd76   : > { %12540 = vmatpush3.bf16.msra.mxu1 %v13315_v59 }
 0xd77   : > { %12541 = vmatprep.subr.bf16.mxu1 %v15756_v46  ;;  %v8085_v8 = vpop.f32.mrb[168].mxu0 }
 0xd78   : > { %v8091_v12 = vadd.f32 %v8085_v8, %v7983_v6  ;;  %v12451_v61 = vpop.f32.mrb[169].mxu0 }
 0xd79   : > { %v8088_v13 = vpop.f32.mrb[170].mxu0 }
 0xd7a   : > { %12542 = vmatpush3.bf16.msra.mxu1 %v13316_v10  ;;  %v12452_v16 = vpop.f32.mrb[171].mxu0 }
 0xd7b   : > { %12543 = vmatprep.subr.bf16.mxu1 %v15756_v46 }
 0xd7e   : > { %12544 = vmatpush3.bf16.msra.mxu1 %v13317_v63 }
 0xd7f   : > { %12545 = vmatprep.subr.bf16.mxu1 %v15756_v46 }
 0xd82   : > { %12546 = vmatpush3.bf16.msra.mxu1 %v13318_v7 }
 0xd83   : > { %12547 = vmatprep.subr.bf16.mxu1 %v15756_v46 }
 0xd86   : > { %12548 = vmatpush3.bf16.msra.mxu1 %v13319_v18 }
 0xd89   : > { %12550 = vmatmul.mubr.bf16.vlgmr.msra.gmra.mrb[188].mxu1 %v8525_v19 }
 0xd97   : > { %v8301_v60 = vpop.f32.mrb[172].mxu0 }
 0xd98   : > { %v12491_v20 = vpop.f32.mrb[173].mxu0 }
 0xd99   : > { %v8304_v2 = vpop.f32.mrb[174].mxu0 }
 0xd9a   : > { %v12492_v11 = vpop.f32.mrb[175].mxu0 }
 0xdb7   : > { %v8517_v21 = vpop.f32.mrb[176].mxu0 }
 0xdb8   : > { %v12531_v25 = vpop.f32.mrb[177].mxu0 }
 0xdb9   : > { %v8520_v26 = vpop.f32.mrb[178].mxu0 }
 0xdba   : > { %v12532_v42 = vpop.f32.mrb[179].mxu0 }
 0xe1c   : > { %v8193_v14 = vpop.f32.mrb[180].mxu1 }
 0xe1d   : > { %v8199_v30 = vadd.f32 %v8193_v14, %v8091_v12  ;;  %v12471_v31 = vpop.f32.mrb[181].mxu1 }
 0xe1e   : > { %v8196_v23 = vpop.f32.mrb[182].mxu1 }
 0xe1f   : > { %v8307_v15 = vadd.f32 %v8301_v60, %v8199_v30  ;;  %v12472_v32 = vpop.f32.mrb[183].mxu1 }
 0xe3c   : > { %v8409_v46 = vpop.f32.mrb[184].mxu1 }
 0xe3d   : > { %v8415_v0 = vadd.f32 %v8409_v46, %v8307_v15  ;;  %v12511_v5 = vpop.f32.mrb[185].mxu1 }
 0xe3e   : > { %v8412_v17 = vpop.f32.mrb[186].mxu1 }
 0xe3f   : > { %v8523_v37 = vadd.f32 %v8517_v21, %v8415_v0  ;;  %v12512_v40 = vpop.f32.mrb[187].mxu1 }
 0xe5c   : > { %v8625_v41 = vpop.f32.mrb[188].mxu1 }
 0xe5d   : > { %v8631_v35 = vadd.f32 %v8625_v41, %v8523_v37  ;;  %v12551_v43 = vpop.f32.mrb[189].mxu1 }
 0xe5e   : > { %v8628_v28 = vpop.f32.mrb[190].mxu1 }
 0xe5f   : > { %v8634_v44 = vadd.f32 %v10259_v22, %v8631_v35  ;;  %v12552_v38 = vpop.f32.mrb[191].mxu1 }
 0xe61   : > { %8635 = vst [vmem:[%s162_s27] sm:$0x1] %v8634_v44 }
 0xe62   : > { %13341 = shalt.err (!%p13338_p3)
}
 0xe63   : > { %s13342_s10 = scalar_lea.hbm %s15944_s4, 16  ;;  %s13346_s19 = scalar_lea.hbm %s15989_s3, 32 }
 0xe64   : > { %p13343_p4 = scmp.ne.s32.totalorder %s15944_s4, %s13342_s10  ;;  %p13347_p9 = scmp.lt.u32.totalorder %s15944_s4, %s15989_s3 }
 0xe65   : > { %p13348_p10 = scmp.lt.u32.totalorder %s13346_s19, %s13342_s10  ;;  %p13350_p12 = scmp.lt.u32.totalorder %s13342_s10, %s15944_s4 }
 0xe66   : > { %p13344_p7 = pnand %p13343_p4, %p13455_p5 }
 0xe67   : > { %p13349_p11 = por %p13348_p10, %p13347_p9 }
 0xe68   : > { %p13345_p8 = pneg %p13344_p7 }
 0xe69   : > { %p13351_p13 = por %p13350_p12, %p13349_p11 }
 0xe6b   : > { %p13352_p0 = pnand %p13351_p13, %p13345_p8 }
 0xe6d   : > { %13355 = shalt.err (!%p13352_p0)
}
 0xe6e   : > { %12761 = dma.vmem_to_hbm [thread:$0]  (%p13455_p5), %s15946_s28, 16, %s15944_s4, %s8637_s5  }
 0xe6f PF: > { %p12767_p1 = scmp.ge.s32.totalorder %s13390_s15, 2  ;;  %s8661_s25 = sand.u32 1, %s13378_s12  }
 0xe70   : > { %s8662_s7 = scalar_lea.sflag [#allocation10], %s8661_s25 }
 0xe71   : > { %p12764_p2 = pnand %p12767_p1, %p13459_p6 }
 0xe73   : > { %13373 = dma.done.wait (!%p12764_p2), %s8662_s7, 16  }
 0xe74   : > { %13375 = vsyncadd (!%p12764_p2), %s8662_s7, 4294967280  ;;  %p13_p3 = scmp.ge.s32.totalorder %s13442_s18, 4   ;;  %s15994_s12 = smov %s13382_s13 }
 0xe75   : > { %s15995_s13 = smov %s13386_s14  ;;  %s15996_s14 = smov %s13453_s21 }
 0xe76   : > { %s15997_s15 = smov %s13442_s18  ;;  %15 = sbr.rel (!%p13_p3) target bundleno = 3 (0x3), region = 137 }
 0xe7d   :  { %8666 = vsyncpa [#allocation10], 1 }
 0xe7e   :  { %8668 = vsyncpa [#allocation10 + $0x1], 1 }

</bundles_post_ra>
